<compile_context>
chip_gen: v7x
topology: tpu7x:2x2x1
jax: 0.10.0
libtpu: 0.0.40
codegen_flags: <defaults>
</compile_context>

<pallas_src>
import functools
import math

import jax
import jax.numpy as jnp
from jax import lax
from jax.experimental import pallas as pl
from jax.experimental.pallas import tpu as pltpu

_NEG_INF = -1e30                      # finite mask value: robust under bf16/f32
_GELU_C = math.sqrt(2.0 / math.pi)
_LM_HEAD_TV = 512                     # lane-dense vocab tile (multiple of 128)


# ----------------------------- small config helpers ---------------------------

_VMEM_LIMIT_CACHE = None


def _vmem_limit():
    """~75% of physical per-core VMEM (48 MiB v7x, 96 MiB v5e/v6e); fallback 64 MiB."""
    global _VMEM_LIMIT_CACHE
    if _VMEM_LIMIT_CACHE is None:
        limit = 64 * 1024 * 1024
        try:
            info = pltpu.get_tpu_info()
            cap = getattr(info, "vmem_capacity_bytes", None)
            if cap:
                limit = (int(cap) * 3) // 4
        except Exception:
            pass
        _VMEM_LIMIT_CACHE = limit
    return _VMEM_LIMIT_CACHE


_BUFFERED_OK = None


def _buffered_ok():
    """Probe (compile-only) whether BlockSpec(pipeline_mode=pl.Buffered(1)) works."""
    global _BUFFERED_OK
    if _BUFFERED_OK is None:
        ok = False
        if hasattr(pl, "Buffered"):
            try:
                spec = pl.BlockSpec((8, 128), lambda i: (0, 0),
                                    pipeline_mode=pl.Buffered(1))

                def _probe(x_ref, o_ref):
                    o_ref[...] = x_ref[...] + 1.0

                fn = pl.pallas_call(
                    _probe,
                    out_shape=jax.ShapeDtypeStruct((8, 128), jnp.float32),
                    grid=(2,),
                    in_specs=[spec],
                    out_specs=pl.BlockSpec((8, 128), lambda i: (0, 0)))
                jax.jit(fn).lower(
                    jax.ShapeDtypeStruct((8, 128), jnp.float32)).compile()
                ok = True
            except Exception:
                ok = False
        _BUFFERED_OK = ok
    return _BUFFERED_OK


def _resident_spec(block_shape, index_map):
    """Constant-index weight spec; single-buffered when supported (halves VMEM)."""
    if _buffered_ok():
        return pl.BlockSpec(block_shape, index_map, pipeline_mode=pl.Buffered(1))
    return pl.BlockSpec(block_shape, index_map)


def _pick_tile(m, preferred=512, min_steps=2):
    """Largest tile <= preferred (mult of 8) dividing m, keeping >= min_steps grid
    steps (so v7x's 2 TensorCores both get work and double-buffering stays live)."""
    best = None
    for t in (1024, 512, 256, 128, 64, 32, 16, 8):
        if t > preferred or t > m or m % t:
            continue
        if best is None:
            best = t                      # largest divisor <= preferred (fallback)
        if m // t >= min_steps:
            return t
    return best if best is not None else m


def _pick_seq_tile(t_len, preferred=512):
    for t in (512, 256, 128):
        if t <= preferred and t_len % t == 0:
            return t
    return t_len


def _head_group(num_heads, head_dim):
    """Smallest #heads per block so the block's last dim is a multiple of 128."""
    for g in range(1, num_heads + 1):
        if num_heads % g == 0 and (g * head_dim) % 128 == 0:
            return g
    raise ValueError("num_heads * head_dim must contain a 128-multiple head group")


# ----------------------------- in-kernel helpers -----------------------------

def _layernorm(x, scale, shift, eps=1e-5):
    # matches torch: mean over last dim, biased variance
    mean = jnp.mean(x, axis=-1, keepdims=True)
    var = jnp.mean(jnp.square(x - mean), axis=-1, keepdims=True)
    return scale * ((x - mean) / jnp.sqrt(var + eps)) + shift


def _gelu_tanh(x):
    return 0.5 * x * (1.0 + jnp.tanh(_GELU_C * (x + 0.044715 * x * x * x)))


# ------------------------------ kernel bodies --------------------------------

def ln_qkv_kernel(x_ref, ln_s_ref, ln_b_ref, wqkv_ref, qkv_ref):
    x = x_ref[...]                                            # (tm, D) f32
    h = _layernorm(x, ln_s_ref[...], ln_b_ref[...])           # f32
    qkv = jnp.dot(h.astype(jnp.bfloat16), wqkv_ref[...],
                  preferred_element_type=jnp.float32)         # (tm, 3D) f32 acc
    qkv_ref[...] = qkv.astype(jnp.bfloat16)                   # one lane-dense store


def flash_attn_kernel(q_ref, k_ref, v_ref, o_ref, m_sc, l_sc, acc_sc, *,
                      head_dim, heads_per_block, tq, tk):
    qi = pl.program_id(2)
    ki = pl.program_id(3)
    nk = pl.num_programs(3)

    @pl.when(ki == 0)
    def _():
        m_sc[...] = jnp.full(m_sc.shape, _NEG_INF, jnp.float32)
        l_sc[...] = jnp.zeros(l_sc.shape, jnp.float32)
        acc_sc[...] = jnp.zeros(acc_sc.shape, jnp.float32)

    # Causal block skip: only kv blocks intersecting the lower triangle do work.
    @pl.when(ki * tk < (qi + 1) * tq)
    def _():
        row = qi * tq + lax.broadcasted_iota(jnp.int32, (tq, tk), 0)
        col = ki * tk + lax.broadcasted_iota(jnp.int32, (tq, tk), 1)
        causal = col <= row
        for h in range(heads_per_block):                      # static per-head loop
            sl = slice(h * head_dim, (h + 1) * head_dim)
            q = q_ref[0, :, sl]                               # (tq, hd) bf16 (pre-scaled Wq)
            k = k_ref[0, :, sl]                               # (tk, hd) bf16
            v = v_ref[0, :, sl]                               # (tk, hd) bf16
            s = jnp.dot(q, k.T, preferred_element_type=jnp.float32)   # (tq, tk) f32
            s = jnp.where(causal, s, jnp.float32(_NEG_INF))
            m_prev = m_sc[h]                                  # (tq, 1) f32
            m_new = jnp.maximum(m_prev, jnp.max(s, axis=-1, keepdims=True))
            alpha = jnp.exp(m_prev - m_new)
            p = jnp.exp(s - m_new)                            # unnormalized probs (f32)
            l_sc[h] = alpha * l_sc[h] + jnp.sum(p, axis=-1, keepdims=True)
            acc_sc[:, sl] = alpha * acc_sc[:, sl] + jnp.dot(
                p.astype(jnp.bfloat16), v, preferred_element_type=jnp.float32)
            m_sc[h] = m_new

    @pl.when(ki == nk - 1)
    def _():
        for h in range(heads_per_block):
            sl = slice(h * head_dim, (h + 1) * head_dim)
            inv_l = pl.reciprocal(l_sc[h], approx=True)       # deferred softmax norm (EUP)
            o_ref[0, :, sl] = (acc_sc[:, sl] * inv_l).astype(o_ref.dtype)


def outproj_ffn_kernel(x_ref, ctx_ref, wo_ref, bo_ref, ln2s_ref, ln2b_ref,
                       w1_ref, b1_ref, w2_ref, b2_ref, o_ref):
    x = x_ref[...]                                            # (tm, D) f32 residual
    attn = jnp.dot(ctx_ref[...], wo_ref[...],
                   preferred_element_type=jnp.float32) + bo_ref[...]
    x = x + attn                                              # residual 1
    h = _layernorm(x, ln2s_ref[...], ln2b_ref[...])
    ff = jnp.dot(h.astype(jnp.bfloat16), w1_ref[...],
                 preferred_element_type=jnp.float32) + b1_ref[...]
    ff = _gelu_tanh(ff)                                       # f32 elementwise
    ff = jnp.dot(ff.astype(jnp.bfloat16), w2_ref[...],
                 preferred_element_type=jnp.float32) + b2_ref[...]
    o_ref[...] = x + ff                                       # residual 2
    # TODO(synk): for emb_dim >= ~1024 on v7x, add an 'arbitrary' reduction axis
    # over the FFN hidden dim with an f32 accumulator instead of keeping W1/W2
    # fully resident (bounds VMEM under the 64 MiB per-core limit).


def lm_head_kernel(x_ref, lns_ref, lnb_ref, w_ref, o_ref, h_sc):
    # Final LayerNorm + bf16 cast hoisted out of the vocab loop: computed once
    # per token tile (vocab index 0) into VMEM scratch, reused across vocab tiles.
    @pl.when(pl.program_id(1) == 0)
    def _():
        h_sc[...] = _layernorm(x_ref[...], lns_ref[...],
                               lnb_ref[...]).astype(jnp.bfloat16)
    o_ref[...] = jnp.dot(h_sc[...], w_ref[...],
                         preferred_element_type=jnp.float32)


# ------------------------------ pallas wrappers -------------------------------

def ln_qkv(x, ln_s, ln_b, wqkv):
    M, D = x.shape
    D3 = wqkv.shape[1]
    tm = _pick_tile(M)
    return pl.pallas_call(
        ln_qkv_kernel,
        out_shape=jax.ShapeDtypeStruct((M, D3), jnp.bfloat16),
        grid=(M // tm,),
        in_specs=[
            pl.BlockSpec((tm, D), lambda i: (i, 0)),          # pipelined token tile
            pl.BlockSpec((1, D), lambda i: (0, 0)),           # LN scale
            pl.BlockSpec((1, D), lambda i: (0, 0)),           # LN shift
            _resident_spec((D, D3), lambda i: (0, 0)),        # fused Wqkv (resident)
        ],
        out_specs=pl.BlockSpec((tm, D3), lambda i: (i, 0)),
        compiler_params=pltpu.CompilerParams(
            dimension_semantics=("parallel",),
            vmem_limit_bytes=_vmem_limit()),
    )(x, ln_s, ln_b, wqkv)


def attention(qkv, *, num_heads, head_dim):
    """Flash-style causal attention reading q/k/v straight from the fused qkv."""
    B, T, D3 = qkv.shape
    D = D3 // 3
    assert D == num_heads * head_dim
    g = _head_group(num_heads, head_dim)                      # heads per block
    ghd = g * head_dim
    n_groups = num_heads // g
    tq = _pick_seq_tile(T)
    tk = tq
    nq, nk = T // tq, T // tk

    q_map = lambda b, hg, qi, ki: (b, qi, hg)
    k_map = lambda b, hg, qi, ki: (b, ki, n_groups + hg)
    v_map = lambda b, hg, qi, ki: (b, ki, 2 * n_groups + hg)
    o_map = lambda b, hg, qi, ki: (b, qi, hg)

    kern = functools.partial(flash_attn_kernel, head_dim=head_dim,
                             heads_per_block=g, tq=tq, tk=tk)
    return pl.pallas_call(
        kern,
        out_shape=jax.ShapeDtypeStruct((B, T, D), jnp.bfloat16),
        grid=(B, n_groups, nq, nk),
        in_specs=[pl.BlockSpec((1, tq, ghd), q_map),
                  pl.BlockSpec((1, tk, ghd), k_map),
                  pl.BlockSpec((1, tk, ghd), v_map)],
        out_specs=pl.BlockSpec((1, tq, ghd), o_map),
        scratch_shapes=[pltpu.VMEM((g, tq, 1), jnp.float32),   # running max m
                        pltpu.VMEM((g, tq, 1), jnp.float32),   # running sum l
                        pltpu.VMEM((tq, ghd), jnp.float32)],   # f32 accumulator
        compiler_params=pltpu.CompilerParams(
            dimension_semantics=("parallel", "parallel", "parallel", "arbitrary"),
            vmem_limit_bytes=_vmem_limit()),
    )(qkv, qkv, qkv)


def outproj_ffn(x, ctx, blk):
    M, D = x.shape
    H = blk['w1'].shape[1]
    tm = _pick_tile(M)
    t_spec = pl.BlockSpec((tm, D), lambda i: (i, 0))
    return pl.pallas_call(
        outproj_ffn_kernel,
        out_shape=jax.ShapeDtypeStruct((M, D), jnp.float32),
        grid=(M // tm,),
        in_specs=[
            t_spec,                                            # x residual tile (f32)
            pl.BlockSpec((tm, D), lambda i: (i, 0)),           # ctx tile (bf16)
            _resident_spec((D, D), lambda i: (0, 0)),          # Wo (resident)
            pl.BlockSpec((1, D), lambda i: (0, 0)),            # bo
            pl.BlockSpec((1, D), lambda i: (0, 0)),            # ln2 scale
            pl.BlockSpec((1, D), lambda i: (0, 0)),            # ln2 shift
            _resident_spec((D, H), lambda i: (0, 0)),          # W1 (resident)
            pl.BlockSpec((1, H), lambda i: (0, 0)),            # b1
            _resident_spec((H, D), lambda i: (0, 0)),          # W2 (resident)
            pl.BlockSpec((1, D), lambda i: (0, 0)),            # b2
        ],
        out_specs=t_spec,
        compiler_params=pltpu.CompilerParams(
            dimension_semantics=("parallel",),
            vmem_limit_bytes=_vmem_limit()),
    )(x, ctx, blk['wo'], blk['bo'], blk['ln2_s'], blk['ln2_b'],
      blk['w1'], blk['b1'], blk['w2'], blk['b2'])


def lm_head(x, ln_s, ln_b, w_out_padded, *, vocab_size, tv=_LM_HEAD_TV):
    M, D = x.shape
    Vp = w_out_padded.shape[1]
    assert Vp % tv == 0, "w_out must be padded to the vocab tile at init"
    tm = _pick_tile(M)
    out = pl.pallas_call(
        lm_head_kernel,
        out_shape=jax.ShapeDtypeStruct((M, Vp), jnp.float32),
        grid=(M // tm, Vp // tv),                              # vocab axis innermost
        in_specs=[
            pl.BlockSpec((tm, D), lambda i, j: (i, 0)),        # x tile resident over vocab
            pl.BlockSpec((1, D), lambda i, j: (0, 0)),         # final LN scale
            pl.BlockSpec((1, D), lambda i, j: (0, 0)),         # final LN shift
            pl.BlockSpec((D, tv), lambda i, j: (0, j)),        # wide vocab slab of w_out
        ],
        out_specs=pl.BlockSpec((tm, tv), lambda i, j: (i, j)),
        scratch_shapes=[pltpu.VMEM((tm, D), jnp.bfloat16)],    # hoisted LN(x) in bf16
        compiler_params=pltpu.CompilerParams(
            dimension_semantics=("parallel", "arbitrary"),
            vmem_limit_bytes=_vmem_limit()),
    )(x, ln_s, ln_b, w_out_padded)
    if Vp != vocab_size:
        out = out[:, :vocab_size]
    return out


# ------------------------------ model composition -----------------------------

def transformer_block(x_flat, blk, *, B, T, num_heads, head_dim):
    qkv = ln_qkv(x_flat, blk['ln1_s'], blk['ln1_b'], blk['wqkv'])   # (M, 3D) bf16
    ctx = attention(qkv.reshape(B, T, -1), num_heads=num_heads, head_dim=head_dim)
    return outproj_ffn(x_flat, ctx.reshape(B * T, -1), blk)


def init_params(cfg, key):
    V, C, D = cfg['vocab_size'], cfg['context_length'], cfg['emb_dim']
    H = 4 * D
    nh = cfg['n_heads']
    assert D % nh == 0, 'emb_dim must be divisible by n_heads'
    Hd = D // nh
    keys = iter(jax.random.split(key, 3 + 6 * cfg['n_layers'] + 4))
    std = 0.02
    bf16 = jnp.bfloat16

    def normal(shape):
        return std * jax.random.normal(next(keys), shape, dtype=jnp.float32)

    # Pad the LM head weight to the vocab tile ONCE here (no per-forward pad).
    Vp = ((V + _LM_HEAD_TV - 1) // _LM_HEAD_TV) * _LM_HEAD_TV
    w_out = normal((D, V))
    if Vp != V:
        w_out = jnp.pad(w_out, ((0, 0), (0, Vp - V)))

    params = {
        'tok_emb': normal((V, D)),                            # f32 embeddings
        'pos_emb': normal((C, D)),
        'final_ln_s': jnp.ones((1, D), jnp.float32),
        'final_ln_b': jnp.zeros((1, D), jnp.float32),
        'w_out': w_out.astype(bf16),                          # out_head, bias=False
        'blocks': [],
    }
    for _ in range(cfg['n_layers']):
        # Fold 1/sqrt(head_dim) into Wq and fuse Q/K/V into one (D, 3D) weight.
        wq = normal((D, D)) * (1.0 / math.sqrt(Hd))
        wk = normal((D, D))
        wv = normal((D, D))
        params['blocks'].append(dict(
            ln1_s=jnp.ones((1, D), jnp.float32),
            ln1_b=jnp.zeros((1, D), jnp.float32),
            wqkv=jnp.concatenate([wq, wk, wv], axis=1).astype(bf16),   # (D, 3D)
            wo=normal((D, D)).astype(bf16),
            bo=jnp.zeros((1, D), jnp.float32),
            ln2_s=jnp.ones((1, D), jnp.float32),
            ln2_b=jnp.zeros((1, D), jnp.float32),
            w1=normal((D, H)).astype(bf16),
            b1=jnp.zeros((1, H), jnp.float32),
            w2=normal((H, D)).astype(bf16),
            b2=jnp.zeros((1, D), jnp.float32),
        ))
    return params


def gpt_forward(in_idx, params, cfg):
    B, T = in_idx.shape
    D, nh = cfg['emb_dim'], cfg['n_heads']
    hd = D // nh
    assert T <= cfg['context_length'], "sequence longer than context_length"
    # Embedding gathers (data-dependent) stay in plain JAX.
    tok = jnp.take(params['tok_emb'], in_idx, axis=0)         # (B, T, D) f32
    pos = params['pos_emb'][:T][None, :, :]                   # (1, T, D)
    x = (tok + pos).reshape(B * T, D)                         # flat residual stream
    # drop_emb / drop_shortcut: drop_rate = 0.0 (eval) -> identity.
    # TODO(synk): cross-layer weight prefetch (P10 cross-pallas_call DMA futures)
    # not implemented; first weight DMA of each layer is exposed on v5e.
    for blk in params['blocks']:
        x = transformer_block(x, blk, B=B, T=T, num_heads=nh, head_dim=hd)
    logits = lm_head(x, params['final_ln_s'], params['final_ln_b'],
                     params['w_out'], vocab_size=cfg['vocab_size'])
    return logits.reshape(B, T, cfg['vocab_size'])


# ------------------------------------ main ------------------------------------

if __name__ == "__main__":
    # Lane-dense toy config: emb_dim multiple of 128, head_dim = 128,
    # vocab multiple of the 512-wide vocab tile, B*T multiple of 8.
    cfg = dict(vocab_size=512, context_length=128, emb_dim=256,
               n_heads=2, n_layers=2, drop_rate=0.0, qkv_bias=False)

    key = jax.random.PRNGKey(0)
    pkey, dkey = jax.random.split(key)
    params = init_params(cfg, pkey)

    B, T = 2, 128
    in_idx = jax.random.randint(dkey, (B, T), 0, cfg['vocab_size'],
                                dtype=jnp.int32)

    _buffered_ok()                     # probe pipeline_mode support before jit
    fwd = jax.jit(lambda idx, p: gpt_forward(idx, p, cfg))
    logits = fwd(in_idx, params)
    jax.block_until_ready(logits)
    assert logits.shape == (B, T, cfg['vocab_size'])
    assert logits.dtype == jnp.float32
    assert bool(jnp.all(jnp.isfinite(logits)))
    # TODO(synk): dropout layers are identity (drop_rate=0 / eval mode); no in-kernel RNG dropout.
    print("KERNEL_OK")
</pallas_src>

<mosaic_0001>
module attributes {stable_mosaic.version = 11 : i64} {
  func.func @ln_qkv_kernel(%arg0: i32, %arg1: memref<128x256xf32, #tpu.memory_space<vmem>>, %arg2: memref<1x256xf32, #tpu.memory_space<vmem>>, %arg3: memref<1x256xf32, #tpu.memory_space<vmem>>, %arg4: memref<256x768xbf16, #tpu.memory_space<vmem>>, %arg5: memref<128x768xbf16, #tpu.memory_space<vmem>>) attributes {dimension_semantics = [#tpu.dimension_semantics<parallel>], iteration_bounds = array<i64: 2>, scalar_prefetch = 0 : i64, scratch_operands = 0 : i64, tpu.core_type = #tpu.core_type<tc>, window_params = [{transform_indices = @transform_0, window_bounds = array<i64: 128, 256>}, {pipeline_mode = #tpu.pipeline_mode<synchronous>, transform_indices = @transform_1, window_bounds = array<i64: 1, 256>}, {pipeline_mode = #tpu.pipeline_mode<synchronous>, transform_indices = @transform_2, window_bounds = array<i64: 1, 256>}, {pipeline_mode = #tpu.pipeline_mode<synchronous>, transform_indices = @transform_3, window_bounds = array<i64: 256, 768>}, {transform_indices = @transform_4, window_bounds = array<i64: 128, 768>}]} {
    %c0 = arith.constant 0 : index
    %c0_0 = arith.constant 0 : index
    %0 = vector.load %arg1[%c0, %c0_0] : memref<128x256xf32, #tpu.memory_space<vmem>>, vector<128x256xf32>
    %c0_1 = arith.constant 0 : index
    %c0_2 = arith.constant 0 : index
    %1 = vector.load %arg2[%c0_1, %c0_2] : memref<1x256xf32, #tpu.memory_space<vmem>>, vector<1x256xf32>
    %c0_3 = arith.constant 0 : index
    %c0_4 = arith.constant 0 : index
    %2 = vector.load %arg3[%c0_3, %c0_4] : memref<1x256xf32, #tpu.memory_space<vmem>>, vector<1x256xf32>
    %cst = arith.constant dense<0.000000e+00> : vector<128xf32>
    %3 = vector.multi_reduction <add>, %0, %cst [1] : vector<128x256xf32> to vector<128xf32>
    %4 = vector.shape_cast %3 : vector<128xf32> to vector<128x1xf32>
    %cst_5 = arith.constant 2.560000e+02 : f32
    %5 = vector.broadcast %cst_5 : f32 to vector<128x1xf32>
    %6 = arith.divf %4, %5 : vector<128x1xf32>
    %7 = vector.broadcast %6 : vector<128x1xf32> to vector<128x256xf32>
    %8 = arith.subf %0, %7 : vector<128x256xf32>
    %9 = arith.mulf %8, %8 : vector<128x256xf32>
    %cst_6 = arith.constant dense<0.000000e+00> : vector<128xf32>
    %10 = vector.multi_reduction <add>, %9, %cst_6 [1] : vector<128x256xf32> to vector<128xf32>
    %11 = vector.shape_cast %10 : vector<128xf32> to vector<128x1xf32>
    %cst_7 = arith.constant 2.560000e+02 : f32
    %12 = vector.broadcast %cst_7 : f32 to vector<128x1xf32>
    %13 = arith.divf %11, %12 : vector<128x1xf32>
    %14 = vector.broadcast %6 : vector<128x1xf32> to vector<128x256xf32>
    %15 = arith.subf %0, %14 : vector<128x256xf32>
    %cst_8 = arith.constant 9.99999974E-6 : f32
    %16 = vector.broadcast %cst_8 : f32 to vector<128x1xf32>
    %17 = arith.addf %13, %16 : vector<128x1xf32>
    %18 = math.sqrt %17 : vector<128x1xf32>
    %19 = vector.broadcast %18 : vector<128x1xf32> to vector<128x256xf32>
    %20 = arith.divf %15, %19 : vector<128x256xf32>
    %21 = vector.broadcast %1 : vector<1x256xf32> to vector<128x256xf32>
    %22 = arith.mulf %21, %20 : vector<128x256xf32>
    %23 = vector.broadcast %2 : vector<1x256xf32> to vector<128x256xf32>
    %24 = arith.addf %22, %23 : vector<128x256xf32>
    %25 = arith.truncf %24 : vector<128x256xf32> to vector<128x256xbf16>
    %c0_9 = arith.constant 0 : index
    %c0_10 = arith.constant 0 : index
    %26 = vector.load %arg4[%c0_9, %c0_10] : memref<256x768xbf16, #tpu.memory_space<vmem>>, vector<256x768xbf16>
    %cst_11 = arith.constant dense<0.000000e+00> : vector<128x768xf32>
    %27 = tpu.matmul %25, %26, %cst_11 {dimension_numbers = #tpu.dot_dimension_numbers<[1], [0], [0], [1], [0, 0, 1, 1], [], []>} : vector<128x256xbf16>, vector<256x768xbf16>, vector<128x768xf32> -> vector<128x768xf32>
    %28 = arith.truncf %27 : vector<128x768xf32> to vector<128x768xbf16>
    %c0_12 = arith.constant 0 : index
    %c0_13 = arith.constant 0 : index
    %29 = vector.load %arg5[%c0_12, %c0_13] : memref<128x768xbf16, #tpu.memory_space<vmem>>, vector<128x768xbf16>
    tpu.vector_store %arg5[%c0_12, %c0_13], %28 {strides = array<i32>} : memref<128x768xbf16, #tpu.memory_space<vmem>>, vector<128x768xbf16>,
    return
  }
  func.func @transform_0(%arg0: i32) -> (i32, i32) {
    %c0_i32 = arith.constant 0 : i32
    %c0_i32_0 = arith.constant 0 : i32
    return %arg0, %c0_i32 : i32, i32
  }
  func.func @transform_1(%arg0: i32) -> (i32, i32) {
    %c0_i32 = arith.constant 0 : i32
    %c0_i32_0 = arith.constant 0 : i32
    %c0_i32_1 = arith.constant 0 : i32
    return %c0_i32, %c0_i32_0 : i32, i32
  }
  func.func @transform_2(%arg0: i32) -> (i32, i32) {
    %c0_i32 = arith.constant 0 : i32
    %c0_i32_0 = arith.constant 0 : i32
    %c0_i32_1 = arith.constant 0 : i32
    return %c0_i32, %c0_i32_0 : i32, i32
  }
  func.func @transform_3(%arg0: i32) -> (i32, i32) {
    %c0_i32 = arith.constant 0 : i32
    %c0_i32_0 = arith.constant 0 : i32
    %c0_i32_1 = arith.constant 0 : i32
    return %c0_i32, %c0_i32_0 : i32, i32
  }
  func.func @transform_4(%arg0: i32) -> (i32, i32) {
    %c0_i32 = arith.constant 0 : i32
    %c0_i32_0 = arith.constant 0 : i32
    return %arg0, %c0_i32 : i32, i32
  }
}

module attributes {stable_mosaic.version = 11 : i64} {
  func.func @flash_attn_kernel(%arg0: i32, %arg1: i32, %arg2: i32, %arg3: i32, %arg4: memref<1x128x128xbf16, #tpu.memory_space<vmem>>, %arg5: memref<1x128x128xbf16, #tpu.memory_space<vmem>>, %arg6: memref<1x128x128xbf16, #tpu.memory_space<vmem>>, %arg7: memref<1x128x128xbf16, #tpu.memory_space<vmem>>, %arg8: memref<1x128x1xf32, #tpu.memory_space<vmem>>, %arg9: memref<1x128x1xf32, #tpu.memory_space<vmem>>, %arg10: memref<128x128xf32, #tpu.memory_space<vmem>>) attributes {dimension_semantics = [#tpu.dimension_semantics<parallel>, #tpu.dimension_semantics<parallel>, #tpu.dimension_semantics<parallel>, #tpu.dimension_semantics<arbitrary>], iteration_bounds = array<i64: 2, 2, 1, 1>, scalar_prefetch = 0 : i64, scratch_operands = 3 : i64, tpu.core_type = #tpu.core_type<tc>, window_params = [{transform_indices = @transform_0, window_bounds = array<i64: 1, 128, 128>}, {transform_indices = @transform_1, window_bounds = array<i64: 1, 128, 128>}, {transform_indices = @transform_2, window_bounds = array<i64: 1, 128, 128>}, {transform_indices = @transform_3, window_bounds = array<i64: 1, 128, 128>}]} {
    %c0_i32 = arith.constant 0 : i32
    %0 = arith.cmpi eq, %arg3, %c0_i32 : i32
    %1 = arith.extui %0 : i1 to i32
    %c0_i32_0 = arith.constant 0 : i32
    %2 = arith.cmpi ne, %1, %c0_i32_0 : i32
    scf.if %2 {
      %cst = arith.constant -1.000000e+30 : f32
      %12 = vector.broadcast %cst : f32 to vector<1x128x1xf32>
      %c0 = arith.constant 0 : index
      %c0_5 = arith.constant 0 : index
      %c0_6 = arith.constant 0 : index
      %13 = vector.load %arg8[%c0, %c0_5, %c0_6] : memref<1x128x1xf32, #tpu.memory_space<vmem>>, vector<1x128x1xf32>
      tpu.vector_store %arg8[%c0, %c0_5, %c0_6], %12 {strides = array<i32>} : memref<1x128x1xf32, #tpu.memory_space<vmem>>, vector<1x128x1xf32>,
      %cst_7 = arith.constant 0.000000e+00 : f32
      %14 = vector.broadcast %cst_7 : f32 to vector<1x128x1xf32>
      %c0_8 = arith.constant 0 : index
      %c0_9 = arith.constant 0 : index
      %c0_10 = arith.constant 0 : index
      %15 = vector.load %arg9[%c0_8, %c0_9, %c0_10] : memref<1x128x1xf32, #tpu.memory_space<vmem>>, vector<1x128x1xf32>
      tpu.vector_store %arg9[%c0_8, %c0_9, %c0_10], %14 {strides = array<i32>} : memref<1x128x1xf32, #tpu.memory_space<vmem>>, vector<1x128x1xf32>,
      %cst_11 = arith.constant 0.000000e+00 : f32
      %16 = vector.broadcast %cst_11 : f32 to vector<128x128xf32>
      %c0_12 = arith.constant 0 : index
      %c0_13 = arith.constant 0 : index
      %17 = vector.load %arg10[%c0_12, %c0_13] : memref<128x128xf32, #tpu.memory_space<vmem>>, vector<128x128xf32>
      tpu.vector_store %arg10[%c0_12, %c0_13], %16 {strides = array<i32>} : memref<128x128xf32, #tpu.memory_space<vmem>>, vector<128x128xf32>,
    } else {
    }
    %c128_i32 = arith.constant 128 : i32
    %3 = arith.muli %arg3, %c128_i32 : i32
    %c1_i32 = arith.constant 1 : i32
    %4 = arith.addi %arg2, %c1_i32 : i32
    %c128_i32_1 = arith.constant 128 : i32
    %5 = arith.muli %4, %c128_i32_1 : i32
    %6 = arith.cmpi slt, %3, %5 : i32
    %7 = arith.extui %6 : i1 to i32
    %c0_i32_2 = arith.constant 0 : i32
    %8 = arith.cmpi ne, %7, %c0_i32_2 : i32
    scf.if %8 {
      %c128_i32_5 = arith.constant 128 : i32
      %12 = arith.muli %arg2, %c128_i32_5 : i32
      %13 = tpu.iota {dimensions = array<i32: 0>} : vector<128x128xi32>
      %14 = vector.broadcast %12 : i32 to vector<128x128xi32>
      %15 = arith.addi %14, %13 : vector<128x128xi32>
      %c128_i32_6 = arith.constant 128 : i32
      %16 = arith.muli %arg3, %c128_i32_6 : i32
      %17 = tpu.iota {dimensions = array<i32: 1>} : vector<128x128xi32>
      %18 = vector.broadcast %16 : i32 to vector<128x128xi32>
      %19 = arith.addi %18, %17 : vector<128x128xi32>
      %20 = arith.cmpi sle, %19, %15 : vector<128x128xi32>
      %c0 = arith.constant 0 : index
      %c0_7 = arith.constant 0 : index
      %c0_8 = arith.constant 0 : index
      %21 = vector.load %arg4[%c0, %c0_7, %c0_8] : memref<1x128x128xbf16, #tpu.memory_space<vmem>>, vector<1x128x128xbf16>
      %22 = vector.shape_cast %21 : vector<1x128x128xbf16> to vector<128x128xbf16>
      %c0_9 = arith.constant 0 : index
      %c0_10 = arith.constant 0 : index
      %c0_11 = arith.constant 0 : index
      %23 = vector.load %arg5[%c0_9, %c0_10, %c0_11] : memref<1x128x128xbf16, #tpu.memory_space<vmem>>, vector<1x128x128xbf16>
      %24 = vector.shape_cast %23 : vector<1x128x128xbf16> to vector<128x128xbf16>
      %c0_12 = arith.constant 0 : index
      %c0_13 = arith.constant 0 : index
      %c0_14 = arith.constant 0 : index
      %25 = vector.load %arg6[%c0_12, %c0_13, %c0_14] : memref<1x128x128xbf16, #tpu.memory_space<vmem>>, vector<1x128x128xbf16>
      %26 = vector.shape_cast %25 : vector<1x128x128xbf16> to vector<128x128xbf16>
      %27 = tpu.transpose %24, [1, 0] : vector<128x128xbf16> -> vector<128x128xbf16>
      %cst = arith.constant dense<0.000000e+00> : vector<128x128xf32>
      %28 = tpu.matmul %22, %27, %cst {dimension_numbers = #tpu.dot_dimension_numbers<[1], [0], [0], [1], [0, 0, 1, 1], [], []>} : vector<128x128xbf16>, vector<128x128xbf16>, vector<128x128xf32> -> vector<128x128xf32>
      %cst_15 = arith.constant -1.000000e+30 : f32
      %29 = vector.broadcast %cst_15 : f32 to vector<128x128xf32>
      %30 = arith.select %20, %28, %29 : vector<128x128xi1>, vector<128x128xf32>
      %c0_16 = arith.constant 0 : index
      %c0_17 = arith.constant 0 : index
      %c0_18 = arith.constant 0 : index
      %31 = vector.load %arg8[%c0_16, %c0_17, %c0_18] : memref<1x128x1xf32, #tpu.memory_space<vmem>>, vector<1x128x1xf32>
      %32 = vector.shape_cast %31 : vector<1x128x1xf32> to vector<128x1xf32>
      %cst_19 = arith.constant dense<0xFF800000> : vector<128xf32>
      %33 = vector.multi_reduction <maximumf>, %30, %cst_19 [1] : vector<128x128xf32> to vector<128xf32>
      %34 = vector.shape_cast %33 : vector<128xf32> to vector<128x1xf32>
      %35 = arith.maximumf %32, %34 : vector<128x1xf32>
      %36 = arith.subf %32, %35 : vector<128x1xf32>
      %37 = math.exp %36 : vector<128x1xf32>
      %38 = vector.broadcast %35 : vector<128x1xf32> to vector<128x128xf32>
      %39 = arith.subf %30, %38 : vector<128x128xf32>
      %40 = math.exp %39 : vector<128x128xf32>
      %c0_20 = arith.constant 0 : index
      %c0_21 = arith.constant 0 : index
      %c0_22 = arith.constant 0 : index
      %41 = vector.load %arg9[%c0_20, %c0_21, %c0_22] : memref<1x128x1xf32, #tpu.memory_space<vmem>>, vector<1x128x1xf32>
      %42 = vector.shape_cast %41 : vector<1x128x1xf32> to vector<128x1xf32>
      %43 = arith.mulf %37, %42 : vector<128x1xf32>
      %cst_23 = arith.constant dense<0.000000e+00> : vector<128xf32>
      %44 = vector.multi_reduction <add>, %40, %cst_23 [1] : vector<128x128xf32> to vector<128xf32>
      %45 = vector.shape_cast %44 : vector<128xf32> to vector<128x1xf32>
      %46 = arith.addf %43, %45 : vector<128x1xf32>
      %c0_24 = arith.constant 0 : index
      %c0_25 = arith.constant 0 : index
      %c0_26 = arith.constant 0 : index
      %47 = vector.load %arg9[%c0_24, %c0_25, %c0_26] : memref<1x128x1xf32, #tpu.memory_space<vmem>>, vector<1x128x1xf32>
      %48 = vector.shape_cast %47 : vector<1x128x1xf32> to vector<128x1xf32>
      %49 = vector.shape_cast %46 : vector<128x1xf32> to vector<1x128x1xf32>
      tpu.vector_store %arg9[%c0_24, %c0_25, %c0_26], %49 {strides = array<i32>} : memref<1x128x1xf32, #tpu.memory_space<vmem>>, vector<1x128x1xf32>,
      %c0_27 = arith.constant 0 : index
      %c0_28 = arith.constant 0 : index
      %50 = vector.load %arg10[%c0_27, %c0_28] : memref<128x128xf32, #tpu.memory_space<vmem>>, vector<128x128xf32>
      %51 = vector.broadcast %37 : vector<128x1xf32> to vector<128x128xf32>
      %52 = arith.mulf %51, %50 : vector<128x128xf32>
      %53 = arith.truncf %40 : vector<128x128xf32> to vector<128x128xbf16>
      %cst_29 = arith.constant dense<0.000000e+00> : vector<128x128xf32>
      %54 = tpu.matmul %53, %26, %cst_29 {dimension_numbers = #tpu.dot_dimension_numbers<[1], [0], [0], [1], [0, 0, 1, 1], [], []>} : vector<128x128xbf16>, vector<128x128xbf16>, vector<128x128xf32> -> vector<128x128xf32>
      %55 = arith.addf %52, %54 : vector<128x128xf32>
      %c0_30 = arith.constant 0 : index
      %c0_31 = arith.constant 0 : index
      %56 = vector.load %arg10[%c0_30, %c0_31] : memref<128x128xf32, #tpu.memory_space<vmem>>, vector<128x128xf32>
      tpu.vector_store %arg10[%c0_30, %c0_31], %55 {strides = array<i32>} : memref<128x128xf32, #tpu.memory_space<vmem>>, vector<128x128xf32>,
      %c0_32 = arith.constant 0 : index
      %c0_33 = arith.constant 0 : index
      %c0_34 = arith.constant 0 : index
      %57 = vector.load %arg8[%c0_32, %c0_33, %c0_34] : memref<1x128x1xf32, #tpu.memory_space<vmem>>, vector<1x128x1xf32>
      %58 = vector.shape_cast %57 : vector<1x128x1xf32> to vector<128x1xf32>
      %59 = vector.shape_cast %35 : vector<128x1xf32> to vector<1x128x1xf32>
      tpu.vector_store %arg8[%c0_32, %c0_33, %c0_34], %59 {strides = array<i32>} : memref<1x128x1xf32, #tpu.memory_space<vmem>>, vector<1x128x1xf32>,
    } else {
    }
    %c0_i32_3 = arith.constant 0 : i32
    %9 = arith.cmpi eq, %arg3, %c0_i32_3 : i32
    %10 = arith.extui %9 : i1 to i32
    %c0_i32_4 = arith.constant 0 : i32
    %11 = arith.cmpi ne, %10, %c0_i32_4 : i32
    scf.if %11 {
      %c0 = arith.constant 0 : index
      %c0_5 = arith.constant 0 : index
      %c0_6 = arith.constant 0 : index
      %12 = vector.load %arg9[%c0, %c0_5, %c0_6] : memref<1x128x1xf32, #tpu.memory_space<vmem>>, vector<1x128x1xf32>
      %13 = vector.shape_cast %12 : vector<1x128x1xf32> to vector<128x1xf32>
      %14 = tpu.reciprocal %13 {approx = true} : vector<128x1xf32> -> vector<128x1xf32>
      %c0_7 = arith.constant 0 : index
      %c0_8 = arith.constant 0 : index
      %15 = vector.load %arg10[%c0_7, %c0_8] : memref<128x128xf32, #tpu.memory_space<vmem>>, vector<128x128xf32>
      %16 = vector.broadcast %14 : vector<128x1xf32> to vector<128x128xf32>
      %17 = arith.mulf %15, %16 : vector<128x128xf32>
      %18 = arith.truncf %17 : vector<128x128xf32> to vector<128x128xbf16>
      %c0_9 = arith.constant 0 : index
      %c0_10 = arith.constant 0 : index
      %c0_11 = arith.constant 0 : index
      %19 = vector.load %arg7[%c0_9, %c0_10, %c0_11] : memref<1x128x128xbf16, #tpu.memory_space<vmem>>, vector<1x128x128xbf16>
      %20 = vector.shape_cast %19 : vector<1x128x128xbf16> to vector<128x128xbf16>
      %21 = vector.shape_cast %18 : vector<128x128xbf16> to vector<1x128x128xbf16>
      tpu.vector_store %arg7[%c0_9, %c0_10, %c0_11], %21 {strides = array<i32>} : memref<1x128x128xbf16, #tpu.memory_space<vmem>>, vector<1x128x128xbf16>,
    } else {
    }
    return
  }
  func.func @transform_0(%arg0: i32, %arg1: i32, %arg2: i32, %arg3: i32) -> (i32, i32, i32) {
    %c0_i32 = arith.constant 0 : i32
    return %arg0, %arg2, %arg1 : i32, i32, i32
  }
  func.func @transform_1(%arg0: i32, %arg1: i32, %arg2: i32, %arg3: i32) -> (i32, i32, i32) {
    %c2_i32 = arith.constant 2 : i32
    %0 = arith.addi %c2_i32, %arg1 : i32
    %c0_i32 = arith.constant 0 : i32
    return %arg0, %arg3, %0 : i32, i32, i32
  }
  func.func @transform_2(%arg0: i32, %arg1: i32, %arg2: i32, %arg3: i32) -> (i32, i32, i32) {
    %c4_i32 = arith.constant 4 : i32
    %0 = arith.addi %c4_i32, %arg1 : i32
    %c0_i32 = arith.constant 0 : i32
    return %arg0, %arg3, %0 : i32, i32, i32
  }
  func.func @transform_3(%arg0: i32, %arg1: i32, %arg2: i32, %arg3: i32) -> (i32, i32, i32) {
    %c0_i32 = arith.constant 0 : i32
    return %arg0, %arg2, %arg1 : i32, i32, i32
  }
}

module attributes {stable_mosaic.version = 11 : i64} {
  func.func @outproj_ffn_kernel(%arg0: i32, %arg1: memref<128x256xf32, #tpu.memory_space<vmem>>, %arg2: memref<128x256xbf16, #tpu.memory_space<vmem>>, %arg3: memref<256x256xbf16, #tpu.memory_space<vmem>>, %arg4: memref<1x256xf32, #tpu.memory_space<vmem>>, %arg5: memref<1x256xf32, #tpu.memory_space<vmem>>, %arg6: memref<1x256xf32, #tpu.memory_space<vmem>>, %arg7: memref<256x1024xbf16, #tpu.memory_space<vmem>>, %arg8: memref<1x1024xf32, #tpu.memory_space<vmem>>, %arg9: memref<1024x256xbf16, #tpu.memory_space<vmem>>, %arg10: memref<1x256xf32, #tpu.memory_space<vmem>>, %arg11: memref<128x256xf32, #tpu.memory_space<vmem>>) attributes {dimension_semantics = [#tpu.dimension_semantics<parallel>], iteration_bounds = array<i64: 2>, scalar_prefetch = 0 : i64, scratch_operands = 0 : i64, tpu.core_type = #tpu.core_type<tc>, window_params = [{transform_indices = @transform_0, window_bounds = array<i64: 128, 256>}, {transform_indices = @transform_1, window_bounds = array<i64: 128, 256>}, {pipeline_mode = #tpu.pipeline_mode<synchronous>, transform_indices = @transform_2, window_bounds = array<i64: 256, 256>}, {pipeline_mode = #tpu.pipeline_mode<synchronous>, transform_indices = @transform_3, window_bounds = array<i64: 1, 256>}, {pipeline_mode = #tpu.pipeline_mode<synchronous>, transform_indices = @transform_4, window_bounds = array<i64: 1, 256>}, {pipeline_mode = #tpu.pipeline_mode<synchronous>, transform_indices = @transform_5, window_bounds = array<i64: 1, 256>}, {pipeline_mode = #tpu.pipeline_mode<synchronous>, transform_indices = @transform_6, window_bounds = array<i64: 256, 1024>}, {pipeline_mode = #tpu.pipeline_mode<synchronous>, transform_indices = @transform_7, window_bounds = array<i64: 1, 1024>}, {pipeline_mode = #tpu.pipeline_mode<synchronous>, transform_indices = @transform_8, window_bounds = array<i64: 1024, 256>}, {pipeline_mode = #tpu.pipeline_mode<synchronous>, transform_indices = @transform_9, window_bounds = array<i64: 1, 256>}, {transform_indices = @transform_10, window_bounds = array<i64: 128, 256>}]} {
    %c0 = arith.constant 0 : index
    %c0_0 = arith.constant 0 : index
    %0 = vector.load %arg1[%c0, %c0_0] : memref<128x256xf32, #tpu.memory_space<vmem>>, vector<128x256xf32>
    %c0_1 = arith.constant 0 : index
    %c0_2 = arith.constant 0 : index
    %1 = vector.load %arg2[%c0_1, %c0_2] : memref<128x256xbf16, #tpu.memory_space<vmem>>, vector<128x256xbf16>
    %c0_3 = arith.constant 0 : index
    %c0_4 = arith.constant 0 : index
    %2 = vector.load %arg3[%c0_3, %c0_4] : memref<256x256xbf16, #tpu.memory_space<vmem>>, vector<256x256xbf16>
    %cst = arith.constant dense<0.000000e+00> : vector<128x256xf32>
    %3 = tpu.matmul %1, %2, %cst {dimension_numbers = #tpu.dot_dimension_numbers<[1], [0], [0], [1], [0, 0, 1, 1], [], []>} : vector<128x256xbf16>, vector<256x256xbf16>, vector<128x256xf32> -> vector<128x256xf32>
    %c0_5 = arith.constant 0 : index
    %c0_6 = arith.constant 0 : index
    %4 = vector.load %arg4[%c0_5, %c0_6] : memref<1x256xf32, #tpu.memory_space<vmem>>, vector<1x256xf32>
    %5 = vector.broadcast %4 : vector<1x256xf32> to vector<128x256xf32>
    %6 = arith.addf %3, %5 : vector<128x256xf32>
    %7 = arith.addf %0, %6 : vector<128x256xf32>
    %c0_7 = arith.constant 0 : index
    %c0_8 = arith.constant 0 : index
    %8 = vector.load %arg5[%c0_7, %c0_8] : memref<1x256xf32, #tpu.memory_space<vmem>>, vector<1x256xf32>
    %c0_9 = arith.constant 0 : index
    %c0_10 = arith.constant 0 : index
    %9 = vector.load %arg6[%c0_9, %c0_10] : memref<1x256xf32, #tpu.memory_space<vmem>>, vector<1x256xf32>
    %cst_11 = arith.constant dense<0.000000e+00> : vector<128xf32>
    %10 = vector.multi_reduction <add>, %7, %cst_11 [1] : vector<128x256xf32> to vector<128xf32>
    %11 = vector.shape_cast %10 : vector<128xf32> to vector<128x1xf32>
    %cst_12 = arith.constant 2.560000e+02 : f32
    %12 = vector.broadcast %cst_12 : f32 to vector<128x1xf32>
    %13 = arith.divf %11, %12 : vector<128x1xf32>
    %14 = vector.broadcast %13 : vector<128x1xf32> to vector<128x256xf32>
    %15 = arith.subf %7, %14 : vector<128x256xf32>
    %16 = arith.mulf %15, %15 : vector<128x256xf32>
    %cst_13 = arith.constant dense<0.000000e+00> : vector<128xf32>
    %17 = vector.multi_reduction <add>, %16, %cst_13 [1] : vector<128x256xf32> to vector<128xf32>
    %18 = vector.shape_cast %17 : vector<128xf32> to vector<128x1xf32>
    %cst_14 = arith.constant 2.560000e+02 : f32
    %19 = vector.broadcast %cst_14 : f32 to vector<128x1xf32>
    %20 = arith.divf %18, %19 : vector<128x1xf32>
    %21 = vector.broadcast %13 : vector<128x1xf32> to vector<128x256xf32>
    %22 = arith.subf %7, %21 : vector<128x256xf32>
    %cst_15 = arith.constant 9.99999974E-6 : f32
    %23 = vector.broadcast %cst_15 : f32 to vector<128x1xf32>
    %24 = arith.addf %20, %23 : vector<128x1xf32>
    %25 = math.sqrt %24 : vector<128x1xf32>
    %26 = vector.broadcast %25 : vector<128x1xf32> to vector<128x256xf32>
    %27 = arith.divf %22, %26 : vector<128x256xf32>
    %28 = vector.broadcast %8 : vector<1x256xf32> to vector<128x256xf32>
    %29 = arith.mulf %28, %27 : vector<128x256xf32>
    %30 = vector.broadcast %9 : vector<1x256xf32> to vector<128x256xf32>
    %31 = arith.addf %29, %30 : vector<128x256xf32>
    %32 = arith.truncf %31 : vector<128x256xf32> to vector<128x256xbf16>
    %c0_16 = arith.constant 0 : index
    %c0_17 = arith.constant 0 : index
    %33 = vector.load %arg7[%c0_16, %c0_17] : memref<256x1024xbf16, #tpu.memory_space<vmem>>, vector<256x1024xbf16>
    %cst_18 = arith.constant dense<0.000000e+00> : vector<128x1024xf32>
    %34 = tpu.matmul %32, %33, %cst_18 {dimension_numbers = #tpu.dot_dimension_numbers<[1], [0], [0], [1], [0, 0, 1, 1], [], []>} : vector<128x256xbf16>, vector<256x1024xbf16>, vector<128x1024xf32> -> vector<128x1024xf32>
    %c0_19 = arith.constant 0 : index
    %c0_20 = arith.constant 0 : index
    %35 = vector.load %arg8[%c0_19, %c0_20] : memref<1x1024xf32, #tpu.memory_space<vmem>>, vector<1x1024xf32>
    %36 = vector.broadcast %35 : vector<1x1024xf32> to vector<128x1024xf32>
    %37 = arith.addf %34, %36 : vector<128x1024xf32>
    %cst_21 = arith.constant 5.000000e-01 : f32
    %38 = vector.broadcast %cst_21 : f32 to vector<128x1024xf32>
    %39 = arith.mulf %38, %37 : vector<128x1024xf32>
    %cst_22 = arith.constant 4.471500e-02 : f32
    %40 = vector.broadcast %cst_22 : f32 to vector<128x1024xf32>
    %41 = arith.mulf %40, %37 : vector<128x1024xf32>
    %42 = arith.mulf %41, %37 : vector<128x1024xf32>
    %43 = arith.mulf %42, %37 : vector<128x1024xf32>
    %44 = arith.addf %37, %43 : vector<128x1024xf32>
    %cst_23 = arith.constant 0.797884583 : f32
    %45 = vector.broadcast %cst_23 : f32 to vector<128x1024xf32>
    %46 = arith.mulf %45, %44 : vector<128x1024xf32>
    %47 = math.tanh %46 : vector<128x1024xf32>
    %cst_24 = arith.constant 1.000000e+00 : f32
    %48 = vector.broadcast %cst_24 : f32 to vector<128x1024xf32>
    %49 = arith.addf %48, %47 : vector<128x1024xf32>
    %50 = arith.mulf %39, %49 : vector<128x1024xf32>
    %51 = arith.truncf %50 : vector<128x1024xf32> to vector<128x1024xbf16>
    %c0_25 = arith.constant 0 : index
    %c0_26 = arith.constant 0 : index
    %52 = vector.load %arg9[%c0_25, %c0_26] : memref<1024x256xbf16, #tpu.memory_space<vmem>>, vector<1024x256xbf16>
    %cst_27 = arith.constant dense<0.000000e+00> : vector<128x256xf32>
    %53 = tpu.matmul %51, %52, %cst_27 {dimension_numbers = #tpu.dot_dimension_numbers<[1], [0], [0], [1], [0, 0, 1, 1], [], []>} : vector<128x1024xbf16>, vector<1024x256xbf16>, vector<128x256xf32> -> vector<128x256xf32>
    %c0_28 = arith.constant 0 : index
    %c0_29 = arith.constant 0 : index
    %54 = vector.load %arg10[%c0_28, %c0_29] : memref<1x256xf32, #tpu.memory_space<vmem>>, vector<1x256xf32>
    %55 = vector.broadcast %54 : vector<1x256xf32> to vector<128x256xf32>
    %56 = arith.addf %53, %55 : vector<128x256xf32>
    %57 = arith.addf %7, %56 : vector<128x256xf32>
    %c0_30 = arith.constant 0 : index
    %c0_31 = arith.constant 0 : index
    %58 = vector.load %arg11[%c0_30, %c0_31] : memref<128x256xf32, #tpu.memory_space<vmem>>, vector<128x256xf32>
    tpu.vector_store %arg11[%c0_30, %c0_31], %57 {strides = array<i32>} : memref<128x256xf32, #tpu.memory_space<vmem>>, vector<128x256xf32>,
    return
  }
  func.func @transform_0(%arg0: i32) -> (i32, i32) {
    %c0_i32 = arith.constant 0 : i32
    %c0_i32_0 = arith.constant 0 : i32
    return %arg0, %c0_i32 : i32, i32
  }
  func.func @transform_1(%arg0: i32) -> (i32, i32) {
    %c0_i32 = arith.constant 0 : i32
    %c0_i32_0 = arith.constant 0 : i32
    return %arg0, %c0_i32 : i32, i32
  }
  func.func @transform_2(%arg0: i32) -> (i32, i32) {
    %c0_i32 = arith.constant 0 : i32
    %c0_i32_0 = arith.constant 0 : i32
    %c0_i32_1 = arith.constant 0 : i32
    return %c0_i32, %c0_i32_0 : i32, i32
  }
  func.func @transform_3(%arg0: i32) -> (i32, i32) {
    %c0_i32 = arith.constant 0 : i32
    %c0_i32_0 = arith.constant 0 : i32
    %c0_i32_1 = arith.constant 0 : i32
    return %c0_i32, %c0_i32_0 : i32, i32
  }
  func.func @transform_4(%arg0: i32) -> (i32, i32) {
    %c0_i32 = arith.constant 0 : i32
    %c0_i32_0 = arith.constant 0 : i32
    %c0_i32_1 = arith.constant 0 : i32
    return %c0_i32, %c0_i32_0 : i32, i32
  }
  func.func @transform_5(%arg0: i32) -> (i32, i32) {
    %c0_i32 = arith.constant 0 : i32
    %c0_i32_0 = arith.constant 0 : i32
    %c0_i32_1 = arith.constant 0 : i32
    return %c0_i32, %c0_i32_0 : i32, i32
  }
  func.func @transform_6(%arg0: i32) -> (i32, i32) {
    %c0_i32 = arith.constant 0 : i32
    %c0_i32_0 = arith.constant 0 : i32
    %c0_i32_1 = arith.constant 0 : i32
    return %c0_i32, %c0_i32_0 : i32, i32
  }
  func.func @transform_7(%arg0: i32) -> (i32, i32) {
    %c0_i32 = arith.constant 0 : i32
    %c0_i32_0 = arith.constant 0 : i32
    %c0_i32_1 = arith.constant 0 : i32
    return %c0_i32, %c0_i32_0 : i32, i32
  }
  func.func @transform_8(%arg0: i32) -> (i32, i32) {
    %c0_i32 = arith.constant 0 : i32
    %c0_i32_0 = arith.constant 0 : i32
    %c0_i32_1 = arith.constant 0 : i32
    return %c0_i32, %c0_i32_0 : i32, i32
  }
  func.func @transform_9(%arg0: i32) -> (i32, i32) {
    %c0_i32 = arith.constant 0 : i32
    %c0_i32_0 = arith.constant 0 : i32
    %c0_i32_1 = arith.constant 0 : i32
    return %c0_i32, %c0_i32_0 : i32, i32
  }
  func.func @transform_10(%arg0: i32) -> (i32, i32) {
    %c0_i32 = arith.constant 0 : i32
    %c0_i32_0 = arith.constant 0 : i32
    return %arg0, %c0_i32 : i32, i32
  }
}

module attributes {stable_mosaic.version = 11 : i64} {
  func.func @lm_head_kernel(%arg0: i32, %arg1: i32, %arg2: memref<128x256xf32, #tpu.memory_space<vmem>>, %arg3: memref<1x256xf32, #tpu.memory_space<vmem>>, %arg4: memref<1x256xf32, #tpu.memory_space<vmem>>, %arg5: memref<256x512xbf16, #tpu.memory_space<vmem>>, %arg6: memref<128x512xf32, #tpu.memory_space<vmem>>, %arg7: memref<128x256xbf16, #tpu.memory_space<vmem>>) attributes {dimension_semantics = [#tpu.dimension_semantics<parallel>, #tpu.dimension_semantics<arbitrary>], iteration_bounds = array<i64: 2, 1>, scalar_prefetch = 0 : i64, scratch_operands = 1 : i64, tpu.core_type = #tpu.core_type<tc>, window_params = [{transform_indices = @transform_0, window_bounds = array<i64: 128, 256>}, {pipeline_mode = #tpu.pipeline_mode<synchronous>, transform_indices = @transform_1, window_bounds = array<i64: 1, 256>}, {pipeline_mode = #tpu.pipeline_mode<synchronous>, transform_indices = @transform_2, window_bounds = array<i64: 1, 256>}, {transform_indices = @transform_3, window_bounds = array<i64: 256, 512>}, {transform_indices = @transform_4, window_bounds = array<i64: 128, 512>}]} {
    %c0_i32 = arith.constant 0 : i32
    %0 = arith.cmpi eq, %arg1, %c0_i32 : i32
    %1 = arith.extui %0 : i1 to i32
    %c0_i32_0 = arith.constant 0 : i32
    %2 = arith.cmpi ne, %1, %c0_i32_0 : i32
    scf.if %2 {
      %c0_6 = arith.constant 0 : index
      %c0_7 = arith.constant 0 : index
      %7 = vector.load %arg2[%c0_6, %c0_7] : memref<128x256xf32, #tpu.memory_space<vmem>>, vector<128x256xf32>
      %c0_8 = arith.constant 0 : index
      %c0_9 = arith.constant 0 : index
      %8 = vector.load %arg3[%c0_8, %c0_9] : memref<1x256xf32, #tpu.memory_space<vmem>>, vector<1x256xf32>
      %c0_10 = arith.constant 0 : index
      %c0_11 = arith.constant 0 : index
      %9 = vector.load %arg4[%c0_10, %c0_11] : memref<1x256xf32, #tpu.memory_space<vmem>>, vector<1x256xf32>
      %cst_12 = arith.constant dense<0.000000e+00> : vector<128xf32>
      %10 = vector.multi_reduction <add>, %7, %cst_12 [1] : vector<128x256xf32> to vector<128xf32>
      %11 = vector.shape_cast %10 : vector<128xf32> to vector<128x1xf32>
      %cst_13 = arith.constant 2.560000e+02 : f32
      %12 = vector.broadcast %cst_13 : f32 to vector<128x1xf32>
      %13 = arith.divf %11, %12 : vector<128x1xf32>
      %14 = vector.broadcast %13 : vector<128x1xf32> to vector<128x256xf32>
      %15 = arith.subf %7, %14 : vector<128x256xf32>
      %16 = arith.mulf %15, %15 : vector<128x256xf32>
      %cst_14 = arith.constant dense<0.000000e+00> : vector<128xf32>
      %17 = vector.multi_reduction <add>, %16, %cst_14 [1] : vector<128x256xf32> to vector<128xf32>
      %18 = vector.shape_cast %17 : vector<128xf32> to vector<128x1xf32>
      %cst_15 = arith.constant 2.560000e+02 : f32
      %19 = vector.broadcast %cst_15 : f32 to vector<128x1xf32>
      %20 = arith.divf %18, %19 : vector<128x1xf32>
      %21 = vector.broadcast %13 : vector<128x1xf32> to vector<128x256xf32>
      %22 = arith.subf %7, %21 : vector<128x256xf32>
      %cst_16 = arith.constant 9.99999974E-6 : f32
      %23 = vector.broadcast %cst_16 : f32 to vector<128x1xf32>
      %24 = arith.addf %20, %23 : vector<128x1xf32>
      %25 = math.sqrt %24 : vector<128x1xf32>
      %26 = vector.broadcast %25 : vector<128x1xf32> to vector<128x256xf32>
      %27 = arith.divf %22, %26 : vector<128x256xf32>
      %28 = vector.broadcast %8 : vector<1x256xf32> to vector<128x256xf32>
      %29 = arith.mulf %28, %27 : vector<128x256xf32>
      %30 = vector.broadcast %9 : vector<1x256xf32> to vector<128x256xf32>
      %31 = arith.addf %29, %30 : vector<128x256xf32>
      %32 = arith.truncf %31 : vector<128x256xf32> to vector<128x256xbf16>
      %c0_17 = arith.constant 0 : index
      %c0_18 = arith.constant 0 : index
      %33 = vector.load %arg7[%c0_17, %c0_18] : memref<128x256xbf16, #tpu.memory_space<vmem>>, vector<128x256xbf16>
      tpu.vector_store %arg7[%c0_17, %c0_18], %32 {strides = array<i32>} : memref<128x256xbf16, #tpu.memory_space<vmem>>, vector<128x256xbf16>,
    } else {
    }
    %c0 = arith.constant 0 : index
    %c0_1 = arith.constant 0 : index
    %3 = vector.load %arg7[%c0, %c0_1] : memref<128x256xbf16, #tpu.memory_space<vmem>>, vector<128x256xbf16>
    %c0_2 = arith.constant 0 : index
    %c0_3 = arith.constant 0 : index
    %4 = vector.load %arg5[%c0_2, %c0_3] : memref<256x512xbf16, #tpu.memory_space<vmem>>, vector<256x512xbf16>
    %cst = arith.constant dense<0.000000e+00> : vector<128x512xf32>
    %5 = tpu.matmul %3, %4, %cst {dimension_numbers = #tpu.dot_dimension_numbers<[1], [0], [0], [1], [0, 0, 1, 1], [], []>} : vector<128x256xbf16>, vector<256x512xbf16>, vector<128x512xf32> -> vector<128x512xf32>
    %c0_4 = arith.constant 0 : index
    %c0_5 = arith.constant 0 : index
    %6 = vector.load %arg6[%c0_4, %c0_5] : memref<128x512xf32, #tpu.memory_space<vmem>>, vector<128x512xf32>
    tpu.vector_store %arg6[%c0_4, %c0_5], %5 {strides = array<i32>} : memref<128x512xf32, #tpu.memory_space<vmem>>, vector<128x512xf32>,
    return
  }
  func.func @transform_0(%arg0: i32, %arg1: i32) -> (i32, i32) {
    %c0_i32 = arith.constant 0 : i32
    %c0_i32_0 = arith.constant 0 : i32
    return %arg0, %c0_i32 : i32, i32
  }
  func.func @transform_1(%arg0: i32, %arg1: i32) -> (i32, i32) {
    %c0_i32 = arith.constant 0 : i32
    %c0_i32_0 = arith.constant 0 : i32
    %c0_i32_1 = arith.constant 0 : i32
    return %c0_i32, %c0_i32_0 : i32, i32
  }
  func.func @transform_2(%arg0: i32, %arg1: i32) -> (i32, i32) {
    %c0_i32 = arith.constant 0 : i32
    %c0_i32_0 = arith.constant 0 : i32
    %c0_i32_1 = arith.constant 0 : i32
    return %c0_i32, %c0_i32_0 : i32, i32
  }
  func.func @transform_3(%arg0: i32, %arg1: i32) -> (i32, i32) {
    %c0_i32 = arith.constant 0 : i32
    %c0_i32_0 = arith.constant 0 : i32
    return %c0_i32, %arg1 : i32, i32
  }
  func.func @transform_4(%arg0: i32, %arg1: i32) -> (i32, i32) {
    %c0_i32 = arith.constant 0 : i32
    return %arg0, %arg1 : i32, i32
  }
}

</mosaic_0001>

<bundles_post_ra>
// kernel: _lambda_.8
= control target key start
LH: loop header
LB: loop body
LE: loop exit
PB: predicated region body
PF: predicated region fallthrough
CT: control target
= control target key end

     0   :  { %s3425_s0 = inlined_call_operand.hbm [shape: bf16[2,128,768], index: 0, kind: input, shape index: {}, may-alias: {0,1,2}]   ;;  %s3426_s1 = inlined_call_operand.hbm [shape: bf16[2,128,768], index: 1, kind: input, shape index: {}, may-alias: {0,1,2}]   ;;  %s3427_s2 = inlined_call_operand.hbm [shape: bf16[2,128,768], index: 2, kind: input, shape index: {}, may-alias: {0,1,2}]   ;;  %s3428_s3 = inlined_call_operand.hbm [shape: bf16[2,128,256], index: 3, kind: output, shape index: {}]  }
   0x1   :  { %3450 = sst [smem:[#allocation26_spill]] %s3425_s0 }
   0x2   :  { %3451 = sst [smem:[#allocation27_spill]] %s3426_s1 }
   0x3   :  { %3452 = sst [smem:[#allocation28_spill]] %s3428_s3 }
   0x4   :  { %8 = vsyncpa [#allocation6], 0 }
   0x5   :  { %10 = vsyncpa [#allocation6 + $0x1], 0 }
   0x6   :  { %11 = vsyncpa [#allocation9], 0 }
   0x7   :  { %13 = vsyncpa [#allocation9 + $0x1], 0 }
   0x8   :  { %14 = vsyncpa [#allocation7], 0 }
   0x9   :  { %16 = vsyncpa [#allocation7 + $0x1], 0  ;;  %s2519_s12 = smov 0   ;;  %s2521_s13 = smov 0  }
   0xa   :  { %s2523_s14 = smov 0   ;;  %s2525_s15 = smov 0  }
   0xb   :  { %s2527_s16 = smov 0   ;;  %s2529_s17 = smov 0  }
   0xc   :  { %s2531_s18 = smov 0   ;;  %s2533_s19 = smov 0  }
   0xd   :  { %s2535_s20 = smov 0   ;;  %s2537_s21 = smov 0  }
   0xe   :  { %s2539_s22 = smov 0   ;;  %s2541_s23 = smov 0  }
   0xf   :  { %s2543_s24 = smov 0   ;;  %s2545_s25 = smov 0  }
  0x10 LB: > { %3453 = sst [smem:[#allocation16_spill]] %s2448_s16  ;;  %s2590_s26 = sadd.s32 4294967295, %s2484_s25   ;;  %s2484_s25 = sphi %s2545_s25, %s22_s25   ;;  %s2480_s24 = sphi %s2543_s24, %s3520_s24   ;;  %s2476_s23 = sphi %s2541_s23, %s3519_s23   ;;  %s2472_s22 = sphi %s2539_s22, %s3518_s22   ;;  %s2468_s21 = sphi %s2537_s21, %s3517_s21   ;;  %s2464_s20 = sphi %s2535_s20, %s3516_s20   ;;  %s2460_s19 = sphi %s2533_s19, %s3527_s19   ;;  %s2456_s18 = sphi %s2531_s18, %s3526_s18   ;;  %s2452_s17 = sphi %s2529_s17, %s3525_s17   ;;  %s2448_s16 = sphi %s2527_s16, %s3524_s16   ;;  %s2444_s15 = sphi %s2525_s15, %s3514_s15   ;;  %s2440_s14 = sphi %s2523_s14, %s3523_s14   ;;  %s2436_s13 = sphi %s2521_s13, %s3522_s13   ;;  %s2432_s12 = sphi %s2519_s12, %s3521_s12  }
  0x11   : > { %3454 = sst [smem:[#allocation17_spill]] %s2464_s20  ;;  %s44_s27 = sadd.s32 1, %s2476_s23 }
  0x12   : > { %3455 = sst [smem:[#allocation18_spill]] %s2468_s21  ;;  %p46_p0 = scmp.ge.s32.totalorder %s44_s27, 2 }
  0x13   : > { %3456 = sst [smem:[#allocation19_spill]] %s2472_s22  ;;  %s48_s28 = sadd.s32 1, %s2480_s24 }
  0x14   : > { %3457 = sst [smem:[#allocation20_spill]] %s2476_s23  ;;  %p3436_p1 = scmp.eq.s32.totalorder %s2484_s25, 0 }
  0x15   : > { %3458 = sst [smem:[#allocation21_spill]] %s2480_s24  ;;  %p3435_p2 = scmp.eq.s32.totalorder %s2590_s26, 0 }
  0x16   : > { %s3529_s27 = smov (%p46_p0, %s44_s27), 0  ;;  %s3531_s28 = smov (!%p46_p0, %s48_s28), %s2480_s24 }
  0x17   : > { %3459 = sst [smem:[#allocation22_spill]] %s3529_s27  ;;  %s82_s29 = sadd.s32 2, %s2476_s23 }
  0x18   : > { %s83_s30 = sadd.s32 2, %s3529_s27  ;;  %p50_p3 = scmp.ge.s32.totalorder %s3531_s28, 2 }
  0x19   : > { %s87_s4 = ssub.s32 %s82_s29, %s83_s30  ;;  %s91_s5 = sadd.s32 1, %s2452_s17 }
  0x1a   : > { %p98_p4 = scmp.ne.s32.totalorder %s2452_s17, %s2448_s16  ;;  %s3533_s28 = smov (%p50_p3, %s3531_s28), 0 }
  0x1b   : > { %3460 = sst [smem:[#allocation23_spill]] %s3533_s28  ;;  %p104_p6 = scmp.ne.s32.totalorder %s2448_s16, %s2444_s15 }
  0x1c   : > { %p2608_p5 = por %p98_p4, %p3436_p1  ;;  %s2616_s7 = ssub.s32 %s2480_s24, %s3533_s28 }
  0x1d   : > { %s114_s8 = sadd.s32 4, %s2476_s23  ;;  %s88_s9 = sor.u32 %s87_s4, %s2616_s7 }
  0x1e   : > { %p2622_p7 = por %p104_p6, %p3435_p2  ;;  %p89_p8 = scmp.eq.s32.totalorder %s88_s9, 0 }
  0x1f   : > { %s115_s11 = sadd.s32 4, %s3529_s27  ;;  %p3434_p9 = scmp.lt.s32.totalorder %s2484_s25, 4 }
  0x20   : > { %s3462_s10 = scalar_select %p2622_p7, 1, 0 }
  0x21   : > { %s119_s29 = ssub.s32 %s114_s8, %s115_s11  ;;  %s1970_s4 = smul.u32 96, %s2480_s24 }
  0x22   : > { %3463 = sst [smem:[#allocation24_spill]] %s3462_s10  ;;  %s120_s15 = sor.u32 %s119_s29, %s2616_s7 }
  0x23   : > { %s2628_s30 = scalar_select %p89_p8, %s2452_s17, %s91_s5  }
  0x24   : > { %p2632_p10 = scmp.eq.s32.totalorder %s120_s15, 0  ;;  %s202_s3 = sadd.s32 %s2476_s23, %s1970_s4 }
  0x25   : > { %s2638_s21 = sshll.u32 %s202_s3, 6  ;;  %s215_s9 = sand.u32 1, %s2484_s25  }
  0x26   : > { %s217_s22 = sand.u32 1, %s2452_s17   ;;  %s3465_s1 = sld [smem:[#allocation27_spill]] }
  0x27   : > { %s1757_s10 = sshll.u32 %s217_s22, 6  ;;  %p2652_p11 = pnand %p3434_p9, %p2608_p5 }
  0x28   : > { %s219_s29 = scalar_lea.vmem [#allocation8], %s1757_s10  ;;  %s2660_s16 = scalar_lea.sflag [#allocation9], %s215_s9 }
  0x29   : > { %s231_s15 = sshll.u32 %s219_s29, 4  ;;  %p2240_p3 = pneg %p2652_p11  ;;  %s2656_s15 = int_to_ptr.vmem [resolvable:$true] %s231_s15 }
  0x2c   : > { %s1647_s5 = scalar_lea.hbm %s3465_s1, %s2638_s21  ;;  %s2243_s4 = scalar_lea.hbm %s3465_s1, 12288 }
  0x2d   : > { %s2646_s11 = scalar_lea.hbm %s1647_s5, 128  ;;  %s2268_s22 = scalar_lea.hbm %s1647_s5, 1152 }
  0x2e   : > { %p2239_p0 = scmp.ne.s32.totalorder %s2646_s11, %s2268_s22  ;;  %p2244_p5 = scmp.lt.u32.totalorder %s2646_s11, %s3465_s1 }
  0x2f   : > { %p2245_p8 = scmp.lt.u32.totalorder %s2243_s4, %s2268_s22  ;;  %p2247_p2 = scmp.lt.u32.totalorder %s2268_s22, %s2646_s11 }
  0x30   : > { %p2241_p4 = pnand %p2240_p3, %p2239_p0 }
  0x31   : > { %p2246_p9 = por %p2245_p8, %p2244_p5 }
  0x32   : > { %p2242_p6 = pneg %p2241_p4 }
  0x33   : > { %p2248_p1 = por %p2247_p2, %p2246_p9 }
  0x35   : > { %p2249_p12 = pnand %p2248_p1, %p2242_p6 }
  0x37   : > { %2252 = shalt.err (!%p2249_p12)
}
  0x38   : > { %s2253_s9 = scalar_lea.vmem %s2656_s15, 1024  ;;  %s2486_s5 = smov [#allocation8]  }
  0x39   : > { %p2254_p0 = scmp.ne.s32.totalorder %s2656_s15, %s2253_s9  ;;  %s2258_s6 = sshll.u32 %s2486_s5, 4  ;;  %s2259_s6 = int_to_ptr.vmem [resolvable:$false] %s2258_s6 }
  0x3a   : > { %s2260_s10 = scalar_lea.vmem %s2259_s6, 2048  ;;  %p2261_p7 = scmp.lt.s32.totalorder %s2656_s15, %s2259_s6 }
  0x3b   : > { %p2256_p4 = pnand %p2254_p0, %p2240_p3  ;;  %p2262_p5 = scmp.lt.s32.totalorder %s2260_s10, %s2253_s9 }
  0x3d   : > { %p2257_p13 = pneg %p2256_p4  ;;  %p2263_p8 = por %p2262_p5, %p2261_p7 }
  0x3f   : > { %p2264_p2 = pnand %p2263_p8, %p2257_p13 }
  0x41   : > { %2267 = shalt.err (!%p2264_p2)
}
  0x42   : > { %s3438_s22 = smov 384   ;;  %s3440_s4 = smov 64  }
  0x43   : > { %s3442_s8 = smov 4   ;;  %p3467_p1 = scmp.lt.s32.totalorder %s2484_s25, 5 }
  0x44   : > { %1985 = dma.hbm_to_vmem [thread:$0]  (!%p2652_p11), %s2646_s11, 1024, %s2656_s15, %s2660_s16, %s3438_s22, %s3440_s4, %s3442_s8  }
  0x45   : > { %p3468_p7 = scmp.ge.s32.totalorder %s2484_s25, 1  ;;  %s1752_s9 = sadd.s32 4294967294, %s2484_s25  }
  0x46   : > { %s55_s5 = ssub.s32 %s2476_s23, %s3529_s27  ;;  %s59_s6 = sadd.s32 1, %s2464_s20 }
  0x47   : > { %p2694_p9 = pnand %p3468_p7, %p3467_p1  ;;  %s56_s10 = sor.u32 %s55_s5, %s2616_s7 }
  0x48   : > { %p66_p12 = scmp.ne.s32.totalorder %s2464_s20, %s2460_s19  ;;  %p57_p13 = scmp.eq.s32.totalorder %s56_s10, 0 }
  0x49   : > { %s3469_s29 = scalar_select %p2694_p9, 1, 0 }
  0x4a   : > { %p72_p3 = scmp.ne.s32.totalorder %s2460_s19, %s2456_s18  ;;  %p3470_p6 = scmp.eq.s32.totalorder %s2484_s25, 0 }
  0x4b   : > { %p164_p11 = scmp.eq.s32.totalorder %s2590_s26, 3  ;;  %p3473_p4 = scmp.eq.s32.totalorder %s2590_s26, 0 }
  0x4c   : > { %p2709_p0 = por %p3470_p6, %p66_p12  ;;  %p170_p2 = scmp.eq.s32.totalorder %s1752_s9, 3 }
  0x4d   : > { %s2715_s11 = scalar_select %p57_p13, %s2464_s20, %s59_s6  }
  0x4e   : > { %p2719_p5 = por %p3473_p4, %p72_p3  ;;  %p2723_p8 = por %p164_p11, %p66_p12 }
  0x4f   : > { %3472 = sst [smem:[#allocation25_spill]] %s2715_s11  ;;  %s190_s5 = sand.u32 1, %s2464_s20  }
  0x50   : > { %s3474_s15 = scalar_select %p2719_p5, 1, 0 }
  0x51   : > { %s3475_s7 = scalar_select %p2723_p8, 1, 0 }
  0x52   : > { %s1755_s10 = sshll.u32 %s190_s5, 6  ;;  %p2728_p1 = por %p170_p2, %p72_p3 }
  0x53   : > { %s3477_s0 = sld [smem:[#allocation26_spill]]  ;;  %s194_s1 = scalar_lea.vmem [#allocation5], %s1755_s10 }
  0x54   : > { %s3476_s22 = scalar_select %p2728_p1, 1, 0 }
  0x55   : > { %s205_s27 = sshll.u32 %s194_s1, 4  ;;  %p3478_p7 = scmp.lt.s32.totalorder %s2484_s25, 4  ;;  %s2738_s27 = int_to_ptr.vmem [resolvable:$true] %s205_s27 }
  0x56   : > { %s2748_s24 = scalar_lea.sflag [#allocation6], %s190_s5 }
  0x57   : > { %p2744_p12 = pnand %p3478_p7, %p2709_p0 }
  0x59   : > { %s2736_s6 = scalar_lea.hbm %s3477_s0, %s2638_s21  ;;  %p2271_p3 = pneg %p2744_p12 }
  0x5a   : > { %s2269_s4 = scalar_lea.hbm %s2736_s6, 1024  ;;  %s2274_s3 = scalar_lea.hbm %s3477_s0, 12288 }
  0x5b   : > { %p2270_p13 = scmp.ne.s32.totalorder %s2736_s6, %s2269_s4  ;;  %p2275_p0 = scmp.lt.u32.totalorder %s2736_s6, %s3477_s0 }
  0x5c   : > { %p2276_p4 = scmp.lt.u32.totalorder %s2274_s3, %s2269_s4  ;;  %p2278_p7 = scmp.lt.u32.totalorder %s2269_s4, %s2736_s6 }
  0x5d   : > { %p2272_p6 = pnand %p2271_p3, %p2270_p13 }
  0x5e   : > { %p2277_p2 = por %p2276_p4, %p2275_p0 }
  0x5f   : > { %p2273_p11 = pneg %p2272_p6 }
  0x60   : > { %p2279_p1 = por %p2278_p7, %p2277_p2 }
  0x62   : > { %p2280_p8 = pnand %p2279_p1, %p2273_p11 }
  0x64   : > { %2283 = shalt.err (!%p2280_p8)
}
  0x65   : > { %s2284_s5 = scalar_lea.vmem %s2738_s27, 1024  ;;  %s2490_s1 = smov [#allocation5]  }
  0x66   : > { %p2285_p13 = scmp.ne.s32.totalorder %s2738_s27, %s2284_s5  ;;  %s2289_s8 = sshll.u32 %s2490_s1, 4  ;;  %s2290_s8 = int_to_ptr.vmem [resolvable:$false] %s2289_s8 }
  0x67   : > { %s2291_s23 = scalar_lea.vmem %s2290_s8, 2048  ;;  %p2292_p9 = scmp.lt.s32.totalorder %s2738_s27, %s2290_s8 }
  0x68   : > { %p2287_p6 = pnand %p2285_p13, %p2271_p3  ;;  %p2293_p0 = scmp.lt.s32.totalorder %s2291_s23, %s2284_s5 }
  0x6a   : > { %p2288_p5 = pneg %p2287_p6  ;;  %p2294_p4 = por %p2293_p0, %p2292_p9 }
  0x6c   : > { %p2295_p2 = pnand %p2294_p4, %p2288_p5 }
  0x6e   : > { %2298 = shalt.err (!%p2295_p2)
}
  0x6f   : > { %s3480_s4 = smov 4   ;;  %s3481_s3 = smov 64  }
  0x70   : > { %s3482_s10 = smov 384   ;;  %s123_s9 = sadd.s32 1, %s2440_s14 }
  0x71   : > { %1982 = dma.hbm_to_vmem [thread:$0]  (!%p2744_p12), %s2736_s6, 1024, %s2738_s27, %s2748_s24, %s3482_s10, %s3481_s3, %s3480_s4  }
  0x72   : > { %s2783_s5 = scalar_select %p2632_p10, %s2440_s14, %s123_s9  }
  0x73   : > { %p130_p9 = scmp.ne.s32.totalorder %s2440_s14, %s2436_s13  ;;  %p136_p5 = scmp.ne.s32.totalorder %s2436_s13, %s2432_s12 }
  0x74   : > { %s243_s1 = sand.u32 1, %s2440_s14   ;;  %s1657_s0 = scalar_lea.hbm %s3427_s2, %s2638_s21 }
  0x75   : > { %p3483_p8 = scmp.eq.s32.totalorder %s2484_s25, 0  ;;  %p3484_p3 = scmp.eq.s32.totalorder %s2590_s26, 0 }
  0x76   : > { %s1759_s20 = sshll.u32 %s243_s1, 6  ;;  %s2802_s24 = scalar_lea.hbm %s1657_s0, 256 }
  0x77   : > { %p132_p1 = por %p130_p9, %p3483_p8  ;;  %p2798_p11 = por %p136_p5, %p3484_p3 }
  0x78   : > { %p3486_p12 = scmp.lt.s32.totalorder %s2484_s25, 4  ;;  %s245_s21 = scalar_lea.vmem [#allocation10], %s1759_s20 }
  0x79   : > { %s257_s27 = sshll.u32 %s245_s21, 4  ;;  %s2329_s28 = scalar_lea.hbm %s1657_s0, 1280  ;;  %s2810_s27 = int_to_ptr.vmem [resolvable:$true] %s257_s27 }
  0x7a   : > { %p2806_p10 = pnand %p3486_p12, %p132_p1  ;;  %p2300_p7 = scmp.ne.s32.totalorder %s2802_s24, %s2329_s28 }
  0x7b   : > { %s2304_s1 = scalar_lea.hbm %s3427_s2, 12288  ;;  %p2305_p4 = scmp.lt.u32.totalorder %s2802_s24, %s3427_s2 }
  0x7c   : > { %p2301_p13 = pneg %p2806_p10  ;;  %p2306_p2 = scmp.lt.u32.totalorder %s2304_s1, %s2329_s28 }
  0x7d   : > { %p2308_p5 = scmp.lt.u32.totalorder %s2329_s28, %s2802_s24 }
  0x7e   : > { %p2302_p6 = pnand %p2301_p13, %p2300_p7  ;;  %p2307_p9 = por %p2306_p2, %p2305_p4 }
  0x80   : > { %p2303_p0 = pneg %p2302_p6  ;;  %p2309_p8 = por %p2308_p5, %p2307_p9 }
  0x82   : > { %p2310_p1 = pnand %p2309_p8, %p2303_p0 }
  0x84   : > { %2313 = shalt.err (!%p2310_p1)
}
  0x85   : > { %s2314_s0 = scalar_lea.vmem %s2810_s27, 1024  ;;  %s2491_s20 = smov [#allocation10]  }
  0x86   : > { %p2315_p3 = scmp.ne.s32.totalorder %s2810_s27, %s2314_s0  ;;  %s2319_s21 = sshll.u32 %s2491_s20, 4  ;;  %s2320_s21 = int_to_ptr.vmem [resolvable:$false] %s2319_s21 }
  0x87   : > { %s2321_s6 = scalar_lea.vmem %s2320_s21, 2048  ;;  %p2322_p6 = scmp.lt.s32.totalorder %s2810_s27, %s2320_s21 }
  0x88   : > { %p2317_p12 = pnand %p2315_p3, %p2301_p13  ;;  %p2323_p4 = scmp.lt.s32.totalorder %s2321_s6, %s2314_s0 }
  0x8a   : > { %p2318_p7 = pneg %p2317_p12  ;;  %p2324_p2 = por %p2323_p4, %p2322_p6 }
  0x8c   : > { %p2325_p9 = pnand %p2324_p2, %p2318_p7 }
  0x8e   : > { %2328 = shalt.err (!%p2325_p9)
}
  0x8f   : > { %1988 = dma.hbm_to_vmem [thread:$0]  (!%p2806_p10), %s2802_s24, 1024, %s2810_s27, %s2660_s16, %s3482_s10, %s3481_s3, %s3480_s4  }
  0x90   : > { %p3488_p13 = scmp.ne.s32.totalorder %s3469_s29, 0 }
  0x91   : > { %s2843_s28 = sand.u32 (!%p3488_p13), 1, %s2460_s19   ;;  %p3489_p0 = scmp.ne.s32.totalorder (!%p3488_p13), %s3474_s15, 0 }
  0x92   : > { %269 = sbr.rel (%p3488_p13) target bundleno = 1093 (0x445), region = 32  ;;  %s1762_s9 = sshll.u32 (!%p3488_p13), %s2843_s28, 6 }
  0x93   : > { %s272_s1 = scalar_lea.sflag (!%p3488_p13), [#allocation6], %s2843_s28  ;;  %s2849_s12 = scalar_lea.vmem (!%p3488_p13), [#allocation5], %s1762_s9 }
  0x99   : > { %2415 = dma.done.wait (%p3489_p0), %s272_s1, 1024  }
  0x9a   : > { %2417 = vsyncadd (%p3489_p0), %s272_s1, 4294966272  ;;  %s3490_s16 = sld [smem:[#allocation16_spill]]  ;;  %s3491_s29 = sld [smem:[#allocation24_spill]] }
  0x9b   : > { %s280_s4 = sand.u32 1, %s2590_s26  }
  0x9c   : > { %s281_s24 = scalar_lea.sflag [#allocation9], %s280_s4 }
  0xa0   : > { %s282_s3 = sand.u32 1, %s3490_s16   ;;  %p3492_p10 = scmp.ne.s32.totalorder %s3491_s29, 0 }
  0xa1   : > { %s1763_s10 = sshll.u32 %s282_s3, 6 }
  0xa2   : > { %s284_s27 = scalar_lea.vmem [#allocation8], %s1763_s10 }
  0xa3   : > { %2419 = dma.done.wait (%p3492_p10), %s281_s24, 1024  }
  0xa4   : > { %2421 = vsyncadd (%p3492_p10), %s281_s24, 4294966272  ;;  %s291_s8 = sand.u32 1, %s2436_s13  }
  0xa5   : > { %s1764_s23 = sshll.u32 %s291_s8, 6 }
  0xa6   : > { %s2862_s0 = scalar_lea.vmem [#allocation10], %s1764_s23 }
  0xa7   : > { %2423 = dma.done.wait (%p2798_p11), %s281_s24, 1024  }
  0xa8   : > { %2425 = vsyncadd (%p2798_p11), %s281_s24, 4294966272  ;;  %v2118_v0 = vld [vmem:[%s284_s27] sm:$0xff]   ;;  %v2119_v1 = vld [vmem:[%s284_s27 + $0x8] sm:$0xff]   ;;  %vm337_vm0 = vcmask 7168   ;;  %v2492_v16 = vmov -1e+30   ;;  %v394_v17 = vlaneseq }
  0xa9   : > { %1906 = vmatprep.subr.bf16.mxu0 %v2118_v0  ;;  %v2120_v2 = vld [vmem:[%s284_s27 + $0x10] sm:$0xff]   ;;  %v2126_v3 = vld [vmem:[%s2849_s12] sm:$0xff]   ;;  %v2121_v4 = vld [vmem:[%s284_s27 + $0x18] sm:$0xff]   ;;  %340 = vst.msk [vmem:[#allocation2 + $0x10] sm:$0xff] %vm337_vm0, %v2492_v16  ;;  %v2493_v49 = vmov 0   ;;  %v2494_v62 = vmov 0.0  }
  0xaa   : > { %1907 = vmatpush3.bf16.xpose.msra.mxu0 %v2118_v0  ;;  %1922 = vmatprep.mubr.bf16.mxu0 %v2126_v3  ;;  %v2122_v5 = vld [vmem:[%s284_s27 + $0x20] sm:$0xff]   ;;  %v2123_v6 = vld [vmem:[%s284_s27 + $0x28] sm:$0xff]   ;;  %v2124_v7 = vld [vmem:[%s284_s27 + $0x30] sm:$0xff]   ;;  %338 = vst.msk [vmem:[#allocation2] sm:$0xff] %vm337_vm0, %v2492_v16  ;;  %v2892_v18 = vshrl.u32 %v394_v17, 7  ;;  %v2895_v20 = vand.u32 127, %v394_v17 }
  0xab   : > { %1908 = vmatprep.subr.bf16.mxu0 %v2119_v1  ;;  %v2125_v8 = vld [vmem:[%s284_s27 + $0x38] sm:$0xff]   ;;  %v2127_v9 = vld [vmem:[%s2849_s12 + $0x8] sm:$0xff]   ;;  %v2128_v10 = vld [vmem:[%s2849_s12 + $0x10] sm:$0xff]   ;;  %339 = vst.msk [vmem:[#allocation2 + $0x8] sm:$0xff] %vm337_vm0, %v2492_v16  ;;  %2117 = vset.pattern.permute.xlu1 %v2493_v49  ;;  %s3318_s26 = scalar_lea.vmem [#allocation11], %s1762_s9  ;;  %s3507_s11 = sld [smem:[#allocation19_spill]] }
  0xac   : > { %v2129_v11 = vld [vmem:[%s2849_s12 + $0x18] sm:$0xff]   ;;  %v2130_v12 = vld [vmem:[%s2849_s12 + $0x20] sm:$0xff]   ;;  %v2131_v13 = vld [vmem:[%s2849_s12 + $0x28] sm:$0xff]   ;;  %341 = vst.msk [vmem:[#allocation2 + $0x18] sm:$0xff] %vm337_vm0, %v2492_v16  ;;  %v397_v19 = vadd.s32 16, %v2892_v18  ;;  %v398_v21 = vadd.s32 24, %v2892_v18  ;;  %vm432_vm2 = vcmp.le.s32.totalorder %v2895_v20, %v2892_v18  ;;  %2116 = vset.pattern.permute.xlu0 %v2493_v49 }
  0xad   : > { %v2132_v14 = vld [vmem:[%s2849_s12 + $0x30] sm:$0xff]   ;;  %v2133_v15 = vld [vmem:[%s2849_s12 + $0x38] sm:$0xff]   ;;  %342 = vst.msk [vmem:[#allocation2 + $0x20] sm:$0xff] %vm337_vm0, %v2492_v16  ;;  %343 = vst.msk [vmem:[#allocation2 + $0x28] sm:$0xff] %vm337_vm0, %v2492_v16  ;;  %v396_v22 = vadd.s32 8, %v2892_v18  ;;  %v399_v29 = vadd.s32 32, %v2892_v18 }
  0xae   : > { %344 = vst.msk [vmem:[#allocation2 + $0x30] sm:$0xff] %vm337_vm0, %v2492_v16  ;;  %345 = vst.msk [vmem:[#allocation2 + $0x38] sm:$0xff] %vm337_vm0, %v2492_v16  ;;  %vm434_vm1 = vcmp.le.s32.totalorder %v2895_v20, %v397_v19  ;;  %vm435_vm3 = vcmp.le.s32.totalorder %v2895_v20, %v398_v21  ;;  %v402_v30 = vadd.s32 56, %v2892_v18  ;;  %v401_v33 = vadd.s32 48, %v2892_v18  ;;  %v2139_v49 = vld [vmem:[%s2862_s0 + $0x28] sm:$0xff]   ;;  %s3508_s15 = sld [smem:[#allocation18_spill]] }
  0xaf   : > { %346 = vst.msk [vmem:[#allocation2 + $0x40] sm:$0xff] %vm337_vm0, %v2492_v16  ;;  %347 = vst.msk [vmem:[#allocation2 + $0x48] sm:$0xff] %vm337_vm0, %v2492_v16  ;;  %vm433_vm4 = vcmp.le.s32.totalorder %v2895_v20, %v396_v22  ;;  %vm436_vm5 = vcmp.le.s32.totalorder %v2895_v20, %v399_v29  ;;  %v400_v35 = vadd.s32 40, %v2892_v18  ;;  %v403_v41 = vadd.s32 64, %v2892_v18  ;;  %s1600_s6 = sshll.u32 %s3318_s26, 4  ;;  %s3509_s16 = sld [smem:[#allocation28_spill]]  ;;  %s3340_s6 = int_to_ptr.vmem [resolvable:$true] %s1600_s6 }
  0xb0   : > { %348 = vst.msk [vmem:[#allocation2 + $0x50] sm:$0xff] %vm337_vm0, %v2492_v16  ;;  %349 = vst.msk [vmem:[#allocation2 + $0x58] sm:$0xff] %vm337_vm0, %v2492_v16  ;;  %vm439_vm6 = vcmp.le.s32.totalorder %v2895_v20, %v402_v30  ;;  %vm438_vm7 = vcmp.le.s32.totalorder %v2895_v20, %v401_v33  ;;  %v406_v42 = vadd.s32 88, %v2892_v18  ;;  %v405_v43 = vadd.s32 80, %v2892_v18  ;;  %s1583_s3 = scalar_lea.sflag [#allocation7], %s2843_s28  ;;  %s2330_s10 = scalar_lea.vmem %s3340_s6, 1024 }
  0xb1   : > { %350 = vst.msk [vmem:[#allocation2 + $0x60] sm:$0xff] %vm337_vm0, %v2492_v16  ;;  %351 = vst.msk [vmem:[#allocation2 + $0x68] sm:$0xff] %vm337_vm0, %v2492_v16  ;;  %vm437_vm8 = vcmp.le.s32.totalorder %v2895_v20, %v400_v35  ;;  %v404_v45 = vadd.s32 72, %v2892_v18  ;;  %vm440_vm9 = vcmp.le.s32.totalorder %v2895_v20, %v403_v41  ;;  %v407_v54 = vadd.s32 96, %v2892_v18  ;;  %s1807_s20 = sshll.u32 %s3507_s11, 5  ;;  %p2331_p11 = scmp.ne.s32.totalorder %s3340_s6, %s2330_s10 }
  0xb2   : > { %1909 = vmatpush3.bf16.xpose.msra.mxu0 %v2119_v1  ;;  %352 = vst.msk [vmem:[#allocation2 + $0x70] sm:$0xff] %vm337_vm0, %v2492_v16  ;;  %353 = vst.msk [vmem:[#allocation2 + $0x78] sm:$0xff] %vm337_vm0, %v2492_v16  ;;  %vm443_vm10 = vcmp.le.s32.totalorder %v2895_v20, %v406_v42  ;;  %vm442_vm11 = vcmp.le.s32.totalorder %v2895_v20, %v405_v43  ;;  %v410_v56 = vadd.s32 120, %v2892_v18  ;;  %v409_v58 = vadd.s32 112, %v2892_v18  ;;  %v2136_v16 = vld [vmem:[%s2862_s0 + $0x10] sm:$0xff]   ;;  %p3511_p5 = scmp.ne.s32.totalorder %s3475_s7, 0 }
  0xb3   : > { %1910 = vmatprep.subr.bf16.mxu0 %v2120_v2  ;;  %vm441_vm12 = vcmp.le.s32.totalorder %v2895_v20, %v404_v45  ;;  %v408_v59 = vadd.s32 104, %v2892_v18  ;;  %vm444_vm13 = vcmp.le.s32.totalorder %v2895_v20, %v407_v54  ;;  %356 = vst.msk [vmem:[#allocation3 + $0x10] sm:$0xff] %vm337_vm0, %v2494_v62  ;;  %354 = vst.msk [vmem:[#allocation3] sm:$0xff] %vm337_vm0, %v2494_v62  ;;  %s2495_s24 = smov [#allocation11]  }
  0xb4   : > { %vm447_vm14 = vcmp.le.s32.totalorder %v2895_v20, %v410_v56  ;;  %vm446_vm15 = vcmp.le.s32.totalorder %v2895_v20, %v409_v58  ;;  %355 = vst.msk [vmem:[#allocation3 + $0x8] sm:$0xff] %vm337_vm0, %v2494_v62  ;;  %357 = vst.msk [vmem:[#allocation3 + $0x18] sm:$0xff] %vm337_vm0, %v2494_v62  ;;  %s1597_s21 = sadd.s32 %s3508_s15, %s1807_s20  ;;  %p2332_p8 = pnand %p2331_p11, %p3511_p5 }
  0xb5   : > { %358 = vst.msk [vmem:[#allocation3 + $0x20] sm:$0xff] %vm337_vm0, %v2494_v62  ;;  %359 = vst.msk [vmem:[#allocation3 + $0x28] sm:$0xff] %vm337_vm0, %v2494_v62  ;;  %v3052_v35 = vld [vmem:[#allocation2 + $0x30] sm:$0xff]  ;;  %s1808_s9 = sshll.u32 %s1597_s21, 6  ;;  %s3510_s29 = smov %s3509_s16 }
  0xb6   : > { %360 = vst.msk [vmem:[#allocation3 + $0x30] sm:$0xff] %vm337_vm0, %v2494_v62  ;;  %361 = vst.msk [vmem:[#allocation3 + $0x38] sm:$0xff] %vm337_vm0, %v2494_v62  ;;  %s3346_s4 = scalar_lea.hbm %s3509_s16, %s1808_s9  ;;  %p2333_p1 = pneg %p2332_p8 }
  0xb7   : > { %362 = vst.msk [vmem:[#allocation3 + $0x40] sm:$0xff] %vm337_vm0, %v2494_v62  ;;  %363 = vst.msk [vmem:[#allocation3 + $0x48] sm:$0xff] %vm337_vm0, %v2494_v62  ;;  %s2334_s27 = sshll.u32 %s2495_s24, 4  ;;  %s2335_s27 = int_to_ptr.vmem [resolvable:$false] %s2334_s27 }
  0xb8   : > { %364 = vst.msk [vmem:[#allocation3 + $0x50] sm:$0xff] %vm337_vm0, %v2494_v62  ;;  %365 = vst.msk [vmem:[#allocation3 + $0x58] sm:$0xff] %vm337_vm0, %v2494_v62  ;;  %s2336_s8 = scalar_lea.vmem %s2335_s27, 2048  ;;  %p2337_p3 = scmp.lt.s32.totalorder %s3340_s6, %s2335_s27 }
  0xb9   : > { %366 = vst.msk [vmem:[#allocation3 + $0x60] sm:$0xff] %vm337_vm0, %v2494_v62  ;;  %367 = vst.msk [vmem:[#allocation3 + $0x68] sm:$0xff] %vm337_vm0, %v2494_v62  ;;  %p2338_p12 = scmp.lt.s32.totalorder %s2336_s8, %s2330_s10 }
  0xba   : > { %1911 = vmatpush3.bf16.xpose.msra.mxu0 %v2120_v2  ;;  %368 = vst.msk [vmem:[#allocation3 + $0x70] sm:$0xff] %vm337_vm0, %v2494_v62  ;;  %369 = vst.msk [vmem:[#allocation3 + $0x78] sm:$0xff] %vm337_vm0, %v2494_v62  ;;  %v2140_v62 = vld [vmem:[%s2862_s0 + $0x30] sm:$0xff]  }
  0xbb   : > { %1912 = vmatprep.subr.bf16.mxu0 %v2121_v4  ;;  %p2339_p7 = por %p2338_p12, %p2337_p3 }
  0xbd   : > { %p2340_p6 = pnand %p2339_p7, %p2333_p1 }
  0xc2   : > { %1913 = vmatpush3.bf16.xpose.msra.mxu0 %v2121_v4 }
  0xc3   : > { %1914 = vmatprep.subr.bf16.mxu0 %v2122_v5 }
  0xca   : > { %1915 = vmatpush3.bf16.xpose.msra.mxu0 %v2122_v5  ;;  %v2134_v5 = vld [vmem:[%s2862_s0] sm:$0xff]  }
  0xcb   : > { %1916 = vmatprep.subr.bf16.mxu0 %v2123_v6  ;;  %1938 = vmatprep.subr.bf16.mxu1 %v2134_v5 }
  0xcc   : > { %1939 = vmatpush3.bf16.msra.mxu1 %v2134_v5 }
  0xd2   : > { %1917 = vmatpush3.bf16.xpose.msra.mxu0 %v2123_v6  ;;  %v2135_v6 = vld [vmem:[%s2862_s0 + $0x8] sm:$0xff]  }
  0xd3   : > { %1918 = vmatprep.subr.bf16.mxu0 %v2124_v7  ;;  %1940 = vmatprep.subr.bf16.mxu1 %v2135_v6 }
  0xd4   : > { %1941 = vmatpush3.bf16.msra.mxu1 %v2135_v6 }
  0xd5   : > { %1942 = vmatprep.subr.bf16.mxu1 %v2136_v16 }
  0xd8   : > { %1943 = vmatpush3.bf16.msra.mxu1 %v2136_v16 }
  0xda   : > { %1919 = vmatpush3.bf16.xpose.msra.mxu0 %v2124_v7  ;;  %v3000_v7 = vld [vmem:[#allocation2 + $0x10] sm:$0xff] }
  0xdb   : > { %1920 = vmatprep.subr.bf16.mxu0 %v2125_v8 }
  0xe2   : > { %1921 = vmatpush3.bf16.xpose.msra.mxu0 %v2125_v8  ;;  %v3002_v8 = vld [vmem:[#allocation2] sm:$0xff] }
  0xe9   : > { %1923 = vmatmul.mubr.bf16.vlgmr.msra.gmra.mrb[0].mxu0 %v2127_v9 }
  0xea   : > { %1926 = vmatprep.mubr.bf16.mxu0 %v2128_v10 }
  0xf1   : > { %1927 = vmatmul.mubr.bf16.gmra.mrb[4].mxu0 %v2129_v11 }
  0xf2   : > { %1930 = vmatprep.mubr.bf16.mxu0 %v2130_v12 }
  0xf9   : > { %1931 = vmatmul.mubr.bf16.gmra.mrb[8].mxu0 %v2131_v13  ;;  %v3010_v13 = vld [vmem:[#allocation2 + $0x18] sm:$0xff] }
  0xfa   : > { %1934 = vmatprep.mubr.bf16.mxu0 %v2132_v14 }
 0x101   : > { %1935 = vmatmul.mubr.bf16.gmra.mrb[12].mxu0 %v2133_v15  ;;  %v3017_v15 = vld [vmem:[#allocation2 + $0x8] sm:$0xff] }
 0x1bc   : > { %v1924_v23 = vpop.f32.mrb[0].mxu0 }
 0x1bd   : > { %v626_v24 = vpop.f32.mrb[1].mxu0  ;;  %v2902_v25 = vsel %vm434_vm1, %v1924_v23, -1e+30  ;;  %vm445_vm1 = vcmp.le.s32.totalorder %v2895_v20, %v408_v59  ;;  %v3036_v23 = vld [vmem:[#allocation2 + $0x20] sm:$0xff] }
 0x1be   : > { %725 = vmax.xlane.f32.xlu1 %v2902_v25  ;;  %v1925_v26 = vpop.f32.mrb[2].mxu0  ;;  %v2905_v27 = vsel %vm432_vm2, %v626_v24, -1e+30  ;;  %v2137_v24 = vld [vmem:[%s2862_s0 + $0x18] sm:$0xff]  }
 0x1bf   : > { %721 = vmax.xlane.f32.xlu0 %v2905_v27  ;;  %v629_v28 = vpop.f32.mrb[3].mxu0  ;;  %v2912_v31 = vsel %vm435_vm3, %v1925_v26, -1e+30  ;;  %1944 = vmatprep.subr.bf16.mxu1 %v2137_v24 }
 0x1c0   : > { %v2915_v32 = vsel %vm433_vm4, %v629_v28, -1e+30  ;;  %v3043_v28 = vld [vmem:[#allocation2 + $0x38] sm:$0xff]  ;;  %1945 = vmatpush3.bf16.msra.mxu1 %v2137_v24 }
 0x1c2   : > { %727 = vmax.xlane.f32.xlu1 %v2912_v31 }
 0x1c3   : > { %723 = vmax.xlane.f32.xlu0 %v2915_v32 }
 0x1c4   : > { %v1928_v34 = vpop.f32.mrb[4].mxu0 }
 0x1c5   : > { %v642_v36 = vpop.f32.mrb[5].mxu0  ;;  %v2933_v44 = vsel %vm438_vm7, %v1928_v34, -1e+30 }
 0x1c6   : > { %v1929_v37 = vpop.f32.mrb[6].mxu0  ;;  %v2922_v38 = vsel %vm436_vm5, %v642_v36, -1e+30  ;;  %v2138_v36 = vld [vmem:[%s2862_s0 + $0x20] sm:$0xff]  }
 0x1c7   : > { %729 = vmax.xlane.f32.xlu0 %v2922_v38  ;;  %v645_v39 = vpop.f32.mrb[7].mxu0  ;;  %v2925_v40 = vsel %vm439_vm6, %v1929_v37, -1e+30  ;;  %1946 = vmatprep.subr.bf16.mxu1 %v2138_v36 }
 0x1c8   : > { %735 = vmax.xlane.f32.xlu1 %v2925_v40  ;;  %v2937_v46 = vsel %vm437_vm8, %v645_v39, -1e+30  ;;  %v3059_v39 = vld [vmem:[#allocation2 + $0x28] sm:$0xff]  ;;  %1947 = vmatpush3.bf16.msra.mxu1 %v2138_v36 }
 0x1c9   : > { %1948 = vmatprep.subr.bf16.mxu1 %v2139_v49 }
 0x1cb   : > { %733 = vmax.xlane.f32.xlu0 %v2933_v44 }
 0x1cc   : > { %731 = vmax.xlane.f32.xlu1 %v2937_v46  ;;  %v1932_v47 = vpop.f32.mrb[8].mxu0  ;;  %1949 = vmatpush3.bf16.msra.mxu1 %v2139_v49 }
 0x1cd   : > { %v658_v48 = vpop.f32.mrb[9].mxu0  ;;  %v2951_v55 = vsel %vm442_vm11, %v1932_v47, -1e+30  ;;  %1950 = vmatprep.subr.bf16.mxu1 %v2140_v62 }
 0x1ce   : > { %v1933_v50 = vpop.f32.mrb[10].mxu0  ;;  %v2943_v51 = vsel %vm440_vm9, %v658_v48, -1e+30  ;;  %v3071_v48 = vld [vmem:[#allocation2 + $0x40] sm:$0xff] }
 0x1cf   : > { %v2946_v52 = vsel %vm443_vm10, %v1933_v50, -1e+30  ;;  %737 = vmax.xlane.f32.xlu0 %v2943_v51  ;;  %v661_v53 = vpop.f32.mrb[11].mxu0 }
 0x1d0   : > { %743 = vmax.xlane.f32.xlu1 %v2946_v52  ;;  %v2954_v57 = vsel %vm441_vm12, %v661_v53, -1e+30  ;;  %v3079_v53 = vld [vmem:[#allocation2 + $0x58] sm:$0xff]  ;;  %1951 = vmatpush3.bf16.msra.mxu1 %v2140_v62  ;;  %v3139_v62 = vld [vmem:[#allocation2 + $0x68] sm:$0xff] }
 0x1d3   : > { %741 = vmax.xlane.f32.xlu0 %v2951_v55 }
 0x1d4   : > { %739 = vmax.xlane.f32.xlu1 %v2954_v57  ;;  %v1936_v60 = vpop.f32.mrb[12].mxu0 }
 0x1d5   : > { %v674_v61 = vpop.f32.mrb[13].mxu0  ;;  %v2992_v3 = vsel %vm446_vm15, %v1936_v60, -1e+30 }
 0x1d6   : > { %v1937_v63 = vpop.f32.mrb[14].mxu0  ;;  %v2981_v0 = vsel %vm444_vm13, %v674_v61, -1e+30  ;;  %v3091_v61 = vld [vmem:[#allocation2 + $0x50] sm:$0xff] }
 0x1d7   : > { %v2986_v1 = vsel %vm447_vm14, %v1937_v63, -1e+30  ;;  %745 = vmax.xlane.f32.xlu0 %v2981_v0  ;;  %v677_v2 = vpop.f32.mrb[15].mxu0 }
 0x1d8   : > { %751 = vmax.xlane.f32.xlu1 %v2986_v1  ;;  %v2994_v4 = vsel %vm445_vm1, %v677_v2, -1e+30  ;;  %v3099_v2 = vld [vmem:[#allocation2 + $0x48] sm:$0xff] }
 0x1db   : > { %749 = vmax.xlane.f32.xlu0 %v2992_v3 }
 0x1dc   : > { %747 = vmax.xlane.f32.xlu1 %v2994_v4 }
 0x24b   : > { %v726_v9 = vpop.xlane.xlu1 %725 }
 0x24c   : > { %v3005_v10 = vmax.f32 %v3000_v7, %v726_v9  ;;  %v722_v11 = vpop.xlane.xlu0 %721 }
 0x24d   : > { %v3008_v12 = vmax.f32 %v3002_v8, %v722_v11 }
 0x24e   : > { %v771_v14 = vsub.f32 %v3000_v7, %v3005_v10  ;;  %1341 = vst.msk [vmem:[#allocation2 + $0x10] sm:$0xff] %vm337_vm0, %v3005_v10  ;;  %829 = vperm.xlu1 %2117, %v3005_v10  }
 0x24f   : > { %1339 = vst.msk [vmem:[#allocation2] sm:$0xff] %vm337_vm0, %v3008_v12  ;;  %v728_v18 = vpop.xlane.xlu1 %727  ;;  %819 = vperm.xlu0 %2116, %v3008_v12  }
 0x250   : > { %v3026_v19 = vmax.f32 %v3010_v13, %v728_v18  ;;  %v724_v20 = vpop.xlane.xlu0 %723  ;;  %v3111_v18 = vld [vmem:[#allocation2 + $0x60] sm:$0xff] }
 0x251   : > { %v3029_v21 = vmax.f32 %v3017_v15, %v724_v20  ;;  %v2141_v20 = vld [vmem:[%s2862_s0 + $0x38] sm:$0xff]  }
 0x252   : > { %1342 = vst.msk [vmem:[#allocation2 + $0x18] sm:$0xff] %vm337_vm0, %v3026_v19  ;;  %834 = vperm.xlu1 %2117, %v3026_v19   ;;  %1952 = vmatprep.subr.bf16.mxu1 %v2141_v20 }
 0x253   : > { %v770_v26 = vsub.f32 %v3017_v15, %v3029_v21  ;;  %1340 = vst.msk [vmem:[#allocation2 + $0x8] sm:$0xff] %vm337_vm0, %v3029_v21  ;;  %1953 = vmatpush3.bf16.msra.mxu1 %v2141_v20 }
 0x254   : > { %v730_v29 = vpop.xlane.xlu0 %729 }
 0x255   : > { %v3046_v30 = vmax.f32 %v3036_v23, %v730_v29  ;;  %v736_v33 = vpop.xlane.xlu1 %735  ;;  %v3119_v29 = vld [vmem:[#allocation2 + $0x78] sm:$0xff] }
 0x256   : > { %v3049_v34 = vmax.f32 %v3043_v28, %v736_v33  ;;  %824 = vperm.xlu1 %2117, %v3029_v21  }
 0x257   : > { %1343 = vst.msk [vmem:[#allocation2 + $0x20] sm:$0xff] %vm337_vm0, %v3046_v30 }
 0x258   : > { %1346 = vst.msk [vmem:[#allocation2 + $0x38] sm:$0xff] %vm337_vm0, %v3049_v34  ;;  %v734_v42 = vpop.xlane.xlu0 %733 }
 0x259   : > { %v3066_v43 = vmax.f32 %v3052_v35, %v734_v42  ;;  %v732_v45 = vpop.xlane.xlu1 %731 }
 0x25a   : > { %v3069_v47 = vmax.f32 %v3059_v39, %v732_v45 }
 0x25b   : > { %1345 = vst.msk [vmem:[#allocation2 + $0x30] sm:$0xff] %vm337_vm0, %v3066_v43  ;;  %849 = vperm.xlu1 %2117, %v3066_v43   ;;  %v3496_v7 = vsub.f32 %v3052_v35, %v3066_v43 }
 0x25c   : > { %1344 = vst.msk [vmem:[#allocation2 + $0x28] sm:$0xff] %vm337_vm0, %v3069_v47  ;;  %v738_v56 = vpop.xlane.xlu0 %737 }
 0x25d   : > { %v744_v58 = vpop.xlane.xlu1 %743  ;;  %v3086_v59 = vmax.f32 %v3071_v48, %v738_v56  ;;  %v3132_v56 = vld [vmem:[#allocation2 + $0x70] sm:$0xff]  ;;  %v797_v10 = vmul.f32 1.442695, %v3496_v7 }
 0x25e   : > { %v3089_v60 = vmax.f32 %v3079_v53, %v744_v58 }
 0x25f   : > { %1347 = vst.msk [vmem:[#allocation2 + $0x40] sm:$0xff] %vm337_vm0, %v3086_v59  ;;  %839 = vperm.xlu1 %2117, %v3046_v30   ;;  %v3498_v21 = vsub.f32 %v3071_v48, %v3086_v59 }
 0x260   : > { %1350 = vst.msk [vmem:[#allocation2 + $0x58] sm:$0xff] %vm337_vm0, %v3089_v60  ;;  %v742_v6 = vpop.xlane.xlu0 %741 }
 0x261   : > { %v740_v9 = vpop.xlane.xlu1 %739  ;;  %v3106_v11 = vmax.f32 %v3091_v61, %v742_v6 }
 0x262   : > { %v3109_v16 = vmax.f32 %v3099_v2, %v740_v9 }
 0x263   : > { %1349 = vst.msk [vmem:[#allocation2 + $0x50] sm:$0xff] %vm337_vm0, %v3106_v11  ;;  %844 = vperm.xlu1 %2117, %v3069_v47   ;;  %v3500_v35 = vsub.f32 %v3091_v61, %v3106_v11  ;;  %v3503_v61 = vsub.f32 %v3079_v53, %v3089_v60 }
 0x264   : > { %1348 = vst.msk [vmem:[#allocation2 + $0x48] sm:$0xff] %vm337_vm0, %v3109_v16  ;;  %864 = vperm.xlu0 %2116, %v3109_v16   ;;  %v746_v36 = vpop.xlane.xlu0 %745  ;;  %v3501_v43 = vsub.f32 %v3099_v2, %v3109_v16 }
 0x265   : > { %v752_v42 = vpop.xlane.xlu1 %751  ;;  %v3127_v45 = vmax.f32 %v3111_v18, %v746_v36 }
 0x266   : > { %v3130_v49 = vmax.f32 %v3119_v29, %v752_v42 }
 0x267   : > { %1351 = vst.msk [vmem:[#allocation2 + $0x60] sm:$0xff] %vm337_vm0, %v3127_v45  ;;  %854 = vperm.xlu1 %2117, %v3049_v34  }
 0x268   : > { %1354 = vst.msk [vmem:[#allocation2 + $0x78] sm:$0xff] %vm337_vm0, %v3130_v49  ;;  %874 = vperm.xlu0 %2116, %v3089_v60   ;;  %v750_v9 = vpop.xlane.xlu0 %749  ;;  %v3506_v60 = vsub.f32 %v3119_v29, %v3130_v49 }
 0x269   : > { %v748_v20 = vpop.xlane.xlu1 %747  ;;  %v3147_v36 = vmax.f32 %v3132_v56, %v750_v9 }
 0x26a   : > { %v3150_v42 = vmax.f32 %v3139_v62, %v748_v20 }
 0x26b   : > { %1353 = vst.msk [vmem:[#allocation2 + $0x70] sm:$0xff] %vm337_vm0, %v3147_v36  ;;  %859 = vperm.xlu1 %2117, %v3086_v59   ;;  %v3504_v2 = vsub.f32 %v3132_v56, %v3147_v36  ;;  %v815_v56 = vmul.f32 1.442695, %v3506_v60 }
 0x26c   : > { %1352 = vst.msk [vmem:[#allocation2 + $0x68] sm:$0xff] %vm337_vm0, %v3150_v42  ;;  %884 = vperm.xlu0 %2116, %v3150_v42  }
 0x26d   : > { %v813_v16 = vmul.f32 1.442695, %v3504_v2  ;;  %v954_v2 = vld [vmem:[#allocation3 + $0x48] sm:$0xff] }
 0x26f   : > { %869 = vperm.xlu1 %2117, %v3106_v11   ;;  %v807_v11 = vmul.f32 1.442695, %v3503_v61 }
 0x270   : > { %894 = vperm.xlu0 %2116, %v3130_v49  }
 0x273   : > { %879 = vperm.xlu1 %2117, %v3127_v45  }
 0x277   : > { %889 = vperm.xlu1 %2117, %v3147_v36  }
 0x2cd   : > { %v830_v9 = vpop.permute.xlu1 %829 }
 0x2ce   : > { %v899_v20 = vsub.f32 %v2902_v25, %v830_v9  ;;  %v820_v5 = vpop.permute.xlu0 %819 }
 0x2cf   : > { %v897_v58 = vsub.f32 %v2905_v27, %v820_v5 }
 0x2d0   : > { %v917_v6 = vmul.f32 1.442695, %v899_v20 }
 0x2d1   : > { %v913_v33 = vmul.f32 1.442695, %v897_v58  ;;  %v835_v24 = vpop.permute.xlu1 %834 }
 0x2d2   : > { %2142 = vpow2.f32 %v917_v6  ;;  %v900_v41 = vsub.f32 %v2912_v31, %v835_v24 }
 0x2d3   : > { %2144 = vpow2.f32 %v913_v33 }
 0x2d4   : > { %v919_v63 = vmul.f32 1.442695, %v900_v41 }
 0x2d5   : > { %v825_v54 = vpop.permute.xlu1 %824 }
 0x2d6   : > { %2146 = vpow2.f32 %v919_v63  ;;  %v898_v50 = vsub.f32 %v2915_v32, %v825_v54 }
 0x2d8   : > { %v915_v22 = vmul.f32 1.442695, %v898_v50 }
 0x2da   : > { %2148 = vpow2.f32 %v915_v22  ;;  %v850_v37 = vpop.permute.xlu1 %849 }
 0x2db   : > { %v903_v25 = vsub.f32 %v2933_v44, %v850_v37 }
 0x2dc   : > { %v2143_v9 = vpop.eup %2142 }
 0x2dd   : > { %v2145_v17 = vpop.eup %2144  ;;  %v925_v27 = vmul.f32 1.442695, %v903_v25  ;;  %981 = vadd.xlane.f32.xlu0 %v2143_v9 }
 0x2de   : > { %v840_v5 = vpop.permute.xlu1 %839  ;;  %977 = vadd.xlane.f32.xlu1 %v2145_v17 }
 0x2df   : > { %2150 = vpow2.f32 %v925_v27  ;;  %v901_v31 = vsub.f32 %v2922_v38, %v840_v5 }
 0x2e0   : > { %v2147_v24 = vpop.eup %2146 }
 0x2e1   : > { %v921_v41 = vmul.f32 1.442695, %v901_v31  ;;  %v1155_v58 = vpack.c.bf16 %v2147_v24, %v2143_v9 }
 0x2e2   : > { %v845_v33 = vpop.permute.xlu1 %844  ;;  %983 = vadd.xlane.f32.xlu1 %v2147_v24 }
 0x2e3   : > { %2152 = vpow2.f32 %v921_v41  ;;  %v902_v32 = vsub.f32 %v2937_v46, %v845_v33  ;;  %v865_v22 = vpop.permute.xlu0 %864 }
 0x2e4   : > { %v2149_v50 = vpop.eup %2148  ;;  %v906_v37 = vsub.f32 %v2954_v57, %v865_v22 }
 0x2e5   : > { %v923_v54 = vmul.f32 1.442695, %v902_v32  ;;  %979 = vadd.xlane.f32.xlu0 %v2149_v50  ;;  %v1154_v44 = vpack.c.bf16 %v2149_v50, %v2145_v17 }
 0x2e6   : > { %v855_v63 = vpop.permute.xlu1 %854  ;;  %v931_v27 = vmul.f32 1.442695, %v906_v37 }
 0x2e7   : > { %2154 = vpow2.f32 %v923_v54  ;;  %v904_v6 = vsub.f32 %v2925_v40, %v855_v63  ;;  %1954 = vmatprep.mubr.bf16.mxu1 %v1154_v44  ;;  %v875_v38 = vpop.permute.xlu0 %874 }
 0x2e8   : > { %1955 = vmatmul.mubr.bf16.vlgmr.msra.gmra.mrb[0].mxu1 %v1155_v58  ;;  %v908_v46 = vsub.f32 %v2946_v52, %v875_v38 }
 0x2e9   : > { %v2151_v20 = vpop.eup %2150  ;;  %v927_v25 = vmul.f32 1.442695, %v904_v6 }
 0x2ea   : > { %v860_v5 = vpop.permute.xlu1 %859  ;;  %989 = vadd.xlane.f32.xlu0 %v2151_v20  ;;  %v935_v9 = vmul.f32 1.442695, %v908_v46 }
 0x2eb   : > { %2156 = vpow2.f32 %v927_v25  ;;  %v905_v17 = vsub.f32 %v2943_v51, %v860_v5  ;;  %v885_v31 = vpop.permute.xlu0 %884 }
 0x2ec   : > { %2158 = vpow2.f32 %v931_v27  ;;  %v910_v40 = vsub.f32 %v2994_v4, %v885_v31 }
 0x2ed   : > { %v2153_v57 = vpop.eup %2152  ;;  %v929_v41 = vmul.f32 1.442695, %v905_v17 }
 0x2ee   : > { %v870_v24 = vpop.permute.xlu1 %869  ;;  %985 = vadd.xlane.f32.xlu0 %v2153_v57  ;;  %v939_v50 = vmul.f32 1.442695, %v910_v40  ;;  %v787_v40 = vmul.f32 1.442695, %v770_v26 }
 0x2ef   : > { %2160 = vpow2.f32 %v929_v41  ;;  %v907_v33 = vsub.f32 %v2951_v55, %v870_v24  ;;  %v895_v32 = vpop.permute.xlu0 %894  ;;  %v789_v24 = vmul.f32 1.442695, %v771_v14 }
 0x2f0   : > { %2162 = vpow2.f32 %v935_v9  ;;  %v912_v54 = vsub.f32 %v2986_v1, %v895_v32 }
 0x2f1   : > { %v2155_v22 = vpop.eup %2154  ;;  %v933_v52 = vmul.f32 1.442695, %v907_v33  ;;  %v3493_v33 = vsub.f32 %v3002_v8, %v3008_v12  ;;  %v3497_v8 = vsub.f32 %v3059_v39, %v3069_v47  ;;  %v805_v39 = vmul.f32 1.442695, %v3500_v35 }
 0x2f2   : > { %v880_v51 = vpop.permute.xlu1 %879  ;;  %v1156_v44 = vpack.c.bf16 %v2155_v22, %v2153_v57  ;;  %v943_v58 = vmul.f32 1.442695, %v912_v54  ;;  %v803_v47 = vmul.f32 1.442695, %v3501_v43 }
 0x2f3   : > { %2164 = vpow2.f32 %v933_v52  ;;  %v909_v37 = vsub.f32 %v2981_v0, %v880_v51  ;;  %v785_v32 = vmul.f32 1.442695, %v3493_v33  ;;  %v795_v12 = vmul.f32 1.442695, %v3497_v8 }
 0x2f4   : > { %1958 = vmatprep.mubr.bf16.mxu1 %v1156_v44  ;;  %2166 = vpow2.f32 %v939_v50  ;;  %v3495_v50 = vsub.f32 %v3010_v13, %v3026_v19  ;;  %v801_v13 = vmul.f32 1.442695, %v3498_v21  ;;  %v3499_v19 = vsub.f32 %v3043_v28, %v3049_v34 }
 0x2f5   : > { %v2157_v63 = vpop.eup %2156  ;;  %v937_v4 = vmul.f32 1.442695, %v909_v37  ;;  %v3502_v28 = vsub.f32 %v3111_v18, %v3127_v45  ;;  %v3505_v18 = vsub.f32 %v3139_v62, %v3150_v42 }
 0x2f6   : > { %v890_v6 = vpop.permute.xlu1 %889  ;;  %991 = vadd.xlane.f32.xlu1 %v2157_v63  ;;  %v1157_v55 = vpack.c.bf16 %v2157_v63, %v2151_v20  ;;  %v2159_v25 = vpop.eup %2158  ;;  %v791_v15 = vmul.f32 1.442695, %v3495_v50 }
 0x2f7   : > { %2168 = vpow2.f32 %v937_v4  ;;  %v911_v38 = vsub.f32 %v2992_v3, %v890_v6  ;;  %v809_v34 = vmul.f32 1.442695, %v3502_v28  ;;  %v811_v45 = vmul.f32 1.442695, %v3505_v18  ;;  %v947_v4 = vld [vmem:[#allocation3 + $0x10] sm:$0xff] }
 0x2f8   : > { %1959 = vmatmul.mubr.bf16.gmra.mrb[4].mxu1 %v1157_v55  ;;  %2170 = vpow2.f32 %v943_v58  ;;  %v945_v58 = vld [vmem:[#allocation3] sm:$0xff] }
 0x2f9   : > { %v2161_v27 = vpop.eup %2160  ;;  %v941_v1 = vmul.f32 1.442695, %v911_v38 }
 0x2fa   : > { %987 = vadd.xlane.f32.xlu1 %v2155_v22  ;;  %v1158_v46 = vpack.c.bf16 %v2159_v25, %v2161_v27  ;;  %v2163_v0 = vpop.eup %2162  ;;  %v3494_v22 = vsub.f32 %v3036_v23, %v3046_v30  ;;  %v799_v23 = vmul.f32 1.442695, %v3499_v19 }
 0x2fb   : > { %2172 = vpow2.f32 %v941_v1  ;;  %v948_v1 = vld [vmem:[#allocation3 + $0x18] sm:$0xff] }
 0x2fc   : > { %1962 = vmatprep.mubr.bf16.mxu1 %v1158_v46  ;;  %2174 = vpow2.f32 %v787_v40  ;;  %v793_v52 = vmul.f32 1.442695, %v3494_v22 }
 0x2fd   : > { %v2165_v5 = vpop.eup %2164  ;;  %2176 = vpow2.f32 %v789_v24 }
 0x2fe   : > { %997 = vadd.xlane.f32.xlu0 %v2165_v5  ;;  %999 = vadd.xlane.f32.xlu1 %v2163_v0  ;;  %v1159_v17 = vpack.c.bf16 %v2163_v0, %v2165_v5  ;;  %v2167_v31 = vpop.eup %2166  ;;  %2178 = vpow2.f32 %v785_v32  ;;  %v946_v5 = vld [vmem:[#allocation3 + $0x8] sm:$0xff]  ;;  %v949_v32 = vld [vmem:[#allocation3 + $0x20] sm:$0xff] }
 0x2ff   : > { %2180 = vpow2.f32 %v793_v52 }
 0x300   : > { %1963 = vmatmul.mubr.bf16.gmra.mrb[8].mxu1 %v1159_v17  ;;  %2182 = vpow2.f32 %v791_v15 }
 0x301   : > { %v2169_v20 = vpop.eup %2168  ;;  %2184 = vpow2.f32 %v797_v10 }
 0x302   : > { %993 = vadd.xlane.f32.xlu0 %v2161_v27  ;;  %995 = vadd.xlane.f32.xlu1 %v2159_v25  ;;  %v1160_v3 = vpack.c.bf16 %v2167_v31, %v2169_v20  ;;  %v2171_v57 = vpop.eup %2170  ;;  %2186 = vpow2.f32 %v795_v12  ;;  %v952_v12 = vld [vmem:[#allocation3 + $0x38] sm:$0xff] }
 0x303   : > { %2188 = vpow2.f32 %v801_v13 }
 0x304   : > { %1966 = vmatprep.mubr.bf16.mxu1 %v1160_v3  ;;  %2190 = vpow2.f32 %v799_v23  ;;  %v950_v23 = vld [vmem:[#allocation3 + $0x28] sm:$0xff] }
 0x305   : > { %v2173_v41 = vpop.eup %2172  ;;  %2192 = vpow2.f32 %v805_v39 }
 0x306   : > { %1001 = vadd.xlane.f32.xlu0 %v2169_v20  ;;  %1007 = vadd.xlane.f32.xlu1 %v2171_v57  ;;  %v1161_v9 = vpack.c.bf16 %v2171_v57, %v2173_v41  ;;  %v3203_v14 = vpop.eup %2174  ;;  %2194 = vpow2.f32 %v803_v47 }
 0x307   : > { %v2177_v26 = vpop.eup %2176  ;;  %2196 = vpow2.f32 %v809_v34  ;;  %v962_v20 = vmul.f32 %v3203_v14, %v946_v5 }
 0x308   : > { %1967 = vmatmul.mubr.bf16.gmra.mrb[12].mxu1 %v1161_v9  ;;  %v2179_v30 = vpop.eup %2178  ;;  %2198 = vpow2.f32 %v807_v11  ;;  %v963_v6 = vmul.f32 %v2177_v26, %v947_v4  ;;  %v960_v4 = vld [vmem:[#allocation3 + $0x78] sm:$0xff] }
 0x309   : > { %v3218_v48 = vpop.eup %2180  ;;  %2200 = vpow2.f32 %v813_v16  ;;  %v961_v38 = vmul.f32 %v2179_v30, %v945_v58  ;;  %v953_v16 = vld [vmem:[#allocation3 + $0x40] sm:$0xff] }
 0x30a   : > { %1005 = vadd.xlane.f32.xlu0 %v2173_v41  ;;  %1003 = vadd.xlane.f32.xlu1 %v2167_v31  ;;  %v2183_v59 = vpop.eup %2182  ;;  %2202 = vpow2.f32 %v811_v45  ;;  %v951_v41 = vld [vmem:[#allocation3 + $0x30] sm:$0xff]  ;;  %v965_v50 = vmul.f32 %v3218_v48, %v949_v32  ;;  %v957_v58 = vld [vmem:[#allocation3 + $0x60] sm:$0xff] }
 0x30b   : > { %v2185_v54 = vpop.eup %2184  ;;  %2204 = vpow2.f32 %v815_v56  ;;  %v964_v0 = vmul.f32 %v2183_v59, %v948_v1 }
 0x30c   : > { %v3227_v51 = vpop.eup %2186  ;;  %v967_v40 = vmul.f32 %v2185_v54, %v951_v41 }
 0x30d   : > { %v3236_v44 = vpop.eup %2188  ;;  %v966_v39 = vmul.f32 %v3227_v51, %v950_v23 }
 0x30e   : > { %v3238_v53 = vpop.eup %2190  ;;  %v969_v56 = vmul.f32 %v3236_v44, %v953_v16 }
 0x30f   : > { %v3245_v36 = vpop.eup %2192  ;;  %v968_v21 = vmul.f32 %v3238_v53, %v952_v12 }
 0x310   : > { %v3247_v37 = vpop.eup %2194 }
 0x311   : > { %v3251_v62 = vpop.eup %2196  ;;  %v970_v60 = vmul.f32 %v3247_v37, %v954_v2 }
 0x312   : > { %v3253_v42 = vpop.eup %2198 }
 0x313   : > { %v3257_v29 = vpop.eup %2200 }
 0x314   : > { %v3259_v49 = vpop.eup %2202 }
 0x315   : > { %v3263_v63 = vpop.eup %2204 }
 0x31b   : > { %1065 = vperm.xlu1 %2117, %v3203_v14  }
 0x31f   : > { %1070 = vperm.xlu1 %2117, %v2177_v26  }
 0x320   : > { %1060 = vperm.xlu0 %2116, %v2179_v30  }
 0x323   : > { %1080 = vperm.xlu1 %2117, %v3218_v48   ;;  %v956_v48 = vld [vmem:[#allocation3 + $0x58] sm:$0xff] }
 0x324   : > { %1075 = vperm.xlu0 %2116, %v2183_v59   ;;  %v955_v59 = vld [vmem:[#allocation3 + $0x50] sm:$0xff]  ;;  %v972_v34 = vmul.f32 %v3253_v42, %v956_v48 }
 0x325   : > { %v971_v61 = vmul.f32 %v3245_v36, %v955_v59 }
 0x327   : > { %1090 = vperm.xlu1 %2117, %v2185_v54  }
 0x328   : > { %1085 = vperm.xlu0 %2116, %v3227_v51  }
 0x32b   : > { %1100 = vperm.xlu1 %2117, %v3236_v44  }
 0x32c   : > { %1095 = vperm.xlu0 %2116, %v3238_v53  }
 0x32f   : > { %1110 = vperm.xlu1 %2117, %v3245_v36  }
 0x330   : > { %1105 = vperm.xlu0 %2116, %v3247_v37   ;;  %v973_v37 = vmul.f32 %v3251_v62, %v957_v58 }
 0x333   : > { %1120 = vperm.xlu1 %2117, %v3251_v62  }
 0x334   : > { %1115 = vperm.xlu0 %2116, %v3253_v42  }
 0x337   : > { %1130 = vperm.xlu1 %2117, %v3257_v29  }
 0x338   : > { %1125 = vperm.xlu0 %2116, %v3259_v49  }
 0x33c   : > { %1135 = vperm.xlu0 %2116, %v3263_v63  }
 0x36a   : > { %v982_v55 = vpop.xlane.xlu0 %981 }
 0x36b   : > { %v1011_v25 = vadd.f32 %v982_v55, %v963_v6  ;;  %v978_v27 = vpop.xlane.xlu1 %977 }
 0x36c   : > { %v1009_v46 = vadd.f32 %v978_v27, %v961_v38  ;;  %v976_v27 = vmul.f32 %v3263_v63, %v960_v4 }
 0x36d   : > { %1028 = vst.msk [vmem:[#allocation3 + $0x10] sm:$0xff] %vm337_vm0, %v1011_v25 }
 0x36e   : > { %1026 = vst.msk [vmem:[#allocation3] sm:$0xff] %vm337_vm0, %v1009_v46  ;;  %v958_v46 = vld [vmem:[#allocation3 + $0x68] sm:$0xff] }
 0x36f   : > { %v984_v17 = vpop.xlane.xlu1 %983 }
 0x370   : > { %v1012_v31 = vadd.f32 %v984_v17, %v964_v0  ;;  %v959_v0 = vld [vmem:[#allocation3 + $0x70] sm:$0xff] }
 0x372   : > { %1029 = vst.msk [vmem:[#allocation3 + $0x18] sm:$0xff] %vm337_vm0, %v1012_v31  ;;  %v980_v3 = vpop.xlane.xlu0 %979 }
 0x373   : > { %v1010_v57 = vadd.f32 %v980_v3, %v962_v20  ;;  %v974_v3 = vmul.f32 %v3259_v49, %v958_v46 }
 0x374   : > { %v1360_v9 = vld [vmem:[#allocation3 + $0x10] sm:$0xff] }
 0x375   : > { %1027 = vst.msk [vmem:[#allocation3 + $0x8] sm:$0xff] %vm337_vm0, %v1010_v57  ;;  %2206 = vrcp.f32 %v1360_v9  ;;  %v1358_v24 = vld [vmem:[#allocation3] sm:$0xff]  ;;  %v975_v57 = vmul.f32 %v3257_v29, %v959_v0 }
 0x376   : > { %2208 = vrcp.f32 %v1358_v24 }
 0x377   : > { %v990_v33 = vpop.xlane.xlu0 %989 }
 0x378   : > { %v1015_v22 = vadd.f32 %v990_v33, %v967_v40 }
 0x379   : > { %v1361_v52 = vld [vmem:[#allocation3 + $0x18] sm:$0xff] }
 0x37a   : > { %1032 = vst.msk [vmem:[#allocation3 + $0x30] sm:$0xff] %vm337_vm0, %v1015_v22  ;;  %2210 = vrcp.f32 %v1361_v52 }
 0x37b   : > { %v986_v15 = vpop.xlane.xlu0 %985 }
 0x37c   : > { %v1013_v7 = vadd.f32 %v986_v15, %v965_v50  ;;  %v1359_v10 = vld [vmem:[#allocation3 + $0x8] sm:$0xff] }
 0x37d   : > { %2212 = vrcp.f32 %v1359_v10 }
 0x37e   : > { %1030 = vst.msk [vmem:[#allocation3 + $0x20] sm:$0xff] %vm337_vm0, %v1013_v7 }
 0x37f   : > { %v2207_v8 = vpop.eup %2206 }
 0x380   : > { %1418 = vperm.xlu1 %2117, %v2207_v8   ;;  %v2209_v13 = vpop.eup %2208 }
 0x381   : > { %v1364_v14 = vld [vmem:[#allocation3 + $0x30] sm:$0xff] }
 0x382   : > { %2214 = vrcp.f32 %v1364_v14 }
 0x383   : > { %v992_v19 = vpop.xlane.xlu1 %991 }
 0x384   : > { %v2211_v26 = vpop.eup %2210  ;;  %v1016_v30 = vadd.f32 %v992_v19, %v968_v21  ;;  %1408 = vperm.xlu1 %2117, %v2209_v13  }
 0x385   : > { %1423 = vperm.xlu0 %2116, %v2211_v26   ;;  %v1362_v35 = vld [vmem:[#allocation3 + $0x20] sm:$0xff] }
 0x386   : > { %1033 = vst.msk [vmem:[#allocation3 + $0x38] sm:$0xff] %vm337_vm0, %v1016_v30  ;;  %2216 = vrcp.f32 %v1362_v35 }
 0x387   : > { %v2213_v43 = vpop.eup %2212  ;;  %v988_v47 = vpop.xlane.xlu1 %987 }
 0x388   : > { %v1014_v28 = vadd.f32 %v988_v47, %v966_v39 }
 0x389   : > { %1413 = vperm.xlu0 %2116, %v2213_v43  }
 0x38a   : > { %1031 = vst.msk [vmem:[#allocation3 + $0x28] sm:$0xff] %vm337_vm0, %v1014_v28 }
 0x38b   : > { %v1000_v11 = vpop.xlane.xlu1 %999  ;;  %v998_v54 = vpop.xlane.xlu0 %997 }
 0x38c   : > { %v2215_v18 = vpop.eup %2214  ;;  %v1020_v45 = vadd.f32 %v1000_v11, %v972_v34  ;;  %v1019_v51 = vadd.f32 %v998_v54, %v971_v61 }
 0x38d   : > { %1438 = vperm.xlu1 %2117, %v2215_v18   ;;  %v1365_v53 = vld [vmem:[#allocation3 + $0x38] sm:$0xff] }
 0x38e   : > { %1037 = vst.msk [vmem:[#allocation3 + $0x58] sm:$0xff] %vm337_vm0, %v1020_v45  ;;  %1036 = vst.msk [vmem:[#allocation3 + $0x50] sm:$0xff] %vm337_vm0, %v1019_v51  ;;  %2218 = vrcp.f32 %v1365_v53 }
 0x38f   : > { %v996_v42 = vpop.xlane.xlu1 %995  ;;  %v994_v36 = vpop.xlane.xlu0 %993 }
 0x390   : > { %v2217_v6 = vpop.eup %2216  ;;  %v1018_v55 = vadd.f32 %v996_v42, %v970_v60  ;;  %v1017_v38 = vadd.f32 %v994_v36, %v969_v56 }
 0x391   : > { %1428 = vperm.xlu1 %2117, %v2217_v6   ;;  %v1363_v25 = vld [vmem:[#allocation3 + $0x28] sm:$0xff] }
 0x392   : > { %1035 = vst.msk [vmem:[#allocation3 + $0x48] sm:$0xff] %vm337_vm0, %v1018_v55  ;;  %1034 = vst.msk [vmem:[#allocation3 + $0x40] sm:$0xff] %vm337_vm0, %v1017_v38  ;;  %2220 = vrcp.f32 %v1363_v25 }
 0x393   : > { %v1008_v44 = vpop.xlane.xlu1 %1007  ;;  %v1002_v1 = vpop.xlane.xlu0 %1001 }
 0x394   : > { %v1024_v5 = vadd.f32 %v1008_v44, %v976_v27  ;;  %v1021_v17 = vadd.f32 %v1002_v1, %v973_v37 }
 0x395   : > { %v1369_v31 = vld [vmem:[#allocation3 + $0x58] sm:$0xff]  ;;  %v1368_v20 = vld [vmem:[#allocation3 + $0x50] sm:$0xff] }
 0x396   : > { %1041 = vst.msk [vmem:[#allocation3 + $0x78] sm:$0xff] %vm337_vm0, %v1024_v5  ;;  %1038 = vst.msk [vmem:[#allocation3 + $0x60] sm:$0xff] %vm337_vm0, %v1021_v17  ;;  %2222 = vrcp.f32 %v1369_v31 }
 0x397   : > { %v1004_v63 = vpop.xlane.xlu1 %1003  ;;  %v1006_v62 = vpop.xlane.xlu0 %1005  ;;  %2224 = vrcp.f32 %v1368_v20 }
 0x398   : > { %v2219_v41 = vpop.eup %2218  ;;  %v1022_v9 = vadd.f32 %v1004_v63, %v974_v3  ;;  %v1023_v40 = vadd.f32 %v1006_v62, %v975_v57 }
 0x399   : > { %1443 = vperm.xlu0 %2116, %v2219_v41   ;;  %v1367_v24 = vld [vmem:[#allocation3 + $0x48] sm:$0xff]  ;;  %v1366_v33 = vld [vmem:[#allocation3 + $0x40] sm:$0xff] }
 0x39a   : > { %1039 = vst.msk [vmem:[#allocation3 + $0x68] sm:$0xff] %vm337_vm0, %v1022_v9  ;;  %1040 = vst.msk [vmem:[#allocation3 + $0x70] sm:$0xff] %vm337_vm0, %v1023_v40  ;;  %2226 = vrcp.f32 %v1367_v24 }
 0x39b   : > { %2228 = vrcp.f32 %v1366_v33  ;;  %v1066_v47 = vpop.permute.xlu1 %1065 }
 0x39c   : > { %v2221_v32 = vpop.eup %2220  ;;  %v1139_v5 = vmul.f32 0.0, %v1066_v47 }
 0x39d   : > { %1433 = vperm.xlu0 %2116, %v2221_v32   ;;  %v1370_v49 = vld [vmem:[#allocation3 + $0x60] sm:$0xff]  ;;  %v1373_v15 = vld [vmem:[#allocation3 + $0x78] sm:$0xff] }
 0x39e   : > { %2230 = vrcp.f32 %v1370_v49 }
 0x39f   : > { %v1061_v34 = vpop.permute.xlu0 %1060  ;;  %v1071_v11 = vpop.permute.xlu1 %1070 }
 0x3a0   : > { %v2223_v29 = vpop.eup %2222  ;;  %v1140_v37 = vmul.f32 0.0, %v1071_v11  ;;  %v1138_v17 = vmul.f32 0.0, %v1061_v34 }
 0x3a1   : > { %v2225_v22 = vpop.eup %2224  ;;  %1463 = vperm.xlu0 %2116, %v2223_v29   ;;  %v1371_v52 = vld [vmem:[#allocation3 + $0x68] sm:$0xff]  ;;  %v1372_v50 = vld [vmem:[#allocation3 + $0x70] sm:$0xff] }
 0x3a2   : > { %1458 = vperm.xlu1 %2117, %v2225_v22   ;;  %2232 = vrcp.f32 %v1371_v52 }
 0x3a3   : > { %2234 = vrcp.f32 %v1372_v50  ;;  %v1076_v2 = vpop.permute.xlu0 %1075  ;;  %v1081_v45 = vpop.permute.xlu1 %1080 }
 0x3a4   : > { %v2227_v7 = vpop.eup %2226  ;;  %2236 = vrcp.f32 %v1373_v15  ;;  %v1141_v44 = vmul.f32 0.0, %v1076_v2  ;;  %v1142_v50 = vmul.f32 0.0, %v1081_v45 }
 0x3a5   : > { %v2229_v10 = vpop.eup %2228  ;;  %1453 = vperm.xlu0 %2116, %v2227_v7  }
 0x3a6   : > { %1448 = vperm.xlu1 %2117, %v2229_v10  }
 0x3a7   : > { %v1086_v53 = vpop.permute.xlu0 %1085  ;;  %v1091_v60 = vpop.permute.xlu1 %1090 }
 0x3a8   : > { %v2231_v8 = vpop.eup %2230  ;;  %v1144_v32 = vmul.f32 0.0, %v1091_v60  ;;  %v1143_v15 = vmul.f32 0.0, %v1086_v53 }
 0x3aa   : > { %1468 = vperm.xlu1 %2117, %v2231_v8  }
 0x3ab   : > { %v1096_v56 = vpop.permute.xlu0 %1095  ;;  %v1101_v42 = vpop.permute.xlu1 %1100 }
 0x3ac   : > { %v2233_v12 = vpop.eup %2232  ;;  %v1145_v49 = vmul.f32 0.0, %v1096_v56 }
 0x3ad   : > { %v2235_v14 = vpop.eup %2234  ;;  %1473 = vperm.xlu0 %2116, %v2233_v12  }
 0x3ae   : > { %1478 = vperm.xlu1 %2117, %v2235_v14   ;;  %v2237_v21 = vpop.eup %2236 }
 0x3af   : > { %v1106_v36 = vpop.permute.xlu0 %1105  ;;  %v1111_v4 = vpop.permute.xlu1 %1110 }
 0x3b0   : > { %v1148_v47 = vmul.f32 0.0, %v1111_v4  ;;  %v1147_v2 = vmul.f32 0.0, %v1106_v36 }
 0x3b1   : > { %1483 = vperm.xlu0 %2116, %v2237_v21  }
 0x3b3   : > { %v1116_v58 = vpop.permute.xlu0 %1115  ;;  %v3308_v6 = vpop.permute.xlu1 %1120 }
 0x3b7   : > { %v3310_v55 = vpop.permute.xlu0 %1125  ;;  %v3312_v38 = vpop.permute.xlu1 %1130 }
 0x3bb   : > { %v1956_v13 = vpop.f32.mrb[0].mxu1  ;;  %v3314_v25 = vpop.permute.xlu0 %1135 }
 0x3bc   : > { %v1244_v19 = vpop.f32.mrb[1].mxu1  ;;  %v1309_v1 = vadd.f32 %v1956_v13, %v1140_v37  ;;  %v1150_v37 = vmul.f32 0.0, %v3308_v6 }
 0x3bd   : > { %v1957_v23 = vpop.f32.mrb[2].mxu1  ;;  %v1307_v57 = vadd.f32 %v1244_v19, %v1138_v17  ;;  %v1149_v19 = vmul.f32 0.0, %v1116_v58 }
 0x3be   : > { %v1247_v26 = vpop.f32.mrb[3].mxu1  ;;  %v1310_v46 = vadd.f32 %v1957_v23, %v1141_v44  ;;  %v1151_v44 = vmul.f32 0.0, %v3310_v55 }
 0x3bf   : > { %v1308_v63 = vadd.f32 %v1247_v26, %v1139_v5 }
 0x3cb   : > { %v1960_v30 = vpop.f32.mrb[4].mxu1 }
 0x3cc   : > { %v1260_v35 = vpop.f32.mrb[5].mxu1  ;;  %v1313_v29 = vadd.f32 %v1960_v30, %v1144_v32 }
 0x3cd   : > { %v1961_v39 = vpop.f32.mrb[6].mxu1  ;;  %v1311_v12 = vadd.f32 %v1260_v35, %v1142_v50  ;;  %v1146_v35 = vmul.f32 0.0, %v1101_v42 }
 0x3ce   : > { %v1263_v43 = vpop.f32.mrb[7].mxu1  ;;  %v1314_v22 = vadd.f32 %v1961_v39, %v1145_v49 }
 0x3cf   : > { %v1312_v14 = vadd.f32 %v1263_v43, %v1143_v15 }
 0x3d3   : > { %v3294_v48 = vpop.f32.mrb[8].mxu1 }
 0x3d4   : > { %v3296_v59 = vpop.f32.mrb[9].mxu1  ;;  %v1317_v39 = vadd.f32 %v3294_v48, %v1148_v47 }
 0x3d5   : > { %v1965_v28 = vpop.f32.mrb[10].mxu1  ;;  %v1315_v56 = vadd.f32 %v3296_v59, %v1146_v35 }
 0x3d6   : > { %v3298_v61 = vpop.f32.mrb[11].mxu1  ;;  %v1318_v34 = vadd.f32 %v1965_v28, %v1149_v19 }
 0x3d7   : > { %v1316_v60 = vadd.f32 %v3298_v61, %v1147_v2 }
 0x3db   : > { %v3300_v54 = vpop.f32.mrb[12].mxu1 }
 0x3dc   : > { %v3302_v16 = vpop.f32.mrb[13].mxu1 }
 0x3dd   : > { %v3304_v18 = vpop.f32.mrb[14].mxu1  ;;  %v1319_v61 = vadd.f32 %v3302_v16, %v1150_v37 }
 0x3de   : > { %v3306_v51 = vpop.f32.mrb[15].mxu1 }
 0x3df   : > { %v1320_v59 = vadd.f32 %v3306_v51, %v1151_v44 }
 0x3ff   : > { %v1419_v27 = vpop.permute.xlu1 %1418 }
 0x400   : > { %v1488_v31 = vmul.f32 %v1419_v27, %v1309_v1 }
 0x403   : > { %v1409_v3 = vpop.permute.xlu1 %1408 }
 0x404   : > { %v1424_v0 = vpop.permute.xlu0 %1423  ;;  %v1486_v9 = vmul.f32 %v1409_v3, %v1307_v57 }
 0x405   : > { %v1489_v20 = vmul.f32 %v1424_v0, %v1310_v46  ;;  %v1152_v46 = vmul.f32 0.0, %v3312_v38  ;;  %v1153_v0 = vmul.f32 0.0, %v3314_v25 }
 0x407   : > { %v1835_v62 = vpack.c.bf16 %v1489_v20, %v1488_v31  ;;  %v1321_v17 = vadd.f32 %v3300_v54, %v1152_v46  ;;  %v1322_v16 = vadd.f32 %v3304_v18, %v1153_v0 }
 0x408   : > { %v1414_v41 = vpop.permute.xlu0 %1413 }
 0x409   : > { %1867 = vst [vmem:[%s3318_s26 + $0x8] sm:$0xff] %v1835_v62   ;;  %v1487_v40 = vmul.f32 %v1414_v41, %v1308_v63 }
 0x40b   : > { %v1830_v24 = vpack.c.bf16 %v1487_v40, %v1486_v9 }
 0x40c   : > { %v1439_v33 = vpop.permute.xlu1 %1438 }
 0x40d   : > { %1831 = vst [vmem:[%s3318_s26] sm:$0xff] %v1830_v24   ;;  %v1492_v7 = vmul.f32 %v1439_v33, %v1313_v29 }
 0x410   : > { %v1429_v8 = vpop.permute.xlu1 %1428 }
 0x411   : > { %v1490_v23 = vmul.f32 %v1429_v8, %v1311_v12 }
 0x418   : > { %v1444_v52 = vpop.permute.xlu0 %1443 }
 0x419   : > { %v1493_v10 = vmul.f32 %v1444_v52, %v1314_v22 }
 0x41b   : > { %v1845_v21 = vpack.c.bf16 %v1493_v10, %v1492_v7 }
 0x41c   : > { %v1434_v13 = vpop.permute.xlu0 %1433 }
 0x41d   : > { %1869 = vst [vmem:[%s3318_s26 + $0x18] sm:$0xff] %v1845_v21   ;;  %v1491_v26 = vmul.f32 %v1434_v13, %v1312_v14 }
 0x41f   : > { %v1840_v30 = vpack.c.bf16 %v1491_v26, %v1490_v23 }
 0x420   : > { %v1464_v11 = vpop.permute.xlu0 %1463 }
 0x421   : > { %1868 = vst [vmem:[%s3318_s26 + $0x10] sm:$0xff] %v1840_v30   ;;  %v1497_v45 = vmul.f32 %v1464_v11, %v1318_v34  ;;  %v1459_v53 = vpop.permute.xlu1 %1458 }
 0x422   : > { %v1496_v43 = vmul.f32 %v1459_v53, %v1317_v39 }
 0x424   : > { %v1855_v4 = vpack.c.bf16 %v1497_v45, %v1496_v43  ;;  %v1454_v28 = vpop.permute.xlu0 %1453 }
 0x425   : > { %v1495_v58 = vmul.f32 %v1454_v28, %v1316_v60  ;;  %v1449_v27 = vpop.permute.xlu1 %1448 }
 0x426   : > { %1871 = vst [vmem:[%s3318_s26 + $0x28] sm:$0xff] %v1855_v4   ;;  %v1494_v48 = vmul.f32 %v1449_v27, %v1315_v56 }
 0x428   : > { %v1850_v36 = vpack.c.bf16 %v1495_v58, %v1494_v48 }
 0x429   : > { %v1469_v1 = vpop.permute.xlu1 %1468 }
 0x42a   : > { %1870 = vst [vmem:[%s3318_s26 + $0x20] sm:$0xff] %v1850_v36   ;;  %v1498_v5 = vmul.f32 %v1469_v1, %v1319_v61 }
 0x42c   : > { %v1474_v42 = vpop.permute.xlu0 %1473 }
 0x42d   : > { %v1499_v6 = vmul.f32 %v1474_v42, %v1320_v59  ;;  %v1479_v55 = vpop.permute.xlu1 %1478 }
 0x42e   : > { %v1500_v38 = vmul.f32 %v1479_v55, %v1321_v17 }
 0x42f   : > { %v1860_v31 = vpack.c.bf16 %v1499_v6, %v1498_v5 }
 0x430   : > { %v1484_v51 = vpop.permute.xlu0 %1483 }
 0x431   : > { %1872 = vst [vmem:[%s3318_s26 + $0x30] sm:$0xff] %v1860_v31   ;;  %v1501_v25 = vmul.f32 %v1484_v51, %v1322_v16 }
 0x433   : > { %v1865_v20 = vpack.c.bf16 %v1501_v25, %v1500_v38 }
 0x435   : > { %1873 = vst [vmem:[%s3318_s26 + $0x38] sm:$0xff] %v1865_v20  }
 0x436   : > { %2343 = shalt.err (!%p2340_p6)
}
 0x437   : > { %s2344_s23 = scalar_lea.hbm %s3346_s4, 1024  ;;  %s2348_s11 = scalar_lea.hbm %s3510_s29, 4096 }
 0x438   : > { %p2345_p4 = scmp.ne.s32.totalorder %s3346_s4, %s2344_s23  ;;  %p2349_p13 = scmp.lt.u32.totalorder %s3346_s4, %s3510_s29 }
 0x439   : > { %p2350_p0 = scmp.lt.u32.totalorder %s2348_s11, %s2344_s23  ;;  %p2352_p11 = scmp.lt.u32.totalorder %s2344_s23, %s3346_s4 }
 0x43a   : > { %p2346_p2 = pnand %p2345_p4, %p3511_p5 }
 0x43b   : > { %p2351_p10 = por %p2350_p0, %p2349_p13 }
 0x43c   : > { %p2347_p9 = pneg %p2346_p2 }
 0x43d   : > { %p2353_p8 = por %p2352_p11, %p2351_p10 }
 0x43f   : > { %p2354_p1 = pnand %p2353_p8, %p2347_p9 }
 0x441   : > { %2357 = shalt.err (!%p2354_p1)
}
 0x442   : > { %s2496_s21 = smov 64   ;;  %s2497_s9 = smov 128  }
 0x443   : > { %s2498_s1 = smov 4  }
 0x444   : > { %1977 = dma.vmem_to_hbm [thread:$0]  (%p3511_p5), %s3340_s6, 1024, %s3346_s4, %s1583_s3, %s2496_s21, %s2497_s9, %s2498_s1  }
 0x445 PF: > { %p1994_p3 = scmp.ge.s32.totalorder %s2484_s25, 2  ;;  %s1615_s12 = sand.u32 1, %s2456_s18  }
 0x446   : > { %p3512_p12 = scmp.ne.s32.totalorder %s3476_s22, 0  ;;  %s1616_s16 = scalar_lea.sflag [#allocation7], %s1615_s12 }
 0x448   : > { %p1990_p7 = pnand %p1994_p3, %p3512_p12 }
 0x44a   : > { %2427 = dma.done.wait (!%p1990_p7), %s1616_s16, 1024  }
 0x44b   : > { %2429 = vsyncadd (!%p1990_p7), %s1616_s16, 4294966272  ;;  %s22_s25 = sadd.s32 1, %s2484_s25   ;;  %s3514_s15 = sld [smem:[#allocation16_spill]] }
 0x44c   : > { %p3378_p6 = scmp.ge.s32.totalorder %s22_s25, 6   ;;  %s3515_s7 = sld [smem:[#allocation17_spill]] }
 0x44d   : > { %s3516_s20 = sld [smem:[#allocation25_spill]]  ;;  %s3517_s21 = sld [smem:[#allocation20_spill]] }
 0x44e   : > { %s3518_s22 = sld [smem:[#allocation21_spill]]  ;;  %s3519_s23 = sld [smem:[#allocation22_spill]] }
 0x44f   : > { %s3520_s24 = sld [smem:[#allocation23_spill]]  ;;  %s3521_s12 = smov %s2436_s13 }
 0x450   : > { %s3522_s13 = smov %s2440_s14  ;;  %s3523_s14 = smov %s2783_s5 }
 0x451   : > { %s3524_s16 = smov %s2452_s17  ;;  %s3525_s17 = smov %s2628_s30 }
 0x452   : > { %s3526_s18 = smov %s2460_s19  ;;  %s3527_s19 = smov %s3515_s7 }
 0x453   :  { %21 = sbr.rel (!%p3378_p6) target bundleno = 16 (0x10), region = 113 }
 0x45a   :  { %1621 = vsyncpa [#allocation6], 1 }
 0x45b   :  { %1623 = vsyncpa [#allocation6 + $0x1], 1 }
 0x45c   :  { %1624 = vsyncpa [#allocation9], 1 }
 0x45d   :  { %1626 = vsyncpa [#allocation9 + $0x1], 1 }
 0x45e   :  { %1627 = vsyncpa [#allocation7], 1 }
 0x45f   :  { %1629 = vsyncpa [#allocation7 + $0x1], 1 }

// kernel: _lambda_.7
= control target key start
LH: loop header
LB: loop body
LE: loop exit
PB: predicated region body
PF: predicated region fallthrough
CT: control target
= control target key end

     0   :  { %9 = vsyncpa [#allocation3], 0  ;;  %s3843_s0 = inlined_call_operand.hbm [shape: f32[256,256], index: 0, kind: input, shape index: {}]   ;;  %s3844_s1 = inlined_call_operand.hbm [shape: f32[1,256], index: 1, kind: input, shape index: {}]   ;;  %s3845_s2 = inlined_call_operand.hbm [shape: f32[1,256], index: 2, kind: input, shape index: {}]   ;;  %s3846_s3 = inlined_call_operand.hbm [shape: bf16[256,768], index: 3, kind: input, shape index: {}]   ;;  %s3847_s4 = inlined_call_operand.hbm [shape: bf16[256,768], index: 4, kind: output, shape index: {}]  }
   0x1   :  { %11 = vsyncpa [#allocation3 + $0x1], 0 }
   0x2   :  { %12 = vsyncpa [#allocation6], 0 }
   0x3   :  { %13 = vsyncpa [#allocation9], 0 }
   0x4   :  { %14 = vsyncpa [#allocation4], 0 }
   0x5   :  { %16 = vsyncpa [#allocation4 + $0x1], 0  ;;  %s2897_s15 = smov 0   ;;  %s2899_s16 = smov 0  }
   0x6   :  { %s2901_s17 = smov 0   ;;  %s2903_s18 = smov 0  }
   0x7 LB: > { %s2918_s19 = sadd.s32 4294967295, %s2859_s18   ;;  %s2132_s20 = sadd.s32 4294967294, %s2859_s18   ;;  %s2859_s18 = sphi %s2903_s18, %s3888_s18   ;;  %s2855_s17 = sphi %s2901_s17, %s3887_s17   ;;  %s2851_s16 = sphi %s2899_s16, %s3886_s16   ;;  %s2847_s15 = sphi %s2897_s15, %s3885_s15  }
   0x8   : > { %p42_p0 = scmp.ne.s32.totalorder %s2851_s16, %s2847_s15  ;;  %p3848_p1 = scmp.eq.s32.totalorder %s2918_s19, 0 }
   0x9   : > { %p135_p3 = scmp.eq.s32.totalorder %s2132_s20, 1  ;;  %p2133_p5 = scmp.ge.s32.totalorder %s2859_s18, 1 }
   0xa   : > { %p2927_p4 = por %p3848_p1, %p42_p0  ;;  %p142_p7 = scmp.lt.s32.totalorder %s2859_s18, 3 }
   0xb   : > { %p2932_p6 = por %p135_p3, %p42_p0  ;;  %s2861_s24 = smov [#allocation5]  }
   0xc   : > { %s3857_s21 = scalar_select %p2927_p4, 1, 0 }
   0xd   : > { %s3858_s22 = scalar_select %p2932_p6, 1, 0 }
   0xe   : > { %p2937_p8 = pnand %p2133_p5, %p142_p7  ;;  %s155_s25 = sshll.u32 %s2861_s24, 4  ;;  %s156_s25 = int_to_ptr.vmem [resolvable:$true] %s155_s25 }
   0xf   : > { %s2862_s26 = smov [#allocation7]   ;;  %s2863_s29 = smov [#allocation8]  }
  0x10   : > { %s3859_s23 = scalar_select %p2937_p8, 1, 0 }
  0x11   : > { %p2396_p10 = pneg %p2937_p8  ;;  %s166_s27 = sshll.u32 %s2862_s26, 4  ;;  %s2950_s27 = int_to_ptr.vmem [resolvable:$true] %s166_s27 }
  0x12   : > { %s176_s30 = sshll.u32 %s2863_s29, 4  ;;  %s2671_s7 = scalar_lea.hbm %s3844_s1, 32  ;;  %s2952_s30 = int_to_ptr.vmem [resolvable:$true] %s176_s30 }
  0x13   : > { %p2946_p11 = pnand %p2396_p10, %p3848_p1  ;;  %p2672_p12 = scmp.ne.s32.totalorder %s3844_s1, %s2671_s7 }
  0x14   : > { %p2678_p5 = scmp.lt.u32.totalorder %s2671_s7, %s3844_s1 }
  0x15   : > { %p2962_p13 = pneg %p2946_p11 }
  0x17   : > { %p2674_p0 = pnand %p2962_p13, %p2672_p12 }
  0x19   : > { %p2675_p3 = pneg %p2674_p0 }
  0x1b   : > { %p2680_p7 = pnand %p2678_p5, %p2675_p3 }
  0x1d   : > { %2683 = shalt.err (!%p2680_p7)
}
  0x1e   : > { %s2684_s13 = scalar_lea.vmem %s156_s25, 32  ;;  %p2692_p2 = scmp.lt.s32.totalorder %s156_s25, %s156_s25 }
  0x1f   : > { %p2685_p10 = scmp.ne.s32.totalorder %s156_s25, %s2684_s13  ;;  %p2693_p6 = scmp.lt.s32.totalorder %s2684_s13, %s2684_s13 }
  0x21   : > { %p2687_p9 = pnand %p2685_p10, %p2962_p13  ;;  %p2694_p4 = por %p2693_p6, %p2692_p2 }
  0x23   : > { %p2688_p1 = pneg %p2687_p9 }
  0x25   : > { %p2695_p8 = pnand %p2694_p4, %p2688_p1 }
  0x27   : > { %2698 = shalt.err (!%p2695_p8)
}
  0x28   : > { %2399 = dma.hbm_to_vmem [thread:$0]  (!%p2946_p11), %s3844_s1, 32, %s156_s25, [#allocation6]  }
  0x29   : > { %s2699_s29 = scalar_lea.hbm %s3845_s2, 32 }
  0x2a   : > { %p2700_p9 = scmp.ne.s32.totalorder %s3845_s2, %s2699_s29  ;;  %p2706_p1 = scmp.lt.u32.totalorder %s2699_s29, %s3845_s2 }
  0x2c   : > { %p2702_p12 = pnand %p2700_p9, %p2962_p13 }
  0x2e   : > { %p2703_p2 = pneg %p2702_p12 }
  0x30   : > { %p2708_p4 = pnand %p2706_p1, %p2703_p2 }
  0x32   : > { %2711 = shalt.err (!%p2708_p4)
}
  0x33   : > { %s2712_s25 = scalar_lea.vmem %s2950_s27, 32  ;;  %p2720_p3 = scmp.lt.s32.totalorder %s2950_s27, %s2950_s27 }
  0x34   : > { %p2713_p6 = scmp.ne.s32.totalorder %s2950_s27, %s2712_s25  ;;  %p2721_p5 = scmp.lt.s32.totalorder %s2712_s25, %s2712_s25 }
  0x36   : > { %p2715_p8 = pnand %p2713_p6, %p2962_p13  ;;  %p2722_p7 = por %p2721_p5, %p2720_p3 }
  0x38   : > { %p2716_p0 = pneg %p2715_p8 }
  0x3a   : > { %p2723_p10 = pnand %p2722_p7, %p2716_p0 }
  0x3c   : > { %2726 = shalt.err (!%p2723_p10)
}
  0x3d   : > { %2402 = dma.hbm_to_vmem [thread:$0]  (!%p2946_p11), %s3845_s2, 32, %s2950_s27, [#allocation6]  }
  0x3e   : > { %s2727_s14 = scalar_lea.hbm %s3846_s3, 12288 }
  0x3f   : > { %p2728_p9 = scmp.ne.s32.totalorder %s3846_s3, %s2727_s14  ;;  %p2734_p1 = scmp.lt.u32.totalorder %s2727_s14, %s3846_s3 }
  0x41   : > { %p2730_p12 = pnand %p2728_p9, %p2962_p13 }
  0x43   : > { %p2731_p2 = pneg %p2730_p12 }
  0x45   : > { %p2736_p4 = pnand %p2734_p1, %p2731_p2 }
  0x47   : > { %2739 = shalt.err (!%p2736_p4)
}
  0x48   : > { %s2740_s27 = scalar_lea.vmem %s2952_s30, 12288  ;;  %p2748_p3 = scmp.lt.s32.totalorder %s2952_s30, %s2952_s30 }
  0x49   : > { %p2741_p6 = scmp.ne.s32.totalorder %s2952_s30, %s2740_s27  ;;  %p2749_p5 = scmp.lt.s32.totalorder %s2740_s27, %s2740_s27 }
  0x4b   : > { %p2743_p8 = pnand %p2741_p6, %p2962_p13  ;;  %p2750_p7 = por %p2749_p5, %p2748_p3 }
  0x4d   : > { %p2744_p0 = pneg %p2743_p8 }
  0x4f   : > { %p2751_p10 = pnand %p2750_p7, %p2744_p0 }
  0x51   : > { %2754 = shalt.err (!%p2751_p10)
}
  0x52   : > { %s2864_s5 = smov 384   ;;  %s2865_s10 = smov 24  }
  0x53   : > { %2405 = dma.hbm_to_vmem [thread:$0]  (!%p2946_p11), %s3846_s3, 12288, %s2952_s30, [#allocation9], %s2864_s5, %s2864_s5, %s2865_s10  }
  0x54   : > { %s3025_s8 = sadd.s32 1, %s2859_s18   ;;  %s29_s9 = sadd.s32 1, %s2855_s17 }
  0x55   : > { %s26_s25 = ssub.s32 %s2859_s18, %s3025_s8  ;;  %p36_p9 = scmp.ne.s32.totalorder %s2855_s17, %s2851_s16 }
  0x56   : > { %p27_p13 = scmp.eq.s32.totalorder %s26_s25, 0  ;;  %p37_p12 = scmp.eq.s32.totalorder %s2859_s18, 0 }
  0x57   : > { %p2417_p2 = scmp.lt.s32.totalorder %s2859_s18, 2  ;;  %p3862_p4 = scmp.eq.s32.totalorder %s2918_s19, 1 }
  0x58   : > { %s3035_s11 = scalar_select %p27_p13, %s2855_s17, %s29_s9  }
  0x59   : > { %p38_p1 = por %p37_p12, %p36_p9  ;;  %p3039_p6 = por %p3862_p4, %p36_p9 }
  0x5a   : > { %s190_s28 = sand.u32 1, %s2855_s17   ;;  %s2297_s13 = sshll.u32 %s2859_s18, 12 }
  0x5b   : > { %s2138_s30 = sshll.u32 %s190_s28, 8  ;;  %s3048_s24 = scalar_lea.hbm %s3843_s0, %s2297_s13 }
  0x5c   : > { %s194_s26 = scalar_lea.vmem [#allocation2], %s2138_s30  ;;  %p3050_p11 = pnand %p2417_p2, %p38_p1 }
  0x5d   : > { %s202_s29 = sshll.u32 %s194_s26, 4  ;;  %s3056_s5 = scalar_lea.sflag [#allocation3], %s190_s28  ;;  %s3054_s29 = int_to_ptr.vmem [resolvable:$true] %s202_s29 }
  0x5e   : > { %s2755_s10 = scalar_lea.hbm %s3048_s24, 4096  ;;  %p2757_p0 = pneg %p3050_p11 }
  0x5f   : > { %p2756_p8 = scmp.ne.s32.totalorder %s3048_s24, %s2755_s10  ;;  %s2760_s25 = scalar_lea.hbm %s3843_s0, 8192 }
  0x60   : > { %p2761_p7 = scmp.lt.u32.totalorder %s3048_s24, %s3843_s0  ;;  %p2762_p10 = scmp.lt.u32.totalorder %s2760_s25, %s2755_s10 }
  0x61   : > { %p2758_p3 = pnand %p2757_p0, %p2756_p8  ;;  %p2764_p9 = scmp.lt.u32.totalorder %s2755_s10, %s3048_s24 }
  0x62   : > { %p2763_p13 = por %p2762_p10, %p2761_p7 }
  0x63   : > { %p2759_p5 = pneg %p2758_p3 }
  0x64   : > { %p2765_p12 = por %p2764_p9, %p2763_p13 }
  0x66   : > { %p2766_p2 = pnand %p2765_p12, %p2759_p5 }
  0x68   : > { %2769 = shalt.err (!%p2766_p2)
}
  0x69   : > { %s2770_s28 = scalar_lea.vmem %s3054_s29, 4096  ;;  %s2866_s30 = smov [#allocation2]  }
  0x6a   : > { %p2771_p1 = scmp.ne.s32.totalorder %s3054_s29, %s2770_s28  ;;  %s2775_s14 = sshll.u32 %s2866_s30, 4  ;;  %s2776_s14 = int_to_ptr.vmem [resolvable:$false] %s2775_s14 }
  0x6b   : > { %s2777_s20 = scalar_lea.vmem %s2776_s14, 8192  ;;  %p2778_p3 = scmp.lt.s32.totalorder %s3054_s29, %s2776_s14 }
  0x6c   : > { %p2773_p4 = pnand %p2771_p1, %p2757_p0  ;;  %p2779_p7 = scmp.lt.s32.totalorder %s2777_s20, %s2770_s28 }
  0x6e   : > { %p2774_p8 = pneg %p2773_p4  ;;  %p2780_p10 = por %p2779_p7, %p2778_p3 }
  0x70   : > { %p2781_p13 = pnand %p2780_p10, %p2774_p8 }
  0x72   : > { %2784 = shalt.err (!%p2781_p13)
}
  0x73   : > { %s2867_s26 = smov 256   ;;  %s2868_s10 = smov 16  }
  0x74   : > { %2409 = dma.hbm_to_vmem [thread:$0]  (!%p3050_p11), %s3048_s24, 4096, %s3054_s29, %s3056_s5, %s2867_s26, %s2867_s26, %s2868_s10  }
  0x75   : > { %p3865_p0 = scmp.ne.s32.totalorder %s3859_s23, 0 }
  0x77   : > { %214 = sbr.rel (%p3865_p0) target bundleno = 799 (0x31f), region = 36 }
  0x7e   : > { %s3087_s6 = sand.u32 1, %s2851_s16   ;;  %p3866_p5 = scmp.ne.s32.totalorder %s3857_s21, 0 }
  0x7f   : > { %s2143_s7 = sshll.u32 %s3087_s6, 8  ;;  %s217_s25 = scalar_lea.sflag [#allocation3], %s3087_s6 }
  0x80   : > { %s3091_s9 = scalar_lea.vmem [#allocation2], %s2143_s7 }
  0x81   : > { %2830 = dma.done.wait (%p3866_p5), %s217_s25, 4096  }
  0x82   : > { %2832 = vsyncadd (%p3866_p5), %s217_s25, 4294963200  ;;  %p3867_p11 = scmp.eq.s32.totalorder %s2918_s19, 0 }
  0x84   : > { %2834 = dma.done.wait (%p3867_p11), [#allocation6], 64   ;;  %p3868_p9 = pmov %p3867_p11 }
  0x86   : > { %2836 = vsyncadd (%p3868_p9), [#allocation6], 4294967232  ;;  %p3869_p12 = pmov %p3868_p9 }
  0x87   : > { %p3870_p2 = pmov %p3868_p9 }
  0x88   : > { %2838 = dma.done.wait (%p3869_p12), [#allocation9], 12288  }
  0x89   : > { %2840 = vsyncadd (%p3870_p2), [#allocation9], 4294955008  ;;  %v3106_v0 = vld [vmem:[%s3091_s9] sm:$0xff]  ;;  %v3109_v1 = vld [vmem:[%s3091_s9 + $0x8] sm:$0xff]  ;;  %s2378_s21 = smul.u32 384, %s3087_s6  ;;  %s2869_s30 = smov [#allocation10]  }
  0x8a   : > { %v3112_v2 = vld [vmem:[%s3091_s9 + $0x20] sm:$0xff]  ;;  %v293_v3 = vadd.f32 %v3109_v1, %v3106_v0  ;;  %v3117_v4 = vld [vmem:[%s3091_s9 + $0x28] sm:$0xff]  ;;  %v3120_v5 = vld [vmem:[%s3091_s9 + $0x10] sm:$0xff]  ;;  %s2379_s24 = smul.u32 6144, %s2918_s19  ;;  %s2016_s19 = scalar_lea.sflag [#allocation4], %s3087_s6 }
  0x8b   : > { %v3123_v6 = vld [vmem:[%s3091_s9 + $0x18] sm:$0xff]  ;;  %v299_v7 = vadd.f32 %v3117_v4, %v3112_v2  ;;  %v3128_v8 = vld [vmem:[%s3091_s9 + $0x30] sm:$0xff]  ;;  %v3138_v12 = vld [vmem:[%s3091_s9 + $0x40] sm:$0xff]  ;;  %s3742_s23 = scalar_lea.vmem [#allocation10], %s2378_s21  ;;  %s2789_s14 = sshll.u32 %s2869_s30, 4  ;;  %s2790_s14 = int_to_ptr.vmem [resolvable:$false] %s2789_s14 }
  0x8c   : > { %v3131_v9 = vld [vmem:[%s3091_s9 + $0x38] sm:$0xff]  ;;  %294 = vadd.xlane.f32.xlu0 %v293_v3  ;;  %v296_v10 = vadd.f32 %v3123_v6, %v3120_v5  ;;  %v3141_v13 = vld [vmem:[%s3091_s9 + $0x48] sm:$0xff]  ;;  %v3144_v14 = vld [vmem:[%s3091_s9 + $0x50] sm:$0xff]  ;;  %s2030_s29 = sshll.u32 %s3742_s23, 4  ;;  %s3793_s13 = scalar_lea.hbm %s3847_s4, %s2379_s24  ;;  %s3797_s29 = int_to_ptr.vmem [resolvable:$true] %s2030_s29 }
  0x8d   : > { %300 = vadd.xlane.f32.xlu1 %v299_v7  ;;  %v302_v11 = vadd.f32 %v3131_v9, %v3128_v8  ;;  %v3147_v15 = vld [vmem:[%s3091_s9 + $0x58] sm:$0xff]  ;;  %v305_v16 = vadd.f32 %v3141_v13, %v3138_v12  ;;  %v3154_v18 = vld [vmem:[%s3091_s9 + $0x60] sm:$0xff]  ;;  %v3157_v19 = vld [vmem:[%s3091_s9 + $0x68] sm:$0xff]  ;;  %s2785_s28 = scalar_lea.vmem %s3797_s29, 6144  ;;  %s2791_s20 = scalar_lea.vmem %s2790_s14, 12288 }
  0x8e   : > { %v308_v17 = vadd.f32 %v3147_v15, %v3144_v14  ;;  %v3160_v20 = vld [vmem:[%s3091_s9 + $0x70] sm:$0xff]  ;;  %v3163_v21 = vld [vmem:[%s3091_s9 + $0x78] sm:$0xff]  ;;  %v3166_v22 = vld [vmem:[%s3091_s9 + $0x80] sm:$0xff]  ;;  %v311_v24 = vadd.f32 %v3157_v19, %v3154_v18  ;;  %p2786_p1 = scmp.ne.s32.totalorder %s3797_s29, %s2785_s28  ;;  %p2792_p3 = scmp.lt.s32.totalorder %s3797_s29, %s2790_s14 }
  0x8f   : > { %v3169_v23 = vld [vmem:[%s3091_s9 + $0x88] sm:$0xff]  ;;  %v3174_v25 = vld [vmem:[%s3091_s9 + $0x90] sm:$0xff]  ;;  %v3177_v26 = vld [vmem:[%s3091_s9 + $0x98] sm:$0xff]  ;;  %v314_v27 = vadd.f32 %v3163_v21, %v3160_v20  ;;  %p2793_p7 = scmp.lt.s32.totalorder %s2791_s20, %s2785_s28 }
  0x90   : > { %297 = vadd.xlane.f32.xlu0 %v296_v10  ;;  %v3182_v28 = vld [vmem:[%s3091_s9 + $0xa0] sm:$0xff]  ;;  %v3185_v29 = vld [vmem:[%s3091_s9 + $0xa8] sm:$0xff]  ;;  %v317_v30 = vadd.f32 %v3169_v23, %v3166_v22  ;;  %v3190_v31 = vld [vmem:[%s3091_s9 + $0xb0] sm:$0xff]  ;;  %v320_v33 = vadd.f32 %v3177_v26, %v3174_v25  ;;  %p2787_p4 = pnand %p2786_p1, %p3039_p6 }
  0x91   : > { %303 = vadd.xlane.f32.xlu1 %v302_v11  ;;  %v3193_v32 = vld [vmem:[%s3091_s9 + $0xb8] sm:$0xff]  ;;  %v3198_v34 = vld [vmem:[%s3091_s9 + $0xc0] sm:$0xff]  ;;  %v3201_v35 = vld [vmem:[%s3091_s9 + $0xc8] sm:$0xff]  ;;  %v323_v36 = vadd.f32 %v3185_v29, %v3182_v28  ;;  %p2794_p10 = por %p2793_p7, %p2792_p3 }
  0x92   : > { %v3206_v37 = vld [vmem:[%s3091_s9 + $0xd0] sm:$0xff]  ;;  %v3209_v38 = vld [vmem:[%s3091_s9 + $0xd8] sm:$0xff]  ;;  %v326_v39 = vadd.f32 %v3193_v32, %v3190_v31  ;;  %v3214_v40 = vld [vmem:[%s3091_s9 + $0xe0] sm:$0xff]  ;;  %v329_v42 = vadd.f32 %v3201_v35, %v3198_v34  ;;  %p2788_p8 = pneg %p2787_p4 }
  0x93   : > { %v3217_v41 = vld [vmem:[%s3091_s9 + $0xe8] sm:$0xff]  ;;  %v3222_v43 = vld [vmem:[%s3091_s9 + $0xf0] sm:$0xff]  ;;  %v3225_v44 = vld [vmem:[%s3091_s9 + $0xf8] sm:$0xff]  ;;  %v332_v45 = vadd.f32 %v3209_v38, %v3206_v37 }
  0x94   : > { %306 = vadd.xlane.f32.xlu0 %v305_v16  ;;  %v335_v46 = vadd.f32 %v3217_v41, %v3214_v40  ;;  %v338_v47 = vadd.f32 %v3225_v44, %v3222_v43  ;;  %v2463_v48 = vld [vmem:[#allocation8 + $0x4] ss:$24 sps:$4 sm:$0xff]   ;;  %v2467_v50 = vld [vmem:[#allocation8] ss:$24 sps:$4 sm:$0xff]   ;;  %v2469_v52 = vld [vmem:[#allocation8 + $0x34] ss:$24 sps:$4 sm:$0xff]   ;;  %p2795_p13 = pnand %p2794_p10, %p2788_p8 }
  0x95   : > { %309 = vadd.xlane.f32.xlu1 %v308_v17  ;;  %v2465_v49 = vld [vmem:[#allocation8 + $0xc] ss:$24 sps:$4 sm:$0xff]   ;;  %v2468_v51 = vld [vmem:[#allocation8 + $0x8] ss:$24 sps:$4 sm:$0xff]   ;;  %v2471_v53 = vld [vmem:[#allocation8 + $0x3c] ss:$24 sps:$4 sm:$0xff]   ;;  %1340 = vmatprep.subr.bf16.mxu0 %v2463_v48 }
  0x96   : > { %1453 = vmatprep.subr.bf16.mxu1 %v2465_v49  ;;  %1341 = vmatpush1.bf16.msra.mxu0 %v2467_v50  ;;  %v2473_v54 = vld [vmem:[#allocation8 + $0x30] ss:$24 sps:$4 sm:$0xff]   ;;  %v2475_v56 = vld [vmem:[#allocation8 + $0x64] ss:$24 sps:$4 sm:$0xff]   ;;  %v2479_v58 = vld [vmem:[#allocation8 + $0x60] ss:$24 sps:$4 sm:$0xff]  }
  0x97   : > { %1454 = vmatpush1.bf16.msra.mxu1 %v2468_v51  ;;  %v2474_v55 = vld [vmem:[#allocation8 + $0x38] ss:$24 sps:$4 sm:$0xff]   ;;  %1342 = vmatprep.subr.bf16.mxu0 %v2469_v52  ;;  %v2477_v57 = vld [vmem:[#allocation8 + $0x6c] ss:$24 sps:$4 sm:$0xff]   ;;  %v2480_v59 = vld [vmem:[#allocation8 + $0x68] ss:$24 sps:$4 sm:$0xff]  }
  0x98   : > { %312 = vadd.xlane.f32.xlu0 %v311_v24  ;;  %1455 = vmatprep.subr.bf16.mxu1 %v2471_v53  ;;  %v2481_v60 = vld [vmem:[#allocation8 + $0x94] ss:$24 sps:$4 sm:$0xff]   ;;  %v2485_v62 = vld [vmem:[#allocation8 + $0x90] ss:$24 sps:$4 sm:$0xff]   ;;  %v2487_v3 = vld [vmem:[#allocation8 + $0xc4] ss:$24 sps:$4 sm:$0xff]  }
  0x99   : > { %315 = vadd.xlane.f32.xlu1 %v314_v27  ;;  %v2483_v61 = vld [vmem:[#allocation8 + $0x9c] ss:$24 sps:$4 sm:$0xff]   ;;  %v2486_v63 = vld [vmem:[#allocation8 + $0x98] ss:$24 sps:$4 sm:$0xff]   ;;  %v2489_v7 = vld [vmem:[#allocation8 + $0xcc] ss:$24 sps:$4 sm:$0xff]  }
  0x9a   : > { %1343 = vmatpush1.bf16.msra.mxu0 %v2473_v54  ;;  %v2491_v10 = vld [vmem:[#allocation8 + $0xc0] ss:$24 sps:$4 sm:$0xff]   ;;  %v2493_v16 = vld [vmem:[#allocation8 + $0xf4] ss:$24 sps:$4 sm:$0xff]   ;;  %v2497_v24 = vld [vmem:[#allocation8 + $0xf0] ss:$24 sps:$4 sm:$0xff]  }
  0x9b   : > { %1456 = vmatpush1.bf16.msra.mxu1 %v2474_v55  ;;  %1344 = vmatprep.subr.bf16.mxu0 %v2475_v56  ;;  %v2492_v11 = vld [vmem:[#allocation8 + $0xc8] ss:$24 sps:$4 sm:$0xff]   ;;  %v2495_v17 = vld [vmem:[#allocation8 + $0xfc] ss:$24 sps:$4 sm:$0xff]   ;;  %v2498_v27 = vld [vmem:[#allocation8 + $0xf8] ss:$24 sps:$4 sm:$0xff]  }
  0x9c   : > { %318 = vadd.xlane.f32.xlu0 %v317_v30  ;;  %1457 = vmatprep.subr.bf16.mxu1 %v2477_v57 }
  0x9d   : > { %321 = vadd.xlane.f32.xlu1 %v320_v33 }
  0x9e   : > { %1345 = vmatpush1.bf16.msra.mxu0 %v2479_v58 }
  0x9f   : > { %1458 = vmatpush1.bf16.msra.mxu1 %v2480_v59  ;;  %1346 = vmatprep.subr.bf16.mxu0 %v2481_v60 }
  0xa0   : > { %324 = vadd.xlane.f32.xlu0 %v323_v36  ;;  %1459 = vmatprep.subr.bf16.mxu1 %v2483_v61 }
  0xa1   : > { %327 = vadd.xlane.f32.xlu1 %v326_v39 }
  0xa2   : > { %1347 = vmatpush1.bf16.msra.mxu0 %v2485_v62 }
  0xa3   : > { %1460 = vmatpush1.bf16.msra.mxu1 %v2486_v63  ;;  %1348 = vmatprep.subr.bf16.mxu0 %v2487_v3 }
  0xa4   : > { %330 = vadd.xlane.f32.xlu0 %v329_v42  ;;  %1461 = vmatprep.subr.bf16.mxu1 %v2489_v7 }
  0xa5   : > { %333 = vadd.xlane.f32.xlu1 %v332_v45 }
  0xa6   : > { %1349 = vmatpush1.bf16.msra.mxu0 %v2491_v10 }
  0xa7   : > { %1462 = vmatpush1.bf16.msra.mxu1 %v2492_v11  ;;  %1350 = vmatprep.subr.bf16.mxu0 %v2493_v16 }
  0xa8   : > { %336 = vadd.xlane.f32.xlu0 %v335_v46  ;;  %1463 = vmatprep.subr.bf16.mxu1 %v2495_v17 }
  0xa9   : > { %339 = vadd.xlane.f32.xlu1 %v338_v47 }
  0xaa   : > { %1351 = vmatpush1.bf16.msra.mxu0 %v2497_v24 }
  0xab   : > { %1464 = vmatpush1.bf16.msra.mxu1 %v2498_v27 }
 0x119   : > { %v295_v30 = vpop.xlane.xlu0 %294 }
 0x11a   : > { %v342_v33 = vmul.f32 0.00390625, %v295_v30  ;;  %v301_v36 = vpop.xlane.xlu1 %300 }
 0x11b   : > { %v344_v39 = vmul.f32 0.00390625, %v301_v36 }
 0x11c   : > { %v3234_v42 = vsub.f32 %v3106_v0, %v342_v33  ;;  %v3237_v45 = vsub.f32 %v3109_v1, %v342_v33 }
 0x11d   : > { %v3240_v46 = vsub.f32 %v3112_v2, %v344_v39  ;;  %v3243_v47 = vsub.f32 %v3117_v4, %v344_v39  ;;  %v298_v48 = vpop.xlane.xlu0 %297 }
 0x11e   : > { %v343_v49 = vmul.f32 0.00390625, %v298_v48  ;;  %v304_v50 = vpop.xlane.xlu1 %303  ;;  %v390_v51 = vmul.f32 %v3234_v42, %v3234_v42  ;;  %v391_v52 = vmul.f32 %v3237_v45, %v3237_v45 }
 0x11f   : > { %v345_v0 = vmul.f32 0.00390625, %v304_v50  ;;  %v394_v1 = vmul.f32 %v3240_v46, %v3240_v46  ;;  %v395_v2 = vmul.f32 %v3243_v47, %v3243_v47 }
 0x120   : > { %v3254_v53 = vsub.f32 %v3120_v5, %v343_v49  ;;  %v3257_v4 = vsub.f32 %v3123_v6, %v343_v49  ;;  %v422_v54 = vadd.f32 %v391_v52, %v390_v51 }
 0x121   : > { %v3260_v55 = vsub.f32 %v3128_v8, %v345_v0  ;;  %v3263_v56 = vsub.f32 %v3131_v9, %v345_v0  ;;  %v307_v57 = vpop.xlane.xlu0 %306  ;;  %v428_v60 = vadd.f32 %v395_v2, %v394_v1 }
 0x122   : > { %v346_v58 = vmul.f32 0.00390625, %v307_v57  ;;  %423 = vadd.xlane.f32.xlu0 %v422_v54  ;;  %v310_v59 = vpop.xlane.xlu1 %309  ;;  %v392_v61 = vmul.f32 %v3254_v53, %v3254_v53  ;;  %v393_v5 = vmul.f32 %v3257_v4, %v3257_v4 }
 0x123   : > { %v347_v6 = vmul.f32 0.00390625, %v310_v59  ;;  %v396_v62 = vmul.f32 %v3260_v55, %v3260_v55  ;;  %v397_v8 = vmul.f32 %v3263_v56, %v3263_v56 }
 0x124   : > { %v3274_v9 = vsub.f32 %v3138_v12, %v346_v58  ;;  %v3277_v63 = vsub.f32 %v3141_v13, %v346_v58  ;;  %v425_v3 = vadd.f32 %v393_v5, %v392_v61 }
 0x125   : > { %v3280_v7 = vsub.f32 %v3144_v14, %v347_v6  ;;  %v3283_v10 = vsub.f32 %v3147_v15, %v347_v6  ;;  %v313_v11 = vpop.xlane.xlu0 %312  ;;  %v431_v24 = vadd.f32 %v397_v8, %v396_v62 }
 0x126   : > { %v348_v16 = vmul.f32 0.00390625, %v313_v11  ;;  %429 = vadd.xlane.f32.xlu0 %v428_v60  ;;  %426 = vadd.xlane.f32.xlu1 %v425_v3  ;;  %v316_v17 = vpop.xlane.xlu1 %315  ;;  %v398_v12 = vmul.f32 %v3274_v9, %v3274_v9  ;;  %v399_v13 = vmul.f32 %v3277_v63, %v3277_v63 }
 0x127   : > { %v349_v27 = vmul.f32 0.00390625, %v316_v17  ;;  %v400_v14 = vmul.f32 %v3280_v7, %v3280_v7  ;;  %v401_v15 = vmul.f32 %v3283_v10, %v3283_v10 }
 0x128   : > { %v3294_v30 = vsub.f32 %v3154_v18, %v348_v16  ;;  %v3297_v33 = vsub.f32 %v3157_v19, %v348_v16  ;;  %v434_v36 = vadd.f32 %v399_v13, %v398_v12  ;;  %v2501_v12 = vld [vmem:[#allocation8 + $0x12c] ss:$24 sps:$4 sm:$0xff]  }
 0x129   : > { %v3300_v39 = vsub.f32 %v3160_v20, %v349_v27  ;;  %v3303_v48 = vsub.f32 %v3163_v21, %v349_v27  ;;  %v319_v49 = vpop.xlane.xlu0 %318  ;;  %v437_v52 = vadd.f32 %v401_v15, %v400_v14  ;;  %v2503_v15 = vld [vmem:[#allocation8 + $0x120] ss:$24 sps:$4 sm:$0xff]   ;;  %1465 = vmatprep.subr.bf16.mxu1 %v2501_v12  ;;  %v2513_v12 = vld [vmem:[#allocation8 + $0x18c] ss:$24 sps:$4 sm:$0xff]  }
 0x12a   : > { %v350_v50 = vmul.f32 0.00390625, %v319_v49  ;;  %432 = vadd.xlane.f32.xlu1 %v431_v24  ;;  %435 = vadd.xlane.f32.xlu0 %v434_v36  ;;  %v322_v51 = vpop.xlane.xlu1 %321  ;;  %v402_v18 = vmul.f32 %v3294_v30, %v3294_v30  ;;  %v403_v19 = vmul.f32 %v3297_v33, %v3297_v33  ;;  %v2499_v24 = vld [vmem:[#allocation8 + $0x124] ss:$24 sps:$4 sm:$0xff]  }
 0x12b   : > { %v351_v0 = vmul.f32 0.00390625, %v322_v51  ;;  %v404_v20 = vmul.f32 %v3300_v39, %v3300_v39  ;;  %v405_v21 = vmul.f32 %v3303_v48, %v3303_v48  ;;  %1352 = vmatprep.subr.bf16.mxu0 %v2499_v24 }
 0x12c   : > { %v3314_v1 = vsub.f32 %v3166_v22, %v350_v50  ;;  %v3317_v2 = vsub.f32 %v3169_v23, %v350_v50  ;;  %v440_v54 = vadd.f32 %v403_v19, %v402_v18  ;;  %1353 = vmatpush1.bf16.msra.mxu0 %v2503_v15  ;;  %v2519_v15 = vld [vmem:[#allocation8 + $0x1bc] ss:$24 sps:$4 sm:$0xff]  }
 0x12d   : > { %v3320_v57 = vsub.f32 %v3174_v25, %v351_v0  ;;  %v3323_v58 = vsub.f32 %v3177_v26, %v351_v0  ;;  %v325_v59 = vpop.xlane.xlu0 %324  ;;  %v443_v5 = vadd.f32 %v405_v21, %v404_v20 }
 0x12e   : > { %v352_v60 = vmul.f32 0.00390625, %v325_v59  ;;  %438 = vadd.xlane.f32.xlu1 %v437_v52  ;;  %441 = vadd.xlane.f32.xlu0 %v440_v54  ;;  %v328_v61 = vpop.xlane.xlu1 %327  ;;  %v406_v22 = vmul.f32 %v3314_v1, %v3314_v1  ;;  %v407_v23 = vmul.f32 %v3317_v2, %v3317_v2 }
 0x12f   : > { %v353_v6 = vmul.f32 0.00390625, %v328_v61  ;;  %v408_v25 = vmul.f32 %v3320_v57, %v3320_v57  ;;  %v409_v26 = vmul.f32 %v3323_v58, %v3323_v58  ;;  %v2507_v61 = vld [vmem:[#allocation8 + $0x15c] ss:$24 sps:$4 sm:$0xff]  }
 0x130   : > { %v3334_v62 = vsub.f32 %v3182_v28, %v352_v60  ;;  %v3337_v8 = vsub.f32 %v3185_v29, %v352_v60  ;;  %v446_v3 = vadd.f32 %v407_v23, %v406_v22  ;;  %v2505_v60 = vld [vmem:[#allocation8 + $0x154] ss:$24 sps:$4 sm:$0xff]  }
 0x131   : > { %v3340_v11 = vsub.f32 %v3190_v31, %v353_v6  ;;  %v3343_v16 = vsub.f32 %v3193_v32, %v353_v6  ;;  %v331_v17 = vpop.xlane.xlu0 %330  ;;  %v449_v14 = vadd.f32 %v409_v26, %v408_v25  ;;  %v2504_v31 = vld [vmem:[#allocation8 + $0x128] ss:$24 sps:$4 sm:$0xff]   ;;  %v2510_v25 = vld [vmem:[#allocation8 + $0x158] ss:$24 sps:$4 sm:$0xff]   ;;  %1354 = vmatprep.subr.bf16.mxu0 %v2505_v60  ;;  %v2541_v60 = vld [vmem:[#allocation8 + $0x274] ss:$24 sps:$4 sm:$0xff]  }
 0x132   : > { %v354_v13 = vmul.f32 0.00390625, %v331_v17  ;;  %444 = vadd.xlane.f32.xlu1 %v443_v5  ;;  %447 = vadd.xlane.f32.xlu0 %v446_v3  ;;  %v334_v27 = vpop.xlane.xlu1 %333  ;;  %v410_v28 = vmul.f32 %v3334_v62, %v3334_v62  ;;  %v411_v29 = vmul.f32 %v3337_v8, %v3337_v8  ;;  %v2509_v6 = vld [vmem:[#allocation8 + $0x150] ss:$24 sps:$4 sm:$0xff]  }
 0x133   : > { %v355_v36 = vmul.f32 0.00390625, %v334_v27  ;;  %v412_v32 = vmul.f32 %v3340_v11, %v3340_v11  ;;  %v413_v49 = vmul.f32 %v3343_v16, %v3343_v16  ;;  %1466 = vmatpush1.bf16.msra.mxu1 %v2504_v31  ;;  %1355 = vmatpush1.bf16.msra.mxu0 %v2509_v6  ;;  %v2515_v27 = vld [vmem:[#allocation8 + $0x180] ss:$24 sps:$4 sm:$0xff]   ;;  %v2521_v31 = vld [vmem:[#allocation8 + $0x1b0] ss:$24 sps:$4 sm:$0xff]  }
 0x134   : > { %v3354_v50 = vsub.f32 %v3198_v34, %v354_v13  ;;  %v3357_v51 = vsub.f32 %v3201_v35, %v354_v13  ;;  %v452_v52 = vadd.f32 %v411_v29, %v410_v28  ;;  %1467 = vmatprep.subr.bf16.mxu1 %v2507_v61  ;;  %v2517_v29 = vld [vmem:[#allocation8 + $0x1b4] ss:$24 sps:$4 sm:$0xff]   ;;  %v2546_v6 = vld [vmem:[#allocation8 + $0x278] ss:$24 sps:$4 sm:$0xff]  }
 0x135   : > { %v3360_v18 = vsub.f32 %v3206_v37, %v355_v36  ;;  %v3363_v19 = vsub.f32 %v3209_v38, %v355_v36  ;;  %v337_v0 = vpop.xlane.xlu0 %336  ;;  %v455_v54 = vadd.f32 %v413_v49, %v412_v32  ;;  %v2522_v36 = vld [vmem:[#allocation8 + $0x1b8] ss:$24 sps:$4 sm:$0xff]   ;;  %v2523_v32 = vld [vmem:[#allocation8 + $0x1e4] ss:$24 sps:$4 sm:$0xff]  }
 0x136   : > { %3871 = vst [vmem:[#allocation15_spill] sm:$0xff] %v3354_v50  ;;  %v356_v20 = vmul.f32 0.00390625, %v337_v0  ;;  %450 = vadd.xlane.f32.xlu1 %v449_v14  ;;  %453 = vadd.xlane.f32.xlu0 %v452_v52  ;;  %v340_v21 = vpop.xlane.xlu1 %339  ;;  %v414_v34 = vmul.f32 %v3354_v50, %v3354_v50  ;;  %v415_v35 = vmul.f32 %v3357_v51, %v3357_v51  ;;  %v2516_v14 = vld [vmem:[#allocation8 + $0x188] ss:$24 sps:$4 sm:$0xff]   ;;  %v2525_v49 = vld [vmem:[#allocation8 + $0x1ec] ss:$24 sps:$4 sm:$0xff]  }
 0x137   : > { %3872 = vst [vmem:[#allocation16_spill] sm:$0xff] %v3360_v18  ;;  %v357_v59 = vmul.f32 0.00390625, %v340_v21  ;;  %v416_v37 = vmul.f32 %v3360_v18, %v3360_v18  ;;  %v417_v38 = vmul.f32 %v3363_v19, %v3363_v19  ;;  %1468 = vmatpush1.bf16.msra.mxu1 %v2510_v25  ;;  %v2527_v52 = vld [vmem:[#allocation8 + $0x1e0] ss:$24 sps:$4 sm:$0xff]   ;;  %v2531_v21 = vld [vmem:[#allocation8 + $0x21c] ss:$24 sps:$4 sm:$0xff]  }
 0x138   : > { %v3374_v5 = vsub.f32 %v3214_v40, %v356_v20  ;;  %v3377_v22 = vsub.f32 %v3217_v41, %v356_v20  ;;  %v458_v23 = vadd.f32 %v415_v35, %v414_v34  ;;  %1469 = vmatprep.subr.bf16.mxu1 %v2513_v12  ;;  %v2528_v0 = vld [vmem:[#allocation8 + $0x1e8] ss:$24 sps:$4 sm:$0xff]   ;;  %v2529_v20 = vld [vmem:[#allocation8 + $0x214] ss:$24 sps:$4 sm:$0xff]   ;;  %v2534_v34 = vld [vmem:[#allocation8 + $0x218] ss:$24 sps:$4 sm:$0xff]  }
 0x139   : > { %v3380_v26 = vsub.f32 %v3222_v43, %v357_v59  ;;  %v3383_v3 = vsub.f32 %v3225_v44, %v357_v59  ;;  %v461_v17 = vadd.f32 %v417_v38, %v416_v37  ;;  %v2511_v44 = vld [vmem:[#allocation8 + $0x184] ss:$24 sps:$4 sm:$0xff]   ;;  %v2539_v37 = vld [vmem:[#allocation8 + $0x240] ss:$24 sps:$4 sm:$0xff]  }
 0x13a   : > { %3873 = vst [vmem:[#allocation17_spill] sm:$0xff] %v3374_v5  ;;  %3874 = vst [vmem:[#allocation18_spill] sm:$0xff] %v3377_v22  ;;  %456 = vadd.xlane.f32.xlu1 %v455_v54  ;;  %459 = vadd.xlane.f32.xlu0 %v458_v23  ;;  %v418_v40 = vmul.f32 %v3374_v5, %v3374_v5  ;;  %v419_v41 = vmul.f32 %v3377_v22, %v3377_v22  ;;  %v2533_v54 = vld [vmem:[#allocation8 + $0x210] ss:$24 sps:$4 sm:$0xff]   ;;  %v2535_v35 = vld [vmem:[#allocation8 + $0x244] ss:$24 sps:$4 sm:$0xff]  }
 0x13b   : > { %3875 = vst [vmem:[#allocation19_spill] sm:$0xff] %v3380_v26  ;;  %3876 = vst [vmem:[#allocation20_spill] sm:$0xff] %v3383_v3  ;;  %v420_v24 = vmul.f32 %v3380_v26, %v3380_v26  ;;  %v421_v43 = vmul.f32 %v3383_v3, %v3383_v3  ;;  %1356 = vmatprep.subr.bf16.mxu0 %v2511_v44  ;;  %1470 = vmatpush1.bf16.msra.mxu1 %v2516_v14  ;;  %v2537_v59 = vld [vmem:[#allocation8 + $0x24c] ss:$24 sps:$4 sm:$0xff]   ;;  %v2540_v38 = vld [vmem:[#allocation8 + $0x248] ss:$24 sps:$4 sm:$0xff]  }
 0x13c   : > { %v464_v13 = vadd.f32 %v419_v41, %v418_v40  ;;  %1357 = vmatpush1.bf16.msra.mxu0 %v2515_v27  ;;  %1471 = vmatprep.subr.bf16.mxu1 %v2519_v15  ;;  %v2543_v61 = vld [vmem:[#allocation8 + $0x27c] ss:$24 sps:$4 sm:$0xff]   ;;  %v2545_v23 = vld [vmem:[#allocation8 + $0x270] ss:$24 sps:$4 sm:$0xff]   ;;  %v2551_v40 = vld [vmem:[#allocation8 + $0x2a0] ss:$24 sps:$4 sm:$0xff]  }
 0x13d   : > { %v467_v28 = vadd.f32 %v421_v43, %v420_v24  ;;  %1358 = vmatprep.subr.bf16.mxu0 %v2517_v29  ;;  %v2547_v25 = vld [vmem:[#allocation8 + $0x2a4] ss:$24 sps:$4 sm:$0xff]   ;;  %v2552_v41 = vld [vmem:[#allocation8 + $0x2a8] ss:$24 sps:$4 sm:$0xff]   ;;  %v2553_v24 = vld [vmem:[#allocation8 + $0x2d4] ss:$24 sps:$4 sm:$0xff]  }
 0x13e   : > { %462 = vadd.xlane.f32.xlu1 %v461_v17  ;;  %465 = vadd.xlane.f32.xlu0 %v464_v13  ;;  %v2549_v17 = vld [vmem:[#allocation8 + $0x2ac] ss:$24 sps:$4 sm:$0xff]   ;;  %v2555_v43 = vld [vmem:[#allocation8 + $0x2dc] ss:$24 sps:$4 sm:$0xff]   ;;  %v2557_v44 = vld [vmem:[#allocation8 + $0x2d0] ss:$24 sps:$4 sm:$0xff]  }
 0x13f   : > { %1472 = vmatpush1.bf16.msra.mxu1 %v2522_v36  ;;  %v2558_v12 = vld [vmem:[#allocation8 + $0x2d8] ss:$24 sps:$4 sm:$0xff]   ;;  %v2561_v13 = vld [vmem:[#allocation8 + $0x14] ss:$24 sps:$4 sm:$0xff]  }
 0x140   : > { %1359 = vmatpush1.bf16.msra.mxu0 %v2521_v31  ;;  %1473 = vmatprep.subr.bf16.mxu1 %v2525_v49 }
 0x141   : > { %1360 = vmatprep.subr.bf16.mxu0 %v2523_v32 }
 0x142   : > { %468 = vadd.xlane.f32.xlu1 %v467_v28 }
 0x143   : > { %1474 = vmatpush1.bf16.msra.mxu1 %v2528_v0 }
 0x144   : > { %1361 = vmatpush1.bf16.msra.mxu0 %v2527_v52  ;;  %1475 = vmatprep.subr.bf16.mxu1 %v2531_v21 }
 0x145   : > { %1362 = vmatprep.subr.bf16.mxu0 %v2529_v20 }
 0x147   : > { %1476 = vmatpush1.bf16.msra.mxu1 %v2534_v34 }
 0x148   : > { %1363 = vmatpush1.bf16.msra.mxu0 %v2533_v54  ;;  %1477 = vmatprep.subr.bf16.mxu1 %v2537_v59 }
 0x149   : > { %1364 = vmatprep.subr.bf16.mxu0 %v2535_v35 }
 0x14b   : > { %1478 = vmatpush1.bf16.msra.mxu1 %v2540_v38 }
 0x14c   : > { %1365 = vmatpush1.bf16.msra.mxu0 %v2539_v37  ;;  %1479 = vmatprep.subr.bf16.mxu1 %v2543_v61 }
 0x14d   : > { %1366 = vmatprep.subr.bf16.mxu0 %v2541_v60  ;;  %v663_v60 = vlaneseq }
 0x14f   : > { %1480 = vmatpush1.bf16.msra.mxu1 %v2546_v6 }
 0x150   : > { %1367 = vmatpush1.bf16.msra.mxu0 %v2545_v23  ;;  %1481 = vmatprep.subr.bf16.mxu1 %v2549_v17 }
 0x151   : > { %1368 = vmatprep.subr.bf16.mxu0 %v2547_v25 }
 0x153   : > { %1482 = vmatpush1.bf16.msra.mxu1 %v2552_v41  ;;  %v664_v41 = vshrl.u32 %v663_v60, 7 }
 0x154   : > { %1369 = vmatpush1.bf16.msra.mxu0 %v2551_v40  ;;  %1483 = vmatprep.subr.bf16.mxu1 %v2555_v43 }
 0x155   : > { %1370 = vmatprep.subr.bf16.mxu0 %v2553_v24 }
 0x157   : > { %1484 = vmatpush1.bf16.msra.mxu1 %v2558_v12 }
 0x158   : > { %1371 = vmatpush1.bf16.msra.mxu0 %v2557_v44  ;;  %2346 = vmatprep.subr.bf16.mxu1 %v2561_v13 }
 0x159   : > { %1566 = vmatprep.subr.bf16.mxu0 %v2561_v13 }
 0x1af   : > { %v424_v27 = vpop.xlane.xlu0 %423 }
 0x1b0   : > { %v470_v14 = vmul.f32 0.00390625, %v424_v27 }
 0x1b2   : > { %v486_v28 = vadd.f32 1e-05, %v470_v14  ;;  %v669_v14 = vsub.s32 1, %v664_v41 }
 0x1b3   : > { %v427_v29 = vpop.xlane.xlu1 %426  ;;  %v430_v15 = vpop.xlane.xlu0 %429 }
 0x1b4   : > { %v471_v31 = vmul.f32 0.00390625, %v427_v29  ;;  %2607 = vrsqrt.f32 %v486_v28  ;;  %v472_v52 = vmul.f32 0.00390625, %v430_v15  ;;  %vm504_vm0 = vcmp.eq.f32.partialorder %v486_v28, inf }
 0x1b5   : > { %v665_v29 = vsub.s32 0, %v664_v41  ;;  %v507_v15 = vand.u32 2147483648, %v486_v28  ;;  %vm506_vm1 = vcmp.eq.f32.partialorder %v486_v28, 0.0 }
 0x1b6   : > { %v3393_v49 = vadd.f32 1e-05, %v471_v31  ;;  %v3396_v34 = vadd.f32 1e-05, %v472_v52  ;;  %v292_v52 = vld [vmem:[#allocation7] sm:$0x3] }
 0x1b7   : > { %v433_v36 = vpop.xlane.xlu1 %432  ;;  %v436_v32 = vpop.xlane.xlu0 %435 }
 0x1b8   : > { %v473_v0 = vmul.f32 0.00390625, %v433_v36  ;;  %v474_v20 = vmul.f32 0.00390625, %v436_v32  ;;  %2609 = vrsqrt.f32 %v3393_v49  ;;  %v291_v32 = vld [vmem:[#allocation5] sm:$0x3]  ;;  %vm511_vm2 = vcmp.eq.f32.partialorder %v3393_v49, inf }
 0x1b9   : > { %2611 = vrsqrt.f32 %v3396_v34  ;;  %v3417_v60 = vrot.slane %v291_v32, %v669_v14  ;;  %vm513_vm3 = vcmp.eq.f32.partialorder %v3393_v49, 0.0  ;;  %v514_v41 = vand.u32 2147483648, %v3393_v49 }
 0x1ba   : > { %v3398_v59 = vadd.f32 1e-05, %v473_v0  ;;  %v3400_v37 = vadd.f32 1e-05, %v474_v20  ;;  %vm518_vm4 = vcmp.eq.f32.partialorder %v3396_v34, inf  ;;  %vm520_vm5 = vcmp.eq.f32.partialorder %v3396_v34, 0.0 }
 0x1bb   : > { %v439_v21 = vpop.xlane.xlu1 %438  ;;  %v442_v54 = vpop.xlane.xlu0 %441 }
 0x1bc   : > { %v475_v35 = vmul.f32 0.00390625, %v439_v21  ;;  %2613 = vrsqrt.f32 %v3398_v59  ;;  %v476_v25 = vmul.f32 0.00390625, %v442_v54  ;;  %vm525_vm6 = vcmp.eq.f32.partialorder %v3398_v59, inf }
 0x1bd   : > { %2615 = vrsqrt.f32 %v3400_v37  ;;  %vm527_vm7 = vcmp.eq.f32.partialorder %v3398_v59, 0.0  ;;  %vm532_vm8 = vcmp.eq.f32.partialorder %v3400_v37, inf  ;;  %vm534_vm9 = vcmp.eq.f32.partialorder %v3400_v37, 0.0 }
 0x1be   : > { %v2608_v61 = vpop.eup %2607  ;;  %v3403_v6 = vadd.f32 1e-05, %v475_v35  ;;  %v3410_v44 = vadd.f32 1e-05, %v476_v25 }
 0x1bf   : > { %v445_v38 = vpop.xlane.xlu1 %444  ;;  %v448_v17 = vpop.xlane.xlu0 %447  ;;  %v503_v40 = vmul.f32 %v2608_v61, %v486_v28  ;;  %v3419_v61 = vrot.slane %v291_v32, %v665_v29  ;;  %v528_v32 = vand.u32 2147483648, %v3398_v59 }
 0x1c0   : > { %v477_v23 = vmul.f32 0.00390625, %v445_v38  ;;  %2617 = vrsqrt.f32 %v3403_v6  ;;  %v478_v27 = vmul.f32 0.00390625, %v448_v17  ;;  %v3426_v17 = vrot.slane %v292_v52, %v665_v29 }
 0x1c1   : > { %v505_v13 = vsel %vm504_vm0, %v486_v28, %v503_v40  ;;  %v3424_v28 = vrot.slane %v292_v52, %v669_v14  ;;  %vm539_vm10 = vcmp.eq.f32.partialorder %v3403_v6, inf  ;;  %vm541_vm11 = vcmp.eq.f32.partialorder %v3403_v6, 0.0 }
 0x1c2   : > { %v3407_v24 = vadd.f32 1e-05, %v477_v23  ;;  %v2610_v12 = vpop.eup %2609  ;;  %v508_v21 = vsel %vm506_vm1, %v507_v15, %v505_v13  ;;  %v3415_v35 = vadd.f32 1e-05, %v478_v27  ;;  %v521_v13 = vand.u32 2147483648, %v3396_v34 }
 0x1c3   : > { %v451_v43 = vpop.xlane.xlu1 %450  ;;  %v454_v36 = vpop.xlane.xlu0 %453  ;;  %v510_v0 = vmul.f32 %v2610_v12, %v3393_v49  ;;  %vm546_vm12 = vcmp.eq.f32.partialorder %v3410_v44, inf  ;;  %vm548_vm13 = vcmp.eq.f32.partialorder %v3410_v44, 0.0  ;;  %v549_v26 = vand.u32 2147483648, %v3410_v44 }
 0x1c4   : > { %2619 = vrsqrt.f32 %v3407_v24  ;;  %v479_v31 = vmul.f32 0.00390625, %v451_v43  ;;  %v2612_v54 = vpop.eup %2611  ;;  %v480_v38 = vmul.f32 0.00390625, %v454_v36  ;;  %vm553_vm14 = vcmp.eq.f32.partialorder %v3407_v24, inf }
 0x1c5   : > { %2621 = vrsqrt.f32 %v3410_v44  ;;  %v512_v12 = vsel %vm511_vm2, %v3393_v49, %v510_v0  ;;  %v517_v15 = vmul.f32 %v2612_v54, %v3396_v34  ;;  %vm555_vm15 = vcmp.eq.f32.partialorder %v3407_v24, 0.0 }
 0x1c6   : > { %v2614_v23 = vpop.eup %2613  ;;  %v3422_v25 = vadd.f32 1e-05, %v479_v31  ;;  %2623 = vrcp.f32 %v508_v21  ;;  %v3437_v14 = vadd.f32 1e-05, %v480_v38  ;;  %v515_v0 = vsel %vm513_vm3, %v514_v41, %v512_v12 }
 0x1c7   : > { %v457_v20 = vpop.xlane.xlu1 %456  ;;  %v2616_v40 = vpop.eup %2615  ;;  %2625 = vrsqrt.f32 %v3415_v35  ;;  %v524_v31 = vmul.f32 %v2614_v23, %v3398_v59  ;;  %v535_v21 = vand.u32 2147483648, %v3400_v37  ;;  %v542_v38 = vand.u32 2147483648, %v3403_v6 }
 0x1c8   : > { %v481_v43 = vmul.f32 0.00390625, %v457_v20  ;;  %v460_v29 = vpop.xlane.xlu0 %459  ;;  %v531_v36 = vmul.f32 %v2616_v40, %v3400_v37  ;;  %2627 = vrsqrt.f32 %v3422_v25  ;;  %v519_v40 = vsel %vm518_vm4, %v3396_v34, %v517_v15 }
 0x1c9   : > { %2629 = vrsqrt.f32 %v3437_v14  ;;  %v526_v41 = vsel %vm525_vm6, %v3398_v59, %v524_v31  ;;  %vm560_vm0 = vcmp.eq.f32.partialorder %v3415_v35, inf  ;;  %vm562_vm1 = vcmp.eq.f32.partialorder %v3415_v35, 0.0 }
 0x1ca   : > { %v2618_v27 = vpop.eup %2617  ;;  %v3445_v52 = vadd.f32 1e-05, %v481_v43  ;;  %v533_v43 = vsel %vm532_vm8, %v3400_v37, %v531_v36  ;;  %2631 = vrcp.f32 %v515_v0  ;;  %v522_v0 = vsel %vm520_vm5, %v521_v13, %v519_v40 }
 0x1cb   : > { %v538_v54 = vmul.f32 %v2618_v27, %v3403_v6  ;;  %v463_v23 = vpop.xlane.xlu1 %462  ;;  %v482_v27 = vmul.f32 0.00390625, %v460_v29  ;;  %v536_v29 = vsel %vm534_vm9, %v535_v21, %v533_v43  ;;  %vm567_vm2 = vcmp.eq.f32.partialorder %v3422_v25, inf }
 0x1cc   : > { %2633 = vrsqrt.f32 %v3445_v52  ;;  %v466_v5 = vpop.xlane.xlu0 %465  ;;  %v483_v31 = vmul.f32 0.00390625, %v463_v23  ;;  %vm569_vm3 = vcmp.eq.f32.partialorder %v3422_v25, 0.0  ;;  %v570_v43 = vand.u32 2147483648, %v3422_v25 }
 0x1cd   : > { %v540_v15 = vsel %vm539_vm10, %v3403_v6, %v538_v54  ;;  %v556_v54 = vand.u32 2147483648, %v3407_v24  ;;  %v484_v3 = vmul.f32 0.00390625, %v466_v5  ;;  %2635 = vrcp.f32 %v522_v0 }
 0x1ce   : > { %v2620_v20 = vpop.eup %2619  ;;  %v3484_v18 = vadd.f32 1e-05, %v482_v27  ;;  %v543_v34 = vsel %vm541_vm11, %v542_v38, %v540_v15  ;;  %v3489_v37 = vadd.f32 1e-05, %v483_v31  ;;  %vm574_vm4 = vcmp.eq.f32.partialorder %v3437_v14, inf }
 0x1cf   : > { %v2622_v49 = vpop.eup %2621  ;;  %v552_v12 = vmul.f32 %v2620_v20, %v3407_v24  ;;  %v529_v20 = vsel %vm527_vm7, %v528_v32, %v526_v41  ;;  %v563_v32 = vand.u32 2147483648, %v3415_v35  ;;  %v469_v21 = vpop.xlane.xlu1 %468  ;;  %vm581_vm5 = vcmp.eq.f32.partialorder %v3445_v52, inf }
 0x1d0   : > { %v2624_v22 = vpop.eup %2623  ;;  %v545_v36 = vmul.f32 %v2622_v49, %v3410_v44  ;;  %2637 = vrcp.f32 %v529_v20  ;;  %v3500_v49 = vadd.f32 1e-05, %v484_v3  ;;  %vm583_vm6 = vcmp.eq.f32.partialorder %v3445_v52, 0.0 }
 0x1d1   : > { %v2626_v50 = vpop.eup %2625  ;;  %v554_v23 = vsel %vm553_vm14, %v3407_v24, %v552_v12  ;;  %v616_v13 = vmul.f32 %v2624_v22, %v3237_v45  ;;  %2639 = vrcp.f32 %v536_v29  ;;  %v615_v6 = vmul.f32 %v2624_v22, %v3234_v42 }
 0x1d2   : > { %v2628_v59 = vpop.eup %2627  ;;  %v547_v5 = vsel %vm546_vm12, %v3410_v44, %v545_v36  ;;  %2641 = vrcp.f32 %v543_v34  ;;  %v559_v38 = vmul.f32 %v2626_v50, %v3415_v35  ;;  %v557_v45 = vsel %vm555_vm15, %v556_v54, %v554_v23 }
 0x1d3   : > { %v2630_v40 = vpop.eup %2629  ;;  %v566_v41 = vmul.f32 %v2628_v59, %v3422_v25  ;;  %2643 = vrsqrt.f32 %v3484_v18  ;;  %v485_v50 = vmul.f32 0.00390625, %v469_v21  ;;  %v674_v22 = vmul.f32 %v3417_v60, %v616_v13 }
 0x1d4   : > { %v2632_v42 = vpop.eup %2631  ;;  %2645 = vrsqrt.f32 %v3489_v37  ;;  %v550_v3 = vsel %vm548_vm13, %v549_v26, %v547_v5  ;;  %v673_v15 = vmul.f32 %v3419_v61, %v615_v6  ;;  %v561_v31 = vsel %vm560_vm0, %v3415_v35, %v559_v38 }
 0x1d5   : > { %v619_v12 = vmul.f32 %v2632_v42, %v3257_v4  ;;  %v618_v27 = vmul.f32 %v2632_v42, %v3254_v53  ;;  %2647 = vrcp.f32 %v557_v45  ;;  %v577_v36 = vand.u32 2147483648, %v3437_v14 }
 0x1d6   : > { %v2634_v24 = vpop.eup %2633  ;;  %2649 = vrsqrt.f32 %v3500_v49  ;;  %v568_v26 = vsel %vm567_vm2, %v3422_v25, %v566_v41  ;;  %v573_v0 = vmul.f32 %v2630_v40, %v3437_v14  ;;  %v3529_v29 = vadd.f32 1e-05, %v485_v50  ;;  %v2559_v50 = vld [vmem:[#allocation8 + $0x10] ss:$24 sps:$4 sm:$0xff]  }
 0x1d7   : > { %v676_v4 = vmul.f32 %v3417_v60, %v619_v12  ;;  %v675_v53 = vmul.f32 %v3419_v61, %v618_v27  ;;  %2651 = vrcp.f32 %v550_v3  ;;  %v2636_v44 = vpop.eup %2635  ;;  %v580_v20 = vmul.f32 %v2634_v24, %v3445_v52 }
 0x1d8   : > { %v717_v54 = vadd.f32 %v3424_v28, %v674_v22  ;;  %v716_v59 = vadd.f32 %v3426_v17, %v673_v15  ;;  %v622_v5 = vmul.f32 %v2636_v44, %v3243_v47  ;;  %v621_v38 = vmul.f32 %v2636_v44, %v3240_v46 }
 0x1d9   : > { %v719_v34 = vadd.f32 %v3424_v28, %v676_v4  ;;  %v718_v13 = vadd.f32 %v3426_v17, %v675_v53  ;;  %v571_v40 = vsel %vm569_vm3, %v570_v43, %v568_v26  ;;  %v564_v25 = vsel %vm562_vm1, %v563_v32, %v561_v31  ;;  %v2562_v26 = vld [vmem:[#allocation8 + $0x40] ss:$24 sps:$4 sm:$0xff]  }
 0x1da   : > { %v2638_v23 = vpop.eup %2637  ;;  %v678_v3 = vmul.f32 %v3417_v60, %v622_v5  ;;  %v582_v12 = vsel %vm581_vm5, %v3445_v52, %v580_v20  ;;  %v584_v27 = vand.u32 2147483648, %v3445_v52  ;;  %2653 = vrcp.f32 %v571_v40 }
 0x1db   : > { %v2640_v21 = vpop.eup %2639  ;;  %v625_v6 = vmul.f32 %v2638_v23, %v3263_v56  ;;  %v624_v45 = vmul.f32 %v2638_v23, %v3260_v55  ;;  %v3541_v42 = vpack.c.bf16 %v719_v34, %v717_v54  ;;  %v3543_v22 = vpack.c.bf16 %v718_v13, %v716_v59  ;;  %v2564_v56 = vld [vmem:[#allocation8 + $0x44] ss:$24 sps:$4 sm:$0xff]   ;;  %v2567_v54 = vld [vmem:[#allocation8 + $0x74] ss:$24 sps:$4 sm:$0xff]  }
 0x1dc   : > { %v2642_v41 = vpop.eup %2641  ;;  %v628_v47 = vmul.f32 %v2640_v21, %v3277_v63  ;;  %2655 = vrsqrt.f32 %v3529_v29  ;;  %v677_v32 = vmul.f32 %v3419_v61, %v621_v38  ;;  %v575_v31 = vsel %vm574_vm4, %v3437_v14, %v573_v0 }
 0x1dd   : > { %v680_v24 = vmul.f32 %v3417_v60, %v625_v6  ;;  %v679_v46 = vmul.f32 %v3419_v61, %v624_v45  ;;  %v631_v55 = vmul.f32 %v2642_v41, %v3283_v10  ;;  %v2644_v43 = vpop.eup %2643  ;;  %1372 = vmatprep.mubr.bf16.mxu0 %v3541_v42  ;;  %1485 = vmatprep.mubr.bf16.mxu1 %v3541_v42  ;;  %2657 = vrcp.f32 %v564_v25 }
 0x1de   : > { %v2646_v63 = vpop.eup %2645  ;;  %1373 = vmatmul.mubr.bf16.vlgmr.msra.gmra.mrb[0].mxu0 %v3543_v22  ;;  %1486 = vmatmul.mubr.bf16.vlgmr.msra.gmra.mrb[0].mxu1 %v3543_v22  ;;  %v721_v10 = vadd.f32 %v3424_v28, %v678_v3  ;;  %v682_v4 = vmul.f32 %v3417_v60, %v628_v47  ;;  %vm576_vm7 = vcmp.eq.f32.partialorder %v3437_v14, 0.0  ;;  %v630_v0 = vmul.f32 %v2642_v41, %v3280_v7  ;;  %v2570_v14 = vld [vmem:[#allocation8 + $0xa4] ss:$24 sps:$4 sm:$0xff]  }
 0x1df   : > { %v723_v35 = vadd.f32 %v3424_v28, %v680_v24  ;;  %v2648_v15 = vpop.eup %2647  ;;  %1567 = vmatpush1.bf16.msra.mxu0 %v2559_v50  ;;  %2362 = vmatpush1.bf16.msra.mxu1 %v2559_v50  ;;  %v684_v53 = vmul.f32 %v3417_v60, %v631_v55  ;;  %v722_v23 = vadd.f32 %v3426_v17, %v679_v46  ;;  %vm588_vm8 = vcmp.eq.f32.partialorder %v3484_v18, inf  ;;  %v2568_v55 = vld [vmem:[#allocation8 + $0xa0] ss:$24 sps:$4 sm:$0xff]  }
 0x1e0   : > { %v3570_v44 = vpop.eup %2649  ;;  %1568 = vmatprep.subr.bf16.mxu0 %v2564_v56  ;;  %2347 = vmatprep.subr.bf16.mxu1 %v2564_v56  ;;  %v587_v59 = vmul.f32 %v2644_v43, %v3484_v18  ;;  %v627_v13 = vmul.f32 %v2640_v21, %v3274_v9  ;;  %v585_v5 = vsel %vm583_vm6, %v584_v27, %v582_v12  ;;  %v2565_v9 = vld [vmem:[#allocation8 + $0x70] ss:$24 sps:$4 sm:$0xff]   ;;  %vm595_vm9 = vcmp.eq.f32.partialorder %v3489_v37, inf  ;;  %v2573_v12 = vld [vmem:[#allocation8 + $0xd4] ss:$24 sps:$4 sm:$0xff]  }
 0x1e1   : > { %v3573_v20 = vpack.c.bf16 %v723_v35, %v721_v10  ;;  %v2652_v34 = vpop.eup %2651  ;;  %v720_v6 = vadd.f32 %v3426_v17, %v677_v32  ;;  %v727_v38 = vadd.f32 %v3424_v28, %v684_v53  ;;  %v637_v7 = vmul.f32 %v2648_v15, %v3303_v48 }
 0x1e2   : > { %v594_v45 = vmul.f32 %v2646_v63, %v3489_v37  ;;  %v725_v52 = vadd.f32 %v3424_v28, %v682_v4  ;;  %v578_v21 = vsel %vm576_vm7, %v577_v36, %v575_v31  ;;  %v683_v48 = vmul.f32 %v3419_v61, %v630_v0 }
 0x1e3   : > { %1382 = vmatprep.mubr.bf16.mxu0 %v3573_v20  ;;  %1495 = vmatprep.mubr.bf16.mxu1 %v3573_v20  ;;  %v3594_v40 = vpack.c.bf16 %v722_v23, %v720_v6  ;;  %v634_v41 = vmul.f32 %v2652_v34, %v3297_v33  ;;  %v589_v50 = vsel %vm588_vm8, %v3484_v18, %v587_v59  ;;  %vm590_vm10 = vcmp.eq.f32.partialorder %v3484_v18, 0.0  ;;  %v2574_v6 = vld [vmem:[#allocation8 + $0x100] ss:$24 sps:$4 sm:$0xff]  }
 0x1e4   : > { %1569 = vmatpush1.bf16.msra.mxu0 %v2562_v26  ;;  %2363 = vmatpush1.bf16.msra.mxu1 %v2562_v26  ;;  %v591_v3 = vand.u32 2147483648, %v3484_v18  ;;  %2659 = vrcp.f32 %v585_v5  ;;  %v598_v36 = vand.u32 2147483648, %v3489_v37  ;;  %v3606_v47 = vpack.c.bf16 %v727_v38, %v725_v52  ;;  %v2654_v56 = vpop.eup %2653 }
 0x1e5   : > { %1570 = vmatprep.subr.bf16.mxu0 %v2567_v54  ;;  %2348 = vmatprep.subr.bf16.mxu1 %v2567_v54  ;;  %v681_v33 = vmul.f32 %v3419_v61, %v627_v13  ;;  %v688_v24 = vmul.f32 %v3417_v60, %v637_v7  ;;  %v596_v46 = vsel %vm595_vm9, %v3489_v37, %v594_v45  ;;  %vm597_vm11 = vcmp.eq.f32.partialorder %v3489_v37, 0.0  ;;  %v2579_v45 = vld [vmem:[#allocation8 + $0x134] ss:$24 sps:$4 sm:$0xff]  }
 0x1e6   : > { %1383 = vmatmul.mubr.bf16.gmra.mrb[4].mxu0 %v3594_v40  ;;  %1496 = vmatmul.mubr.bf16.gmra.mrb[4].mxu1 %v3594_v40  ;;  %v636_v25 = vmul.f32 %v2648_v15, %v3300_v39  ;;  %2661 = vrcp.f32 %v578_v21  ;;  %v2656_v43 = vpop.eup %2655  ;;  %v726_v27 = vadd.f32 %v3426_v17, %v683_v48  ;;  %v686_v63 = vmul.f32 %v3417_v60, %v634_v41 }
 0x1e7   : > { %1392 = vmatprep.mubr.bf16.mxu0 %v3606_v47  ;;  %1505 = vmatprep.mubr.bf16.mxu1 %v3606_v47  ;;  %v2658_v10 = vpop.eup %2657  ;;  %v633_v35 = vmul.f32 %v2652_v34, %v3294_v30  ;;  %v592_v32 = vsel %vm590_vm10, %v591_v3, %v589_v50  ;;  %v724_v39 = vadd.f32 %v3426_v17, %v681_v33  ;;  %v2571_v30 = vld [vmem:[#allocation8 + $0xd0] ss:$24 sps:$4 sm:$0xff]   ;;  %vm609_vm12 = vcmp.eq.f32.partialorder %v3529_v29, inf }
 0x1e8   : > { %1571 = vmatpush1.bf16.msra.mxu0 %v2565_v9  ;;  %2364 = vmatpush1.bf16.msra.mxu1 %v2565_v9  ;;  %v731_v15 = vadd.f32 %v3424_v28, %v688_v24  ;;  %v643_v31 = vmul.f32 %v2654_v56, %v3323_v58  ;;  %v599_v26 = vsel %vm597_vm11, %v598_v36, %v596_v46  ;;  %vm602_vm13 = vcmp.eq.f32.partialorder %v3500_v49, inf  ;;  %v2577_v36 = vld [vmem:[#allocation8 + $0x130] ss:$24 sps:$4 sm:$0xff]  }
 0x1e9   : > { %1572 = vmatprep.subr.bf16.mxu0 %v2570_v14  ;;  %2349 = vmatprep.subr.bf16.mxu1 %v2570_v14  ;;  %v601_v4 = vmul.f32 %v3570_v44, %v3500_v49  ;;  %v608_v53 = vmul.f32 %v2656_v43, %v3529_v29  ;;  %v687_v18 = vmul.f32 %v3419_v61, %v636_v25  ;;  %v2576_v44 = vld [vmem:[#allocation8 + $0x104] ss:$24 sps:$4 sm:$0xff]   ;;  %2663 = vrcp.f32 %v599_v26  ;;  %v2580_v25 = vld [vmem:[#allocation8 + $0x160] ss:$24 sps:$4 sm:$0xff]  }
 0x1ea   : > { %v3632_v54 = vpack.c.bf16 %v726_v27, %v724_v39  ;;  %v729_v58 = vadd.f32 %v3424_v28, %v686_v63  ;;  %v640_v37 = vmul.f32 %v2658_v10, %v3317_v2  ;;  %v685_v23 = vmul.f32 %v3419_v61, %v633_v35  ;;  %v2583_v39 = vld [vmem:[#allocation8 + $0x190] ss:$24 sps:$4 sm:$0xff]  }
 0x1eb   : > { %v605_v0 = vand.u32 2147483648, %v3500_v49  ;;  %v612_v34 = vand.u32 2147483648, %v3529_v29  ;;  %v692_v13 = vmul.f32 %v3417_v60, %v643_v31  ;;  %v610_v2 = vsel %vm609_vm12, %v3529_v29, %v608_v53 }
 0x1ec   : > { %1573 = vmatpush1.bf16.msra.mxu0 %v2568_v55  ;;  %2365 = vmatpush1.bf16.msra.mxu1 %v2568_v55  ;;  %v3642_v59 = vpack.c.bf16 %v731_v15, %v729_v58  ;;  %vm611_vm14 = vcmp.eq.f32.partialorder %v3529_v29, 0.0  ;;  %v730_v38 = vadd.f32 %v3426_v17, %v687_v18  ;;  %2665 = vrcp.f32 %v592_v32  ;;  %v2586_v58 = vld [vmem:[#allocation8 + $0x1c0] ss:$24 sps:$4 sm:$0xff]  }
 0x1ed   : > { %1574 = vmatprep.subr.bf16.mxu0 %v2573_v12  ;;  %2350 = vmatprep.subr.bf16.mxu1 %v2573_v12  ;;  %v603_v7 = vsel %vm602_vm13, %v3500_v49, %v601_v4  ;;  %vm604_vm15 = vcmp.eq.f32.partialorder %v3500_v49, 0.0  ;;  %v690_v9 = vmul.f32 %v3417_v60, %v640_v37  ;;  %v642_v52 = vmul.f32 %v2654_v56, %v3320_v57  ;;  %v2582_v56 = vld [vmem:[#allocation8 + $0x164] ss:$24 sps:$4 sm:$0xff]  }
 0x1ee   : > { %1393 = vmatmul.mubr.bf16.gmra.mrb[8].mxu0 %v3632_v54  ;;  %1506 = vmatmul.mubr.bf16.gmra.mrb[8].mxu1 %v3632_v54  ;;  %v2660_v5 = vpop.eup %2659  ;;  %v728_v48 = vadd.f32 %v3426_v17, %v685_v23  ;;  %v613_v41 = vsel %vm611_vm14, %v612_v34, %v610_v2  ;;  %v735_v50 = vadd.f32 %v3424_v28, %v692_v13  ;;  %v3877_v23 = vld [vmem:[#allocation16_spill] sm:$0xff]  ;;  %v3878_v2 = vld [vmem:[#allocation15_spill] sm:$0xff] }
 0x1ef   : > { %1402 = vmatprep.mubr.bf16.mxu0 %v3642_v59  ;;  %1515 = vmatprep.mubr.bf16.mxu1 %v3642_v59  ;;  %v639_v49 = vmul.f32 %v2658_v10, %v3314_v1  ;;  %v649_v3 = vmul.f32 %v2660_v5, %v3343_v16  ;;  %v606_v14 = vsel %vm604_vm15, %v605_v0, %v603_v7  ;;  %2667 = vrcp.f32 %v613_v41 }
 0x1f0   : > { %1575 = vmatpush1.bf16.msra.mxu0 %v2571_v30  ;;  %2366 = vmatpush1.bf16.msra.mxu1 %v2571_v30  ;;  %v2662_v21 = vpop.eup %2661  ;;  %v3664_v33 = vpack.c.bf16 %v730_v38, %v728_v48  ;;  %v733_v57 = vadd.f32 %v3424_v28, %v690_v9  ;;  %v691_v24 = vmul.f32 %v3419_v61, %v642_v52  ;;  %2669 = vrcp.f32 %v606_v14  ;;  %v3879_v38 = vld [vmem:[#allocation20_spill] sm:$0xff]  ;;  %v3880_v48 = vld [vmem:[#allocation18_spill] sm:$0xff] }
 0x1f1   : > { %1576 = vmatprep.subr.bf16.mxu0 %v2576_v44  ;;  %2351 = vmatprep.subr.bf16.mxu1 %v2576_v44  ;;  %v646_v29 = vmul.f32 %v2662_v21, %v3337_v8  ;;  %v689_v16 = vmul.f32 %v3419_v61, %v639_v49  ;;  %v696_v46 = vmul.f32 %v3417_v60, %v649_v3  ;;  %v2585_v8 = vld [vmem:[#allocation8 + $0x194] ss:$24 sps:$4 sm:$0xff]  }
 0x1f2   : > { %v3671_v1 = vpack.c.bf16 %v735_v50, %v733_v57  ;;  %v648_v43 = vmul.f32 %v2660_v5, %v3340_v11  ;;  %v734_v12 = vadd.f32 %v3426_v17, %v691_v24  ;;  %v645_v10 = vmul.f32 %v2662_v21, %v3334_v62  ;;  %v2588_v62 = vld [vmem:[#allocation8 + $0x1c4] ss:$24 sps:$4 sm:$0xff]   ;;  %v2597_v57 = vld [vmem:[#allocation8 + $0x254] ss:$24 sps:$4 sm:$0xff]  }
 0x1f3   : > { %v2664_v55 = vpop.eup %2663  ;;  %v694_v27 = vmul.f32 %v3417_v60, %v646_v29  ;;  %v732_v35 = vadd.f32 %v3426_v17, %v689_v16  ;;  %v739_v32 = vadd.f32 %v3424_v28, %v696_v46  ;;  %v2594_v50 = vld [vmem:[#allocation8 + $0x224] ss:$24 sps:$4 sm:$0xff]  }
 0x1f4   : > { %1577 = vmatpush1.bf16.msra.mxu0 %v2574_v6  ;;  %2367 = vmatpush1.bf16.msra.mxu1 %v2574_v6  ;;  %v655_v11 = vmul.f32 %v2664_v55, %v3363_v19  ;;  %v695_v15 = vmul.f32 %v3419_v61, %v648_v43  ;;  %v693_v53 = vmul.f32 %v3419_v61, %v645_v10 }
 0x1f5   : > { %1578 = vmatprep.subr.bf16.mxu0 %v2579_v45  ;;  %2352 = vmatprep.subr.bf16.mxu1 %v2579_v45  ;;  %v3685_v31 = vpack.c.bf16 %v734_v12, %v732_v35  ;;  %v737_v26 = vadd.f32 %v3424_v28, %v694_v27  ;;  %v654_v0 = vmul.f32 %v2664_v55, %v3877_v23  ;;  %v2589_v45 = vld [vmem:[#allocation8 + $0x1f0] ss:$24 sps:$4 sm:$0xff]  }
 0x1f6   : > { %1403 = vmatmul.mubr.bf16.gmra.mrb[12].mxu0 %v3664_v33  ;;  %1516 = vmatmul.mubr.bf16.gmra.mrb[12].mxu1 %v3664_v33  ;;  %v2666_v63 = vpop.eup %2665  ;;  %v700_v30 = vmul.f32 %v3417_v60, %v655_v11  ;;  %v738_v37 = vadd.f32 %v3426_v17, %v695_v15  ;;  %v736_v13 = vadd.f32 %v3426_v17, %v693_v53  ;;  %v2603_v11 = vld [vmem:[#allocation8 + $0x2b4] ss:$24 sps:$4 sm:$0xff]   ;;  %v2601_v15 = vld [vmem:[#allocation8 + $0x2b0] ss:$24 sps:$4 sm:$0xff]  }
 0x1f7   : > { %1412 = vmatprep.mubr.bf16.mxu0 %v3671_v1  ;;  %1525 = vmatprep.mubr.bf16.mxu1 %v3671_v1  ;;  %v652_v4 = vmul.f32 %v2666_v63, %v3357_v51  ;;  %v3692_v19 = vpack.c.bf16 %v739_v32, %v737_v26  ;;  %v2591_v51 = vld [vmem:[#allocation8 + $0x1f4] ss:$24 sps:$4 sm:$0xff]   ;;  %v651_v6 = vmul.f32 %v2666_v63, %v3878_v2  ;;  %v2600_v63 = vld [vmem:[#allocation8 + $0x284] ss:$24 sps:$4 sm:$0xff]   ;;  %v2598_v32 = vld [vmem:[#allocation8 + $0x280] ss:$24 sps:$4 sm:$0xff]  }
 0x1f8   : > { %1579 = vmatpush1.bf16.msra.mxu0 %v2577_v36  ;;  %2368 = vmatpush1.bf16.msra.mxu1 %v2577_v36  ;;  %v743_v5 = vadd.f32 %v3424_v28, %v700_v30  ;;  %v3704_v9 = vpack.c.bf16 %v738_v37, %v736_v13  ;;  %v699_v21 = vmul.f32 %v3419_v61, %v654_v0  ;;  %v2592_v36 = vld [vmem:[#allocation8 + $0x220] ss:$24 sps:$4 sm:$0xff]  }
 0x1f9   : > { %1580 = vmatprep.subr.bf16.mxu0 %v2582_v56  ;;  %2353 = vmatprep.subr.bf16.mxu1 %v2582_v56  ;;  %v2668_v18 = vpop.eup %2667  ;;  %v698_v44 = vmul.f32 %v3417_v60, %v652_v4  ;;  %v697_v3 = vmul.f32 %v3419_v61, %v651_v6  ;;  %v3881_v56 = vld [vmem:[#allocation19_spill] sm:$0xff] }
 0x1fa   : > { %v2670_v34 = vpop.eup %2669  ;;  %v661_v7 = vmul.f32 %v2668_v18, %v3879_v38  ;;  %v742_v24 = vadd.f32 %v3426_v17, %v699_v21  ;;  %v660_v16 = vmul.f32 %v2668_v18, %v3881_v56  ;;  %v2606_v4 = vld [vmem:[#allocation8 + $0x2e4] ss:$24 sps:$4 sm:$0xff]  }
 0x1fb   : > { %v741_v52 = vadd.f32 %v3424_v28, %v698_v44  ;;  %v658_v41 = vmul.f32 %v2670_v34, %v3880_v48  ;;  %v740_v46 = vadd.f32 %v3426_v17, %v697_v3 }
 0x1fc   : > { %1581 = vmatpush1.bf16.msra.mxu0 %v2580_v25  ;;  %2369 = vmatpush1.bf16.msra.mxu1 %v2580_v25  ;;  %v704_v14 = vmul.f32 %v3417_v60, %v661_v7  ;;  %v3882_v25 = vld [vmem:[#allocation17_spill] sm:$0xff] }
 0x1fd   : > { %1582 = vmatprep.subr.bf16.mxu0 %v2585_v8  ;;  %2354 = vmatprep.subr.bf16.mxu1 %v2585_v8  ;;  %v3711_v49 = vpack.c.bf16 %v743_v5, %v741_v52  ;;  %v702_v29 = vmul.f32 %v3417_v60, %v658_v41  ;;  %v657_v43 = vmul.f32 %v2670_v34, %v3882_v25  ;;  %v2595_v8 = vld [vmem:[#allocation8 + $0x250] ss:$24 sps:$4 sm:$0xff]  }
 0x1fe   : > { %1413 = vmatmul.mubr.bf16.gmra.mrb[16].mxu0 %v3685_v31  ;;  %1526 = vmatmul.mubr.bf16.gmra.mrb[16].mxu1 %v3685_v31  ;;  %v747_v55 = vadd.f32 %v3424_v28, %v704_v14  ;;  %v760_v12 = vpack.c.bf16 %v742_v24, %v740_v46  ;;  %v703_v60 = vmul.f32 %v3419_v61, %v660_v16 }
 0x1ff   : > { %1422 = vmatprep.mubr.bf16.mxu0 %v3692_v19  ;;  %1535 = vmatprep.mubr.bf16.mxu1 %v3692_v19  ;;  %v745_v27 = vadd.f32 %v3424_v28, %v702_v29  ;;  %v701_v35 = vmul.f32 %v3419_v61, %v657_v43  ;;  %v2604_v61 = vld [vmem:[#allocation8 + $0x2e0] ss:$24 sps:$4 sm:$0xff]  }
 0x200   : > { %1583 = vmatpush1.bf16.msra.mxu0 %v2583_v39  ;;  %2370 = vmatpush1.bf16.msra.mxu1 %v2583_v39  ;;  %v746_v39 = vadd.f32 %v3426_v17, %v703_v60 }
 0x201   : > { %1584 = vmatprep.subr.bf16.mxu0 %v2588_v62  ;;  %2355 = vmatprep.subr.bf16.mxu1 %v2588_v62  ;;  %v763_v10 = vpack.c.bf16 %v747_v55, %v745_v27  ;;  %v744_v28 = vadd.f32 %v3426_v17, %v701_v35 }
 0x203   : > { %v762_v26 = vpack.c.bf16 %v746_v39, %v744_v28 }
 0x204   : > { %1585 = vmatpush1.bf16.msra.mxu0 %v2586_v58  ;;  %2371 = vmatpush1.bf16.msra.mxu1 %v2586_v58 }
 0x205   : > { %1586 = vmatprep.subr.bf16.mxu0 %v2591_v51  ;;  %2356 = vmatprep.subr.bf16.mxu1 %v2591_v51 }
 0x206   : > { %1423 = vmatmul.mubr.bf16.gmra.mrb[20].mxu0 %v3704_v9  ;;  %1536 = vmatmul.mubr.bf16.gmra.mrb[20].mxu1 %v3704_v9 }
 0x207   : > { %1432 = vmatprep.mubr.bf16.mxu0 %v3711_v49  ;;  %1545 = vmatprep.mubr.bf16.mxu1 %v3711_v49 }
 0x208   : > { %1587 = vmatpush1.bf16.msra.mxu0 %v2589_v45  ;;  %2372 = vmatpush1.bf16.msra.mxu1 %v2589_v45 }
 0x209   : > { %1588 = vmatprep.subr.bf16.mxu0 %v2594_v50  ;;  %2357 = vmatprep.subr.bf16.mxu1 %v2594_v50 }
 0x20c   : > { %1589 = vmatpush1.bf16.msra.mxu0 %v2592_v36  ;;  %2373 = vmatpush1.bf16.msra.mxu1 %v2592_v36 }
 0x20d   : > { %1590 = vmatprep.subr.bf16.mxu0 %v2597_v57  ;;  %2358 = vmatprep.subr.bf16.mxu1 %v2597_v57 }
 0x20e   : > { %1433 = vmatmul.mubr.bf16.gmra.mrb[24].mxu0 %v760_v12  ;;  %1546 = vmatmul.mubr.bf16.gmra.mrb[24].mxu1 %v760_v12 }
 0x20f   : > { %1442 = vmatprep.mubr.bf16.mxu0 %v763_v10  ;;  %1555 = vmatprep.mubr.bf16.mxu1 %v763_v10 }
 0x210   : > { %1591 = vmatpush1.bf16.msra.mxu0 %v2595_v8  ;;  %2374 = vmatpush1.bf16.msra.mxu1 %v2595_v8 }
 0x211   : > { %1592 = vmatprep.subr.bf16.mxu0 %v2600_v63  ;;  %2359 = vmatprep.subr.bf16.mxu1 %v2600_v63 }
 0x214   : > { %1593 = vmatpush1.bf16.msra.mxu0 %v2598_v32  ;;  %2375 = vmatpush1.bf16.msra.mxu1 %v2598_v32 }
 0x215   : > { %1594 = vmatprep.subr.bf16.mxu0 %v2603_v11  ;;  %2360 = vmatprep.subr.bf16.mxu1 %v2603_v11 }
 0x216   : > { %1443 = vmatmul.mubr.bf16.gmra.mrb[28].mxu0 %v762_v26  ;;  %1556 = vmatmul.mubr.bf16.gmra.mrb[28].mxu1 %v762_v26 }
 0x217   : > { %1598 = vmatprep.mubr.bf16.mxu0 %v3541_v42  ;;  %1638 = vmatprep.mubr.bf16.mxu1 %v3671_v1 }
 0x218   : > { %1595 = vmatpush1.bf16.msra.mxu0 %v2601_v15  ;;  %2376 = vmatpush1.bf16.msra.mxu1 %v2601_v15 }
 0x219   : > { %1596 = vmatprep.subr.bf16.mxu0 %v2606_v4  ;;  %2361 = vmatprep.subr.bf16.mxu1 %v2606_v4 }
 0x21c   : > { %1597 = vmatpush1.bf16.msra.mxu0 %v2604_v61  ;;  %2377 = vmatpush1.bf16.msra.mxu1 %v2604_v61 }
 0x21f   : > { %1599 = vmatmul.mubr.bf16.vlgmr.msra.gmra.mrb[32].mxu0 %v3543_v22  ;;  %1639 = vmatmul.mubr.bf16.vlgmr.msra.gmra.mrb[32].mxu1 %v3685_v31 }
 0x220   : > { %1608 = vmatprep.mubr.bf16.mxu0 %v3573_v20  ;;  %1648 = vmatprep.mubr.bf16.mxu1 %v3692_v19 }
 0x227   : > { %1609 = vmatmul.mubr.bf16.gmra.mrb[36].mxu0 %v3594_v40  ;;  %1649 = vmatmul.mubr.bf16.gmra.mrb[36].mxu1 %v3704_v9 }
 0x228   : > { %1618 = vmatprep.mubr.bf16.mxu0 %v3606_v47  ;;  %1658 = vmatprep.mubr.bf16.mxu1 %v3711_v49 }
 0x22f   : > { %1619 = vmatmul.mubr.bf16.gmra.mrb[40].mxu0 %v3632_v54  ;;  %1659 = vmatmul.mubr.bf16.gmra.mrb[40].mxu1 %v760_v12 }
 0x230   : > { %1628 = vmatprep.mubr.bf16.mxu0 %v3642_v59  ;;  %1668 = vmatprep.mubr.bf16.mxu1 %v763_v10 }
 0x237   : > { %1629 = vmatmul.mubr.bf16.gmra.mrb[44].mxu0 %v3664_v33  ;;  %1669 = vmatmul.mubr.bf16.gmra.mrb[44].mxu1 %v762_v26 }
 0x2b1   : > { %v1374_v17 = vpop.f32.mrb[0].mxu0  ;;  %v1487_v42 = vpop.f32.mrb[0].mxu1 }
 0x2b2   : > { %v1376_v22 = vpop.f32.mrb[1].mxu0  ;;  %v1489_v20 = vpop.f32.mrb[1].mxu1 }
 0x2b3   : > { %v2298_v40 = vpack.c.bf16 %v1376_v22, %v1374_v17  ;;  %v2299_v1 = vpack.c.bf16 %v1489_v20, %v1487_v42  ;;  %v1378_v31 = vpop.f32.mrb[2].mxu0  ;;  %v1491_v47 = vpop.f32.mrb[2].mxu1 }
 0x2b4   : > { %v1380_v62 = vpop.f32.mrb[3].mxu0  ;;  %v1493_v53 = vpop.f32.mrb[3].mxu1 }
 0x2b5   : > { %1967 = vst [vmem:[%s3742_s23] sm:$0xff] %v2298_v40  ;;  %1968 = vst [vmem:[%s3742_s23 + $0x8] sm:$0xff] %v2299_v1  ;;  %v2301_v54 = vpack.c.bf16 %v1380_v62, %v1378_v31  ;;  %v2302_v59 = vpack.c.bf16 %v1493_v53, %v1491_v47 }
 0x2b7   : > { %1970 = vst [vmem:[%s3742_s23 + $0x18] sm:$0xff] %v2301_v54  ;;  %1971 = vst [vmem:[%s3742_s23 + $0x20] sm:$0xff] %v2302_v59 }
 0x2b9   : > { %v1384_v33 = vpop.f32.mrb[4].mxu0  ;;  %v1497_v19 = vpop.f32.mrb[4].mxu1 }
 0x2ba   : > { %v1386_v30 = vpop.f32.mrb[5].mxu0  ;;  %v1499_v18 = vpop.f32.mrb[5].mxu1 }
 0x2bb   : > { %v2304_v58 = vpack.c.bf16 %v1386_v30, %v1384_v33  ;;  %v2305_v37 = vpack.c.bf16 %v1499_v18, %v1497_v19  ;;  %v1388_v51 = vpop.f32.mrb[6].mxu0  ;;  %v1501_v44 = vpop.f32.mrb[6].mxu1 }
 0x2bc   : > { %v1390_v23 = vpop.f32.mrb[7].mxu0  ;;  %v1503_v0 = vpop.f32.mrb[7].mxu1 }
 0x2bd   : > { %1973 = vst [vmem:[%s3742_s23 + $0x30] sm:$0xff] %v2304_v58  ;;  %1974 = vst [vmem:[%s3742_s23 + $0x38] sm:$0xff] %v2305_v37  ;;  %v2307_v34 = vpack.c.bf16 %v1390_v23, %v1388_v51  ;;  %v2308_v13 = vpack.c.bf16 %v1503_v0, %v1501_v44 }
 0x2bf   : > { %1976 = vst [vmem:[%s3742_s23 + $0x48] sm:$0xff] %v2307_v34  ;;  %1977 = vst [vmem:[%s3742_s23 + $0x50] sm:$0xff] %v2308_v13 }
 0x2c1   : > { %v1394_v5 = vpop.f32.mrb[8].mxu0  ;;  %v1507_v2 = vpop.f32.mrb[8].mxu1 }
 0x2c2   : > { %v1396_v6 = vpop.f32.mrb[9].mxu0  ;;  %v1509_v38 = vpop.f32.mrb[9].mxu1 }
 0x2c3   : > { %v2310_v7 = vpack.c.bf16 %v1396_v6, %v1394_v5  ;;  %v2311_v45 = vpack.c.bf16 %v1509_v38, %v1507_v2  ;;  %v1398_v9 = vpop.f32.mrb[10].mxu0  ;;  %v1511_v52 = vpop.f32.mrb[10].mxu1 }
 0x2c4   : > { %v1400_v21 = vpop.f32.mrb[11].mxu0  ;;  %v1513_v48 = vpop.f32.mrb[11].mxu1 }
 0x2c5   : > { %1979 = vst [vmem:[%s3742_s23 + $0x60] sm:$0xff] %v2310_v7  ;;  %1980 = vst [vmem:[%s3742_s23 + $0x68] sm:$0xff] %v2311_v45  ;;  %v2313_v41 = vpack.c.bf16 %v1400_v21, %v1398_v9  ;;  %v2314_v50 = vpack.c.bf16 %v1513_v48, %v1511_v52 }
 0x2c7   : > { %1982 = vst [vmem:[%s3742_s23 + $0x78] sm:$0xff] %v2313_v41  ;;  %1983 = vst [vmem:[%s3742_s23 + $0x80] sm:$0xff] %v2314_v50 }
 0x2c9   : > { %v1404_v49 = vpop.f32.mrb[12].mxu0  ;;  %v1517_v3 = vpop.f32.mrb[12].mxu1 }
 0x2ca   : > { %v1406_v14 = vpop.f32.mrb[13].mxu0  ;;  %v1519_v36 = vpop.f32.mrb[13].mxu1 }
 0x2cb   : > { %v2316_v57 = vpack.c.bf16 %v1406_v14, %v1404_v49  ;;  %v2317_v24 = vpack.c.bf16 %v1519_v36, %v1517_v3  ;;  %v1408_v29 = vpop.f32.mrb[14].mxu0  ;;  %v1521_v56 = vpop.f32.mrb[14].mxu1 }
 0x2cc   : > { %v1410_v16 = vpop.f32.mrb[15].mxu0  ;;  %v1523_v46 = vpop.f32.mrb[15].mxu1 }
 0x2cd   : > { %1985 = vst [vmem:[%s3742_s23 + $0x90] sm:$0xff] %v2316_v57  ;;  %1986 = vst [vmem:[%s3742_s23 + $0x98] sm:$0xff] %v2317_v24  ;;  %v2319_v55 = vpack.c.bf16 %v1410_v16, %v1408_v29  ;;  %v2320_v25 = vpack.c.bf16 %v1523_v46, %v1521_v56 }
 0x2cf   : > { %1988 = vst [vmem:[%s3742_s23 + $0xa8] sm:$0xff] %v2319_v55  ;;  %1989 = vst [vmem:[%s3742_s23 + $0xb0] sm:$0xff] %v2320_v25 }
 0x2d1   : > { %v1414_v43 = vpop.f32.mrb[16].mxu0  ;;  %v1527_v8 = vpop.f32.mrb[16].mxu1 }
 0x2d2   : > { %v1416_v12 = vpop.f32.mrb[17].mxu0  ;;  %v1529_v27 = vpop.f32.mrb[17].mxu1 }
 0x2d3   : > { %v2322_v60 = vpack.c.bf16 %v1416_v12, %v1414_v43  ;;  %v2323_v63 = vpack.c.bf16 %v1529_v27, %v1527_v8  ;;  %v1418_v10 = vpop.f32.mrb[18].mxu0  ;;  %v1531_v35 = vpop.f32.mrb[18].mxu1 }
 0x2d4   : > { %v1420_v32 = vpop.f32.mrb[19].mxu0  ;;  %v1533_v11 = vpop.f32.mrb[19].mxu1 }
 0x2d5   : > { %1991 = vst [vmem:[%s3742_s23 + $0xc0] sm:$0xff] %v2322_v60  ;;  %1992 = vst [vmem:[%s3742_s23 + $0xc8] sm:$0xff] %v2323_v63  ;;  %v2325_v39 = vpack.c.bf16 %v1420_v32, %v1418_v10  ;;  %v2326_v28 = vpack.c.bf16 %v1533_v11, %v1531_v35 }
 0x2d7   : > { %1994 = vst [vmem:[%s3742_s23 + $0xd8] sm:$0xff] %v2325_v39  ;;  %1995 = vst [vmem:[%s3742_s23 + $0xe0] sm:$0xff] %v2326_v28 }
 0x2d9   : > { %v1424_v15 = vpop.f32.mrb[20].mxu0  ;;  %v1537_v26 = vpop.f32.mrb[20].mxu1 }
 0x2da   : > { %v1426_v4 = vpop.f32.mrb[21].mxu0  ;;  %v1539_v61 = vpop.f32.mrb[21].mxu1 }
 0x2db   : > { %v2328_v17 = vpack.c.bf16 %v1426_v4, %v1424_v15  ;;  %v2329_v42 = vpack.c.bf16 %v1539_v61, %v1537_v26  ;;  %v1428_v22 = vpop.f32.mrb[22].mxu0  ;;  %v1541_v20 = vpop.f32.mrb[22].mxu1 }
 0x2dc   : > { %v1430_v40 = vpop.f32.mrb[23].mxu0  ;;  %v1543_v1 = vpop.f32.mrb[23].mxu1 }
 0x2dd   : > { %1997 = vst [vmem:[%s3742_s23 + $0xf0] sm:$0xff] %v2328_v17  ;;  %1998 = vst [vmem:[%s3742_s23 + $0xf8] sm:$0xff] %v2329_v42  ;;  %v2331_v31 = vpack.c.bf16 %v1430_v40, %v1428_v22  ;;  %v2332_v47 = vpack.c.bf16 %v1543_v1, %v1541_v20 }
 0x2df   : > { %2000 = vst [vmem:[%s3742_s23 + $0x108] sm:$0xff] %v2331_v31  ;;  %2001 = vst [vmem:[%s3742_s23 + $0x110] sm:$0xff] %v2332_v47 }
 0x2e1   : > { %v1434_v62 = vpop.f32.mrb[24].mxu0  ;;  %v1547_v53 = vpop.f32.mrb[24].mxu1 }
 0x2e2   : > { %v1436_v54 = vpop.f32.mrb[25].mxu0  ;;  %v1549_v59 = vpop.f32.mrb[25].mxu1 }
 0x2e3   : > { %v2334_v33 = vpack.c.bf16 %v1436_v54, %v1434_v62  ;;  %v2335_v19 = vpack.c.bf16 %v1549_v59, %v1547_v53  ;;  %v1438_v30 = vpop.f32.mrb[26].mxu0  ;;  %v1551_v18 = vpop.f32.mrb[26].mxu1 }
 0x2e4   : > { %v1440_v58 = vpop.f32.mrb[27].mxu0  ;;  %v1553_v37 = vpop.f32.mrb[27].mxu1 }
 0x2e5   : > { %2003 = vst [vmem:[%s3742_s23 + $0x120] sm:$0xff] %v2334_v33  ;;  %2004 = vst [vmem:[%s3742_s23 + $0x128] sm:$0xff] %v2335_v19  ;;  %v2337_v51 = vpack.c.bf16 %v1440_v58, %v1438_v30  ;;  %v2338_v44 = vpack.c.bf16 %v1553_v37, %v1551_v18 }
 0x2e7   : > { %2006 = vst [vmem:[%s3742_s23 + $0x138] sm:$0xff] %v2337_v51  ;;  %2007 = vst [vmem:[%s3742_s23 + $0x140] sm:$0xff] %v2338_v44 }
 0x2e9   : > { %v1444_v23 = vpop.f32.mrb[28].mxu0  ;;  %v1557_v0 = vpop.f32.mrb[28].mxu1 }
 0x2ea   : > { %v1446_v34 = vpop.f32.mrb[29].mxu0  ;;  %v1559_v13 = vpop.f32.mrb[29].mxu1 }
 0x2eb   : > { %v2340_v5 = vpack.c.bf16 %v1446_v34, %v1444_v23  ;;  %v2341_v2 = vpack.c.bf16 %v1559_v13, %v1557_v0  ;;  %v1448_v6 = vpop.f32.mrb[30].mxu0  ;;  %v1561_v38 = vpop.f32.mrb[30].mxu1 }
 0x2ec   : > { %v1450_v7 = vpop.f32.mrb[31].mxu0  ;;  %v1563_v45 = vpop.f32.mrb[31].mxu1 }
 0x2ed   : > { %2009 = vst [vmem:[%s3742_s23 + $0x150] sm:$0xff] %v2340_v5  ;;  %2010 = vst [vmem:[%s3742_s23 + $0x158] sm:$0xff] %v2341_v2  ;;  %v2343_v9 = vpack.c.bf16 %v1450_v7, %v1448_v6  ;;  %v2344_v52 = vpack.c.bf16 %v1563_v45, %v1561_v38 }
 0x2ef   : > { %2012 = vst [vmem:[%s3742_s23 + $0x168] sm:$0xff] %v2343_v9  ;;  %2013 = vst [vmem:[%s3742_s23 + $0x170] sm:$0xff] %v2344_v52 }
 0x2f2   : > { %v1600_v21 = vpop.f32.mrb[32].mxu0  ;;  %v1640_v48 = vpop.f32.mrb[32].mxu1 }
 0x2f3   : > { %v1602_v41 = vpop.f32.mrb[33].mxu0  ;;  %v1642_v50 = vpop.f32.mrb[33].mxu1 }
 0x2f4   : > { %v2300_v49 = vpack.c.bf16 %v1602_v41, %v1600_v21  ;;  %v2324_v3 = vpack.c.bf16 %v1642_v50, %v1640_v48  ;;  %v1604_v14 = vpop.f32.mrb[34].mxu0  ;;  %v1644_v36 = vpop.f32.mrb[34].mxu1 }
 0x2f5   : > { %v1606_v57 = vpop.f32.mrb[35].mxu0  ;;  %v1646_v24 = vpop.f32.mrb[35].mxu1 }
 0x2f6   : > { %1969 = vst [vmem:[%s3742_s23 + $0x10] sm:$0xff] %v2300_v49  ;;  %1993 = vst [vmem:[%s3742_s23 + $0xd0] sm:$0xff] %v2324_v3  ;;  %v2303_v29 = vpack.c.bf16 %v1606_v57, %v1604_v14  ;;  %v2327_v56 = vpack.c.bf16 %v1646_v24, %v1644_v36 }
 0x2f8   : > { %1972 = vst [vmem:[%s3742_s23 + $0x28] sm:$0xff] %v2303_v29  ;;  %1996 = vst [vmem:[%s3742_s23 + $0xe8] sm:$0xff] %v2327_v56 }
 0x2fa   : > { %v1610_v16 = vpop.f32.mrb[36].mxu0  ;;  %v1650_v46 = vpop.f32.mrb[36].mxu1 }
 0x2fb   : > { %v1612_v55 = vpop.f32.mrb[37].mxu0  ;;  %v1652_v25 = vpop.f32.mrb[37].mxu1 }
 0x2fc   : > { %v2306_v43 = vpack.c.bf16 %v1612_v55, %v1610_v16  ;;  %v2330_v8 = vpack.c.bf16 %v1652_v25, %v1650_v46  ;;  %v1614_v12 = vpop.f32.mrb[38].mxu0  ;;  %v1654_v27 = vpop.f32.mrb[38].mxu1 }
 0x2fd   : > { %v1616_v60 = vpop.f32.mrb[39].mxu0  ;;  %v1656_v63 = vpop.f32.mrb[39].mxu1 }
 0x2fe   : > { %1975 = vst [vmem:[%s3742_s23 + $0x40] sm:$0xff] %v2306_v43  ;;  %1999 = vst [vmem:[%s3742_s23 + $0x100] sm:$0xff] %v2330_v8  ;;  %v2309_v10 = vpack.c.bf16 %v1616_v60, %v1614_v12  ;;  %v2333_v35 = vpack.c.bf16 %v1656_v63, %v1654_v27 }
 0x300   : > { %1978 = vst [vmem:[%s3742_s23 + $0x58] sm:$0xff] %v2309_v10  ;;  %2002 = vst [vmem:[%s3742_s23 + $0x118] sm:$0xff] %v2333_v35 }
 0x302   : > { %v1620_v32 = vpop.f32.mrb[40].mxu0  ;;  %v1660_v11 = vpop.f32.mrb[40].mxu1 }
 0x303   : > { %v1622_v39 = vpop.f32.mrb[41].mxu0  ;;  %v1662_v28 = vpop.f32.mrb[41].mxu1 }
 0x304   : > { %v2312_v15 = vpack.c.bf16 %v1622_v39, %v1620_v32  ;;  %v2336_v26 = vpack.c.bf16 %v1662_v28, %v1660_v11  ;;  %v1624_v4 = vpop.f32.mrb[42].mxu0  ;;  %v1664_v61 = vpop.f32.mrb[42].mxu1 }
 0x305   : > { %v1626_v17 = vpop.f32.mrb[43].mxu0  ;;  %v1666_v42 = vpop.f32.mrb[43].mxu1 }
 0x306   : > { %1981 = vst [vmem:[%s3742_s23 + $0x70] sm:$0xff] %v2312_v15  ;;  %2005 = vst [vmem:[%s3742_s23 + $0x130] sm:$0xff] %v2336_v26  ;;  %v2315_v22 = vpack.c.bf16 %v1626_v17, %v1624_v4  ;;  %v2339_v20 = vpack.c.bf16 %v1666_v42, %v1664_v61 }
 0x308   : > { %1984 = vst [vmem:[%s3742_s23 + $0x88] sm:$0xff] %v2315_v22  ;;  %2008 = vst [vmem:[%s3742_s23 + $0x148] sm:$0xff] %v2339_v20 }
 0x30a   : > { %v1630_v40 = vpop.f32.mrb[44].mxu0  ;;  %v1670_v1 = vpop.f32.mrb[44].mxu1 }
 0x30b   : > { %v1632_v31 = vpop.f32.mrb[45].mxu0  ;;  %v1672_v47 = vpop.f32.mrb[45].mxu1 }
 0x30c   : > { %v2318_v62 = vpack.c.bf16 %v1632_v31, %v1630_v40  ;;  %v2342_v53 = vpack.c.bf16 %v1672_v47, %v1670_v1  ;;  %v1634_v54 = vpop.f32.mrb[46].mxu0  ;;  %v1674_v59 = vpop.f32.mrb[46].mxu1 }
 0x30d   : > { %v1636_v33 = vpop.f32.mrb[47].mxu0  ;;  %v1676_v19 = vpop.f32.mrb[47].mxu1 }
 0x30e   : > { %1987 = vst [vmem:[%s3742_s23 + $0xa0] sm:$0xff] %v2318_v62  ;;  %2011 = vst [vmem:[%s3742_s23 + $0x160] sm:$0xff] %v2342_v53  ;;  %v2321_v30 = vpack.c.bf16 %v1636_v33, %v1634_v54  ;;  %v2345_v18 = vpack.c.bf16 %v1676_v19, %v1674_v59 }
 0x310   : > { %1990 = vst [vmem:[%s3742_s23 + $0xb8] sm:$0xff] %v2321_v30  ;;  %2014 = vst [vmem:[%s3742_s23 + $0x178] sm:$0xff] %v2345_v18 }
 0x311   : > { %2798 = shalt.err (!%p2795_p13)
}
 0x312   : > { %s2799_s26 = scalar_lea.hbm %s3793_s13, 6144  ;;  %s2803_s25 = scalar_lea.hbm %s3847_s4, 12288 }
 0x313   : > { %p2800_p0 = scmp.ne.s32.totalorder %s3793_s13, %s2799_s26  ;;  %p2804_p9 = scmp.lt.u32.totalorder %s3793_s13, %s3847_s4 }
 0x314   : > { %p2805_p12 = scmp.lt.u32.totalorder %s2803_s25, %s2799_s26  ;;  %p2807_p1 = scmp.lt.u32.totalorder %s2799_s26, %s3793_s13 }
 0x315   : > { %p2801_p5 = pnand %p2800_p0, %p3039_p6 }
 0x316   : > { %p2806_p2 = por %p2805_p12, %p2804_p9 }
 0x317   : > { %p2802_p11 = pneg %p2801_p5 }
 0x318   : > { %p2808_p4 = por %p2807_p1, %p2806_p2 }
 0x31a   : > { %p2809_p8 = pnand %p2808_p4, %p2802_p11 }
 0x31c   : > { %2812 = shalt.err (!%p2809_p8)
}
 0x31d   : > { %s2870_s23 = smov 384   ;;  %s2871_s24 = smov 24  }
 0x31e   : > { %2394 = dma.vmem_to_hbm [thread:$0]  (%p3039_p6), %s3797_s29, 6144, %s3793_s13, %s2016_s19, %s2870_s23, %s2870_s23, %s2871_s24  }
 0x31f PF: > { %s2045_s27 = sand.u32 1, %s2847_s15   ;;  %p3883_p3 = scmp.ne.s32.totalorder %s3858_s22, 0 }
 0x320   : > { %p3884_p7 = scmp.ge.s32.totalorder %s2859_s18, 2  ;;  %s2046_s5 = scalar_lea.sflag [#allocation4], %s2045_s27 }
 0x322   : > { %p2411_p10 = pnand %p3884_p7, %p3883_p3 }
 0x324   : > { %2842 = dma.done.wait (!%p2411_p10), %s2046_s5, 6144  }
 0x325   : > { %2844 = vsyncadd (!%p2411_p10), %s2046_s5, 4294961152  ;;  %p19_p13 = scmp.ge.s32.totalorder %s3025_s8, 4   ;;  %s3885_s15 = smov %s2851_s16 }
 0x326   : > { %s3886_s16 = smov %s2855_s17  ;;  %s3887_s17 = smov %s3035_s11 }
 0x327   : > { %s3888_s18 = smov %s3025_s8  ;;  %21 = sbr.rel (!%p19_p13) target bundleno = 7 (0x7), region = 93 }
 0x32e   :  { %2051 = vsyncpa [#allocation3], 1 }
 0x32f   :  { %2053 = vsyncpa [#allocation3 + $0x1], 1 }
 0x330   :  { %2054 = vsyncpa [#allocation6], 1 }
 0x331   :  { %2055 = vsyncpa [#allocation9], 1 }
 0x332   :  { %2056 = vsyncpa [#allocation4], 1 }
 0x333   :  { %2058 = vsyncpa [#allocation4 + $0x1], 1 }

// kernel: _lambda_.13
= control target key start
LH: loop header
LB: loop body
LE: loop exit
PB: predicated region body
PF: predicated region fallthrough
CT: control target
= control target key end

     0   :  { %9 = vsyncpa [#allocation4], 0  ;;  %s3127_s0 = inlined_call_operand.hbm [shape: f32[256,256], index: 0, kind: input, shape index: {}]   ;;  %s3128_s1 = inlined_call_operand.hbm [shape: f32[1,256], index: 1, kind: input, shape index: {}]   ;;  %s3129_s2 = inlined_call_operand.hbm [shape: f32[1,256], index: 2, kind: input, shape index: {}]   ;;  %s3130_s3 = inlined_call_operand.hbm [shape: bf16[256,512], index: 3, kind: input, shape index: {}]   ;;  %s3131_s4 = inlined_call_operand.hbm [shape: f32[256,512], index: 4, kind: output, shape index: {}]  }
   0x1   :  { %11 = vsyncpa [#allocation4 + $0x1], 0 }
   0x2   :  { %12 = vsyncpa [#allocation7], 0 }
   0x3   :  { %13 = vsyncpa [#allocation10], 0 }
   0x4   :  { %14 = vsyncpa [#allocation5], 0 }
   0x5   :  { %16 = vsyncpa [#allocation5 + $0x1], 0  ;;  %s2218_s15 = smov 0   ;;  %s2220_s16 = smov 0  }
   0x6   :  { %s2222_s17 = smov 0   ;;  %s2224_s18 = smov 0  }
   0x7   :  { %s2226_s19 = smov 0   ;;  %s2228_s20 = smov 0  }
   0x8 LB: > { %s1630_s21 = sadd.s32 4294967295, %s2182_s20   ;;  %s1631_s22 = sadd.s32 4294967294, %s2182_s20   ;;  %s2182_s20 = sphi %s2228_s20, %s22_s20   ;;  %s2178_s19 = sphi %s2226_s19, %s3167_s19   ;;  %s2174_s18 = sphi %s2224_s18, %s3166_s18   ;;  %s2170_s17 = sphi %s2222_s17, %s3165_s17   ;;  %s2166_s16 = sphi %s2220_s16, %s3164_s16   ;;  %s2162_s15 = sphi %s2218_s15, %s3163_s15  }
   0x9   : > { %p54_p0 = scmp.ne.s32.totalorder %s2166_s16, %s2162_s15  ;;  %p2252_p1 = scmp.eq.s32.totalorder %s1630_s21, 0 }
   0xa   : > { %p2256_p2 = scmp.eq.s32.totalorder %s1630_s21, 1  ;;  %p154_p3 = scmp.eq.s32.totalorder %s1631_s22, 1 }
   0xb   : > { %s3140_s23 = scalar_select %p2252_p1, 1, 0 }
   0xc   : > { %s3141_s24 = scalar_select %p2256_p2, 1, 0 }
   0xd   : > { %p2262_p4 = por %p2252_p1, %p54_p0  ;;  %p1632_p5 = scmp.ge.s32.totalorder %s2182_s20, 1 }
   0xe   : > { %p2267_p6 = por %p154_p3, %p54_p0  ;;  %p161_p7 = scmp.lt.s32.totalorder %s2182_s20, 3 }
   0xf   : > { %s3142_s25 = scalar_select %p2262_p4, 1, 0 }
  0x10   : > { %s3143_s26 = scalar_select %p2267_p6, 1, 0 }
  0x11   : > { %p2272_p8 = pnand %p1632_p5, %p161_p7  ;;  %s2184_s28 = smov [#allocation6]  }
  0x12   : > { %s174_s29 = sshll.u32 %s2184_s28, 4  ;;  %s2185_s30 = smov [#allocation8]   ;;  %s175_s29 = int_to_ptr.vmem [resolvable:$true] %s174_s29 }
  0x13   : > { %s3144_s27 = scalar_select %p2272_p8, 1, 0 }
  0x14   : > { %p1737_p10 = pneg %p2272_p8  ;;  %s185_s5 = sshll.u32 %s2185_s30, 4  ;;  %s2285_s5 = int_to_ptr.vmem [resolvable:$true] %s185_s5 }
  0x15   : > { %s2186_s7 = smov [#allocation9]   ;;  %s1978_s11 = scalar_lea.hbm %s3128_s1, 32 }
  0x16   : > { %p2281_p11 = pnand %p1737_p10, %p2252_p1  ;;  %s198_s8 = sshll.u32 %s2186_s7, 4  ;;  %s2287_s8 = int_to_ptr.vmem [resolvable:$true] %s198_s8 }
  0x17   : > { %p1979_p12 = scmp.ne.s32.totalorder %s3128_s1, %s1978_s11  ;;  %p1985_p5 = scmp.lt.u32.totalorder %s1978_s11, %s3128_s1 }
  0x18   : > { %p2297_p13 = pneg %p2281_p11 }
  0x1a   : > { %p1981_p0 = pnand %p2297_p13, %p1979_p12 }
  0x1c   : > { %p1982_p3 = pneg %p1981_p0 }
  0x1e   : > { %p1987_p7 = pnand %p1985_p5, %p1982_p3 }
  0x20   : > { %1990 = shalt.err (!%p1987_p7)
}
  0x21   : > { %s1991_s28 = scalar_lea.vmem %s175_s29, 32  ;;  %p1999_p1 = scmp.lt.s32.totalorder %s175_s29, %s175_s29 }
  0x22   : > { %p1992_p10 = scmp.ne.s32.totalorder %s175_s29, %s1991_s28  ;;  %p2000_p4 = scmp.lt.s32.totalorder %s1991_s28, %s1991_s28 }
  0x24   : > { %p1994_p9 = pnand %p1992_p10, %p2297_p13  ;;  %p2001_p8 = por %p2000_p4, %p1999_p1 }
  0x26   : > { %p1995_p6 = pneg %p1994_p9 }
  0x28   : > { %p2002_p2 = pnand %p2001_p8, %p1995_p6 }
  0x2a   : > { %2005 = shalt.err (!%p2002_p2)
}
  0x2b   : > { %1740 = dma.hbm_to_vmem [thread:$0]  (!%p2281_p11), %s3128_s1, 32, %s175_s29, [#allocation7]  }
  0x2c   : > { %s2006_s11 = scalar_lea.hbm %s3129_s2, 32 }
  0x2d   : > { %p2007_p9 = scmp.ne.s32.totalorder %s3129_s2, %s2006_s11  ;;  %p2013_p2 = scmp.lt.u32.totalorder %s2006_s11, %s3129_s2 }
  0x2f   : > { %p2009_p12 = pnand %p2007_p9, %p2297_p13 }
  0x31   : > { %p2010_p1 = pneg %p2009_p12 }
  0x33   : > { %p2015_p4 = pnand %p2013_p2, %p2010_p1 }
  0x35   : > { %2018 = shalt.err (!%p2015_p4)
}
  0x36   : > { %s2019_s29 = scalar_lea.vmem %s2285_s5, 32  ;;  %p2027_p3 = scmp.lt.s32.totalorder %s2285_s5, %s2285_s5 }
  0x37   : > { %p2020_p6 = scmp.ne.s32.totalorder %s2285_s5, %s2019_s29  ;;  %p2028_p5 = scmp.lt.s32.totalorder %s2019_s29, %s2019_s29 }
  0x39   : > { %p2022_p8 = pnand %p2020_p6, %p2297_p13  ;;  %p2029_p7 = por %p2028_p5, %p2027_p3 }
  0x3b   : > { %p2023_p0 = pneg %p2022_p8 }
  0x3d   : > { %p2030_p10 = pnand %p2029_p7, %p2023_p0 }
  0x3f   : > { %2033 = shalt.err (!%p2030_p10)
}
  0x40   : > { %1743 = dma.hbm_to_vmem [thread:$0]  (!%p2281_p11), %s3129_s2, 32, %s2285_s5, [#allocation7]  }
  0x41   : > { %s2034_s10 = scalar_lea.hbm %s3130_s3, 8192 }
  0x42   : > { %p2035_p9 = scmp.ne.s32.totalorder %s3130_s3, %s2034_s10  ;;  %p2041_p2 = scmp.lt.u32.totalorder %s2034_s10, %s3130_s3 }
  0x44   : > { %p2037_p12 = pnand %p2035_p9, %p2297_p13 }
  0x46   : > { %p2038_p1 = pneg %p2037_p12 }
  0x48   : > { %p2043_p4 = pnand %p2041_p2, %p2038_p1 }
  0x4a   : > { %2046 = shalt.err (!%p2043_p4)
}
  0x4b   : > { %s2047_s5 = scalar_lea.vmem %s2287_s8, 8192  ;;  %p2055_p3 = scmp.lt.s32.totalorder %s2287_s8, %s2287_s8 }
  0x4c   : > { %p2048_p6 = scmp.ne.s32.totalorder %s2287_s8, %s2047_s5  ;;  %p2056_p5 = scmp.lt.s32.totalorder %s2047_s5, %s2047_s5 }
  0x4e   : > { %p2050_p8 = pnand %p2048_p6, %p2297_p13  ;;  %p2057_p7 = por %p2056_p5, %p2055_p3 }
  0x50   : > { %p2051_p0 = pneg %p2050_p8 }
  0x52   : > { %p2058_p10 = pnand %p2057_p7, %p2051_p0 }
  0x54   : > { %2061 = shalt.err (!%p2058_p10)
}
  0x55   : > { %s2187_s22 = smov 256   ;;  %s2188_s14 = smov 16  }
  0x56   : > { %1746 = dma.hbm_to_vmem [thread:$0]  (!%p2281_p11), %s3130_s3, 8192, %s2287_s8, [#allocation10], %s2187_s22, %s2187_s22, %s2188_s14  }
  0x57   : > { %s41_s30 = sadd.s32 1, %s2170_s17  ;;  %s34_s7 = sadd.s32 1, %s2178_s19 }
  0x58   : > { %p48_p13 = scmp.ne.s32.totalorder %s2170_s17, %s2166_s16  ;;  %p36_p9 = scmp.ge.s32.totalorder %s34_s7, 2 }
  0x59   : > { %p49_p12 = scmp.eq.s32.totalorder %s2182_s20, 0  ;;  %p3147_p1 = scmp.ne.s32.totalorder %s3141_s24, 0 }
  0x5a   : > { %p1758_p4 = scmp.lt.s32.totalorder %s2182_s20, 2  ;;  %s3169_s7 = smov (%p36_p9, %s34_s7), 0 }
  0x5b   : > { %p2369_p2 = por %p3147_p1, %p48_p13  ;;  %p50_p6 = por %p49_p12, %p48_p13 }
  0x5c   : > { %s212_s6 = sand.u32 1, %s2170_s17   ;;  %s38_s10 = ssub.s32 %s2178_s19, %s3169_s7 }
  0x5d   : > { %p39_p8 = scmp.eq.s32.totalorder %s38_s10, 0  ;;  %s1637_s8 = sshll.u32 %s212_s6, 8 }
  0x5e   : > { %s1718_s11 = sshll.u32 %s2178_s19, 12  ;;  %s216_s5 = scalar_lea.vmem [#allocation3], %s1637_s8 }
  0x5f   : > { %s2381_s12 = scalar_select %p39_p8, %s2170_s17, %s41_s30  }
  0x60   : > { %s2386_s24 = scalar_lea.hbm %s3127_s0, %s1718_s11  ;;  %s224_s29 = sshll.u32 %s216_s5, 4  ;;  %s2388_s29 = int_to_ptr.vmem [resolvable:$true] %s224_s29 }
  0x61   : > { %p2392_p11 = pnand %p1758_p4, %p50_p6  ;;  %s2396_s30 = scalar_lea.sflag [#allocation4], %s212_s6 }
  0x62   : > { %s2062_s10 = scalar_lea.hbm %s2386_s24, 4096  ;;  %s2067_s13 = scalar_lea.hbm %s3127_s0, 8192 }
  0x63   : > { %p2063_p0 = scmp.ne.s32.totalorder %s2386_s24, %s2062_s10  ;;  %p2064_p3 = pneg %p2392_p11 }
  0x64   : > { %p2068_p10 = scmp.lt.u32.totalorder %s2386_s24, %s3127_s0  ;;  %p2069_p13 = scmp.lt.u32.totalorder %s2067_s13, %s2062_s10 }
  0x65   : > { %p2065_p5 = pnand %p2064_p3, %p2063_p0  ;;  %p2071_p12 = scmp.lt.u32.totalorder %s2062_s10, %s2386_s24 }
  0x66   : > { %p2070_p9 = por %p2069_p13, %p2068_p10 }
  0x67   : > { %p2066_p7 = pneg %p2065_p5 }
  0x68   : > { %p2072_p1 = por %p2071_p12, %p2070_p9 }
  0x6a   : > { %p2073_p4 = pnand %p2072_p1, %p2066_p7 }
  0x6c   : > { %2076 = shalt.err (!%p2073_p4)
}
  0x6d   : > { %s2077_s6 = scalar_lea.vmem %s2388_s29, 4096  ;;  %s2189_s8 = smov [#allocation3]  }
  0x6e   : > { %p2078_p6 = scmp.ne.s32.totalorder %s2388_s29, %s2077_s6  ;;  %s2082_s11 = sshll.u32 %s2189_s8, 4  ;;  %s2083_s11 = int_to_ptr.vmem [resolvable:$false] %s2082_s11 }
  0x6f   : > { %s2084_s21 = scalar_lea.vmem %s2083_s11, 8192  ;;  %p2085_p5 = scmp.lt.s32.totalorder %s2388_s29, %s2083_s11 }
  0x70   : > { %p2080_p8 = pnand %p2078_p6, %p2064_p3  ;;  %p2086_p10 = scmp.lt.s32.totalorder %s2084_s21, %s2077_s6 }
  0x72   : > { %p2081_p0 = pneg %p2080_p8  ;;  %p2087_p13 = por %p2086_p10, %p2085_p5 }
  0x74   : > { %p2088_p9 = pnand %p2087_p13, %p2081_p0 }
  0x76   : > { %2091 = shalt.err (!%p2088_p9)
}
  0x77   : > { %1750 = dma.hbm_to_vmem [thread:$0]  (!%p2392_p11), %s2386_s24, 4096, %s2388_s29, %s2396_s30, %s2187_s22, %s2187_s22, %s2188_s14  }
  0x78   : > { %p3150_p3 = scmp.ne.s32.totalorder %s3144_s27, 0 }
  0x7a   : > { %236 = sbr.rel (%p3150_p3) target bundleno = 766 (0x2fe), region = 36 }
  0x81   : > { %s2430_s10 = sand.u32 1, %s2166_s16   ;;  %p3151_p7 = scmp.ne.s32.totalorder %s3142_s25, 0 }
  0x82   : > { %s1642_s13 = sshll.u32 %s2430_s10, 8  ;;  %s239_s5 = scalar_lea.sflag [#allocation4], %s2430_s10 }
  0x83   : > { %s2434_s6 = scalar_lea.vmem [#allocation3], %s1642_s13 }
  0x84   : > { %2145 = dma.done.wait (%p3151_p7), %s239_s5, 4096  }
  0x85   : > { %2147 = vsyncadd (%p3151_p7), %s239_s5, 4294963200  ;;  %p3152_p11 = scmp.ne.s32.totalorder %s3140_s23, 0 }
  0x87   : > { %2149 = dma.done.wait (%p3152_p11), [#allocation7], 64  }
  0x88   : > { %2151 = vsyncadd (%p3152_p11), [#allocation7], 4294967232 }
  0x89   : > { %2153 = dma.done.wait (%p3152_p11), [#allocation10], 8192  }
  0x8a   : > { %2155 = vsyncadd (%p3152_p11), [#allocation10], 4294959104  ;;  %v2449_v0 = vld [vmem:[%s2434_s6] sm:$0xff]  ;;  %v2452_v1 = vld [vmem:[%s2434_s6 + $0x8] sm:$0xff]  ;;  %s1646_s23 = sshll.u32 %s2430_s10, 9  ;;  %s1720_s27 = sshll.u32 %s2174_s18, 13 }
  0x8b   : > { %v2455_v2 = vld [vmem:[%s2434_s6 + $0x20] sm:$0xff]  ;;  %v321_v3 = vadd.f32 %v2452_v1, %v2449_v0  ;;  %v2460_v4 = vld [vmem:[%s2434_s6 + $0x28] sm:$0xff]  ;;  %v2463_v5 = vld [vmem:[%s2434_s6 + $0x10] sm:$0xff]  ;;  %s3005_s25 = scalar_lea.vmem [#allocation11], %s1646_s23  ;;  %s3070_s29 = scalar_lea.hbm %s3131_s4, %s1720_s27 }
  0x8c   : > { %v2466_v6 = vld [vmem:[%s2434_s6 + $0x18] sm:$0xff]  ;;  %v327_v7 = vadd.f32 %v2460_v4, %v2455_v2  ;;  %v2471_v8 = vld [vmem:[%s2434_s6 + $0x30] sm:$0xff]  ;;  %v2481_v12 = vld [vmem:[%s2434_s6 + $0x40] sm:$0xff]  ;;  %s1515_s22 = sshll.u32 %s3005_s25, 4  ;;  %s1499_s18 = scalar_lea.sflag [#allocation5], %s2430_s10  ;;  %s3072_s22 = int_to_ptr.vmem [resolvable:$true] %s1515_s22 }
  0x8d   : > { %v2474_v9 = vld [vmem:[%s2434_s6 + $0x38] sm:$0xff]  ;;  %322 = vadd.xlane.f32.xlu0 %v321_v3  ;;  %v324_v10 = vadd.f32 %v2466_v6, %v2463_v5  ;;  %v2484_v13 = vld [vmem:[%s2434_s6 + $0x48] sm:$0xff]  ;;  %v2487_v14 = vld [vmem:[%s2434_s6 + $0x50] sm:$0xff]  ;;  %s2092_s28 = scalar_lea.vmem %s3072_s22, 8192  ;;  %s2190_s30 = smov [#allocation11]  }
  0x8e   : > { %328 = vadd.xlane.f32.xlu1 %v327_v7  ;;  %v330_v11 = vadd.f32 %v2474_v9, %v2471_v8  ;;  %v2490_v15 = vld [vmem:[%s2434_s6 + $0x58] sm:$0xff]  ;;  %v333_v16 = vadd.f32 %v2484_v13, %v2481_v12  ;;  %v2497_v18 = vld [vmem:[%s2434_s6 + $0x60] sm:$0xff]  ;;  %v2500_v19 = vld [vmem:[%s2434_s6 + $0x68] sm:$0xff]  ;;  %p2093_p12 = scmp.ne.s32.totalorder %s3072_s22, %s2092_s28  ;;  %s2096_s8 = sshll.u32 %s2190_s30, 4  ;;  %s2097_s8 = int_to_ptr.vmem [resolvable:$false] %s2096_s8 }
  0x8f   : > { %v336_v17 = vadd.f32 %v2490_v15, %v2487_v14  ;;  %v2503_v20 = vld [vmem:[%s2434_s6 + $0x70] sm:$0xff]  ;;  %v2506_v21 = vld [vmem:[%s2434_s6 + $0x78] sm:$0xff]  ;;  %v2509_v22 = vld [vmem:[%s2434_s6 + $0x80] sm:$0xff]  ;;  %v339_v24 = vadd.f32 %v2500_v19, %v2497_v18  ;;  %s2098_s11 = scalar_lea.vmem %s2097_s8, 16384  ;;  %p2099_p6 = scmp.lt.s32.totalorder %s3072_s22, %s2097_s8 }
  0x90   : > { %v2512_v23 = vld [vmem:[%s2434_s6 + $0x88] sm:$0xff]  ;;  %v2517_v25 = vld [vmem:[%s2434_s6 + $0x90] sm:$0xff]  ;;  %v2520_v26 = vld [vmem:[%s2434_s6 + $0x98] sm:$0xff]  ;;  %v342_v27 = vadd.f32 %v2506_v21, %v2503_v20  ;;  %p2094_p1 = pnand %p2093_p12, %p2369_p2  ;;  %p2100_p8 = scmp.lt.s32.totalorder %s2098_s11, %s2092_s28 }
  0x91   : > { %325 = vadd.xlane.f32.xlu0 %v324_v10  ;;  %v2525_v28 = vld [vmem:[%s2434_s6 + $0xa0] sm:$0xff]  ;;  %v2528_v29 = vld [vmem:[%s2434_s6 + $0xa8] sm:$0xff]  ;;  %v345_v30 = vadd.f32 %v2512_v23, %v2509_v22  ;;  %v2533_v31 = vld [vmem:[%s2434_s6 + $0xb0] sm:$0xff]  ;;  %v348_v33 = vadd.f32 %v2520_v26, %v2517_v25 }
  0x92   : > { %331 = vadd.xlane.f32.xlu1 %v330_v11  ;;  %v2536_v32 = vld [vmem:[%s2434_s6 + $0xb8] sm:$0xff]  ;;  %v2541_v34 = vld [vmem:[%s2434_s6 + $0xc0] sm:$0xff]  ;;  %v2544_v35 = vld [vmem:[%s2434_s6 + $0xc8] sm:$0xff]  ;;  %v351_v36 = vadd.f32 %v2528_v29, %v2525_v28  ;;  %p2095_p4 = pneg %p2094_p1  ;;  %p2101_p0 = por %p2100_p8, %p2099_p6 }
  0x93   : > { %v2549_v37 = vld [vmem:[%s2434_s6 + $0xd0] sm:$0xff]  ;;  %v2552_v38 = vld [vmem:[%s2434_s6 + $0xd8] sm:$0xff]  ;;  %v354_v39 = vadd.f32 %v2536_v32, %v2533_v31  ;;  %v2557_v40 = vld [vmem:[%s2434_s6 + $0xe0] sm:$0xff]  ;;  %v357_v42 = vadd.f32 %v2544_v35, %v2541_v34 }
  0x94   : > { %v2560_v41 = vld [vmem:[%s2434_s6 + $0xe8] sm:$0xff]  ;;  %v2565_v43 = vld [vmem:[%s2434_s6 + $0xf0] sm:$0xff]  ;;  %v2568_v44 = vld [vmem:[%s2434_s6 + $0xf8] sm:$0xff]  ;;  %v360_v45 = vadd.f32 %v2552_v38, %v2549_v37  ;;  %p2102_p5 = pnand %p2101_p0, %p2095_p4 }
  0x95   : > { %334 = vadd.xlane.f32.xlu0 %v333_v16  ;;  %v363_v46 = vadd.f32 %v2560_v41, %v2557_v40  ;;  %v366_v47 = vadd.f32 %v2568_v44, %v2565_v43  ;;  %v1818_v48 = vld [vmem:[#allocation9 + $0x4] ss:$16 sps:$4 sm:$0xff]   ;;  %v1820_v49 = vld [vmem:[#allocation9 + $0xc] ss:$16 sps:$4 sm:$0xff]   ;;  %v1822_v50 = vld [vmem:[#allocation9] ss:$16 sps:$4 sm:$0xff]  }
  0x96   : > { %337 = vadd.xlane.f32.xlu1 %v336_v17  ;;  %v1823_v51 = vld [vmem:[#allocation9 + $0x8] ss:$16 sps:$4 sm:$0xff]   ;;  %v1824_v52 = vld [vmem:[#allocation9 + $0x24] ss:$16 sps:$4 sm:$0xff]   ;;  %v1826_v53 = vld [vmem:[#allocation9 + $0x2c] ss:$16 sps:$4 sm:$0xff]   ;;  %1208 = vmatprep.subr.bf16.mxu0 %v1818_v48 }
  0x97   : > { %1321 = vmatprep.subr.bf16.mxu1 %v1820_v49  ;;  %1209 = vmatpush1.bf16.msra.mxu0 %v1822_v50  ;;  %v1828_v54 = vld [vmem:[#allocation9 + $0x20] ss:$16 sps:$4 sm:$0xff]   ;;  %v1829_v55 = vld [vmem:[#allocation9 + $0x28] ss:$16 sps:$4 sm:$0xff]   ;;  %v1830_v56 = vld [vmem:[#allocation9 + $0x44] ss:$16 sps:$4 sm:$0xff]  }
  0x98   : > { %1322 = vmatpush1.bf16.msra.mxu1 %v1823_v51  ;;  %1210 = vmatprep.subr.bf16.mxu0 %v1824_v52  ;;  %v1832_v57 = vld [vmem:[#allocation9 + $0x4c] ss:$16 sps:$4 sm:$0xff]   ;;  %v1834_v58 = vld [vmem:[#allocation9 + $0x40] ss:$16 sps:$4 sm:$0xff]   ;;  %v1835_v59 = vld [vmem:[#allocation9 + $0x48] ss:$16 sps:$4 sm:$0xff]  }
  0x99   : > { %340 = vadd.xlane.f32.xlu0 %v339_v24  ;;  %1323 = vmatprep.subr.bf16.mxu1 %v1826_v53  ;;  %v1836_v60 = vld [vmem:[#allocation9 + $0x64] ss:$16 sps:$4 sm:$0xff]   ;;  %v1838_v61 = vld [vmem:[#allocation9 + $0x6c] ss:$16 sps:$4 sm:$0xff]   ;;  %v1840_v62 = vld [vmem:[#allocation9 + $0x60] ss:$16 sps:$4 sm:$0xff]  }
  0x9a   : > { %343 = vadd.xlane.f32.xlu1 %v342_v27  ;;  %v1841_v63 = vld [vmem:[#allocation9 + $0x68] ss:$16 sps:$4 sm:$0xff]   ;;  %v1842_v3 = vld [vmem:[#allocation9 + $0x84] ss:$16 sps:$4 sm:$0xff]   ;;  %v1844_v7 = vld [vmem:[#allocation9 + $0x8c] ss:$16 sps:$4 sm:$0xff]  }
  0x9b   : > { %1211 = vmatpush1.bf16.msra.mxu0 %v1828_v54  ;;  %v1846_v10 = vld [vmem:[#allocation9 + $0x80] ss:$16 sps:$4 sm:$0xff]   ;;  %v1847_v11 = vld [vmem:[#allocation9 + $0x88] ss:$16 sps:$4 sm:$0xff]   ;;  %v1848_v16 = vld [vmem:[#allocation9 + $0xa4] ss:$16 sps:$4 sm:$0xff]  }
  0x9c   : > { %1324 = vmatpush1.bf16.msra.mxu1 %v1829_v55  ;;  %1212 = vmatprep.subr.bf16.mxu0 %v1830_v56  ;;  %v1850_v17 = vld [vmem:[#allocation9 + $0xac] ss:$16 sps:$4 sm:$0xff]  }
  0x9d   : > { %346 = vadd.xlane.f32.xlu0 %v345_v30  ;;  %1325 = vmatprep.subr.bf16.mxu1 %v1832_v57 }
  0x9e   : > { %349 = vadd.xlane.f32.xlu1 %v348_v33 }
  0x9f   : > { %1213 = vmatpush1.bf16.msra.mxu0 %v1834_v58 }
  0xa0   : > { %1326 = vmatpush1.bf16.msra.mxu1 %v1835_v59  ;;  %1214 = vmatprep.subr.bf16.mxu0 %v1836_v60 }
  0xa1   : > { %352 = vadd.xlane.f32.xlu0 %v351_v36  ;;  %1327 = vmatprep.subr.bf16.mxu1 %v1838_v61 }
  0xa2   : > { %355 = vadd.xlane.f32.xlu1 %v354_v39 }
  0xa3   : > { %1215 = vmatpush1.bf16.msra.mxu0 %v1840_v62 }
  0xa4   : > { %1328 = vmatpush1.bf16.msra.mxu1 %v1841_v63  ;;  %1216 = vmatprep.subr.bf16.mxu0 %v1842_v3 }
  0xa5   : > { %358 = vadd.xlane.f32.xlu0 %v357_v42  ;;  %1329 = vmatprep.subr.bf16.mxu1 %v1844_v7 }
  0xa6   : > { %361 = vadd.xlane.f32.xlu1 %v360_v45 }
  0xa7   : > { %1217 = vmatpush1.bf16.msra.mxu0 %v1846_v10 }
  0xa8   : > { %1330 = vmatpush1.bf16.msra.mxu1 %v1847_v11  ;;  %1218 = vmatprep.subr.bf16.mxu0 %v1848_v16 }
  0xa9   : > { %364 = vadd.xlane.f32.xlu0 %v363_v46  ;;  %1331 = vmatprep.subr.bf16.mxu1 %v1850_v17 }
  0xaa   : > { %367 = vadd.xlane.f32.xlu1 %v366_v47 }
 0x11a   : > { %v323_v24 = vpop.xlane.xlu0 %322 }
 0x11b   : > { %v370_v27 = vmul.f32 0.00390625, %v323_v24  ;;  %v329_v30 = vpop.xlane.xlu1 %328 }
 0x11c   : > { %v372_v33 = vmul.f32 0.00390625, %v329_v30 }
 0x11d   : > { %v2577_v36 = vsub.f32 %v2449_v0, %v370_v27  ;;  %v2580_v39 = vsub.f32 %v2452_v1, %v370_v27 }
 0x11e   : > { %v2583_v42 = vsub.f32 %v2455_v2, %v372_v33  ;;  %v2586_v45 = vsub.f32 %v2460_v4, %v372_v33  ;;  %v326_v46 = vpop.xlane.xlu0 %325 }
 0x11f   : > { %v371_v47 = vmul.f32 0.00390625, %v326_v46  ;;  %v332_v48 = vpop.xlane.xlu1 %331  ;;  %v418_v49 = vmul.f32 %v2577_v36, %v2577_v36  ;;  %v419_v50 = vmul.f32 %v2580_v39, %v2580_v39 }
 0x120   : > { %v373_v0 = vmul.f32 0.00390625, %v332_v48  ;;  %v422_v1 = vmul.f32 %v2583_v42, %v2583_v42  ;;  %v423_v2 = vmul.f32 %v2586_v45, %v2586_v45 }
 0x121   : > { %v2597_v51 = vsub.f32 %v2463_v5, %v371_v47  ;;  %v2600_v4 = vsub.f32 %v2466_v6, %v371_v47  ;;  %v450_v52 = vadd.f32 %v419_v50, %v418_v49 }
 0x122   : > { %v2603_v53 = vsub.f32 %v2471_v8, %v373_v0  ;;  %v2606_v54 = vsub.f32 %v2474_v9, %v373_v0  ;;  %v335_v55 = vpop.xlane.xlu0 %334  ;;  %v456_v58 = vadd.f32 %v423_v2, %v422_v1 }
 0x123   : > { %v374_v56 = vmul.f32 0.00390625, %v335_v55  ;;  %451 = vadd.xlane.f32.xlu0 %v450_v52  ;;  %v338_v57 = vpop.xlane.xlu1 %337  ;;  %v420_v59 = vmul.f32 %v2597_v51, %v2597_v51  ;;  %v421_v5 = vmul.f32 %v2600_v4, %v2600_v4 }
 0x124   : > { %v375_v6 = vmul.f32 0.00390625, %v338_v57  ;;  %v424_v60 = vmul.f32 %v2603_v53, %v2603_v53  ;;  %v425_v8 = vmul.f32 %v2606_v54, %v2606_v54 }
 0x125   : > { %v2617_v9 = vsub.f32 %v2481_v12, %v374_v56  ;;  %v2620_v61 = vsub.f32 %v2484_v13, %v374_v56  ;;  %v453_v62 = vadd.f32 %v421_v5, %v420_v59 }
 0x126   : > { %v2623_v63 = vsub.f32 %v2487_v14, %v375_v6  ;;  %v2626_v3 = vsub.f32 %v2490_v15, %v375_v6  ;;  %v341_v7 = vpop.xlane.xlu0 %340  ;;  %v459_v16 = vadd.f32 %v425_v8, %v424_v60  ;;  %v1852_v6 = vld [vmem:[#allocation9 + $0xa0] ss:$16 sps:$4 sm:$0xff]   ;;  %v1853_v60 = vld [vmem:[#allocation9 + $0xa8] ss:$16 sps:$4 sm:$0xff]  }
 0x127   : > { %v376_v10 = vmul.f32 0.00390625, %v341_v7  ;;  %457 = vadd.xlane.f32.xlu0 %v456_v58  ;;  %454 = vadd.xlane.f32.xlu1 %v453_v62  ;;  %v344_v11 = vpop.xlane.xlu1 %343  ;;  %v426_v12 = vmul.f32 %v2617_v9, %v2617_v9  ;;  %v427_v13 = vmul.f32 %v2620_v61, %v2620_v61 }
 0x128   : > { %v377_v17 = vmul.f32 0.00390625, %v344_v11  ;;  %v428_v14 = vmul.f32 %v2623_v63, %v2623_v63  ;;  %v429_v15 = vmul.f32 %v2626_v3, %v2626_v3  ;;  %1219 = vmatpush1.bf16.msra.mxu0 %v1852_v6  ;;  %1332 = vmatpush1.bf16.msra.mxu1 %v1853_v60 }
 0x129   : > { %v2637_v24 = vsub.f32 %v2497_v18, %v376_v10  ;;  %v2640_v27 = vsub.f32 %v2500_v19, %v376_v10  ;;  %v462_v30 = vadd.f32 %v427_v13, %v426_v12  ;;  %v1854_v13 = vld [vmem:[#allocation9 + $0xc4] ss:$16 sps:$4 sm:$0xff]  }
 0x12a   : > { %v2643_v33 = vsub.f32 %v2503_v20, %v377_v17  ;;  %v2646_v46 = vsub.f32 %v2506_v21, %v377_v17  ;;  %v347_v47 = vpop.xlane.xlu0 %346  ;;  %v465_v50 = vadd.f32 %v429_v15, %v428_v14  ;;  %v1856_v17 = vld [vmem:[#allocation9 + $0xcc] ss:$16 sps:$4 sm:$0xff]   ;;  %1220 = vmatprep.subr.bf16.mxu0 %v1854_v13 }
 0x12b   : > { %v378_v48 = vmul.f32 0.00390625, %v347_v47  ;;  %460 = vadd.xlane.f32.xlu1 %v459_v16  ;;  %463 = vadd.xlane.f32.xlu0 %v462_v30  ;;  %v350_v49 = vpop.xlane.xlu1 %349  ;;  %v430_v18 = vmul.f32 %v2637_v24, %v2637_v24  ;;  %v431_v19 = vmul.f32 %v2640_v27, %v2640_v27 }
 0x12c   : > { %v379_v0 = vmul.f32 0.00390625, %v350_v49  ;;  %v432_v20 = vmul.f32 %v2643_v33, %v2643_v33  ;;  %v433_v21 = vmul.f32 %v2646_v46, %v2646_v46  ;;  %1333 = vmatprep.subr.bf16.mxu1 %v1856_v17  ;;  %v1868_v17 = vld [vmem:[#allocation9 + $0x10c] ss:$16 sps:$4 sm:$0xff]  }
 0x12d   : > { %v2657_v1 = vsub.f32 %v2509_v22, %v378_v48  ;;  %v2660_v2 = vsub.f32 %v2512_v23, %v378_v48  ;;  %v468_v52 = vadd.f32 %v431_v19, %v430_v18  ;;  %v1858_v18 = vld [vmem:[#allocation9 + $0xc0] ss:$16 sps:$4 sm:$0xff]   ;;  %v1859_v19 = vld [vmem:[#allocation9 + $0xc8] ss:$16 sps:$4 sm:$0xff]  }
 0x12e   : > { %v2663_v55 = vsub.f32 %v2517_v25, %v379_v0  ;;  %v2666_v56 = vsub.f32 %v2520_v26, %v379_v0  ;;  %v353_v57 = vpop.xlane.xlu0 %352  ;;  %v471_v5 = vadd.f32 %v433_v21, %v432_v20  ;;  %1221 = vmatpush1.bf16.msra.mxu0 %v1858_v18  ;;  %1334 = vmatpush1.bf16.msra.mxu1 %v1859_v19  ;;  %v1880_v18 = vld [vmem:[#allocation9 + $0x14c] ss:$16 sps:$4 sm:$0xff]   ;;  %v1882_v19 = vld [vmem:[#allocation9 + $0x140] ss:$16 sps:$4 sm:$0xff]  }
 0x12f   : > { %v380_v58 = vmul.f32 0.00390625, %v353_v57  ;;  %466 = vadd.xlane.f32.xlu1 %v465_v50  ;;  %469 = vadd.xlane.f32.xlu0 %v468_v52  ;;  %v356_v59 = vpop.xlane.xlu1 %355  ;;  %v434_v22 = vmul.f32 %v2657_v1, %v2657_v1  ;;  %v435_v23 = vmul.f32 %v2660_v2, %v2660_v2 }
 0x130   : > { %v381_v8 = vmul.f32 0.00390625, %v356_v59  ;;  %v436_v25 = vmul.f32 %v2663_v55, %v2663_v55  ;;  %v437_v26 = vmul.f32 %v2666_v56, %v2666_v56 }
 0x131   : > { %v2677_v62 = vsub.f32 %v2525_v28, %v380_v58  ;;  %v2680_v7 = vsub.f32 %v2528_v29, %v380_v58  ;;  %v474_v10 = vadd.f32 %v435_v23, %v434_v22  ;;  %v1862_v22 = vld [vmem:[#allocation9 + $0xec] ss:$16 sps:$4 sm:$0xff]  }
 0x132   : > { %v2683_v11 = vsub.f32 %v2533_v31, %v381_v8  ;;  %v2686_v16 = vsub.f32 %v2536_v32, %v381_v8  ;;  %v359_v12 = vpop.xlane.xlu0 %358  ;;  %v477_v15 = vadd.f32 %v437_v26, %v436_v25  ;;  %v1864_v8 = vld [vmem:[#allocation9 + $0xe0] ss:$16 sps:$4 sm:$0xff]   ;;  %v1865_v25 = vld [vmem:[#allocation9 + $0xe8] ss:$16 sps:$4 sm:$0xff]   ;;  %1335 = vmatprep.subr.bf16.mxu1 %v1862_v22  ;;  %v1898_v22 = vld [vmem:[#allocation9 + $0x1ac] ss:$16 sps:$4 sm:$0xff]  }
 0x133   : > { %v382_v14 = vmul.f32 0.00390625, %v359_v12  ;;  %472 = vadd.xlane.f32.xlu1 %v471_v5  ;;  %475 = vadd.xlane.f32.xlu0 %v474_v10  ;;  %v362_v28 = vpop.xlane.xlu1 %361  ;;  %v438_v29 = vmul.f32 %v2677_v62, %v2677_v62  ;;  %v439_v30 = vmul.f32 %v2680_v7, %v2680_v7  ;;  %v1860_v5 = vld [vmem:[#allocation9 + $0xe4] ss:$16 sps:$4 sm:$0xff]  }
 0x134   : > { %v383_v47 = vmul.f32 0.00390625, %v362_v28  ;;  %v440_v31 = vmul.f32 %v2683_v11, %v2683_v11  ;;  %v441_v32 = vmul.f32 %v2686_v16, %v2686_v16  ;;  %1222 = vmatprep.subr.bf16.mxu0 %v1860_v5  ;;  %1336 = vmatpush1.bf16.msra.mxu1 %v1865_v25  ;;  %v1870_v28 = vld [vmem:[#allocation9 + $0x100] ss:$16 sps:$4 sm:$0xff]   ;;  %v1896_v5 = vld [vmem:[#allocation9 + $0x1a4] ss:$16 sps:$4 sm:$0xff]  }
 0x135   : > { %v2697_v48 = vsub.f32 %v2541_v34, %v382_v14  ;;  %v2700_v49 = vsub.f32 %v2544_v35, %v382_v14  ;;  %v480_v50 = vadd.f32 %v439_v30, %v438_v29  ;;  %1223 = vmatpush1.bf16.msra.mxu0 %v1864_v8  ;;  %1337 = vmatprep.subr.bf16.mxu1 %v1868_v17  ;;  %v1872_v30 = vld [vmem:[#allocation9 + $0x124] ss:$16 sps:$4 sm:$0xff]   ;;  %v1901_v8 = vld [vmem:[#allocation9 + $0x1a8] ss:$16 sps:$4 sm:$0xff]  }
 0x136   : > { %v2703_v0 = vsub.f32 %v2549_v37, %v383_v47  ;;  %v2706_v20 = vsub.f32 %v2552_v38, %v383_v47  ;;  %v365_v21 = vpop.xlane.xlu0 %364  ;;  %v483_v58 = vadd.f32 %v441_v32, %v440_v31  ;;  %v1874_v47 = vld [vmem:[#allocation9 + $0x12c] ss:$16 sps:$4 sm:$0xff]   ;;  %v1876_v31 = vld [vmem:[#allocation9 + $0x120] ss:$16 sps:$4 sm:$0xff]   ;;  %v1877_v32 = vld [vmem:[#allocation9 + $0x128] ss:$16 sps:$4 sm:$0xff]  }
 0x137   : > { %3153 = vst [vmem:[#allocation16_spill] sm:$0xff] %v2697_v48  ;;  %v384_v52 = vmul.f32 0.00390625, %v365_v21  ;;  %478 = vadd.xlane.f32.xlu1 %v477_v15  ;;  %481 = vadd.xlane.f32.xlu0 %v480_v50  ;;  %v368_v57 = vpop.xlane.xlu1 %367  ;;  %v442_v34 = vmul.f32 %v2697_v48, %v2697_v48  ;;  %v443_v35 = vmul.f32 %v2700_v49, %v2700_v49  ;;  %v1871_v15 = vld [vmem:[#allocation9 + $0x108] ss:$16 sps:$4 sm:$0xff]   ;;  %v1878_v50 = vld [vmem:[#allocation9 + $0x144] ss:$16 sps:$4 sm:$0xff]  }
 0x138   : > { %v385_v59 = vmul.f32 0.00390625, %v368_v57  ;;  %v444_v37 = vmul.f32 %v2703_v0, %v2703_v0  ;;  %v445_v38 = vmul.f32 %v2706_v20, %v2706_v20  ;;  %1338 = vmatpush1.bf16.msra.mxu1 %v1871_v15  ;;  %v1883_v21 = vld [vmem:[#allocation9 + $0x148] ss:$16 sps:$4 sm:$0xff]   ;;  %v1886_v57 = vld [vmem:[#allocation9 + $0x16c] ss:$16 sps:$4 sm:$0xff]  }
 0x139   : > { %v2717_v23 = vsub.f32 %v2557_v40, %v384_v52  ;;  %v2720_v6 = vsub.f32 %v2560_v41, %v384_v52  ;;  %v486_v60 = vadd.f32 %v443_v35, %v442_v34  ;;  %1339 = vmatprep.subr.bf16.mxu1 %v1874_v47  ;;  %v1884_v52 = vld [vmem:[#allocation9 + $0x164] ss:$16 sps:$4 sm:$0xff]   ;;  %v1889_v34 = vld [vmem:[#allocation9 + $0x168] ss:$16 sps:$4 sm:$0xff]  }
 0x13a   : > { %v2723_v26 = vsub.f32 %v2565_v43, %v385_v59  ;;  %v2726_v10 = vsub.f32 %v2568_v44, %v385_v59  ;;  %v489_v12 = vadd.f32 %v445_v38, %v444_v37  ;;  %v1866_v44 = vld [vmem:[#allocation9 + $0x104] ss:$16 sps:$4 sm:$0xff]   ;;  %v1892_v59 = vld [vmem:[#allocation9 + $0x18c] ss:$16 sps:$4 sm:$0xff]   ;;  %v1894_v37 = vld [vmem:[#allocation9 + $0x180] ss:$16 sps:$4 sm:$0xff]  }
 0x13b   : > { %3154 = vst [vmem:[#allocation17_spill] sm:$0xff] %v2717_v23  ;;  %3155 = vst [vmem:[#allocation18_spill] sm:$0xff] %v2720_v6  ;;  %484 = vadd.xlane.f32.xlu1 %v483_v58  ;;  %487 = vadd.xlane.f32.xlu0 %v486_v60  ;;  %v446_v40 = vmul.f32 %v2717_v23, %v2717_v23  ;;  %v447_v41 = vmul.f32 %v2720_v6, %v2720_v6  ;;  %v1888_v58 = vld [vmem:[#allocation9 + $0x160] ss:$16 sps:$4 sm:$0xff]   ;;  %v1890_v35 = vld [vmem:[#allocation9 + $0x184] ss:$16 sps:$4 sm:$0xff]  }
 0x13c   : > { %3156 = vst [vmem:[#allocation19_spill] sm:$0xff] %v2723_v26  ;;  %v448_v13 = vmul.f32 %v2723_v26, %v2723_v26  ;;  %v449_v43 = vmul.f32 %v2726_v10, %v2726_v10  ;;  %1224 = vmatprep.subr.bf16.mxu0 %v1866_v44  ;;  %1340 = vmatpush1.bf16.msra.mxu1 %v1877_v32  ;;  %v1895_v38 = vld [vmem:[#allocation9 + $0x188] ss:$16 sps:$4 sm:$0xff]   ;;  %v1900_v60 = vld [vmem:[#allocation9 + $0x1a0] ss:$16 sps:$4 sm:$0xff]  }
 0x13d   : > { %v492_v14 = vadd.f32 %v447_v41, %v446_v40  ;;  %1225 = vmatpush1.bf16.msra.mxu0 %v1870_v28  ;;  %1341 = vmatprep.subr.bf16.mxu1 %v1880_v18  ;;  %v1902_v25 = vld [vmem:[#allocation9 + $0x1c4] ss:$16 sps:$4 sm:$0xff]   ;;  %v1906_v40 = vld [vmem:[#allocation9 + $0x1c0] ss:$16 sps:$4 sm:$0xff]   ;;  %v1907_v41 = vld [vmem:[#allocation9 + $0x1c8] ss:$16 sps:$4 sm:$0xff]  }
 0x13e   : > { %v495_v29 = vadd.f32 %v449_v43, %v448_v13  ;;  %1226 = vmatprep.subr.bf16.mxu0 %v1872_v30  ;;  %v1908_v13 = vld [vmem:[#allocation9 + $0x1e4] ss:$16 sps:$4 sm:$0xff]   ;;  %v1910_v43 = vld [vmem:[#allocation9 + $0x1ec] ss:$16 sps:$4 sm:$0xff]   ;;  %v1912_v44 = vld [vmem:[#allocation9 + $0x1e0] ss:$16 sps:$4 sm:$0xff]  }
 0x13f   : > { %490 = vadd.xlane.f32.xlu1 %v489_v12  ;;  %493 = vadd.xlane.f32.xlu0 %v492_v14  ;;  %v1904_v12 = vld [vmem:[#allocation9 + $0x1cc] ss:$16 sps:$4 sm:$0xff]   ;;  %v1913_v17 = vld [vmem:[#allocation9 + $0x1e8] ss:$16 sps:$4 sm:$0xff]  }
 0x140   : > { %1342 = vmatpush1.bf16.msra.mxu1 %v1883_v21 }
 0x141   : > { %1227 = vmatpush1.bf16.msra.mxu0 %v1876_v31  ;;  %1343 = vmatprep.subr.bf16.mxu1 %v1886_v57 }
 0x142   : > { %1228 = vmatprep.subr.bf16.mxu0 %v1878_v50 }
 0x143   : > { %496 = vadd.xlane.f32.xlu1 %v495_v29 }
 0x144   : > { %1344 = vmatpush1.bf16.msra.mxu1 %v1889_v34 }
 0x145   : > { %1229 = vmatpush1.bf16.msra.mxu0 %v1882_v19  ;;  %1345 = vmatprep.subr.bf16.mxu1 %v1892_v59  ;;  %v691_v59 = vlaneseq }
 0x146   : > { %1230 = vmatprep.subr.bf16.mxu0 %v1884_v52 }
 0x148   : > { %1346 = vmatpush1.bf16.msra.mxu1 %v1895_v38 }
 0x149   : > { %1231 = vmatpush1.bf16.msra.mxu0 %v1888_v58  ;;  %1347 = vmatprep.subr.bf16.mxu1 %v1898_v22 }
 0x14a   : > { %1232 = vmatprep.subr.bf16.mxu0 %v1890_v35 }
 0x14c   : > { %1348 = vmatpush1.bf16.msra.mxu1 %v1901_v8 }
 0x14d   : > { %1233 = vmatpush1.bf16.msra.mxu0 %v1894_v37  ;;  %1349 = vmatprep.subr.bf16.mxu1 %v1904_v12  ;;  %v692_v12 = vshrl.u32 %v691_v59, 7 }
 0x14e   : > { %1234 = vmatprep.subr.bf16.mxu0 %v1896_v5 }
 0x150   : > { %1350 = vmatpush1.bf16.msra.mxu1 %v1907_v41 }
 0x151   : > { %1235 = vmatpush1.bf16.msra.mxu0 %v1900_v60  ;;  %1351 = vmatprep.subr.bf16.mxu1 %v1910_v43 }
 0x152   : > { %1236 = vmatprep.subr.bf16.mxu0 %v1902_v25 }
 0x154   : > { %1352 = vmatpush1.bf16.msra.mxu1 %v1913_v17 }
 0x155   : > { %1237 = vmatpush1.bf16.msra.mxu0 %v1906_v40 }
 0x156   : > { %1238 = vmatprep.subr.bf16.mxu0 %v1908_v13 }
 0x159   : > { %1239 = vmatpush1.bf16.msra.mxu0 %v1912_v44  ;;  %v693_v44 = vsub.s32 0, %v692_v12 }
 0x1b0   : > { %v452_v14 = vpop.xlane.xlu0 %451 }
 0x1b1   : > { %v498_v28 = vmul.f32 0.00390625, %v452_v14 }
 0x1b3   : > { %v514_v15 = vadd.f32 1e-05, %v498_v28 }
 0x1b4   : > { %v455_v29 = vpop.xlane.xlu1 %454  ;;  %v458_v30 = vpop.xlane.xlu0 %457 }
 0x1b5   : > { %v499_v47 = vmul.f32 0.00390625, %v455_v29  ;;  %1914 = vrsqrt.f32 %v514_v15  ;;  %v500_v18 = vmul.f32 0.00390625, %v458_v30  ;;  %vm532_vm0 = vcmp.eq.f32.partialorder %v514_v15, inf  ;;  %v319_v29 = vld [vmem:[#allocation6] sm:$0x3] }
 0x1b6   : > { %v697_v30 = vsub.s32 1, %v692_v12  ;;  %vm534_vm1 = vcmp.eq.f32.partialorder %v514_v15, 0.0 }
 0x1b7   : > { %v2736_v50 = vadd.f32 1e-05, %v499_v47  ;;  %v2739_v58 = vadd.f32 1e-05, %v500_v18  ;;  %v535_v47 = vand.u32 2147483648, %v514_v15 }
 0x1b8   : > { %v461_v31 = vpop.xlane.xlu1 %460  ;;  %v464_v32 = vpop.xlane.xlu0 %463  ;;  %v320_v18 = vld [vmem:[#allocation8] sm:$0x3] }
 0x1b9   : > { %v501_v19 = vmul.f32 0.00390625, %v461_v31  ;;  %v502_v21 = vmul.f32 0.00390625, %v464_v32  ;;  %1916 = vrsqrt.f32 %v2736_v50  ;;  %vm539_vm2 = vcmp.eq.f32.partialorder %v2736_v50, inf }
 0x1ba   : > { %1918 = vrsqrt.f32 %v2739_v58  ;;  %vm541_vm3 = vcmp.eq.f32.partialorder %v2736_v50, 0.0  ;;  %vm546_vm4 = vcmp.eq.f32.partialorder %v2739_v58, inf  ;;  %vm548_vm5 = vcmp.eq.f32.partialorder %v2739_v58, 0.0 }
 0x1bb   : > { %v2741_v35 = vadd.f32 1e-05, %v501_v19  ;;  %v2743_v37 = vadd.f32 1e-05, %v502_v21 }
 0x1bc   : > { %v467_v52 = vpop.xlane.xlu1 %466  ;;  %v470_v57 = vpop.xlane.xlu0 %469 }
 0x1bd   : > { %v503_v34 = vmul.f32 0.00390625, %v467_v52  ;;  %v504_v8 = vmul.f32 0.00390625, %v470_v57  ;;  %1920 = vrsqrt.f32 %v2741_v35  ;;  %v2758_v57 = vrot.slane %v319_v29, %v693_v44 }
 0x1be   : > { %1922 = vrsqrt.f32 %v2743_v37  ;;  %vm553_vm6 = vcmp.eq.f32.partialorder %v2741_v35, inf  ;;  %vm555_vm7 = vcmp.eq.f32.partialorder %v2741_v35, 0.0  ;;  %vm560_vm8 = vcmp.eq.f32.partialorder %v2743_v37, inf }
 0x1bf   : > { %v1915_v5 = vpop.eup %1914  ;;  %v2746_v60 = vadd.f32 1e-05, %v503_v34  ;;  %v2753_v43 = vadd.f32 1e-05, %v504_v8  ;;  %vm562_vm9 = vcmp.eq.f32.partialorder %v2743_v37, 0.0 }
 0x1c0   : > { %v473_v38 = vpop.xlane.xlu1 %472  ;;  %v476_v25 = vpop.xlane.xlu0 %475  ;;  %v531_v40 = vmul.f32 %v1915_v5, %v514_v15  ;;  %v2762_v5 = vrot.slane %v319_v29, %v697_v30 }
 0x1c1   : > { %v505_v22 = vmul.f32 0.00390625, %v473_v38  ;;  %1924 = vrsqrt.f32 %v2746_v60  ;;  %v506_v31 = vmul.f32 0.00390625, %v476_v25  ;;  %v2770_v25 = vrot.slane %v320_v18, %v697_v30 }
 0x1c2   : > { %v533_v14 = vsel %vm532_vm0, %v514_v15, %v531_v40  ;;  %v542_v40 = vand.u32 2147483648, %v2736_v50  ;;  %vm567_vm10 = vcmp.eq.f32.partialorder %v2746_v60, inf  ;;  %vm569_vm11 = vcmp.eq.f32.partialorder %v2746_v60, 0.0 }
 0x1c3   : > { %v2750_v41 = vadd.f32 1e-05, %v505_v22  ;;  %v1917_v17 = vpop.eup %1916  ;;  %v536_v52 = vsel %vm534_vm1, %v535_v47, %v533_v14  ;;  %v2764_v22 = vrot.slane %v320_v18, %v693_v44  ;;  %v2768_v15 = vadd.f32 1e-05, %v506_v31 }
 0x1c4   : > { %v479_v13 = vpop.xlane.xlu1 %478  ;;  %v482_v32 = vpop.xlane.xlu0 %481  ;;  %v538_v19 = vmul.f32 %v1917_v17, %v2736_v50  ;;  %v549_v44 = vand.u32 2147483648, %v2739_v58  ;;  %v556_v47 = vand.u32 2147483648, %v2741_v35  ;;  %vm574_vm12 = vcmp.eq.f32.partialorder %v2753_v43, inf }
 0x1c5   : > { %1926 = vrsqrt.f32 %v2750_v41  ;;  %v507_v28 = vmul.f32 0.00390625, %v479_v13  ;;  %v1919_v34 = vpop.eup %1918  ;;  %v508_v38 = vmul.f32 0.00390625, %v482_v32  ;;  %vm576_vm13 = vcmp.eq.f32.partialorder %v2753_v43, 0.0 }
 0x1c6   : > { %1928 = vrsqrt.f32 %v2753_v43  ;;  %v540_v17 = vsel %vm539_vm2, %v2736_v50, %v538_v19  ;;  %vm581_vm14 = vcmp.eq.f32.partialorder %v2750_v41, inf  ;;  %vm583_vm15 = vcmp.eq.f32.partialorder %v2750_v41, 0.0 }
 0x1c7   : > { %v2760_v59 = vadd.f32 1e-05, %v507_v28  ;;  %v1921_v8 = vpop.eup %1920  ;;  %1930 = vrcp.f32 %v536_v52  ;;  %v545_v28 = vmul.f32 %v1919_v34, %v2739_v58  ;;  %v2781_v29 = vadd.f32 1e-05, %v508_v38 }
 0x1c8   : > { %v485_v21 = vpop.xlane.xlu1 %484  ;;  %v1923_v12 = vpop.eup %1922  ;;  %v552_v30 = vmul.f32 %v1921_v8, %v2741_v35  ;;  %v543_v19 = vsel %vm541_vm3, %v542_v40, %v540_v17  ;;  %vm588_vm0 = vcmp.eq.f32.partialorder %v2768_v15, inf  ;;  %vm590_vm1 = vcmp.eq.f32.partialorder %v2768_v15, 0.0 }
 0x1c9   : > { %v509_v13 = vmul.f32 0.00390625, %v485_v21  ;;  %1932 = vrsqrt.f32 %v2760_v59  ;;  %v559_v31 = vmul.f32 %v1923_v12, %v2743_v37  ;;  %v563_v21 = vand.u32 2147483648, %v2743_v37  ;;  %v488_v34 = vpop.xlane.xlu0 %487 }
 0x1ca   : > { %1934 = vrsqrt.f32 %v2768_v15  ;;  %v547_v8 = vsel %vm546_vm4, %v2739_v58, %v545_v28  ;;  %v570_v12 = vand.u32 2147483648, %v2746_v60  ;;  %v554_v50 = vsel %vm553_vm6, %v2741_v35, %v552_v30 }
 0x1cb   : > { %v1925_v14 = vpop.eup %1924  ;;  %v2789_v18 = vadd.f32 1e-05, %v509_v13  ;;  %1936 = vrsqrt.f32 %v2781_v29  ;;  %v561_v40 = vsel %vm560_vm8, %v2743_v37, %v559_v31  ;;  %v577_v30 = vand.u32 2147483648, %v2753_v43 }
 0x1cc   : > { %v566_v52 = vmul.f32 %v1925_v14, %v2746_v60  ;;  %v491_v17 = vpop.xlane.xlu1 %490  ;;  %1938 = vrcp.f32 %v543_v19  ;;  %v510_v14 = vmul.f32 0.00390625, %v488_v34  ;;  %v584_v31 = vand.u32 2147483648, %v2750_v41 }
 0x1cd   : > { %1940 = vrsqrt.f32 %v2789_v18  ;;  %v511_v26 = vmul.f32 0.00390625, %v491_v17  ;;  %v550_v19 = vsel %vm548_vm5, %v549_v44, %v547_v8  ;;  %v557_v6 = vsel %vm555_vm7, %v556_v47, %v554_v50  ;;  %v494_v58 = vpop.xlane.xlu0 %493 }
 0x1ce   : > { %v568_v28 = vsel %vm567_vm10, %v2746_v60, %v566_v52  ;;  %v564_v34 = vsel %vm562_vm9, %v563_v21, %v561_v40  ;;  %1942 = vrcp.f32 %v550_v19  ;;  %v591_v50 = vand.u32 2147483648, %v2768_v15 }
 0x1cf   : > { %v1927_v32 = vpop.eup %1926  ;;  %1944 = vrcp.f32 %v557_v6  ;;  %v571_v35 = vsel %vm569_vm11, %v570_v12, %v568_v28  ;;  %v2837_v40 = vadd.f32 1e-05, %v511_v26  ;;  %vm595_vm2 = vcmp.eq.f32.partialorder %v2760_v59, inf }
 0x1d0   : > { %v1929_v38 = vpop.eup %1928  ;;  %v580_v13 = vmul.f32 %v1927_v32, %v2750_v41  ;;  %v497_v47 = vpop.xlane.xlu1 %496  ;;  %1946 = vrcp.f32 %v564_v34  ;;  %vm597_vm3 = vcmp.eq.f32.partialorder %v2760_v59, 0.0  ;;  %vm602_vm4 = vcmp.eq.f32.partialorder %v2781_v29, inf }
 0x1d1   : > { %v573_v23 = vmul.f32 %v1929_v38, %v2753_v43  ;;  %v1931_v32 = vpop.eup %1930  ;;  %v2827_v38 = vadd.f32 1e-05, %v510_v14  ;;  %1948 = vrcp.f32 %v571_v35  ;;  %vm609_vm5 = vcmp.eq.f32.partialorder %v2789_v18, inf }
 0x1d2   : > { %v582_v48 = vsel %vm581_vm14, %v2750_v41, %v580_v13  ;;  %v644_v21 = vmul.f32 %v1931_v32, %v2580_v39  ;;  %v643_v8 = vmul.f32 %v1931_v32, %v2577_v36  ;;  %v513_v36 = vmul.f32 0.00390625, %v497_v47 }
 0x1d3   : > { %v1933_v52 = vpop.eup %1932  ;;  %v575_v37 = vsel %vm574_vm12, %v2753_v43, %v573_v23  ;;  %v585_v6 = vsel %vm583_vm15, %v584_v31, %v582_v48  ;;  %v512_v23 = vmul.f32 0.00390625, %v494_v58  ;;  %1950 = vrsqrt.f32 %v2827_v38 }
 0x1d4   : > { %v1935_v44 = vpop.eup %1934  ;;  %v594_v60 = vmul.f32 %v1933_v52, %v2760_v59  ;;  %v578_v26 = vsel %vm576_vm13, %v577_v30, %v575_v37  ;;  %v598_v41 = vand.u32 2147483648, %v2760_v59  ;;  %v702_v48 = vmul.f32 %v2762_v5, %v644_v21 }
 0x1d5   : > { %v1937_v12 = vpop.eup %1936  ;;  %v587_v39 = vmul.f32 %v1935_v44, %v2768_v15  ;;  %v701_v17 = vmul.f32 %v2758_v57, %v643_v8  ;;  %1952 = vrcp.f32 %v585_v6  ;;  %v2859_v30 = vadd.f32 1e-05, %v512_v23 }
 0x1d6   : > { %v1939_v13 = vpop.eup %1938  ;;  %1954 = vrsqrt.f32 %v2837_v40  ;;  %v596_v43 = vsel %vm595_vm2, %v2760_v59, %v594_v60  ;;  %v2864_v19 = vadd.f32 1e-05, %v513_v36  ;;  %v601_v52 = vmul.f32 %v1937_v12, %v2781_v29 }
 0x1d7   : > { %v1941_v14 = vpop.eup %1940  ;;  %v647_v28 = vmul.f32 %v1939_v13, %v2600_v4  ;;  %v646_v31 = vmul.f32 %v1939_v13, %v2597_v51  ;;  %1956 = vrcp.f32 %v578_v26  ;;  %v589_v32 = vsel %vm588_vm0, %v2768_v15, %v587_v39 }
 0x1d8   : > { %v1943_v51 = vpop.eup %1942  ;;  %vm604_vm6 = vcmp.eq.f32.partialorder %v2781_v29, 0.0  ;;  %v608_v58 = vmul.f32 %v1941_v14, %v2789_v18  ;;  %v745_v35 = vadd.f32 %v2770_v25, %v702_v48  ;;  %v744_v44 = vadd.f32 %v2764_v22, %v701_v17 }
 0x1d9   : > { %v704_v34 = vmul.f32 %v2762_v5, %v647_v28  ;;  %v703_v4 = vmul.f32 %v2758_v57, %v646_v31  ;;  %v1945_v37 = vpop.eup %1944  ;;  %v650_v8 = vmul.f32 %v1943_v51, %v2586_v45  ;;  %v599_v6 = vsel %vm597_vm3, %v598_v41, %v596_v43 }
 0x1da   : > { %v1947_v60 = vpop.eup %1946  ;;  %v653_v23 = vmul.f32 %v1945_v37, %v2606_v54  ;;  %v649_v12 = vmul.f32 %v1943_v51, %v2583_v42  ;;  %v652_v39 = vmul.f32 %v1945_v37, %v2603_v53  ;;  %v592_v36 = vsel %vm590_vm1, %v591_v50, %v589_v32 }
 0x1db   : > { %v747_v47 = vadd.f32 %v2770_v25, %v704_v34  ;;  %v746_v21 = vadd.f32 %v2764_v22, %v703_v4  ;;  %v1949_v26 = vpop.eup %1948  ;;  %v706_v17 = vmul.f32 %v2762_v5, %v650_v8  ;;  %v656_v45 = vmul.f32 %v1947_v60, %v2620_v61 }
 0x1dc   : > { %v708_v59 = vmul.f32 %v2762_v5, %v653_v23  ;;  %v707_v41 = vmul.f32 %v2758_v57, %v652_v39  ;;  %v659_v54 = vmul.f32 %v1949_v26, %v2626_v3  ;;  %1958 = vrcp.f32 %v599_v6 }
 0x1dd   : > { %v777_v13 = vpack.c.bf16 %v747_v47, %v745_v35  ;;  %v776_v48 = vpack.c.bf16 %v746_v21, %v744_v44  ;;  %v1951_v42 = vpop.eup %1950  ;;  %v610_v53 = vsel %vm609_vm5, %v2789_v18, %v608_v58  ;;  %vm611_vm7 = vcmp.eq.f32.partialorder %v2789_v18, 0.0 }
 0x1de   : > { %v612_v15 = vand.u32 2147483648, %v2789_v18  ;;  %1960 = vrsqrt.f32 %v2864_v19  ;;  %v749_v50 = vadd.f32 %v2770_v25, %v706_v17  ;;  %v751_v3 = vadd.f32 %v2770_v25, %v708_v59 }
 0x1df   : > { %1240 = vmatprep.mubr.bf16.mxu0 %v777_v13  ;;  %1353 = vmatprep.mubr.bf16.mxu1 %v777_v13  ;;  %v1953_v61 = vpop.eup %1952  ;;  %v705_v14 = vmul.f32 %v2758_v57, %v649_v12  ;;  %1962 = vrcp.f32 %v592_v36  ;;  %v605_v31 = vand.u32 2147483648, %v2781_v29  ;;  %v710_v43 = vmul.f32 %v2762_v5, %v656_v45 }
 0x1e0   : > { %1241 = vmatmul.mubr.bf16.vlgmr.msra.gmra.mrb[0].mxu0 %v776_v48  ;;  %1354 = vmatmul.mubr.bf16.vlgmr.msra.gmra.mrb[0].mxu1 %v776_v48  ;;  %v1955_v28 = vpop.eup %1954  ;;  %1964 = vrsqrt.f32 %v2859_v30  ;;  %v712_v32 = vmul.f32 %v2762_v5, %v659_v54  ;;  %v603_v4 = vsel %vm602_vm4, %v2781_v29, %v601_v52  ;;  %v779_v51 = vpack.c.bf16 %v751_v3, %v749_v50 }
 0x1e1   : > { %v1957_v34 = vpop.eup %1956  ;;  %v750_v58 = vadd.f32 %v2764_v22, %v707_v41  ;;  %v658_v35 = vmul.f32 %v1949_v26, %v2623_v63  ;;  %v665_v37 = vmul.f32 %v1953_v61, %v2646_v46  ;;  %v613_v47 = vsel %vm611_vm7, %v612_v15, %v610_v53 }
 0x1e2   : > { %v755_v44 = vadd.f32 %v2770_v25, %v712_v32  ;;  %v622_v21 = vmul.f32 %v1955_v28, %v2837_v40  ;;  %1250 = vmatprep.mubr.bf16.mxu0 %v779_v51  ;;  %1363 = vmatprep.mubr.bf16.mxu1 %v779_v51  ;;  %v748_v8 = vadd.f32 %v2764_v22, %v705_v14  ;;  %vm623_vm8 = vcmp.eq.f32.partialorder %v2837_v40, inf }
 0x1e3   : > { %v655_v52 = vmul.f32 %v1947_v60, %v2617_v9  ;;  %v753_v6 = vadd.f32 %v2770_v25, %v710_v43  ;;  %v662_v63 = vmul.f32 %v1957_v34, %v2640_v27  ;;  %v606_v46 = vsel %vm604_vm6, %v605_v31, %v603_v4 }
 0x1e4   : > { %v615_v18 = vmul.f32 %v1951_v42, %v2827_v38  ;;  %v778_v23 = vpack.c.bf16 %v750_v58, %v748_v8  ;;  %v711_v12 = vmul.f32 %v2758_v57, %v658_v35  ;;  %1966 = vrcp.f32 %v613_v47 }
 0x1e5   : > { %vm616_vm9 = vcmp.eq.f32.partialorder %v2827_v38, inf  ;;  %v626_v39 = vand.u32 2147483648, %v2837_v40  ;;  %v781_v9 = vpack.c.bf16 %v755_v44, %v753_v6  ;;  %v716_v60 = vmul.f32 %v2762_v5, %v665_v37 }
 0x1e6   : > { %v1959_v36 = vpop.eup %1958  ;;  %v624_v26 = vsel %vm623_vm8, %v2837_v40, %v622_v21  ;;  %vm625_vm10 = vcmp.eq.f32.partialorder %v2837_v40, 0.0  ;;  %v709_v27 = vmul.f32 %v2758_v57, %v655_v52  ;;  %1968 = vrcp.f32 %v606_v46 }
 0x1e7   : > { %v619_v13 = vand.u32 2147483648, %v2827_v38  ;;  %v714_v48 = vmul.f32 %v2762_v5, %v662_v63  ;;  %v617_v45 = vsel %vm616_vm9, %v2827_v38, %v615_v18  ;;  %vm618_vm11 = vcmp.eq.f32.partialorder %v2827_v38, 0.0 }
 0x1e8   : > { %1251 = vmatmul.mubr.bf16.gmra.mrb[4].mxu0 %v778_v23  ;;  %1364 = vmatmul.mubr.bf16.gmra.mrb[4].mxu1 %v778_v23  ;;  %v1961_v29 = vpop.eup %1960  ;;  %v754_v59 = vadd.f32 %v2764_v22, %v711_v12  ;;  %v664_v41 = vmul.f32 %v1953_v61, %v2643_v33  ;;  %v759_v42 = vadd.f32 %v2770_v25, %v716_v60  ;;  %vm637_vm12 = vcmp.eq.f32.partialorder %v2864_v19, inf }
 0x1e9   : > { %1260 = vmatprep.mubr.bf16.mxu0 %v781_v9  ;;  %1373 = vmatprep.mubr.bf16.mxu1 %v781_v9  ;;  %v1963_v17 = vpop.eup %1962  ;;  %v671_v53 = vmul.f32 %v1959_v36, %v2666_v56  ;;  %v627_v15 = vsel %vm625_vm10, %v626_v39, %v624_v26  ;;  %v636_v50 = vmul.f32 %v1961_v29, %v2864_v19  ;;  %vm630_vm13 = vcmp.eq.f32.partialorder %v2859_v30, inf }
 0x1ea   : > { %v1965_v54 = vpop.eup %1964  ;;  %v752_v3 = vadd.f32 %v2764_v22, %v709_v27  ;;  %v661_v14 = vmul.f32 %v1957_v34, %v2637_v24  ;;  %v757_v38 = vadd.f32 %v2770_v25, %v714_v48  ;;  %v668_v33 = vmul.f32 %v1963_v17, %v2660_v2 }
 0x1eb   : > { %v620_v61 = vsel %vm618_vm11, %v619_v13, %v617_v45  ;;  %v629_v28 = vmul.f32 %v1965_v54, %v2859_v30  ;;  %v715_v56 = vmul.f32 %v2758_v57, %v664_v41  ;;  %1970 = vrcp.f32 %v627_v15 }
 0x1ec   : > { %v780_v31 = vpack.c.bf16 %v754_v59, %v752_v3  ;;  %v640_v40 = vand.u32 2147483648, %v2864_v19  ;;  %v783_v43 = vpack.c.bf16 %v759_v42, %v757_v38  ;;  %v720_v24 = vmul.f32 %v2762_v5, %v671_v53  ;;  %v3158_v38 = vld [vmem:[#allocation18_spill] sm:$0xff] }
 0x1ed   : > { %v638_v34 = vsel %vm637_vm12, %v2864_v19, %v636_v50  ;;  %vm639_vm14 = vcmp.eq.f32.partialorder %v2864_v19, 0.0  ;;  %v713_v2 = vmul.f32 %v2758_v57, %v661_v14  ;;  %1972 = vrcp.f32 %v620_v61  ;;  %v3157_v50 = vld [vmem:[#allocation16_spill] sm:$0xff] }
 0x1ee   : > { %v1967_v32 = vpop.eup %1966  ;;  %v633_v4 = vand.u32 2147483648, %v2859_v30  ;;  %v718_v51 = vmul.f32 %v2762_v5, %v668_v33  ;;  %v631_v35 = vsel %vm630_vm13, %v2859_v30, %v629_v28  ;;  %vm632_vm15 = vcmp.eq.f32.partialorder %v2859_v30, 0.0 }
 0x1ef   : > { %v758_v19 = vadd.f32 %v2764_v22, %v715_v56  ;;  %v670_v44 = vmul.f32 %v1959_v36, %v2663_v55  ;;  %v641_v37 = vsel %vm639_vm14, %v640_v40, %v638_v34  ;;  %v763_v47 = vadd.f32 %v2770_v25, %v720_v24 }
 0x1f0   : > { %1261 = vmatmul.mubr.bf16.gmra.mrb[8].mxu0 %v780_v31  ;;  %1374 = vmatmul.mubr.bf16.gmra.mrb[8].mxu1 %v780_v31  ;;  %v1969_v58 = vpop.eup %1968  ;;  %v677_v21 = vmul.f32 %v1967_v32, %v2686_v16  ;;  %v756_v8 = vadd.f32 %v2764_v22, %v713_v2  ;;  %v667_v52 = vmul.f32 %v1963_v17, %v2657_v1  ;;  %1974 = vrcp.f32 %v641_v37  ;;  %v3160_v2 = vld [vmem:[#allocation17_spill] sm:$0xff] }
 0x1f1   : > { %1270 = vmatprep.mubr.bf16.mxu0 %v783_v43  ;;  %1383 = vmatprep.mubr.bf16.mxu1 %v783_v43  ;;  %v634_v6 = vsel %vm632_vm15, %v633_v4, %v631_v35  ;;  %v761_v63 = vadd.f32 %v2770_v25, %v718_v51  ;;  %v674_v46 = vmul.f32 %v1969_v58, %v2680_v7  ;;  %v3159_v43 = vld [vmem:[#allocation19_spill] sm:$0xff] }
 0x1f2   : > { %v782_v30 = vpack.c.bf16 %v758_v19, %v756_v8  ;;  %v719_v18 = vmul.f32 %v2758_v57, %v670_v44  ;;  %v724_v55 = vmul.f32 %v2762_v5, %v677_v21  ;;  %1976 = vrcp.f32 %v634_v6 }
 0x1f3   : > { %v785_v23 = vpack.c.bf16 %v763_v47, %v761_v63  ;;  %v717_v16 = vmul.f32 %v2758_v57, %v667_v52  ;;  %v722_v1 = vmul.f32 %v2762_v5, %v674_v46  ;;  %v676_v9 = vmul.f32 %v1967_v32, %v2683_v11 }
 0x1f4   : > { %v762_v7 = vadd.f32 %v2764_v22, %v719_v18  ;;  %v767_v60 = vadd.f32 %v2770_v25, %v724_v55  ;;  %v673_v27 = vmul.f32 %v1969_v58, %v2677_v62 }
 0x1f5   : > { %v1971_v12 = vpop.eup %1970  ;;  %v760_v26 = vadd.f32 %v2764_v22, %v717_v16  ;;  %v765_v29 = vadd.f32 %v2770_v25, %v722_v1  ;;  %v723_v17 = vmul.f32 %v2758_v57, %v676_v9 }
 0x1f6   : > { %v683_v36 = vmul.f32 %v1971_v12, %v2706_v20  ;;  %v721_v11 = vmul.f32 %v2758_v57, %v673_v27 }
 0x1f7   : > { %v1973_v39 = vpop.eup %1972  ;;  %v784_v48 = vpack.c.bf16 %v762_v7, %v760_v26  ;;  %v787_v45 = vpack.c.bf16 %v767_v60, %v765_v29  ;;  %v766_v54 = vadd.f32 %v2764_v22, %v723_v17 }
 0x1f8   : > { %1271 = vmatmul.mubr.bf16.gmra.mrb[12].mxu0 %v782_v30  ;;  %1384 = vmatmul.mubr.bf16.gmra.mrb[12].mxu1 %v782_v30  ;;  %v680_v13 = vmul.f32 %v1973_v39, %v2700_v49  ;;  %v728_v59 = vmul.f32 %v2762_v5, %v683_v36  ;;  %v682_v49 = vmul.f32 %v1971_v12, %v2703_v0 }
 0x1f9   : > { %1280 = vmatprep.mubr.bf16.mxu0 %v785_v23  ;;  %1393 = vmatprep.mubr.bf16.mxu1 %v785_v23  ;;  %v764_v15 = vadd.f32 %v2764_v22, %v721_v11  ;;  %v679_v3 = vmul.f32 %v1973_v39, %v3157_v50 }
 0x1fa   : > { %v1975_v41 = vpop.eup %1974  ;;  %v726_v20 = vmul.f32 %v2762_v5, %v680_v13  ;;  %v771_v42 = vadd.f32 %v2770_v25, %v728_v59  ;;  %v727_v28 = vmul.f32 %v2758_v57, %v682_v49 }
 0x1fb   : > { %v689_v53 = vmul.f32 %v1975_v41, %v2726_v10  ;;  %v786_v61 = vpack.c.bf16 %v766_v54, %v764_v15  ;;  %v725_v0 = vmul.f32 %v2758_v57, %v679_v3  ;;  %v688_v24 = vmul.f32 %v1975_v41, %v3159_v43 }
 0x1fc   : > { %v1977_v62 = vpop.eup %1976  ;;  %v769_v14 = vadd.f32 %v2770_v25, %v726_v20  ;;  %v770_v40 = vadd.f32 %v2764_v22, %v727_v28 }
 0x1fd   : > { %v686_v33 = vmul.f32 %v1977_v62, %v3158_v38  ;;  %v732_v56 = vmul.f32 %v2762_v5, %v689_v53  ;;  %v768_v34 = vadd.f32 %v2764_v22, %v725_v0  ;;  %v685_v4 = vmul.f32 %v1977_v62, %v3160_v2 }
 0x1fe   : > { %v789_v31 = vpack.c.bf16 %v771_v42, %v769_v14  ;;  %v731_v35 = vmul.f32 %v2758_v57, %v688_v24 }
 0x1ff   : > { %v730_v10 = vmul.f32 %v2762_v5, %v686_v33  ;;  %v775_v32 = vadd.f32 %v2770_v25, %v732_v56  ;;  %v788_v58 = vpack.c.bf16 %v770_v40, %v768_v34  ;;  %v729_v5 = vmul.f32 %v2758_v57, %v685_v4 }
 0x200   : > { %1281 = vmatmul.mubr.bf16.gmra.mrb[16].mxu0 %v784_v48  ;;  %1394 = vmatmul.mubr.bf16.gmra.mrb[16].mxu1 %v784_v48  ;;  %v774_v44 = vadd.f32 %v2764_v22, %v731_v35 }
 0x201   : > { %1290 = vmatprep.mubr.bf16.mxu0 %v787_v45  ;;  %1403 = vmatprep.mubr.bf16.mxu1 %v787_v45  ;;  %v773_v51 = vadd.f32 %v2770_v25, %v730_v10  ;;  %v772_v37 = vadd.f32 %v2764_v22, %v729_v5 }
 0x203   : > { %v791_v19 = vpack.c.bf16 %v775_v32, %v773_v51  ;;  %v790_v47 = vpack.c.bf16 %v774_v44, %v772_v37 }
 0x208   : > { %1291 = vmatmul.mubr.bf16.gmra.mrb[20].mxu0 %v786_v61  ;;  %1404 = vmatmul.mubr.bf16.gmra.mrb[20].mxu1 %v786_v61 }
 0x209   : > { %1300 = vmatprep.mubr.bf16.mxu0 %v789_v31  ;;  %1413 = vmatprep.mubr.bf16.mxu1 %v789_v31 }
 0x210   : > { %1301 = vmatmul.mubr.bf16.gmra.mrb[24].mxu0 %v788_v58  ;;  %1414 = vmatmul.mubr.bf16.gmra.mrb[24].mxu1 %v788_v58 }
 0x211   : > { %1310 = vmatprep.mubr.bf16.mxu0 %v791_v19  ;;  %1423 = vmatprep.mubr.bf16.mxu1 %v791_v19 }
 0x218   : > { %1311 = vmatmul.mubr.bf16.gmra.mrb[28].mxu0 %v790_v47  ;;  %1424 = vmatmul.mubr.bf16.gmra.mrb[28].mxu1 %v790_v47 }
 0x2b3   : > { %v1242_v21 = vpop.f32.mrb[0].mxu0  ;;  %v1355_v25 = vpop.f32.mrb[0].mxu1 }
 0x2b4   : > { %1434 = vst [vmem:[%s3005_s25] sm:$0xff] %v1242_v21  ;;  %1436 = vst [vmem:[%s3005_s25 + $0x10] sm:$0xff] %v1355_v25  ;;  %v1244_v57 = vpop.f32.mrb[1].mxu0  ;;  %v1357_v22 = vpop.f32.mrb[1].mxu1 }
 0x2b5   : > { %1435 = vst [vmem:[%s3005_s25 + $0x8] sm:$0xff] %v1244_v57  ;;  %1437 = vst [vmem:[%s3005_s25 + $0x18] sm:$0xff] %v1357_v22  ;;  %v1246_v8 = vpop.f32.mrb[2].mxu0  ;;  %v1359_v52 = vpop.f32.mrb[2].mxu1 }
 0x2b6   : > { %1438 = vst [vmem:[%s3005_s25 + $0x20] sm:$0xff] %v1246_v8  ;;  %1440 = vst [vmem:[%s3005_s25 + $0x30] sm:$0xff] %v1359_v52  ;;  %v1248_v6 = vpop.f32.mrb[3].mxu0  ;;  %v1361_v63 = vpop.f32.mrb[3].mxu1 }
 0x2b7   : > { %1439 = vst [vmem:[%s3005_s25 + $0x28] sm:$0xff] %v1248_v6  ;;  %1441 = vst [vmem:[%s3005_s25 + $0x38] sm:$0xff] %v1361_v63 }
 0x2bb   : > { %v1252_v46 = vpop.f32.mrb[4].mxu0  ;;  %v1365_v30 = vpop.f32.mrb[4].mxu1 }
 0x2bc   : > { %1442 = vst [vmem:[%s3005_s25 + $0x40] sm:$0xff] %v1252_v46  ;;  %1444 = vst [vmem:[%s3005_s25 + $0x50] sm:$0xff] %v1365_v30  ;;  %v1254_v18 = vpop.f32.mrb[5].mxu0  ;;  %v1367_v23 = vpop.f32.mrb[5].mxu1 }
 0x2bd   : > { %1443 = vst [vmem:[%s3005_s25 + $0x48] sm:$0xff] %v1254_v18  ;;  %1445 = vst [vmem:[%s3005_s25 + $0x58] sm:$0xff] %v1367_v23  ;;  %v1256_v55 = vpop.f32.mrb[6].mxu0  ;;  %v1369_v12 = vpop.f32.mrb[6].mxu1 }
 0x2be   : > { %1446 = vst [vmem:[%s3005_s25 + $0x60] sm:$0xff] %v1256_v55  ;;  %1448 = vst [vmem:[%s3005_s25 + $0x70] sm:$0xff] %v1369_v12  ;;  %v1258_v16 = vpop.f32.mrb[7].mxu0  ;;  %v1371_v1 = vpop.f32.mrb[7].mxu1 }
 0x2bf   : > { %1447 = vst [vmem:[%s3005_s25 + $0x68] sm:$0xff] %v1258_v16  ;;  %1449 = vst [vmem:[%s3005_s25 + $0x78] sm:$0xff] %v1371_v1 }
 0x2c3   : > { %v1262_v39 = vpop.f32.mrb[8].mxu0  ;;  %v1375_v7 = vpop.f32.mrb[8].mxu1 }
 0x2c4   : > { %1450 = vst [vmem:[%s3005_s25 + $0x80] sm:$0xff] %v1262_v39  ;;  %1452 = vst [vmem:[%s3005_s25 + $0x90] sm:$0xff] %v1375_v7  ;;  %v1264_v9 = vpop.f32.mrb[9].mxu0  ;;  %v1377_v60 = vpop.f32.mrb[9].mxu1 }
 0x2c5   : > { %1451 = vst [vmem:[%s3005_s25 + $0x88] sm:$0xff] %v1264_v9  ;;  %1453 = vst [vmem:[%s3005_s25 + $0x98] sm:$0xff] %v1377_v60  ;;  %v1266_v36 = vpop.f32.mrb[10].mxu0  ;;  %v1379_v26 = vpop.f32.mrb[10].mxu1 }
 0x2c6   : > { %1454 = vst [vmem:[%s3005_s25 + $0xa0] sm:$0xff] %v1266_v36  ;;  %1456 = vst [vmem:[%s3005_s25 + $0xb0] sm:$0xff] %v1379_v26  ;;  %v1268_v27 = vpop.f32.mrb[11].mxu0  ;;  %v1381_v29 = vpop.f32.mrb[11].mxu1 }
 0x2c7   : > { %1455 = vst [vmem:[%s3005_s25 + $0xa8] sm:$0xff] %v1268_v27  ;;  %1457 = vst [vmem:[%s3005_s25 + $0xb8] sm:$0xff] %v1381_v29 }
 0x2cb   : > { %v1272_v13 = vpop.f32.mrb[12].mxu0  ;;  %v1385_v48 = vpop.f32.mrb[12].mxu1 }
 0x2cc   : > { %1458 = vst [vmem:[%s3005_s25 + $0xc0] sm:$0xff] %v1272_v13  ;;  %1460 = vst [vmem:[%s3005_s25 + $0xd0] sm:$0xff] %v1385_v48  ;;  %v1274_v17 = vpop.f32.mrb[13].mxu0  ;;  %v1387_v45 = vpop.f32.mrb[13].mxu1 }
 0x2cd   : > { %1459 = vst [vmem:[%s3005_s25 + $0xc8] sm:$0xff] %v1274_v17  ;;  %1461 = vst [vmem:[%s3005_s25 + $0xd8] sm:$0xff] %v1387_v45  ;;  %v1276_v59 = vpop.f32.mrb[14].mxu0  ;;  %v1389_v41 = vpop.f32.mrb[14].mxu1 }
 0x2ce   : > { %1462 = vst [vmem:[%s3005_s25 + $0xe0] sm:$0xff] %v1276_v59  ;;  %1464 = vst [vmem:[%s3005_s25 + $0xf0] sm:$0xff] %v1389_v41  ;;  %v1278_v11 = vpop.f32.mrb[15].mxu0  ;;  %v1391_v20 = vpop.f32.mrb[15].mxu1 }
 0x2cf   : > { %1463 = vst [vmem:[%s3005_s25 + $0xe8] sm:$0xff] %v1278_v11  ;;  %1465 = vst [vmem:[%s3005_s25 + $0xf8] sm:$0xff] %v1391_v20 }
 0x2d3   : > { %v1282_v62 = vpop.f32.mrb[16].mxu0  ;;  %v1395_v54 = vpop.f32.mrb[16].mxu1 }
 0x2d4   : > { %1466 = vst [vmem:[%s3005_s25 + $0x100] sm:$0xff] %v1282_v62  ;;  %1468 = vst [vmem:[%s3005_s25 + $0x110] sm:$0xff] %v1395_v54  ;;  %v1284_v49 = vpop.f32.mrb[17].mxu0  ;;  %v1397_v42 = vpop.f32.mrb[17].mxu1 }
 0x2d5   : > { %1467 = vst [vmem:[%s3005_s25 + $0x108] sm:$0xff] %v1284_v49  ;;  %1469 = vst [vmem:[%s3005_s25 + $0x118] sm:$0xff] %v1397_v42  ;;  %v1286_v53 = vpop.f32.mrb[18].mxu0  ;;  %v1399_v15 = vpop.f32.mrb[18].mxu1 }
 0x2d6   : > { %1470 = vst [vmem:[%s3005_s25 + $0x120] sm:$0xff] %v1286_v53  ;;  %1472 = vst [vmem:[%s3005_s25 + $0x130] sm:$0xff] %v1399_v15  ;;  %v1288_v50 = vpop.f32.mrb[19].mxu0  ;;  %v1401_v3 = vpop.f32.mrb[19].mxu1 }
 0x2d7   : > { %1471 = vst [vmem:[%s3005_s25 + $0x128] sm:$0xff] %v1288_v50  ;;  %1473 = vst [vmem:[%s3005_s25 + $0x138] sm:$0xff] %v1401_v3 }
 0x2db   : > { %v1292_v14 = vpop.f32.mrb[20].mxu0  ;;  %v1405_v38 = vpop.f32.mrb[20].mxu1 }
 0x2dc   : > { %1474 = vst [vmem:[%s3005_s25 + $0x140] sm:$0xff] %v1292_v14  ;;  %1476 = vst [vmem:[%s3005_s25 + $0x150] sm:$0xff] %v1405_v38  ;;  %v1294_v33 = vpop.f32.mrb[21].mxu0  ;;  %v1407_v61 = vpop.f32.mrb[21].mxu1 }
 0x2dd   : > { %1475 = vst [vmem:[%s3005_s25 + $0x148] sm:$0xff] %v1294_v33  ;;  %1477 = vst [vmem:[%s3005_s25 + $0x158] sm:$0xff] %v1407_v61  ;;  %v1296_v28 = vpop.f32.mrb[22].mxu0  ;;  %v1409_v31 = vpop.f32.mrb[22].mxu1 }
 0x2de   : > { %1478 = vst [vmem:[%s3005_s25 + $0x160] sm:$0xff] %v1296_v28  ;;  %1480 = vst [vmem:[%s3005_s25 + $0x170] sm:$0xff] %v1409_v31  ;;  %v1298_v56 = vpop.f32.mrb[23].mxu0  ;;  %v1411_v0 = vpop.f32.mrb[23].mxu1 }
 0x2df   : > { %1479 = vst [vmem:[%s3005_s25 + $0x168] sm:$0xff] %v1298_v56  ;;  %1481 = vst [vmem:[%s3005_s25 + $0x178] sm:$0xff] %v1411_v0 }
 0x2e3   : > { %v1302_v10 = vpop.f32.mrb[24].mxu0  ;;  %v1415_v40 = vpop.f32.mrb[24].mxu1 }
 0x2e4   : > { %1482 = vst [vmem:[%s3005_s25 + $0x180] sm:$0xff] %v1302_v10  ;;  %1484 = vst [vmem:[%s3005_s25 + $0x190] sm:$0xff] %v1415_v40  ;;  %v1304_v43 = vpop.f32.mrb[25].mxu0  ;;  %v1417_v24 = vpop.f32.mrb[25].mxu1 }
 0x2e5   : > { %1483 = vst [vmem:[%s3005_s25 + $0x188] sm:$0xff] %v1304_v43  ;;  %1485 = vst [vmem:[%s3005_s25 + $0x198] sm:$0xff] %v1417_v24  ;;  %v1306_v32 = vpop.f32.mrb[26].mxu0  ;;  %v1419_v34 = vpop.f32.mrb[26].mxu1 }
 0x2e6   : > { %1486 = vst [vmem:[%s3005_s25 + $0x1a0] sm:$0xff] %v1306_v32  ;;  %1488 = vst [vmem:[%s3005_s25 + $0x1b0] sm:$0xff] %v1419_v34  ;;  %v1308_v2 = vpop.f32.mrb[27].mxu0  ;;  %v1421_v4 = vpop.f32.mrb[27].mxu1 }
 0x2e7   : > { %1487 = vst [vmem:[%s3005_s25 + $0x1a8] sm:$0xff] %v1308_v2  ;;  %1489 = vst [vmem:[%s3005_s25 + $0x1b8] sm:$0xff] %v1421_v4 }
 0x2eb   : > { %v1312_v51 = vpop.f32.mrb[28].mxu0  ;;  %v1425_v58 = vpop.f32.mrb[28].mxu1 }
 0x2ec   : > { %1490 = vst [vmem:[%s3005_s25 + $0x1c0] sm:$0xff] %v1312_v51  ;;  %1492 = vst [vmem:[%s3005_s25 + $0x1d0] sm:$0xff] %v1425_v58  ;;  %v1314_v35 = vpop.f32.mrb[29].mxu0  ;;  %v1427_v19 = vpop.f32.mrb[29].mxu1 }
 0x2ed   : > { %1491 = vst [vmem:[%s3005_s25 + $0x1c8] sm:$0xff] %v1314_v35  ;;  %1493 = vst [vmem:[%s3005_s25 + $0x1d8] sm:$0xff] %v1427_v19  ;;  %v1316_v5 = vpop.f32.mrb[30].mxu0  ;;  %v1429_v44 = vpop.f32.mrb[30].mxu1 }
 0x2ee   : > { %1494 = vst [vmem:[%s3005_s25 + $0x1e0] sm:$0xff] %v1316_v5  ;;  %1496 = vst [vmem:[%s3005_s25 + $0x1f0] sm:$0xff] %v1429_v44  ;;  %v1318_v37 = vpop.f32.mrb[31].mxu0  ;;  %v1431_v47 = vpop.f32.mrb[31].mxu1 }
 0x2ef   : > { %1495 = vst [vmem:[%s3005_s25 + $0x1e8] sm:$0xff] %v1318_v37  ;;  %1497 = vst [vmem:[%s3005_s25 + $0x1f8] sm:$0xff] %v1431_v47 }
 0x2f0   : > { %2105 = shalt.err (!%p2102_p5)
}
 0x2f1   : > { %s2106_s21 = scalar_lea.hbm %s3070_s29, 8192  ;;  %s2110_s6 = scalar_lea.hbm %s3131_s4, 16384 }
 0x2f2   : > { %p2107_p10 = scmp.ne.s32.totalorder %s3070_s29, %s2106_s21  ;;  %p2111_p3 = scmp.lt.u32.totalorder %s3070_s29, %s3131_s4 }
 0x2f3   : > { %p2112_p7 = scmp.lt.u32.totalorder %s2110_s6, %s2106_s21  ;;  %p2114_p12 = scmp.lt.u32.totalorder %s2106_s21, %s3070_s29 }
 0x2f4   : > { %p2108_p13 = pnand %p2107_p10, %p2369_p2 }
 0x2f5   : > { %p2113_p11 = por %p2112_p7, %p2111_p3 }
 0x2f6   : > { %p2109_p9 = pneg %p2108_p13 }
 0x2f7   : > { %p2115_p1 = por %p2114_p12, %p2113_p11 }
 0x2f9   : > { %p2116_p4 = pnand %p2115_p1, %p2109_p9 }
 0x2fb   : > { %2119 = shalt.err (!%p2116_p4)
}
 0x2fc   : > { %s2191_s27 = smov 512   ;;  %s2192_s14 = smov 32  }
 0x2fd   : > { %1735 = dma.vmem_to_hbm [thread:$0]  (%p2369_p2), %s3072_s22, 8192, %s3070_s29, %s1499_s18, %s2191_s27, %s2191_s27, %s2192_s14  }
 0x2fe PF: > { %s1530_s24 = sand.u32 1, %s2162_s15   ;;  %p3161_p6 = scmp.ne.s32.totalorder %s3143_s26, 0 }
 0x2ff   : > { %p3162_p8 = scmp.ge.s32.totalorder %s2182_s20, 2  ;;  %s1531_s28 = scalar_lea.sflag [#allocation5], %s1530_s24 }
 0x301   : > { %p1752_p0 = pnand %p3162_p8, %p3161_p6 }
 0x303   : > { %2157 = dma.done.wait (!%p1752_p0), %s1531_s28, 8192  }
 0x304   : > { %2159 = vsyncadd (!%p1752_p0), %s1531_s28, 4294959104  ;;  %s22_s20 = sadd.s32 1, %s2182_s20   ;;  %s3163_s15 = smov %s2166_s16 }
 0x305   : > { %p19_p5 = scmp.ge.s32.totalorder %s22_s20, 4   ;;  %s3164_s16 = smov %s2170_s17 }
 0x306   : > { %s3165_s17 = smov %s2381_s12  ;;  %s3166_s18 = smov %s2178_s19 }
 0x307   : > { %s3167_s19 = smov %s3169_s7  ;;  %21 = sbr.rel (!%p19_p5) target bundleno = 8 (0x8), region = 98 }
 0x30e   :  { %1536 = vsyncpa [#allocation4], 1 }
 0x30f   :  { %1538 = vsyncpa [#allocation4 + $0x1], 1 }
 0x310   :  { %1539 = vsyncpa [#allocation7], 1 }
 0x311   :  { %1540 = vsyncpa [#allocation10], 1 }
 0x312   :  { %1541 = vsyncpa [#allocation5], 1 }
 0x313   :  { %1543 = vsyncpa [#allocation5 + $0x1], 1 }

// kernel: _lambda_.9
= control target key start
LH: loop header
LB: loop body
LE: loop exit
PB: predicated region body
PF: predicated region fallthrough
CT: control target
= control target key end

     0   :  { %s10318_s0 = inlined_call_operand.hbm [shape: f32[256,256], index: 0, kind: input, shape index: {}]   ;;  %s10319_s1 = inlined_call_operand.hbm [shape: bf16[256,256], index: 1, kind: input, shape index: {}]   ;;  %s10320_s2 = inlined_call_operand.hbm [shape: bf16[256,256], index: 2, kind: input, shape index: {}]   ;;  %s10321_s3 = inlined_call_operand.hbm [shape: f32[1,256], index: 3, kind: input, shape index: {}]   ;;  %s10322_s4 = inlined_call_operand.hbm [shape: f32[1,256], index: 4, kind: input, shape index: {}]   ;;  %s10323_s5 = inlined_call_operand.hbm [shape: f32[1,256], index: 5, kind: input, shape index: {}]   ;;  %s10324_s6 = inlined_call_operand.hbm [shape: bf16[256,1024], index: 6, kind: input, shape index: {}]   ;;  %s10325_s7 = inlined_call_operand.hbm [shape: f32[1,1024], index: 7, kind: input, shape index: {}]   ;;  %s10326_s8 = inlined_call_operand.hbm [shape: bf16[1024,256], index: 8, kind: input, shape index: {}]   ;;  %s10327_s9 = inlined_call_operand.hbm [shape: f32[1,256], index: 9, kind: input, shape index: {}]   ;;  %s10328_s10 = inlined_call_operand.hbm [shape: f32[256,256], index: 10, kind: output, shape index: {}]  }
   0x1   :  { %10464 = sst [smem:[#allocation148_spill]] %s10318_s0 }
   0x2   :  { %10465 = sst [smem:[#allocation149_spill]] %s10320_s2 }
   0x3   :  { %10466 = sst [smem:[#allocation150_spill]] %s10321_s3 }
   0x4   :  { %10467 = sst [smem:[#allocation151_spill]] %s10322_s4 }
   0x5   :  { %10468 = sst [smem:[#allocation152_spill]] %s10323_s5 }
   0x6   :  { %10469 = sst [smem:[#allocation153_spill]] %s10324_s6 }
   0x7   :  { %10470 = sst [smem:[#allocation154_spill]] %s10325_s7 }
   0x8   :  { %10471 = sst [smem:[#allocation155_spill]] %s10326_s8 }
   0x9   :  { %10472 = sst [smem:[#allocation156_spill]] %s10328_s10 }
   0xa   :  { %15 = vsyncpa [#allocation3], 0 }
   0xb   :  { %17 = vsyncpa [#allocation3 + $0x1], 0 }
   0xc   :  { %18 = vsyncpa [#allocation6], 0 }
   0xd   :  { %20 = vsyncpa [#allocation6 + $0x1], 0 }
   0xe   :  { %21 = vsyncpa [#allocation9], 0 }
   0xf   :  { %22 = vsyncpa [#allocation12], 0 }
  0x10   :  { %23 = vsyncpa [#allocation15], 0 }
  0x11   :  { %24 = vsyncpa [#allocation18], 0 }
  0x12   :  { %25 = vsyncpa [#allocation4], 0 }
  0x13   :  { %27 = vsyncpa [#allocation4 + $0x1], 0  ;;  %s7154_s13 = smov 0   ;;  %s7156_s14 = smov 0  }
  0x14   :  { %s7158_s15 = smov 0   ;;  %s7160_s16 = smov 0  }
  0x15 LB: > { %s7080_s17 = smov [#allocation7]   ;;  %s7175_s19 = sadd.s32 4294967295, %s7078_s16   ;;  %s7078_s16 = sphi %s7160_s16, %s10869_s16   ;;  %s7074_s15 = sphi %s7158_s15, %s10868_s15   ;;  %s7070_s14 = sphi %s7156_s14, %s10867_s14   ;;  %s7066_s13 = sphi %s7154_s13, %s10866_s13  }
  0x16   : > { %s296_s18 = sshll.u32 %s7080_s17, 4  ;;  %p5441_p0 = scmp.ge.s32.totalorder %s7078_s16, 1  ;;  %s7180_s18 = int_to_ptr.vmem [resolvable:$true] %s296_s18 }
  0x17   : > { %p10333_p1 = scmp.eq.s32.totalorder %s7175_s19, 0  ;;  %p284_p2 = scmp.lt.s32.totalorder %s7078_s16, 3 }
  0x18   : > { %s7081_s21 = smov [#allocation8]   ;;  %s7082_s24 = smov [#allocation11]  }
  0x19   : > { %p7182_p3 = pnand %p5441_p0, %p284_p2  ;;  %s310_s22 = sshll.u32 %s7081_s21, 4  ;;  %s7195_s22 = int_to_ptr.vmem [resolvable:$true] %s310_s22 }
  0x1a   : > { %s332_s25 = sshll.u32 %s7082_s24, 4  ;;  %s10476_s2 = sld [smem:[#allocation149_spill]]  ;;  %s7197_s25 = int_to_ptr.vmem [resolvable:$true] %s332_s25 }
  0x1b   : > { %s10473_s20 = scalar_select %p7182_p3, 1, 0 }
  0x1c   : > { %p5985_p5 = pneg %p7182_p3 }
  0x1d   : > { %10474 = sst [smem:[#allocation28_spill]] %s10473_s20 }
  0x1e   : > { %p7191_p6 = pnand %p5985_p5, %p10333_p1 }
  0x20   : > { %s6704_s28 = scalar_lea.hbm %s10476_s2, 4096  ;;  %p7207_p8 = pneg %p7191_p6 }
  0x21   : > { %p6705_p7 = scmp.ne.s32.totalorder %s10476_s2, %s6704_s28  ;;  %p6711_p11 = scmp.lt.u32.totalorder %s6704_s28, %s10476_s2 }
  0x23   : > { %p6707_p9 = pnand %p7207_p8, %p6705_p7 }
  0x25   : > { %p6708_p10 = pneg %p6707_p9 }
  0x27   : > { %p6713_p12 = pnand %p6711_p11, %p6708_p10 }
  0x29   : > { %6716 = shalt.err (!%p6713_p12)
}
  0x2a   : > { %s6717_s21 = scalar_lea.vmem %s7180_s18, 4096  ;;  %p6725_p5 = scmp.lt.s32.totalorder %s7180_s18, %s7180_s18 }
  0x2b   : > { %p6718_p13 = scmp.ne.s32.totalorder %s7180_s18, %s6717_s21  ;;  %p6726_p4 = scmp.lt.s32.totalorder %s6717_s21, %s6717_s21 }
  0x2d   : > { %p6720_p0 = pnand %p6718_p13, %p7207_p8  ;;  %p6727_p7 = por %p6726_p4, %p6725_p5 }
  0x2f   : > { %p6721_p2 = pneg %p6720_p0 }
  0x31   : > { %p6728_p9 = pnand %p6727_p7, %p6721_p2 }
  0x33   : > { %6731 = shalt.err (!%p6728_p9)
}
  0x34   : > { %s10331_s24 = smov 128   ;;  %s10335_s26 = smov 8  }
  0x35   : > { %5988 = dma.hbm_to_vmem [thread:$0]  (!%p7191_p6), %s10476_s2, 4096, %s7180_s18, [#allocation6], %s10331_s24, %s10331_s24, %s10335_s26  }
  0x36   : > { %s10478_s3 = sld [smem:[#allocation150_spill]] }
  0x3c   : > { %s6732_s12 = scalar_lea.hbm %s10478_s3, 32 }
  0x3d   : > { %p6733_p4 = scmp.ne.s32.totalorder %s10478_s3, %s6732_s12  ;;  %p6739_p12 = scmp.lt.u32.totalorder %s6732_s12, %s10478_s3 }
  0x3f   : > { %p6735_p10 = pnand %p6733_p4, %p7207_p8 }
  0x41   : > { %p6736_p11 = pneg %p6735_p10 }
  0x43   : > { %p6741_p13 = pnand %p6739_p12, %p6736_p11 }
  0x45   : > { %6744 = shalt.err (!%p6741_p13)
}
  0x46   : > { %s6745_s18 = scalar_lea.vmem %s7195_s22, 32  ;;  %p6753_p7 = scmp.lt.s32.totalorder %s7195_s22, %s7195_s22 }
  0x47   : > { %p6746_p0 = scmp.ne.s32.totalorder %s7195_s22, %s6745_s18  ;;  %p6754_p9 = scmp.lt.s32.totalorder %s6745_s18, %s6745_s18 }
  0x49   : > { %p6748_p2 = pnand %p6746_p0, %p7207_p8  ;;  %p6755_p4 = por %p6754_p9, %p6753_p7 }
  0x4b   : > { %p6749_p5 = pneg %p6748_p2 }
  0x4d   : > { %p6756_p10 = pnand %p6755_p4, %p6749_p5 }
  0x4f   : > { %6759 = shalt.err (!%p6756_p10)
}
  0x50   : > { %5991 = dma.hbm_to_vmem [thread:$0]  (!%p7191_p6), %s10478_s3, 32, %s7195_s22, [#allocation9]  }
  0x51   : > { %s10479_s5 = sld [smem:[#allocation152_spill]] }
  0x57   : > { %s6760_s29 = scalar_lea.hbm %s10479_s5, 32 }
  0x58   : > { %p6761_p11 = scmp.ne.s32.totalorder %s10479_s5, %s6760_s29  ;;  %p6767_p0 = scmp.lt.u32.totalorder %s6760_s29, %s10479_s5 }
  0x5a   : > { %p6763_p12 = pnand %p6761_p11, %p7207_p8 }
  0x5c   : > { %p6764_p13 = pneg %p6763_p12 }
  0x5e   : > { %p6769_p2 = pnand %p6767_p0, %p6764_p13 }
  0x60   : > { %6772 = shalt.err (!%p6769_p2)
}
  0x61   : > { %s6773_s22 = scalar_lea.vmem %s7197_s25, 32  ;;  %p6781_p4 = scmp.lt.s32.totalorder %s7197_s25, %s7197_s25 }
  0x62   : > { %p6774_p5 = scmp.ne.s32.totalorder %s7197_s25, %s6773_s22  ;;  %p6782_p10 = scmp.lt.s32.totalorder %s6773_s22, %s6773_s22 }
  0x64   : > { %p6776_p7 = pnand %p6774_p5, %p7207_p8  ;;  %p6783_p11 = por %p6782_p10, %p6781_p4 }
  0x66   : > { %p6777_p9 = pneg %p6776_p7 }
  0x68   : > { %p6784_p12 = pnand %p6783_p11, %p6777_p9 }
  0x6a   : > { %6787 = shalt.err (!%p6784_p12)
}
  0x6b   : > { %5997 = dma.hbm_to_vmem [thread:$0]  (!%p7191_p6), %s10479_s5, 32, %s7197_s25, [#allocation12]  }
  0x6c   : > { %s7085_s20 = smov [#allocation14]   ;;  %s7086_s28 = smov [#allocation10]  }
  0x6d   : > { %s356_s27 = sshll.u32 %s7085_s20, 4  ;;  %s321_s29 = sshll.u32 %s7086_s28, 4  ;;  %s357_s27 = int_to_ptr.vmem [resolvable:$true] %s356_s27  ;;  %s322_s29 = int_to_ptr.vmem [resolvable:$true] %s321_s29 }
  0x6e   : > { %s10480_s7 = sld [smem:[#allocation154_spill]] }
  0x74   : > { %s6788_s17 = scalar_lea.hbm %s10480_s7, 128 }
  0x75   : > { %p6789_p13 = scmp.ne.s32.totalorder %s10480_s7, %s6788_s17  ;;  %p6795_p5 = scmp.lt.u32.totalorder %s6788_s17, %s10480_s7 }
  0x77   : > { %p6791_p0 = pnand %p6789_p13, %p7207_p8 }
  0x79   : > { %p6792_p2 = pneg %p6791_p0 }
  0x7b   : > { %p6797_p7 = pnand %p6795_p5, %p6792_p2 }
  0x7d   : > { %6800 = shalt.err (!%p6797_p7)
}
  0x7e   : > { %s6801_s25 = scalar_lea.vmem %s357_s27, 128  ;;  %p6809_p11 = scmp.lt.s32.totalorder %s357_s27, %s357_s27 }
  0x7f   : > { %p6802_p9 = scmp.ne.s32.totalorder %s357_s27, %s6801_s25  ;;  %p6810_p12 = scmp.lt.s32.totalorder %s6801_s25, %s6801_s25 }
  0x81   : > { %p6804_p4 = pnand %p6802_p9, %p7207_p8  ;;  %p6811_p1 = por %p6810_p12, %p6809_p11 }
  0x83   : > { %p6805_p10 = pneg %p6804_p4 }
  0x85   : > { %p6812_p3 = pnand %p6811_p1, %p6805_p10 }
  0x87   : > { %6815 = shalt.err (!%p6812_p3)
}
  0x88   : > { %6003 = dma.hbm_to_vmem [thread:$0]  (!%p7191_p6), %s10480_s7, 128, %s357_s27, [#allocation15]  }
  0x89   : > { %s10481_s4 = sld [smem:[#allocation151_spill]] }
  0x8f   : > { %s6816_s30 = scalar_lea.hbm %s10481_s4, 32 }
  0x90   : > { %p6817_p13 = scmp.ne.s32.totalorder %s10481_s4, %s6816_s30  ;;  %p6823_p3 = scmp.lt.u32.totalorder %s6816_s30, %s10481_s4 }
  0x92   : > { %p6819_p0 = pnand %p6817_p13, %p7207_p8 }
  0x94   : > { %p6820_p1 = pneg %p6819_p0 }
  0x96   : > { %p6825_p2 = pnand %p6823_p3, %p6820_p1 }
  0x98   : > { %6828 = shalt.err (!%p6825_p2)
}
  0x99   : > { %s6829_s18 = scalar_lea.vmem %s322_s29, 32  ;;  %p6837_p4 = scmp.lt.s32.totalorder %s322_s29, %s322_s29 }
  0x9a   : > { %p6830_p5 = scmp.ne.s32.totalorder %s322_s29, %s6829_s18  ;;  %p6838_p10 = scmp.lt.s32.totalorder %s6829_s18, %s6829_s18 }
  0x9c   : > { %p6832_p7 = pnand %p6830_p5, %p7207_p8  ;;  %p6839_p11 = por %p6838_p10, %p6837_p4 }
  0x9e   : > { %p6833_p9 = pneg %p6832_p7 }
  0xa0   : > { %p6840_p12 = pnand %p6839_p11, %p6833_p9 }
  0xa2   : > { %6843 = shalt.err (!%p6840_p12)
}
  0xa3   : > { %5994 = dma.hbm_to_vmem [thread:$0]  (!%p7191_p6), %s10481_s4, 32, %s322_s29, [#allocation9]  }
  0xa4   : > { %s7087_s10 = smov [#allocation13]   ;;  %s10482_s6 = sld [smem:[#allocation153_spill]] }
  0xa5   : > { %s342_s20 = sshll.u32 %s7087_s10, 4  ;;  %s343_s20 = int_to_ptr.vmem [resolvable:$true] %s342_s20 }
  0xaa   : > { %s6844_s30 = scalar_lea.hbm %s10482_s6, 16384 }
  0xab   : > { %p6845_p13 = scmp.ne.s32.totalorder %s10482_s6, %s6844_s30  ;;  %p6851_p3 = scmp.lt.u32.totalorder %s6844_s30, %s10482_s6 }
  0xad   : > { %p6847_p0 = pnand %p6845_p13, %p7207_p8 }
  0xaf   : > { %p6848_p1 = pneg %p6847_p0 }
  0xb1   : > { %p6853_p2 = pnand %p6851_p3, %p6848_p1 }
  0xb3   : > { %6856 = shalt.err (!%p6853_p2)
}
  0xb4   : > { %s6857_s29 = scalar_lea.vmem %s343_s20, 16384  ;;  %p6865_p4 = scmp.lt.s32.totalorder %s343_s20, %s343_s20 }
  0xb5   : > { %p6858_p5 = scmp.ne.s32.totalorder %s343_s20, %s6857_s29  ;;  %p6866_p10 = scmp.lt.s32.totalorder %s6857_s29, %s6857_s29 }
  0xb7   : > { %p6860_p7 = pnand %p6858_p5, %p7207_p8  ;;  %p6867_p11 = por %p6866_p10, %p6865_p4 }
  0xb9   : > { %p6861_p9 = pneg %p6860_p7 }
  0xbb   : > { %p6868_p12 = pnand %p6867_p11, %p6861_p9 }
  0xbd   : > { %6871 = shalt.err (!%p6868_p12)
}
  0xbe   : > { %s7088_s18 = smov 512   ;;  %s7089_s27 = smov 32  }
  0xbf   : > { %6000 = dma.hbm_to_vmem [thread:$0]  (!%p7191_p6), %s10482_s6, 16384, %s343_s20, [#allocation12], %s7088_s18, %s7088_s18, %s7089_s27  }
  0xc0   : > { %s7090_s24 = smov [#allocation16]   ;;  %s7091_s30 = smov [#allocation17]  }
  0xc1   : > { %s366_s28 = sshll.u32 %s7090_s24, 4  ;;  %s380_s12 = sshll.u32 %s7091_s30, 4  ;;  %s367_s28 = int_to_ptr.vmem [resolvable:$true] %s366_s28  ;;  %s7331_s12 = int_to_ptr.vmem [resolvable:$true] %s380_s12 }
  0xc2   : > { %s10483_s8 = sld [smem:[#allocation155_spill]] }
  0xc8   : > { %s6872_s22 = scalar_lea.hbm %s10483_s8, 16384 }
  0xc9   : > { %p6873_p13 = scmp.ne.s32.totalorder %s10483_s8, %s6872_s22  ;;  %p6879_p3 = scmp.lt.u32.totalorder %s6872_s22, %s10483_s8 }
  0xcb   : > { %p6875_p0 = pnand %p6873_p13, %p7207_p8 }
  0xcd   : > { %p6876_p1 = pneg %p6875_p0 }
  0xcf   : > { %p6881_p2 = pnand %p6879_p3, %p6876_p1 }
  0xd1   : > { %6884 = shalt.err (!%p6881_p2)
}
  0xd2   : > { %s6885_s18 = scalar_lea.vmem %s367_s28, 16384  ;;  %p6893_p4 = scmp.lt.s32.totalorder %s367_s28, %s367_s28 }
  0xd3   : > { %p6886_p5 = scmp.ne.s32.totalorder %s367_s28, %s6885_s18  ;;  %p6894_p10 = scmp.lt.s32.totalorder %s6885_s18, %s6885_s18 }
  0xd5   : > { %p6888_p7 = pnand %p6886_p5, %p7207_p8  ;;  %p6895_p11 = por %p6894_p10, %p6893_p4 }
  0xd7   : > { %p6889_p9 = pneg %p6888_p7 }
  0xd9   : > { %p6896_p12 = pnand %p6895_p11, %p6889_p9 }
  0xdb   : > { %6899 = shalt.err (!%p6896_p12)
}
  0xdc   : > { %s10484_s26 = smov 8   ;;  %s10485_s27 = smov 128  }
  0xdd   : > { %6006 = dma.hbm_to_vmem [thread:$0]  (!%p7191_p6), %s10483_s8, 16384, %s367_s28, [#allocation15], %s10485_s27, %s10485_s27, %s10484_s26  }
  0xde   : > { %s6900_s21 = scalar_lea.hbm %s10327_s9, 32 }
  0xdf   : > { %p6901_p13 = scmp.ne.s32.totalorder %s10327_s9, %s6900_s21  ;;  %p6907_p3 = scmp.lt.u32.totalorder %s6900_s21, %s10327_s9 }
  0xe1   : > { %p6903_p0 = pnand %p6901_p13, %p7207_p8 }
  0xe3   : > { %p6904_p1 = pneg %p6903_p0 }
  0xe5   : > { %p6909_p2 = pnand %p6907_p3, %p6904_p1 }
  0xe7   : > { %6912 = shalt.err (!%p6909_p2)
}
  0xe8   : > { %s6913_s28 = scalar_lea.vmem %s7331_s12, 32  ;;  %p6921_p4 = scmp.lt.s32.totalorder %s7331_s12, %s7331_s12 }
  0xe9   : > { %p6914_p5 = scmp.ne.s32.totalorder %s7331_s12, %s6913_s28  ;;  %p6922_p10 = scmp.lt.s32.totalorder %s6913_s28, %s6913_s28 }
  0xeb   : > { %p6916_p7 = pnand %p6914_p5, %p7207_p8  ;;  %p6923_p11 = por %p6922_p10, %p6921_p4 }
  0xed   : > { %p6917_p9 = pneg %p6916_p7 }
  0xef   : > { %p6924_p12 = pnand %p6923_p11, %p6917_p9 }
  0xf1   : > { %6927 = shalt.err (!%p6924_p12)
}
  0xf2   : > { %6009 = dma.hbm_to_vmem [thread:$0]  (!%p7191_p6), %s10327_s9, 32, %s7331_s12, [#allocation18]  }
  0xf3   : > { %s5440_s23 = sadd.s32 4294967294, %s7078_s16   ;;  %s7379_s11 = sadd.s32 1, %s7078_s16  }
  0xf4   : > { %s37_s24 = ssub.s32 %s7078_s16, %s7379_s11  ;;  %s40_s30 = sadd.s32 1, %s7074_s15 }
  0xf5   : > { %p38_p8 = scmp.eq.s32.totalorder %s37_s24, 0  ;;  %p47_p13 = scmp.ne.s32.totalorder %s7074_s15, %s7070_s14 }
  0xf6   : > { %p48_p0 = scmp.eq.s32.totalorder %s7078_s16, 0  ;;  %p53_p1 = scmp.ne.s32.totalorder %s7070_s14, %s7066_s13 }
  0xf7   : > { %s7390_s17 = scalar_select %p38_p8, %s7074_s15, %s40_s30  }
  0xf8   : > { %p7392_p3 = por %p48_p0, %p47_p13  ;;  %p10487_p2 = scmp.eq.s32.totalorder %s7175_s19, 0 }
  0xf9   : > { %p271_p5 = scmp.eq.s32.totalorder %s7175_s19, 1  ;;  %p277_p7 = scmp.eq.s32.totalorder %s5440_s23, 1 }
  0xfa   : > { %p7398_p6 = por %p10487_p2, %p53_p1  ;;  %p6029_p9 = scmp.lt.s32.totalorder %s7078_s16, 2 }
  0xfb   : > { %s7405_s22 = sand.u32 1, %s7074_s15   ;;  %p7407_p4 = por %p271_p5, %p47_p13 }
  0xfc   : > { %p7411_p10 = por %p277_p7, %p53_p1  ;;  %s5451_s20 = sshll.u32 %s7405_s22, 8 }
  0xfd   : > { %s10489_s29 = scalar_select %p7407_p4, 1, 0 }
  0xfe   : > { %s10490_s25 = scalar_select %p7411_p10, 1, 0 }
  0xff   : > { %s5782_s28 = sshll.u32 %s7078_s16, 12  ;;  %s10491_s0 = sld [smem:[#allocation148_spill]] }
 0x100   : > { %s395_s23 = scalar_lea.vmem [#allocation2], %s5451_s20  ;;  %p7426_p11 = pnand %p6029_p9, %p7392_p3 }
 0x101   : > { %s403_s30 = sshll.u32 %s395_s23, 4  ;;  %s392_s4 = scalar_lea.sflag [#allocation3], %s7405_s22  ;;  %s7422_s30 = int_to_ptr.vmem [resolvable:$true] %s403_s30 }
 0x102   : > { %p6930_p8 = pneg %p7426_p11 }
 0x105   : > { %s7420_s24 = scalar_lea.hbm %s10491_s0, %s5782_s28  ;;  %s6933_s21 = scalar_lea.hbm %s10491_s0, 8192 }
 0x106   : > { %s6928_s18 = scalar_lea.hbm %s7420_s24, 4096  ;;  %p6934_p1 = scmp.lt.u32.totalorder %s7420_s24, %s10491_s0 }
 0x107   : > { %p6929_p12 = scmp.ne.s32.totalorder %s7420_s24, %s6928_s18  ;;  %p6935_p3 = scmp.lt.u32.totalorder %s6933_s21, %s6928_s18 }
 0x108   : > { %p6937_p5 = scmp.lt.u32.totalorder %s6928_s18, %s7420_s24 }
 0x109   : > { %p6931_p13 = pnand %p6930_p8, %p6929_p12  ;;  %p6936_p2 = por %p6935_p3, %p6934_p1 }
 0x10b   : > { %p6932_p0 = pneg %p6931_p13  ;;  %p6938_p7 = por %p6937_p5, %p6936_p2 }
 0x10d   : > { %p6939_p9 = pnand %p6938_p7, %p6932_p0 }
 0x10f   : > { %6942 = shalt.err (!%p6939_p9)
}
 0x110   : > { %s6943_s3 = scalar_lea.vmem %s7422_s30, 4096  ;;  %s7092_s20 = smov [#allocation2]  }
 0x111   : > { %p6944_p12 = scmp.ne.s32.totalorder %s7422_s30, %s6943_s3  ;;  %s6948_s28 = sshll.u32 %s7092_s20, 4  ;;  %s6949_s28 = int_to_ptr.vmem [resolvable:$false] %s6948_s28 }
 0x112   : > { %s6950_s10 = scalar_lea.vmem %s6949_s28, 8192  ;;  %p6951_p4 = scmp.lt.s32.totalorder %s7422_s30, %s6949_s28 }
 0x113   : > { %p6946_p13 = pnand %p6944_p12, %p6930_p8  ;;  %p6952_p1 = scmp.lt.s32.totalorder %s6950_s10, %s6943_s3 }
 0x115   : > { %p6947_p10 = pneg %p6946_p13  ;;  %p6953_p3 = por %p6952_p1, %p6951_p4 }
 0x117   : > { %p6954_p2 = pnand %p6953_p3, %p6947_p10 }
 0x119   : > { %6957 = shalt.err (!%p6954_p2)
}
 0x11a   : > { %s7093_s18 = smov 256   ;;  %s7094_s21 = smov 16  }
 0x11b   : > { %6013 = dma.hbm_to_vmem [thread:$0]  (!%p7426_p11), %s7420_s24, 4096, %s7422_s30, %s392_s4, %s7093_s18, %s7093_s18, %s7094_s21  }
 0x11c   : > { %s5455_s23 = sshll.u32 %s7405_s22, 7  ;;  %s5784_s20 = sshll.u32 %s7078_s16, 11 }
 0x11d   : > { %s7464_s10 = scalar_lea.hbm %s10319_s1, %s5784_s20  ;;  %s417_s0 = scalar_lea.vmem [#allocation5], %s5455_s23 }
 0x11e   : > { %s425_s5 = sshll.u32 %s417_s0, 4  ;;  %s10493_s6 = sand.u32 1, %s7078_s16   ;;  %s7466_s5 = int_to_ptr.vmem [resolvable:$true] %s425_s5 }
 0x11f   : > { %s7470_s7 = scalar_lea.sflag [#allocation6], %s10493_s6  ;;  %s6958_s8 = scalar_lea.hbm %s7464_s10, 2048 }
 0x120   : > { %p6959_p4 = scmp.ne.s32.totalorder %s7464_s10, %s6958_s8  ;;  %s6963_s24 = scalar_lea.hbm %s10319_s1, 4096 }
 0x121   : > { %p6964_p5 = scmp.lt.u32.totalorder %s7464_s10, %s10319_s1  ;;  %p6965_p7 = scmp.lt.u32.totalorder %s6963_s24, %s6958_s8 }
 0x122   : > { %p6961_p10 = pnand %p6959_p4, %p6930_p8  ;;  %p6967_p12 = scmp.lt.u32.totalorder %s6958_s8, %s7464_s10 }
 0x123   : > { %p6966_p9 = por %p6965_p7, %p6964_p5 }
 0x124   : > { %p6962_p0 = pneg %p6961_p10 }
 0x125   : > { %p6968_p13 = por %p6967_p12, %p6966_p9 }
 0x127   : > { %p6969_p1 = pnand %p6968_p13, %p6962_p0 }
 0x129   : > { %6972 = shalt.err (!%p6969_p1)
}
 0x12a   : > { %s6973_s0 = scalar_lea.vmem %s7466_s5, 2048  ;;  %s7095_s6 = smov [#allocation5]  }
 0x12b   : > { %p6974_p3 = scmp.ne.s32.totalorder %s7466_s5, %s6973_s0  ;;  %s6978_s21 = sshll.u32 %s7095_s6, 4  ;;  %s6979_s21 = int_to_ptr.vmem [resolvable:$false] %s6978_s21 }
 0x12c   : > { %s6980_s23 = scalar_lea.vmem %s6979_s21, 4096  ;;  %p6981_p10 = scmp.lt.s32.totalorder %s7466_s5, %s6979_s21 }
 0x12d   : > { %p6976_p2 = pnand %p6974_p3, %p6930_p8  ;;  %p6982_p5 = scmp.lt.s32.totalorder %s6980_s23, %s6973_s0 }
 0x12f   : > { %p6977_p4 = pneg %p6976_p2  ;;  %p6983_p7 = por %p6982_p5, %p6981_p10 }
 0x131   : > { %p6984_p9 = pnand %p6983_p7, %p6977_p4 }
 0x133   : > { %6987 = shalt.err (!%p6984_p9)
}
 0x134   : > { %6016 = dma.hbm_to_vmem [thread:$0]  (!%p7426_p11), %s7464_s10, 2048, %s7466_s5, %s7470_s7, %s10485_s27, %s10485_s27, %s10484_s26  }
 0x135   : > { %s10494_s8 = sld [smem:[#allocation28_spill]] }
 0x13b   : > { %p10495_p8 = scmp.ne.s32.totalorder %s10494_s8, 0 }
 0x13d   : > { %437 = sbr.rel (%p10495_p8) target bundleno = 1783 (0x6f7), region = 60 }
 0x144   : > { %s7502_s20 = sand.u32 1, %s7070_s14  }
 0x145   : > { %s5460_s28 = sshll.u32 %s7502_s20, 8  ;;  %s440_s3 = scalar_lea.sflag [#allocation3], %s7502_s20 }
 0x146   : > { %s7508_s2 = scalar_lea.vmem [#allocation2], %s5460_s28 }
 0x147   : > { %7033 = dma.done.wait (%p7398_p6), %s440_s3, 4096  }
 0x148   : > { %7035 = vsyncadd (%p7398_p6), %s440_s3, 4294963200  ;;  %s448_s5 = sand.u32 1, %s7175_s19   ;;  %s5461_s7 = sshll.u32 %s7502_s20, 7 }
 0x149   : > { %s449_s26 = scalar_lea.sflag [#allocation6], %s448_s5  ;;  %s7516_s27 = scalar_lea.vmem [#allocation5], %s5461_s7 }
 0x14a   : > { %7037 = dma.done.wait (%p7398_p6), %s449_s26, 2048  }
 0x14b   : > { %7039 = vsyncadd (%p7398_p6), %s449_s26, 4294965248  ;;  %p10496_p11 = scmp.eq.s32.totalorder %s7175_s19, 0 }
 0x14d   : > { %7041 = dma.done.wait (%p10496_p11), [#allocation6], 4096   ;;  %p10497_p0 = pmov %p10496_p11 }
 0x14f   : > { %7043 = vsyncadd (%p10497_p0), [#allocation6], 4294963200  ;;  %p10498_p12 = pmov %p10497_p0 }
 0x150   : > { %p10499_p13 = pmov %p10497_p0 }
 0x151   : > { %7045 = dma.done.wait (%p10498_p12), [#allocation9], 64  }
 0x152   : > { %7047 = vsyncadd (%p10499_p13), [#allocation9], 4294967232  ;;  %p10500_p1 = pmov %p10497_p0 }
 0x153   : > { %p10501_p3 = pmov %p10497_p0 }
 0x154   : > { %7049 = dma.done.wait (%p10500_p1), [#allocation12], 16416  }
 0x155   : > { %7051 = vsyncadd (%p10501_p3), [#allocation12], 4294950880  ;;  %p10502_p6 = pmov %p10497_p0 }
 0x156   : > { %p10503_p2 = pmov %p10497_p0 }
 0x157   : > { %7053 = dma.done.wait (%p10502_p6), [#allocation15], 16512  }
 0x158   : > { %7055 = vsyncadd (%p10503_p2), [#allocation15], 4294950784  ;;  %p10504_p4 = pmov %p10497_p0 }
 0x159   : > { %p10505_p10 = pmov %p10497_p0 }
 0x15a   : > { %7057 = dma.done.wait (%p10504_p4), [#allocation18], 32  }
 0x15b   : > { %7059 = vsyncadd (%p10505_p10), [#allocation18], 4294967264  ;;  %v6087_v0 = vld [vmem:[#allocation7 + $0x4] ss:$8 sps:$4 sm:$0xff]   ;;  %v6089_v1 = vld [vmem:[#allocation7] ss:$8 sps:$4 sm:$0xff]   ;;  %v611_v48 = vlaneseq }
 0x15c   : > { %861 = vmatprep.subr.bf16.mxu0 %v6087_v0  ;;  %v6090_v2 = vld [vmem:[#allocation7 + $0x14] ss:$8 sps:$4 sm:$0xff]   ;;  %v6092_v3 = vld [vmem:[#allocation7 + $0x10] ss:$8 sps:$4 sm:$0xff]   ;;  %v6093_v4 = vld [vmem:[#allocation7 + $0x24] ss:$8 sps:$4 sm:$0xff]  }
 0x15d   : > { %862 = vmatpush1.bf16.msra.mxu0 %v6089_v1  ;;  %v6095_v5 = vld [vmem:[#allocation7 + $0x20] ss:$8 sps:$4 sm:$0xff]   ;;  %v6096_v6 = vld [vmem:[#allocation7 + $0x34] ss:$8 sps:$4 sm:$0xff]   ;;  %v6098_v7 = vld [vmem:[#allocation7 + $0x30] ss:$8 sps:$4 sm:$0xff]  }
 0x15e   : > { %863 = vmatprep.subr.bf16.mxu0 %v6090_v2  ;;  %v6099_v8 = vld [vmem:[#allocation7 + $0x44] ss:$8 sps:$4 sm:$0xff]   ;;  %v6101_v9 = vld [vmem:[#allocation7 + $0x40] ss:$8 sps:$4 sm:$0xff]   ;;  %v6102_v10 = vld [vmem:[#allocation7 + $0x54] ss:$8 sps:$4 sm:$0xff]  }
 0x15f   : > { %v6104_v11 = vld [vmem:[#allocation7 + $0x50] ss:$8 sps:$4 sm:$0xff]   ;;  %v6105_v12 = vld [vmem:[#allocation7 + $0x64] ss:$8 sps:$4 sm:$0xff]   ;;  %v6107_v14 = vld [vmem:[#allocation7 + $0x60] ss:$8 sps:$4 sm:$0xff]  }
 0x160   : > { %v6137_v13 = vld [vmem:[%s7516_s27 + $0x4] ss:$8 sps:$4 sm:$0xff]   ;;  %v6108_v15 = vld [vmem:[#allocation7 + $0x74] ss:$8 sps:$4 sm:$0xff]   ;;  %v6110_v16 = vld [vmem:[#allocation7 + $0x70] ss:$8 sps:$4 sm:$0xff]  }
 0x161   : > { %864 = vmatpush1.bf16.msra.mxu0 %v6092_v3  ;;  %893 = vmatprep.mubr.bf16.mxu0 %v6137_v13  ;;  %v6111_v17 = vld [vmem:[#allocation7 + $0x84] ss:$8 sps:$4 sm:$0xff]   ;;  %v6113_v18 = vld [vmem:[#allocation7 + $0x80] ss:$8 sps:$4 sm:$0xff]   ;;  %v6114_v19 = vld [vmem:[#allocation7 + $0x94] ss:$8 sps:$4 sm:$0xff]  }
 0x162   : > { %865 = vmatprep.subr.bf16.mxu0 %v6093_v4  ;;  %v6116_v20 = vld [vmem:[#allocation7 + $0x90] ss:$8 sps:$4 sm:$0xff]   ;;  %v6117_v21 = vld [vmem:[#allocation7 + $0xa4] ss:$8 sps:$4 sm:$0xff]   ;;  %v6119_v22 = vld [vmem:[#allocation7 + $0xa0] ss:$8 sps:$4 sm:$0xff]  }
 0x163   : > { %v6120_v23 = vld [vmem:[#allocation7 + $0xb4] ss:$8 sps:$4 sm:$0xff]   ;;  %v6122_v24 = vld [vmem:[#allocation7 + $0xb0] ss:$8 sps:$4 sm:$0xff]   ;;  %v6123_v25 = vld [vmem:[#allocation7 + $0xc4] ss:$8 sps:$4 sm:$0xff]  }
 0x164   : > { %v6125_v26 = vld [vmem:[#allocation7 + $0xc0] ss:$8 sps:$4 sm:$0xff]   ;;  %v6126_v27 = vld [vmem:[#allocation7 + $0xd4] ss:$8 sps:$4 sm:$0xff]   ;;  %v6128_v28 = vld [vmem:[#allocation7 + $0xd0] ss:$8 sps:$4 sm:$0xff]  }
 0x165   : > { %866 = vmatpush1.bf16.msra.mxu0 %v6095_v5  ;;  %v6129_v29 = vld [vmem:[#allocation7 + $0xe4] ss:$8 sps:$4 sm:$0xff]   ;;  %v6131_v30 = vld [vmem:[#allocation7 + $0xe0] ss:$8 sps:$4 sm:$0xff]   ;;  %v6132_v31 = vld [vmem:[#allocation7 + $0xf4] ss:$8 sps:$4 sm:$0xff]  }
 0x166   : > { %867 = vmatprep.subr.bf16.mxu0 %v6096_v6  ;;  %v6134_v32 = vld [vmem:[#allocation7 + $0xf0] ss:$8 sps:$4 sm:$0xff]   ;;  %v6135_v33 = vld [vmem:[%s7516_s27] ss:$8 sps:$4 sm:$0xff]   ;;  %v6138_v34 = vld [vmem:[%s7516_s27 + $0x14] ss:$8 sps:$4 sm:$0xff]  }
 0x167   : > { %v6140_v35 = vld [vmem:[%s7516_s27 + $0x10] ss:$8 sps:$4 sm:$0xff]   ;;  %v6141_v36 = vld [vmem:[%s7516_s27 + $0x24] ss:$8 sps:$4 sm:$0xff]   ;;  %v6143_v37 = vld [vmem:[%s7516_s27 + $0x20] ss:$8 sps:$4 sm:$0xff]  }
 0x168   : > { %v6144_v38 = vld [vmem:[%s7516_s27 + $0x34] ss:$8 sps:$4 sm:$0xff]   ;;  %v6146_v39 = vld [vmem:[%s7516_s27 + $0x30] ss:$8 sps:$4 sm:$0xff]   ;;  %v6147_v40 = vld [vmem:[%s7516_s27 + $0x44] ss:$8 sps:$4 sm:$0xff]  }
 0x169   : > { %868 = vmatpush1.bf16.msra.mxu0 %v6098_v7  ;;  %v6149_v41 = vld [vmem:[%s7516_s27 + $0x40] ss:$8 sps:$4 sm:$0xff]   ;;  %v6150_v42 = vld [vmem:[%s7516_s27 + $0x54] ss:$8 sps:$4 sm:$0xff]   ;;  %v6152_v43 = vld [vmem:[%s7516_s27 + $0x50] ss:$8 sps:$4 sm:$0xff]  }
 0x16a   : > { %869 = vmatprep.subr.bf16.mxu0 %v6099_v8  ;;  %v6153_v44 = vld [vmem:[%s7516_s27 + $0x64] ss:$8 sps:$4 sm:$0xff]   ;;  %v6155_v45 = vld [vmem:[%s7516_s27 + $0x60] ss:$8 sps:$4 sm:$0xff]   ;;  %v6156_v46 = vld [vmem:[%s7516_s27 + $0x74] ss:$8 sps:$4 sm:$0xff]  }
 0x16b   : > { %v6158_v47 = vld [vmem:[%s7516_s27 + $0x70] ss:$8 sps:$4 sm:$0xff]   ;;  %v7558_v49 = vshrl.u32 %v611_v48, 7  ;;  %v609_v51 = vld [vmem:[#allocation8] sm:$0x3]  ;;  %v530_v58 = vld [vmem:[%s7508_s2 + $0x8] sm:$0xff] }
 0x16c   : > { %v529_v55 = vld [vmem:[%s7508_s2] sm:$0xff]  ;;  %v531_v63 = vld [vmem:[%s7508_s2 + $0x10] sm:$0xff]  ;;  %v532_v1 = vld [vmem:[%s7508_s2 + $0x18] sm:$0xff]  ;;  %s10175_s12 = scalar_lea.vmem [#allocation19], %s5460_s28  ;;  %s5786_s10 = sshll.u32 %s7175_s19, 12 }
 0x16d   : > { %870 = vmatpush1.bf16.msra.mxu0 %v6101_v9  ;;  %10506 = vst [vmem:[#allocation29_spill] sm:$0xff] %v7558_v49  ;;  %v7561_v50 = vsub.s32 0, %v7558_v49  ;;  %v7564_v52 = vsub.s32 1, %v7558_v49  ;;  %v533_v8 = vld [vmem:[%s7508_s2 + $0x20] sm:$0xff]  ;;  %v542_v48 = vld [vmem:[%s7508_s2 + $0x68] sm:$0xff]  ;;  %s5268_s4 = sshll.u32 %s10175_s12, 4  ;;  %s10270_s4 = int_to_ptr.vmem [resolvable:$true] %s5268_s4 }
 0x16e   : > { %871 = vmatprep.subr.bf16.mxu0 %v6102_v10  ;;  %s10861_s30 = sld [smem:[#allocation156_spill]]  ;;  %s5254_s19 = scalar_lea.sflag [#allocation4], %s7502_s20 }
 0x16f   : > { %10507 = vst [vmem:[#allocation30_spill] sm:$0xff] %v7561_v50  ;;  %10508 = vst [vmem:[#allocation31_spill] sm:$0xff] %v7564_v52  ;;  %v7567_v53 = vrot.slane %v609_v51, %v7561_v50  ;;  %v7570_v54 = vrot.slane %v609_v51, %v7564_v52  ;;  %s6988_s0 = scalar_lea.vmem %s10270_s4, 4096  ;;  %p10863_p7 = scmp.ne.s32.totalorder %s10489_s29, 0 }
 0x170   : > { %p6989_p5 = scmp.ne.s32.totalorder %s10270_s4, %s6988_s0  ;;  %s7096_s6 = smov [#allocation19]  }
 0x171   : > { %872 = vmatpush1.bf16.msra.mxu0 %v6104_v11  ;;  %v534_v11 = vld [vmem:[%s7508_s2 + $0x28] sm:$0xff]  ;;  %s6992_s21 = sshll.u32 %s7096_s6, 4  ;;  %s6993_s21 = int_to_ptr.vmem [resolvable:$false] %s6992_s21 }
 0x172   : > { %873 = vmatprep.subr.bf16.mxu0 %v6105_v12  ;;  %p6990_p9 = pnand %p6989_p5, %p10863_p7  ;;  %s6994_s23 = scalar_lea.vmem %s6993_s21, 8192 }
 0x173   : > { %p6995_p11 = scmp.lt.s32.totalorder %s10270_s4, %s6993_s21  ;;  %p6996_p0 = scmp.lt.s32.totalorder %s6994_s23, %s6988_s0 }
 0x174   : > { %s10268_s18 = scalar_lea.hbm %s10861_s30, %s5786_s10  ;;  %p6991_p8 = pneg %p6990_p9 }
 0x175   : > { %874 = vmatpush1.bf16.msra.mxu0 %v6107_v14  ;;  %p6997_p12 = por %p6996_p0, %p6995_p11 }
 0x176   : > { %875 = vmatprep.subr.bf16.mxu0 %v6108_v15 }
 0x177   : > { %p6998_p13 = pnand %p6997_p12, %p6991_p8 }
 0x179   : > { %876 = vmatpush1.bf16.msra.mxu0 %v6110_v16 }
 0x17a   : > { %877 = vmatprep.subr.bf16.mxu0 %v6111_v17  ;;  %v535_v17 = vld [vmem:[%s7508_s2 + $0x30] sm:$0xff] }
 0x17d   : > { %878 = vmatpush1.bf16.msra.mxu0 %v6113_v18 }
 0x17e   : > { %879 = vmatprep.subr.bf16.mxu0 %v6114_v19  ;;  %v536_v19 = vld [vmem:[%s7508_s2 + $0x38] sm:$0xff] }
 0x181   : > { %880 = vmatpush1.bf16.msra.mxu0 %v6116_v20 }
 0x182   : > { %881 = vmatprep.subr.bf16.mxu0 %v6117_v21 }
 0x185   : > { %882 = vmatpush1.bf16.msra.mxu0 %v6119_v22 }
 0x186   : > { %883 = vmatprep.subr.bf16.mxu0 %v6120_v23 }
 0x189   : > { %884 = vmatpush1.bf16.msra.mxu0 %v6122_v24 }
 0x18a   : > { %885 = vmatprep.subr.bf16.mxu0 %v6123_v25 }
 0x18d   : > { %886 = vmatpush1.bf16.msra.mxu0 %v6125_v26  ;;  %v537_v26 = vld [vmem:[%s7508_s2 + $0x40] sm:$0xff] }
 0x18e   : > { %887 = vmatprep.subr.bf16.mxu0 %v6126_v27 }
 0x191   : > { %888 = vmatpush1.bf16.msra.mxu0 %v6128_v28 }
 0x192   : > { %889 = vmatprep.subr.bf16.mxu0 %v6129_v29  ;;  %v538_v29 = vld [vmem:[%s7508_s2 + $0x48] sm:$0xff] }
 0x195   : > { %890 = vmatpush1.bf16.msra.mxu0 %v6131_v30 }
 0x196   : > { %891 = vmatprep.subr.bf16.mxu0 %v6132_v31 }
 0x199   : > { %892 = vmatpush1.bf16.msra.mxu0 %v6134_v32  ;;  %v539_v32 = vld [vmem:[%s7508_s2 + $0x50] sm:$0xff] }
 0x19c   : > { %894 = vmatmul.mubr.bf16.vlgmr.msra.gmra.mrb[0].mxu0 %v6135_v33 }
 0x19d   : > { %903 = vmatprep.mubr.bf16.mxu0 %v6138_v34 }
 0x1a4   : > { %904 = vmatmul.mubr.bf16.gmra.mrb[4].mxu0 %v6140_v35 }
 0x1a5   : > { %913 = vmatprep.mubr.bf16.mxu0 %v6141_v36 }
 0x1ac   : > { %914 = vmatmul.mubr.bf16.gmra.mrb[8].mxu0 %v6143_v37  ;;  %v540_v37 = vld [vmem:[%s7508_s2 + $0x58] sm:$0xff] }
 0x1ad   : > { %923 = vmatprep.mubr.bf16.mxu0 %v6144_v38 }
 0x1b4   : > { %924 = vmatmul.mubr.bf16.gmra.mrb[12].mxu0 %v6146_v39 }
 0x1b5   : > { %933 = vmatprep.mubr.bf16.mxu0 %v6147_v40 }
 0x1bc   : > { %934 = vmatmul.mubr.bf16.gmra.mrb[16].mxu0 %v6149_v41 }
 0x1bd   : > { %943 = vmatprep.mubr.bf16.mxu0 %v6150_v42 }
 0x1c4   : > { %944 = vmatmul.mubr.bf16.gmra.mrb[20].mxu0 %v6152_v43 }
 0x1c5   : > { %953 = vmatprep.mubr.bf16.mxu0 %v6153_v44  ;;  %v541_v44 = vld [vmem:[%s7508_s2 + $0x60] sm:$0xff] }
 0x1cc   : > { %954 = vmatmul.mubr.bf16.gmra.mrb[24].mxu0 %v6155_v45 }
 0x1cd   : > { %963 = vmatprep.mubr.bf16.mxu0 %v6156_v46 }
 0x1d4   : > { %964 = vmatmul.mubr.bf16.gmra.mrb[28].mxu0 %v6158_v47 }
 0x26f   : > { %v895_v56 = vpop.f32.mrb[0].mxu0 }
 0x270   : > { %v896_v57 = vadd.f32 %v895_v56, %v7567_v53  ;;  %v897_v59 = vpop.f32.mrb[1].mxu0  ;;  %v543_v56 = vld [vmem:[%s7508_s2 + $0x70] sm:$0xff] }
 0x271   : > { %v898_v60 = vadd.f32 %v897_v59, %v7570_v54  ;;  %v899_v61 = vpop.f32.mrb[2].mxu0 }
 0x272   : > { %v7576_v62 = vadd.f32 %v896_v57, %v529_v55  ;;  %v900_v0 = vadd.f32 %v899_v61, %v7567_v53  ;;  %v901_v2 = vpop.f32.mrb[3].mxu0 }
 0x273   : > { %v7581_v3 = vadd.f32 %v898_v60, %v530_v58  ;;  %v902_v4 = vadd.f32 %v901_v2, %v7570_v54  ;;  %v544_v60 = vld [vmem:[%s7508_s2 + $0x78] sm:$0xff] }
 0x274   : > { %10509 = vst [vmem:[#allocation32_spill] sm:$0xff] %v7576_v62  ;;  %v7584_v5 = vadd.f32 %v900_v0, %v531_v63 }
 0x275   : > { %10510 = vst [vmem:[#allocation33_spill] sm:$0xff] %v7581_v3  ;;  %v7586_v6 = vadd.f32 %v902_v4, %v532_v1  ;;  %v1008_v7 = vadd.f32 %v7581_v3, %v7576_v62 }
 0x276   : > { %10511 = vst [vmem:[#allocation34_spill] sm:$0xff] %v7584_v5 }
 0x277   : > { %10512 = vst [vmem:[#allocation35_spill] sm:$0xff] %v7586_v6  ;;  %v905_v9 = vpop.f32.mrb[4].mxu0  ;;  %1009 = vadd.xlane.f32.xlu0 %v1008_v7  ;;  %v1011_v15 = vadd.f32 %v7586_v6, %v7584_v5  ;;  %v545_v7 = vld [vmem:[%s7508_s2 + $0x80] sm:$0xff] }
 0x278   : > { %v906_v10 = vadd.f32 %v905_v9, %v7567_v53  ;;  %v907_v12 = vpop.f32.mrb[5].mxu0 }
 0x279   : > { %v908_v13 = vadd.f32 %v907_v12, %v7570_v54  ;;  %v909_v14 = vpop.f32.mrb[6].mxu0 }
 0x27a   : > { %v7596_v16 = vadd.f32 %v906_v10, %v533_v8  ;;  %v910_v18 = vadd.f32 %v909_v14, %v7567_v53  ;;  %v911_v20 = vpop.f32.mrb[7].mxu0  ;;  %v547_v14 = vld [vmem:[%s7508_s2 + $0x90] sm:$0xff] }
 0x27b   : > { %v7601_v21 = vadd.f32 %v908_v13, %v534_v11  ;;  %v912_v22 = vadd.f32 %v911_v20, %v7570_v54  ;;  %1012 = vadd.xlane.f32.xlu0 %v1011_v15  ;;  %v546_v11 = vld [vmem:[%s7508_s2 + $0x88] sm:$0xff] }
 0x27c   : > { %10513 = vst [vmem:[#allocation36_spill] sm:$0xff] %v7596_v16  ;;  %v7604_v23 = vadd.f32 %v910_v18, %v535_v17 }
 0x27d   : > { %10514 = vst [vmem:[#allocation37_spill] sm:$0xff] %v7601_v21  ;;  %v7606_v24 = vadd.f32 %v912_v22, %v536_v19  ;;  %v1014_v25 = vadd.f32 %v7601_v21, %v7596_v16  ;;  %v548_v19 = vld [vmem:[%s7508_s2 + $0x98] sm:$0xff] }
 0x27e   : > { %10515 = vst [vmem:[#allocation38_spill] sm:$0xff] %v7604_v23 }
 0x27f   : > { %10516 = vst [vmem:[#allocation39_spill] sm:$0xff] %v7606_v24  ;;  %v915_v27 = vpop.f32.mrb[8].mxu0  ;;  %1015 = vadd.xlane.f32.xlu1 %v1014_v25  ;;  %v1017_v34 = vadd.f32 %v7606_v24, %v7604_v23 }
 0x280   : > { %v916_v28 = vadd.f32 %v915_v27, %v7567_v53  ;;  %v917_v30 = vpop.f32.mrb[9].mxu0 }
 0x281   : > { %v918_v31 = vadd.f32 %v917_v30, %v7570_v54  ;;  %v919_v33 = vpop.f32.mrb[10].mxu0 }
 0x282   : > { %v7617_v35 = vadd.f32 %v916_v28, %v537_v26  ;;  %v920_v36 = vadd.f32 %v919_v33, %v7567_v53  ;;  %v921_v38 = vpop.f32.mrb[11].mxu0  ;;  %v550_v33 = vld [vmem:[%s7508_s2 + $0xa8] sm:$0xff] }
 0x283   : > { %v7621_v39 = vadd.f32 %v918_v31, %v538_v29  ;;  %v922_v40 = vadd.f32 %v921_v38, %v7570_v54  ;;  %1018 = vadd.xlane.f32.xlu1 %v1017_v34  ;;  %v549_v29 = vld [vmem:[%s7508_s2 + $0xa0] sm:$0xff] }
 0x284   : > { %10517 = vst [vmem:[#allocation40_spill] sm:$0xff] %v7617_v35  ;;  %v7624_v41 = vadd.f32 %v920_v36, %v539_v32 }
 0x285   : > { %10518 = vst [vmem:[#allocation41_spill] sm:$0xff] %v7621_v39  ;;  %v7626_v42 = vadd.f32 %v922_v40, %v540_v37  ;;  %v1020_v43 = vadd.f32 %v7621_v39, %v7617_v35  ;;  %v551_v37 = vld [vmem:[%s7508_s2 + $0xb0] sm:$0xff] }
 0x286   : > { %10519 = vst [vmem:[#allocation42_spill] sm:$0xff] %v7624_v41 }
 0x287   : > { %10520 = vst [vmem:[#allocation43_spill] sm:$0xff] %v7626_v42  ;;  %v925_v45 = vpop.f32.mrb[12].mxu0  ;;  %1021 = vadd.xlane.f32.xlu0 %v1020_v43  ;;  %v1023_v46 = vadd.f32 %v7626_v42, %v7624_v41 }
 0x288   : > { %v926_v47 = vadd.f32 %v925_v45, %v7567_v53  ;;  %v927_v51 = vpop.f32.mrb[13].mxu0 }
 0x289   : > { %v928_v55 = vadd.f32 %v927_v51, %v7570_v54  ;;  %v929_v57 = vpop.f32.mrb[14].mxu0  ;;  %1024 = vadd.xlane.f32.xlu1 %v1023_v46 }
 0x28a   : > { %v7637_v58 = vadd.f32 %v926_v47, %v541_v44  ;;  %v930_v59 = vadd.f32 %v929_v57, %v7567_v53  ;;  %v931_v61 = vpop.f32.mrb[15].mxu0  ;;  %v552_v44 = vld [vmem:[%s7508_s2 + $0xb8] sm:$0xff] }
 0x28b   : > { %v7641_v63 = vadd.f32 %v928_v55, %v542_v48  ;;  %v932_v0 = vadd.f32 %v931_v61, %v7570_v54  ;;  %v554_v61 = vld [vmem:[%s7508_s2 + $0xc8] sm:$0xff] }
 0x28c   : > { %10521 = vst [vmem:[#allocation44_spill] sm:$0xff] %v7637_v58  ;;  %v7644_v1 = vadd.f32 %v930_v59, %v543_v56  ;;  %v553_v56 = vld [vmem:[%s7508_s2 + $0xc0] sm:$0xff] }
 0x28d   : > { %10522 = vst [vmem:[#allocation45_spill] sm:$0xff] %v7641_v63  ;;  %v7646_v2 = vadd.f32 %v932_v0, %v544_v60  ;;  %v1026_v4 = vadd.f32 %v7641_v63, %v7637_v58 }
 0x28e   : > { %10523 = vst [vmem:[#allocation46_spill] sm:$0xff] %v7644_v1 }
 0x28f   : > { %10524 = vst [vmem:[#allocation47_spill] sm:$0xff] %v7646_v2  ;;  %v935_v8 = vpop.f32.mrb[16].mxu0  ;;  %1027 = vadd.xlane.f32.xlu0 %v1026_v4  ;;  %v1029_v9 = vadd.f32 %v7646_v2, %v7644_v1 }
 0x290   : > { %v936_v10 = vadd.f32 %v935_v8, %v7567_v53  ;;  %v937_v12 = vpop.f32.mrb[17].mxu0 }
 0x291   : > { %v938_v13 = vadd.f32 %v937_v12, %v7570_v54  ;;  %v939_v15 = vpop.f32.mrb[18].mxu0  ;;  %1030 = vadd.xlane.f32.xlu1 %v1029_v9 }
 0x292   : > { %v7657_v17 = vadd.f32 %v936_v10, %v545_v7  ;;  %v940_v18 = vadd.f32 %v939_v15, %v7567_v53  ;;  %v941_v20 = vpop.f32.mrb[19].mxu0  ;;  %v555_v7 = vld [vmem:[%s7508_s2 + $0xd0] sm:$0xff] }
 0x293   : > { %v7661_v22 = vadd.f32 %v938_v13, %v546_v11  ;;  %v942_v25 = vadd.f32 %v941_v20, %v7570_v54  ;;  %v556_v11 = vld [vmem:[%s7508_s2 + $0xd8] sm:$0xff]  ;;  %v557_v20 = vld [vmem:[%s7508_s2 + $0xe0] sm:$0xff] }
 0x294   : > { %10525 = vst [vmem:[#allocation48_spill] sm:$0xff] %v7657_v17  ;;  %v7664_v26 = vadd.f32 %v940_v18, %v547_v14 }
 0x295   : > { %10526 = vst [vmem:[#allocation49_spill] sm:$0xff] %v7661_v22  ;;  %v7666_v27 = vadd.f32 %v942_v25, %v548_v19  ;;  %v1032_v28 = vadd.f32 %v7661_v22, %v7657_v17 }
 0x296   : > { %10527 = vst [vmem:[#allocation50_spill] sm:$0xff] %v7664_v26 }
 0x297   : > { %10528 = vst [vmem:[#allocation51_spill] sm:$0xff] %v7666_v27  ;;  %v945_v30 = vpop.f32.mrb[20].mxu0  ;;  %1033 = vadd.xlane.f32.xlu0 %v1032_v28  ;;  %v1035_v31 = vadd.f32 %v7666_v27, %v7664_v26 }
 0x298   : > { %v946_v32 = vadd.f32 %v945_v30, %v7567_v53  ;;  %v947_v34 = vpop.f32.mrb[21].mxu0  ;;  %v558_v30 = vld [vmem:[%s7508_s2 + $0xe8] sm:$0xff] }
 0x299   : > { %v948_v36 = vadd.f32 %v947_v34, %v7570_v54  ;;  %v949_v38 = vpop.f32.mrb[22].mxu0  ;;  %1036 = vadd.xlane.f32.xlu1 %v1035_v31 }
 0x29a   : > { %v7677_v40 = vadd.f32 %v946_v32, %v549_v29  ;;  %v950_v43 = vadd.f32 %v949_v38, %v7567_v53  ;;  %v951_v45 = vpop.f32.mrb[23].mxu0  ;;  %v560_v38 = vld [vmem:[%s7508_s2 + $0xf8] sm:$0xff] }
 0x29b   : > { %v7681_v46 = vadd.f32 %v948_v36, %v550_v33  ;;  %v952_v47 = vadd.f32 %v951_v45, %v7570_v54  ;;  %v559_v33 = vld [vmem:[%s7508_s2 + $0xf0] sm:$0xff] }
 0x29c   : > { %10529 = vst [vmem:[#allocation52_spill] sm:$0xff] %v7677_v40  ;;  %v7684_v48 = vadd.f32 %v950_v43, %v551_v37 }
 0x29d   : > { %10530 = vst [vmem:[#allocation53_spill] sm:$0xff] %v7681_v46  ;;  %v7686_v51 = vadd.f32 %v952_v47, %v552_v44  ;;  %v1038_v55 = vadd.f32 %v7681_v46, %v7677_v40 }
 0x29e   : > { %10531 = vst [vmem:[#allocation54_spill] sm:$0xff] %v7684_v48 }
 0x29f   : > { %10532 = vst [vmem:[#allocation55_spill] sm:$0xff] %v7686_v51  ;;  %v955_v57 = vpop.f32.mrb[24].mxu0  ;;  %1039 = vadd.xlane.f32.xlu0 %v1038_v55  ;;  %v1041_v59 = vadd.f32 %v7686_v51, %v7684_v48 }
 0x2a0   : > { %v956_v60 = vadd.f32 %v955_v57, %v7567_v53  ;;  %v957_v0 = vpop.f32.mrb[25].mxu0 }
 0x2a1   : > { %v958_v4 = vadd.f32 %v957_v0, %v7570_v54  ;;  %v959_v8 = vpop.f32.mrb[26].mxu0  ;;  %1042 = vadd.xlane.f32.xlu1 %v1041_v59  ;;  %v1479_v59 = vld [vmem:[#allocation13] sm:$0xff] }
 0x2a2   : > { %v7697_v9 = vadd.f32 %v956_v60, %v553_v56  ;;  %v960_v10 = vadd.f32 %v959_v8, %v7567_v53  ;;  %v961_v12 = vpop.f32.mrb[27].mxu0  ;;  %v1481_v60 = vld [vmem:[#allocation13 + $0x10] sm:$0xff] }
 0x2a3   : > { %v7701_v13 = vadd.f32 %v958_v4, %v554_v61  ;;  %v962_v14 = vadd.f32 %v961_v12, %v7570_v54  ;;  %v1485_v4 = vld [vmem:[#allocation13 + $0x30] sm:$0xff] }
 0x2a4   : > { %10533 = vst [vmem:[#allocation56_spill] sm:$0xff] %v7697_v9  ;;  %v7704_v15 = vadd.f32 %v960_v10, %v555_v7  ;;  %v1487_v7 = vld [vmem:[#allocation13 + $0x40] sm:$0xff]  ;;  %v5524_v8 = vcombine.high %v1481_v60, %v1485_v4  ;;  %v5523_v10 = vcombine.low %v1481_v60, %v1485_v4  ;;  %v1489_v12 = vld [vmem:[#allocation13 + $0x50] sm:$0xff] }
 0x2a5   : > { %10534 = vst [vmem:[#allocation57_spill] sm:$0xff] %v7701_v13  ;;  %v7706_v18 = vadd.f32 %v962_v14, %v556_v11  ;;  %v1044_v19 = vadd.f32 %v7701_v13, %v7697_v9  ;;  %v1493_v14 = vld [vmem:[#allocation13 + $0x70] sm:$0xff]  ;;  %v1515_v60 = vld [vmem:[#allocation13 + $0x120] sm:$0xff] }
 0x2a6   : > { %10535 = vst [vmem:[#allocation58_spill] sm:$0xff] %v7704_v15  ;;  %2515 = vmatprep.subr.bf16.mxu1 %v5524_v8 }
 0x2a7   : > { %10536 = vst [vmem:[#allocation59_spill] sm:$0xff] %v7706_v18  ;;  %v965_v25 = vpop.f32.mrb[28].mxu0  ;;  %1045 = vadd.xlane.f32.xlu0 %v1044_v19  ;;  %v1047_v28 = vadd.f32 %v7706_v18, %v7704_v15  ;;  %v1495_v19 = vld [vmem:[#allocation13 + $0x80] sm:$0xff]  ;;  %2516 = vmatpush1.bf16.msra.mxu1 %v5523_v10 }
 0x2a8   : > { %v966_v29 = vadd.f32 %v965_v25, %v7567_v53  ;;  %v967_v31 = vpop.f32.mrb[29].mxu0  ;;  %v1499_v25 = vld [vmem:[#allocation13 + $0xa0] sm:$0xff] }
 0x2a9   : > { %v968_v32 = vadd.f32 %v967_v31, %v7570_v54  ;;  %v969_v34 = vpop.f32.mrb[30].mxu0  ;;  %1048 = vadd.xlane.f32.xlu1 %v1047_v28  ;;  %v1497_v28 = vld [vmem:[#allocation13 + $0x90] sm:$0xff]  ;;  %v5531_v31 = vcombine.low %v1489_v12, %v1493_v14  ;;  %v1519_v10 = vld [vmem:[#allocation13 + $0x140] sm:$0xff] }
 0x2aa   : > { %v7717_v36 = vadd.f32 %v966_v29, %v557_v20  ;;  %v970_v37 = vadd.f32 %v969_v34, %v7567_v53  ;;  %v971_v43 = vpop.f32.mrb[31].mxu0  ;;  %v1483_v53 = vld [vmem:[#allocation13 + $0x20] sm:$0xff]  ;;  %v5532_v20 = vcombine.high %v1489_v12, %v1493_v14  ;;  %v1501_v29 = vld [vmem:[#allocation13 + $0xb0] sm:$0xff] }
 0x2ab   : > { %v7721_v44 = vadd.f32 %v968_v32, %v558_v30  ;;  %v972_v45 = vadd.f32 %v971_v43, %v7570_v54  ;;  %v5519_v61 = vcombine.low %v1479_v59, %v1483_v53  ;;  %v5520_v0 = vcombine.high %v1479_v59, %v1483_v53  ;;  %v1491_v54 = vld [vmem:[#allocation13 + $0x60] sm:$0xff]  ;;  %v1509_v43 = vld [vmem:[#allocation13 + $0xf0] sm:$0xff] }
 0x2ac   : > { %10537 = vst [vmem:[#allocation60_spill] sm:$0xff] %v7717_v36  ;;  %v7724_v47 = vadd.f32 %v970_v37, %v559_v33  ;;  %v5528_v11 = vcombine.high %v1487_v7, %v1491_v54  ;;  %v5527_v30 = vcombine.low %v1487_v7, %v1491_v54  ;;  %v5536_v32 = vcombine.high %v1495_v19, %v1499_v25  ;;  %v1503_v34 = vld [vmem:[#allocation13 + $0xc0] sm:$0xff]  ;;  %v7732_v12 = vld [vmem:[#allocation13 + $0x150] sm:$0xff] }
 0x2ad   : > { %10538 = vst [vmem:[#allocation61_spill] sm:$0xff] %v7721_v44  ;;  %v7726_v55 = vadd.f32 %v972_v45, %v560_v38  ;;  %v1050_v56 = vadd.f32 %v7721_v44, %v7717_v36  ;;  %2289 = vmatprep.subr.bf16.mxu0 %v5520_v0  ;;  %2517 = vmatprep.subr.bf16.mxu1 %v5532_v20  ;;  %v1507_v37 = vld [vmem:[#allocation13 + $0xe0] sm:$0xff]  ;;  %v1505_v38 = vld [vmem:[#allocation13 + $0xd0] sm:$0xff] }
 0x2ae   : > { %10539 = vst [vmem:[#allocation62_spill] sm:$0xff] %v7724_v47  ;;  %2290 = vmatpush1.bf16.msra.mxu0 %v5519_v61  ;;  %v5540_v33 = vcombine.high %v1497_v28, %v1501_v29  ;;  %v5535_v45 = vcombine.low %v1495_v19, %v1499_v25  ;;  %2518 = vmatpush1.bf16.msra.mxu1 %v5531_v31  ;;  %v1511_v53 = vld [vmem:[#allocation13 + $0x100] sm:$0xff]  ;;  %v1513_v61 = vld [vmem:[#allocation13 + $0x110] sm:$0xff] }
 0x2af   : > { %10540 = vst [vmem:[#allocation63_spill] sm:$0xff] %v7726_v55  ;;  %1051 = vadd.xlane.f32.xlu0 %v1050_v56  ;;  %v1053_v57 = vadd.f32 %v7726_v55, %v7724_v47  ;;  %2291 = vmatprep.subr.bf16.mxu0 %v5528_v11  ;;  %v5539_v56 = vcombine.low %v1497_v28, %v1501_v29  ;;  %v1517_v0 = vld [vmem:[#allocation13 + $0x130] sm:$0xff]  ;;  %v1523_v11 = vld [vmem:[#allocation13 + $0x160] sm:$0xff] }
 0x2b0   : > { %2519 = vmatprep.subr.bf16.mxu1 %v5540_v33  ;;  %v5548_v59 = vcombine.high %v1505_v38, %v1509_v43  ;;  %v5543_v4 = vcombine.low %v1503_v34, %v1507_v37  ;;  %v5547_v7 = vcombine.low %v1505_v38, %v1509_v43  ;;  %v5552_v54 = vcombine.high %v1511_v53, %v1515_v60  ;;  %v7734_v14 = vld [vmem:[#allocation13 + $0x170] sm:$0xff] }
 0x2b1   : > { %1054 = vadd.xlane.f32.xlu1 %v1053_v57  ;;  %v5544_v57 = vcombine.high %v1503_v34, %v1507_v37  ;;  %v5556_v8 = vcombine.high %v1513_v61, %v1517_v0  ;;  %v5551_v19 = vcombine.low %v1511_v53, %v1515_v60  ;;  %v5555_v20 = vcombine.low %v1513_v61, %v1517_v0 }
 0x2b2   : > { %2292 = vmatpush1.bf16.msra.mxu0 %v5527_v30  ;;  %2520 = vmatpush1.bf16.msra.mxu1 %v5539_v56  ;;  %v5560_v25 = vcombine.high %v1519_v10, %v1523_v11  ;;  %v5564_v28 = vcombine.high %v7732_v12, %v7734_v14  ;;  %v5559_v29 = vcombine.low %v1519_v10, %v1523_v11 }
 0x2b3   : > { %2293 = vmatprep.subr.bf16.mxu0 %v5536_v32  ;;  %2521 = vmatprep.subr.bf16.mxu1 %v5548_v59 }
 0x2b6   : > { %2294 = vmatpush1.bf16.msra.mxu0 %v5535_v45  ;;  %2522 = vmatpush1.bf16.msra.mxu1 %v5547_v7 }
 0x2b7   : > { %2295 = vmatprep.subr.bf16.mxu0 %v5544_v57  ;;  %2523 = vmatprep.subr.bf16.mxu1 %v5556_v8 }
 0x2ba   : > { %2296 = vmatpush1.bf16.msra.mxu0 %v5543_v4  ;;  %2524 = vmatpush1.bf16.msra.mxu1 %v5555_v20 }
 0x2bb   : > { %2297 = vmatprep.subr.bf16.mxu0 %v5552_v54  ;;  %2525 = vmatprep.subr.bf16.mxu1 %v5564_v28 }
 0x2be   : > { %2298 = vmatpush1.bf16.msra.mxu0 %v5551_v19 }
 0x2bf   : > { %2299 = vmatprep.subr.bf16.mxu0 %v5560_v25 }
 0x2c2   : > { %2300 = vmatpush1.bf16.msra.mxu0 %v5559_v29 }
 0x304   : > { %v1010_v30 = vpop.xlane.xlu0 %1009 }
 0x305   : > { %v1057_v31 = vmul.f32 0.00390625, %v1010_v30 }
 0x307   : > { %v7739_v32 = vsub.f32 %v7576_v62, %v1057_v31  ;;  %v7742_v33 = vsub.f32 %v7581_v3, %v1057_v31  ;;  %v7959_v3 = vld [vmem:[#allocation13 + $0x148] sm:$0xff] }
 0x308   : > { %v1013_v34 = vpop.xlane.xlu0 %1012  ;;  %v7969_v62 = vld [vmem:[#allocation13 + $0x188] sm:$0xff] }
 0x309   : > { %v1058_v37 = vmul.f32 0.00390625, %v1013_v34  ;;  %v1105_v38 = vmul.f32 %v7739_v32, %v7739_v32  ;;  %v1106_v43 = vmul.f32 %v7742_v33, %v7742_v33 }
 0x30b   : > { %v7749_v45 = vsub.f32 %v7584_v5, %v1058_v37  ;;  %v7752_v56 = vsub.f32 %v7586_v6, %v1058_v37  ;;  %v1137_v57 = vadd.f32 %v1106_v43, %v1105_v38 }
 0x30c   : > { %v1016_v59 = vpop.xlane.xlu1 %1015 }
 0x30d   : > { %v1059_v53 = vmul.f32 0.00390625, %v1016_v59  ;;  %1138 = vadd.xlane.f32.xlu0 %v1137_v57  ;;  %v1107_v60 = vmul.f32 %v7749_v45, %v7749_v45  ;;  %v1108_v61 = vmul.f32 %v7752_v56, %v7752_v56 }
 0x30f   : > { %v7759_v0 = vsub.f32 %v7596_v16, %v1059_v53  ;;  %v7762_v4 = vsub.f32 %v7601_v21, %v1059_v53  ;;  %v1140_v7 = vadd.f32 %v1108_v61, %v1107_v60  ;;  %v7945_v16 = vld [vmem:[#allocation13 + $0xc8] sm:$0xff] }
 0x310   : > { %v1019_v54 = vpop.xlane.xlu1 %1018 }
 0x311   : > { %v1060_v8 = vmul.f32 0.00390625, %v1019_v54  ;;  %1141 = vadd.xlane.f32.xlu1 %v1140_v7  ;;  %v1109_v10 = vmul.f32 %v7759_v0, %v7759_v0  ;;  %v1110_v11 = vmul.f32 %v7762_v4, %v7762_v4  ;;  %v5563_v7 = vcombine.low %v7732_v12, %v7734_v14 }
 0x313   : > { %v7769_v19 = vsub.f32 %v7604_v23, %v1060_v8  ;;  %v7772_v20 = vsub.f32 %v7606_v24, %v1060_v8  ;;  %v1143_v25 = vadd.f32 %v1110_v11, %v1109_v10  ;;  %v1527_v11 = vld [vmem:[#allocation13 + $0x180] sm:$0xff]  ;;  %2526 = vmatpush1.bf16.msra.mxu1 %v5563_v7 }
 0x314   : > { %v1022_v28 = vpop.xlane.xlu0 %1021  ;;  %v1535_v7 = vld [vmem:[#allocation13 + $0x1c0] sm:$0xff] }
 0x315   : > { %v1061_v29 = vmul.f32 0.00390625, %v1022_v28  ;;  %1144 = vadd.xlane.f32.xlu0 %v1143_v25  ;;  %v1111_v30 = vmul.f32 %v7769_v19, %v7769_v19  ;;  %v1112_v31 = vmul.f32 %v7772_v20, %v7772_v20  ;;  %v1531_v25 = vld [vmem:[#allocation13 + $0x1a0] sm:$0xff]  ;;  %v1529_v28 = vld [vmem:[#allocation13 + $0x190] sm:$0xff] }
 0x316   : > { %v1025_v34 = vpop.xlane.xlu1 %1024 }
 0x317   : > { %v7779_v37 = vsub.f32 %v7617_v35, %v1061_v29  ;;  %v7782_v38 = vsub.f32 %v7621_v39, %v1061_v29  ;;  %v1062_v43 = vmul.f32 0.00390625, %v1025_v34  ;;  %v1146_v57 = vadd.f32 %v1112_v31, %v1111_v30  ;;  %v1533_v31 = vld [vmem:[#allocation13 + $0x1b0] sm:$0xff]  ;;  %v1539_v39 = vld [vmem:[#allocation13 + $0x1e0] sm:$0xff] }
 0x318   : > { %v5568_v30 = vcombine.high %v1527_v11, %v1531_v25  ;;  %v5571_v14 = vcombine.low %v1529_v28, %v1533_v31 }
 0x319   : > { %v7785_v59 = vsub.f32 %v7624_v41, %v1062_v43  ;;  %v7788_v53 = vsub.f32 %v7626_v42, %v1062_v43  ;;  %1147 = vadd.xlane.f32.xlu1 %v1146_v57  ;;  %v1113_v60 = vmul.f32 %v7779_v37, %v7779_v37  ;;  %v1114_v61 = vmul.f32 %v7782_v38, %v7782_v38 }
 0x31a   : > { %v5567_v57 = vcombine.low %v1527_v11, %v1531_v25  ;;  %v5572_v42 = vcombine.high %v1529_v28, %v1533_v31  ;;  %2301 = vmatprep.subr.bf16.mxu0 %v5568_v30  ;;  %v1541_v25 = vld [vmem:[#allocation13 + $0x1f0] sm:$0xff]  ;;  %v5575_v28 = vcombine.low %v1535_v7, %v1539_v39  ;;  %v5576_v30 = vcombine.high %v1535_v7, %v1539_v39 }
 0x31b   : > { %v1149_v54 = vadd.f32 %v1114_v61, %v1113_v60  ;;  %v1115_v8 = vmul.f32 %v7785_v59, %v7785_v59  ;;  %v1116_v10 = vmul.f32 %v7788_v53, %v7788_v53  ;;  %v1549_v7 = vld [vmem:[#allocation13 + $0x230] sm:$0xff] }
 0x31c   : > { %v1028_v29 = vpop.xlane.xlu0 %1027  ;;  %2302 = vmatpush1.bf16.msra.mxu0 %v5567_v57  ;;  %2527 = vmatprep.subr.bf16.mxu1 %v5572_v42 }
 0x31d   : > { %v1063_v34 = vmul.f32 0.00390625, %v1028_v29  ;;  %1150 = vadd.xlane.f32.xlu0 %v1149_v54  ;;  %v1152_v43 = vadd.f32 %v1116_v10, %v1115_v8  ;;  %v1537_v29 = vld [vmem:[#allocation13 + $0x1d0] sm:$0xff]  ;;  %2528 = vmatpush1.bf16.msra.mxu1 %v5571_v14 }
 0x31e   : > { %v1031_v12 = vpop.xlane.xlu1 %1030  ;;  %v5580_v42 = vcombine.high %v1537_v29, %v1541_v25  ;;  %v5579_v31 = vcombine.low %v1537_v29, %v1541_v25  ;;  %2303 = vmatprep.subr.bf16.mxu0 %v5576_v30 }
 0x31f   : > { %v7801_v60 = vsub.f32 %v7637_v58, %v1063_v34  ;;  %v7804_v61 = vsub.f32 %v7641_v63, %v1063_v34  ;;  %v1064_v41 = vmul.f32 0.00390625, %v1031_v12  ;;  %1153 = vadd.xlane.f32.xlu1 %v1152_v43  ;;  %v1543_v12 = vld [vmem:[#allocation13 + $0x200] sm:$0xff] }
 0x320   : > { %2529 = vmatprep.subr.bf16.mxu1 %v5580_v42  ;;  %2304 = vmatpush1.bf16.msra.mxu0 %v5575_v28 }
 0x321   : > { %v7807_v54 = vsub.f32 %v7644_v1, %v1064_v41  ;;  %v7810_v8 = vsub.f32 %v7646_v2, %v1064_v41  ;;  %v1117_v10 = vmul.f32 %v7801_v60, %v7801_v60  ;;  %v1118_v11 = vmul.f32 %v7804_v61, %v7804_v61  ;;  %v1547_v2 = vld [vmem:[#allocation13 + $0x220] sm:$0xff]  ;;  %v1545_v1 = vld [vmem:[#allocation13 + $0x210] sm:$0xff]  ;;  %2530 = vmatpush1.bf16.msra.mxu1 %v5579_v31 }
 0x322   : > { %v5584_v39 = vcombine.high %v1543_v12, %v1547_v2  ;;  %v5587_v42 = vcombine.low %v1545_v1, %v1549_v7 }
 0x323   : > { %v1155_v34 = vadd.f32 %v1118_v11, %v1117_v10  ;;  %v1119_v43 = vmul.f32 %v7807_v54, %v7807_v54  ;;  %v1120_v41 = vmul.f32 %v7810_v8, %v7810_v8  ;;  %v5583_v10 = vcombine.low %v1543_v12, %v1547_v2 }
 0x324   : > { %v1034_v57 = vpop.xlane.xlu0 %1033  ;;  %v5588_v11 = vcombine.high %v1545_v1, %v1549_v7  ;;  %2305 = vmatprep.subr.bf16.mxu0 %v5584_v39  ;;  %v1557_v1 = vld [vmem:[#allocation13 + $0x270] sm:$0xff] }
 0x325   : > { %v1065_v63 = vmul.f32 0.00390625, %v1034_v57  ;;  %1156 = vadd.xlane.f32.xlu0 %v1155_v34  ;;  %v1158_v14 = vadd.f32 %v1120_v41, %v1119_v43  ;;  %2306 = vmatpush1.bf16.msra.mxu0 %v5583_v10  ;;  %v1555_v43 = vld [vmem:[#allocation13 + $0x260] sm:$0xff]  ;;  %v1553_v41 = vld [vmem:[#allocation13 + $0x250] sm:$0xff] }
 0x326   : > { %v1037_v29 = vpop.xlane.xlu1 %1036  ;;  %2531 = vmatprep.subr.bf16.mxu1 %v5588_v11  ;;  %v5596_v11 = vcombine.high %v1553_v41, %v1557_v1 }
 0x327   : > { %v7821_v25 = vsub.f32 %v7657_v17, %v1065_v63  ;;  %v7824_v58 = vsub.f32 %v7661_v22, %v1065_v63  ;;  %v1066_v30 = vmul.f32 0.00390625, %v1037_v29  ;;  %1159 = vadd.xlane.f32.xlu1 %v1158_v14  ;;  %v1551_v63 = vld [vmem:[#allocation13 + $0x240] sm:$0xff]  ;;  %2532 = vmatpush1.bf16.msra.mxu1 %v5587_v42  ;;  %v1561_v22 = vld [vmem:[#allocation13 + $0x290] sm:$0xff] }
 0x328   : > { %v5592_v57 = vcombine.high %v1551_v63, %v1555_v43  ;;  %v5591_v7 = vcombine.low %v1551_v63, %v1555_v43  ;;  %v1563_v42 = vld [vmem:[#allocation13 + $0x2a0] sm:$0xff]  ;;  %2533 = vmatprep.subr.bf16.mxu1 %v5596_v11  ;;  %v1573_v11 = vld [vmem:[#allocation13 + $0x2f0] sm:$0xff] }
 0x329   : > { %v7827_v34 = vsub.f32 %v7664_v26, %v1066_v30  ;;  %v7830_v28 = vsub.f32 %v7666_v27, %v1066_v30  ;;  %v1121_v2 = vmul.f32 %v7821_v25, %v7821_v25  ;;  %v1122_v31 = vmul.f32 %v7824_v58, %v7824_v58  ;;  %v1559_v26 = vld [vmem:[#allocation13 + $0x280] sm:$0xff] }
 0x32a   : > { %2307 = vmatprep.subr.bf16.mxu0 %v5592_v57  ;;  %v5595_v30 = vcombine.low %v1553_v41, %v1557_v1  ;;  %v5599_v41 = vcombine.low %v1559_v26, %v1563_v42 }
 0x32b   : > { %v1161_v12 = vadd.f32 %v1122_v31, %v1121_v2  ;;  %v1123_v14 = vmul.f32 %v7827_v34, %v7827_v34  ;;  %v1124_v39 = vmul.f32 %v7830_v28, %v7830_v28  ;;  %2308 = vmatpush1.bf16.msra.mxu0 %v5591_v7  ;;  %v5600_v2 = vcombine.high %v1559_v26, %v1563_v42  ;;  %v1565_v31 = vld [vmem:[#allocation13 + $0x2b0] sm:$0xff]  ;;  %v1571_v7 = vld [vmem:[#allocation13 + $0x2e0] sm:$0xff] }
 0x32c   : > { %v1040_v29 = vpop.xlane.xlu0 %1039  ;;  %2534 = vmatpush1.bf16.msra.mxu1 %v5595_v30  ;;  %v5604_v57 = vcombine.high %v1561_v22, %v1565_v31  ;;  %v5603_v1 = vcombine.low %v1561_v22, %v1565_v31 }
 0x32d   : > { %v1067_v27 = vmul.f32 0.00390625, %v1040_v29  ;;  %1162 = vadd.xlane.f32.xlu0 %v1161_v12  ;;  %v1164_v10 = vadd.f32 %v1124_v39, %v1123_v14  ;;  %2309 = vmatprep.subr.bf16.mxu0 %v5600_v2  ;;  %v1569_v29 = vld [vmem:[#allocation13 + $0x2d0] sm:$0xff] }
 0x32e   : > { %v1043_v17 = vpop.xlane.xlu1 %1042  ;;  %2535 = vmatprep.subr.bf16.mxu1 %v5604_v57  ;;  %v5612_v31 = vcombine.high %v1569_v29, %v1573_v11  ;;  %v1575_v57 = vld [vmem:[#allocation13 + $0x300] sm:$0xff] }
 0x32f   : > { %v7841_v35 = vsub.f32 %v7677_v40, %v1067_v27  ;;  %v7844_v63 = vsub.f32 %v7681_v46, %v1067_v27  ;;  %v1068_v43 = vmul.f32 0.00390625, %v1043_v17  ;;  %1165 = vadd.xlane.f32.xlu1 %v1164_v10  ;;  %2310 = vmatpush1.bf16.msra.mxu0 %v5599_v41  ;;  %v1567_v17 = vld [vmem:[#allocation13 + $0x2c0] sm:$0xff]  ;;  %v1577_v46 = vld [vmem:[#allocation13 + $0x310] sm:$0xff] }
 0x330   : > { %v5608_v26 = vcombine.high %v1567_v17, %v1571_v7  ;;  %2536 = vmatpush1.bf16.msra.mxu1 %v5603_v1  ;;  %v5607_v42 = vcombine.low %v1567_v17, %v1571_v7  ;;  %v1581_v40 = vld [vmem:[#allocation13 + $0x330] sm:$0xff] }
 0x331   : > { %10541 = vst [vmem:[#allocation64_spill] sm:$0xff] %v7841_v35  ;;  %v7847_v12 = vsub.f32 %v7684_v48, %v1068_v43  ;;  %v7850_v14 = vsub.f32 %v7686_v51, %v1068_v43  ;;  %v1125_v39 = vmul.f32 %v7841_v35, %v7841_v35  ;;  %v1126_v27 = vmul.f32 %v7844_v63, %v7844_v63  ;;  %v1579_v48 = vld [vmem:[#allocation13 + $0x320] sm:$0xff] }
 0x332   : > { %2311 = vmatprep.subr.bf16.mxu0 %v5608_v26  ;;  %v5611_v43 = vcombine.low %v1569_v29, %v1573_v11  ;;  %2537 = vmatprep.subr.bf16.mxu1 %v5612_v31  ;;  %v5615_v7 = vcombine.low %v1575_v57, %v1579_v48  ;;  %v5620_v29 = vcombine.high %v1577_v46, %v1581_v40  ;;  %v1589_v31 = vld [vmem:[#allocation13 + $0x370] sm:$0xff] }
 0x333   : > { %v1167_v22 = vadd.f32 %v1126_v27, %v1125_v39  ;;  %v1127_v30 = vmul.f32 %v7847_v12, %v7847_v12  ;;  %v1128_v10 = vmul.f32 %v7850_v14, %v7850_v14  ;;  %2312 = vmatpush1.bf16.msra.mxu0 %v5607_v42  ;;  %v5616_v27 = vcombine.high %v1575_v57, %v1579_v48  ;;  %v1583_v42 = vld [vmem:[#allocation13 + $0x340] sm:$0xff] }
 0x334   : > { %v1046_v2 = vpop.xlane.xlu0 %1045  ;;  %2538 = vmatpush1.bf16.msra.mxu1 %v5611_v43  ;;  %v5619_v26 = vcombine.low %v1577_v46, %v1581_v40 }
 0x335   : > { %v1069_v41 = vmul.f32 0.00390625, %v1046_v2  ;;  %1168 = vadd.xlane.f32.xlu0 %v1167_v22  ;;  %v1170_v51 = vadd.f32 %v1128_v10, %v1127_v30  ;;  %2313 = vmatprep.subr.bf16.mxu0 %v5616_v27  ;;  %v1585_v2 = vld [vmem:[#allocation13 + $0x350] sm:$0xff] }
 0x336   : > { %v1049_v39 = vpop.xlane.xlu1 %1048  ;;  %2539 = vmatprep.subr.bf16.mxu1 %v5620_v29  ;;  %v5627_v27 = vcombine.low %v1585_v2, %v1589_v31  ;;  %v1591_v29 = vld [vmem:[#allocation13 + $0x380] sm:$0xff] }
 0x337   : > { %v7861_v24 = vsub.f32 %v7697_v9, %v1069_v41  ;;  %v7864_v1 = vsub.f32 %v7701_v13, %v1069_v41  ;;  %v1070_v17 = vmul.f32 0.00390625, %v1049_v39  ;;  %1171 = vadd.xlane.f32.xlu1 %v1170_v51  ;;  %2314 = vmatpush1.bf16.msra.mxu0 %v5615_v7  ;;  %v1587_v51 = vld [vmem:[#allocation13 + $0x360] sm:$0xff]  ;;  %v5628_v39 = vcombine.high %v1585_v2, %v1589_v31  ;;  %v1597_v13 = vld [vmem:[#allocation13 + $0x3b0] sm:$0xff] }
 0x338   : > { %v5624_v48 = vcombine.high %v1583_v42, %v1587_v51  ;;  %2540 = vmatpush1.bf16.msra.mxu1 %v5619_v26  ;;  %v5623_v41 = vcombine.low %v1583_v42, %v1587_v51 }
 0x339   : > { %10542 = vst [vmem:[#allocation65_spill] sm:$0xff] %v7861_v24  ;;  %10543 = vst [vmem:[#allocation66_spill] sm:$0xff] %v7864_v1  ;;  %v7867_v11 = vsub.f32 %v7704_v15, %v1070_v17  ;;  %v7870_v22 = vsub.f32 %v7706_v18, %v1070_v17  ;;  %v1129_v30 = vmul.f32 %v7861_v24, %v7861_v24  ;;  %v1595_v18 = vld [vmem:[#allocation13 + $0x3a0] sm:$0xff]  ;;  %v1593_v15 = vld [vmem:[#allocation13 + $0x390] sm:$0xff]  ;;  %2541 = vmatprep.subr.bf16.mxu1 %v5628_v39 }
 0x33a   : > { %v1130_v10 = vmul.f32 %v7864_v1, %v7864_v1  ;;  %2315 = vmatprep.subr.bf16.mxu0 %v5624_v48  ;;  %v5631_v51 = vcombine.low %v1591_v29, %v1595_v18  ;;  %v5636_v2 = vcombine.high %v1593_v15, %v1597_v13  ;;  %v5635_v48 = vcombine.low %v1593_v15, %v1597_v13  ;;  %v1601_v39 = vld [vmem:[#allocation13 + $0x3d0] sm:$0xff] }
 0x33b   : > { %10544 = vst [vmem:[#allocation67_spill] sm:$0xff] %v7867_v11  ;;  %10545 = vst [vmem:[#allocation68_spill] sm:$0xff] %v7870_v22  ;;  %v1131_v46 = vmul.f32 %v7867_v11, %v7867_v11  ;;  %v1132_v43 = vmul.f32 %v7870_v22, %v7870_v22  ;;  %2316 = vmatpush1.bf16.msra.mxu0 %v5623_v41  ;;  %v1599_v41 = vld [vmem:[#allocation13 + $0x3c0] sm:$0xff] }
 0x33c   : > { %v1173_v40 = vadd.f32 %v1130_v10, %v1129_v30  ;;  %v1052_v57 = vpop.xlane.xlu0 %1051  ;;  %v5632_v10 = vcombine.high %v1591_v29, %v1595_v18  ;;  %2542 = vmatpush1.bf16.msra.mxu1 %v5627_v27  ;;  %v1605_v27 = vld [vmem:[#allocation13 + $0x3f0] sm:$0xff] }
 0x33d   : > { %v1071_v17 = vmul.f32 0.00390625, %v1052_v57  ;;  %v1176_v7 = vadd.f32 %v1132_v43, %v1131_v46  ;;  %v1603_v57 = vld [vmem:[#allocation13 + $0x3e0] sm:$0xff]  ;;  %2543 = vmatprep.subr.bf16.mxu1 %v5636_v2  ;;  %v5644_v29 = vcombine.high %v1601_v39, %v1605_v27 }
 0x33e   : > { %1174 = vadd.xlane.f32.xlu0 %v1173_v40  ;;  %v1055_v30 = vpop.xlane.xlu1 %1054  ;;  %2317 = vmatprep.subr.bf16.mxu0 %v5632_v10  ;;  %v5640_v18 = vcombine.high %v1599_v41, %v1603_v57 }
 0x33f   : > { %v7881_v9 = vsub.f32 %v7717_v36, %v1071_v17  ;;  %v7884_v26 = vsub.f32 %v7721_v44, %v1071_v17  ;;  %v1072_v42 = vmul.f32 0.00390625, %v1055_v30  ;;  %1177 = vadd.xlane.f32.xlu1 %v1176_v7  ;;  %2318 = vmatpush1.bf16.msra.mxu0 %v5631_v51  ;;  %v5639_v7 = vcombine.low %v1599_v41, %v1603_v57  ;;  %v7902_v51 = vld [vmem:[#allocation13 + $0x28] sm:$0xff] }
 0x340   : > { %2544 = vmatpush1.bf16.msra.mxu1 %v5635_v48  ;;  %2319 = vmatprep.subr.bf16.mxu0 %v5640_v18  ;;  %v5643_v30 = vcombine.low %v1601_v39, %v1605_v27  ;;  %v1006_v48 = vld [vmem:[#allocation10] sm:$0x3] }
 0x341   : > { %10546 = vst [vmem:[#allocation69_spill] sm:$0xff] %v7881_v9  ;;  %10547 = vst [vmem:[#allocation70_spill] sm:$0xff] %v7884_v26  ;;  %v7887_v31 = vsub.f32 %v7724_v47, %v1072_v42  ;;  %v7890_v40 = vsub.f32 %v7726_v55, %v1072_v42  ;;  %v1133_v46 = vmul.f32 %v7881_v9, %v7881_v9  ;;  %2545 = vmatprep.subr.bf16.mxu1 %v5644_v29  ;;  %v7900_v42 = vld [vmem:[#allocation13 + $0x8] sm:$0xff] }
 0x342   : > { %v1134_v43 = vmul.f32 %v7884_v26, %v7884_v26  ;;  %v5522_v2 = vcombine.high %v7900_v42, %v7902_v51  ;;  %v7921_v44 = vrot.slane %v1006_v48, %v7561_v50  ;;  %v7977_v9 = vld [vmem:[#allocation13 + $0x1c8] sm:$0xff] }
 0x343   : > { %10548 = vst [vmem:[#allocation71_spill] sm:$0xff] %v7887_v31  ;;  %10549 = vst [vmem:[#allocation72_spill] sm:$0xff] %v7890_v40  ;;  %v1135_v15 = vmul.f32 %v7887_v31, %v7887_v31  ;;  %v1136_v17 = vmul.f32 %v7890_v40, %v7890_v40  ;;  %2320 = vmatpush1.bf16.msra.mxu0 %v5639_v7 }
 0x344   : > { %v1179_v13 = vadd.f32 %v1134_v43, %v1133_v46  ;;  %2546 = vmatpush1.bf16.msra.mxu1 %v5643_v30  ;;  %2402 = vmatprep.subr.bf16.mxu0 %v5522_v2 }
 0x345   : > { %v1182_v10 = vadd.f32 %v1136_v17, %v1135_v15 }
 0x346   : > { %1180 = vadd.xlane.f32.xlu0 %v1179_v13 }
 0x347   : > { %1183 = vadd.xlane.f32.xlu1 %v1182_v10 }
 0x39a   : > { %v1139_v46 = vpop.xlane.xlu0 %1138 }
 0x39b   : > { %v1185_v43 = vmul.f32 0.00390625, %v1139_v46 }
 0x39d   : > { %v1201_v41 = vadd.f32 1e-05, %v1185_v43 }
 0x39e   : > { %v1142_v57 = vpop.xlane.xlu1 %1141 }
 0x39f   : > { %6351 = vrsqrt.f32 %v1201_v41  ;;  %v1186_v39 = vmul.f32 0.00390625, %v1142_v57  ;;  %vm1219_vm0 = vcmp.eq.f32.partialorder %v1201_v41, inf  ;;  %v1222_v46 = vand.u32 2147483648, %v1201_v41 }
 0x3a0   : > { %vm1221_vm1 = vcmp.eq.f32.partialorder %v1201_v41, 0.0 }
 0x3a1   : > { %v1202_v18 = vadd.f32 1e-05, %v1186_v39 }
 0x3a2   : > { %v1145_v27 = vpop.xlane.xlu0 %1144 }
 0x3a3   : > { %v1187_v13 = vmul.f32 0.00390625, %v1145_v27  ;;  %6353 = vrsqrt.f32 %v1202_v18  ;;  %v1007_v27 = vld [vmem:[#allocation11] sm:$0x3]  ;;  %vm1226_vm2 = vcmp.eq.f32.partialorder %v1202_v18, inf  ;;  %vm1228_vm3 = vcmp.eq.f32.partialorder %v1202_v18, 0.0 }
 0x3a5   : > { %v7908_v15 = vadd.f32 1e-05, %v1187_v13 }
 0x3a6   : > { %v1148_v17 = vpop.xlane.xlu1 %1147 }
 0x3a7   : > { %6355 = vrsqrt.f32 %v7908_v15  ;;  %v1188_v7 = vmul.f32 0.00390625, %v1148_v17  ;;  %v7916_v17 = vld [vmem:[#allocation13 + $0x48] sm:$0xff]  ;;  %vm1233_vm4 = vcmp.eq.f32.partialorder %v7908_v15, inf  ;;  %v1236_v21 = vand.u32 2147483648, %v7908_v15 }
 0x3a8   : > { %vm1235_vm5 = vcmp.eq.f32.partialorder %v7908_v15, 0.0 }
 0x3a9   : > { %v6352_v29 = vpop.eup %6351  ;;  %v7911_v10 = vadd.f32 1e-05, %v1188_v7 }
 0x3aa   : > { %v1218_v30 = vmul.f32 %v6352_v29, %v1201_v41  ;;  %v1151_v2 = vpop.xlane.xlu0 %1150  ;;  %v7918_v29 = vld [vmem:[#allocation13 + $0x68] sm:$0xff] }
 0x3ab   : > { %v1189_v43 = vmul.f32 0.00390625, %v1151_v2  ;;  %6357 = vrsqrt.f32 %v7911_v10  ;;  %v7928_v2 = vld [vmem:[#allocation13 + $0xa8] sm:$0xff]  ;;  %vm1240_vm6 = vcmp.eq.f32.partialorder %v7911_v10, inf  ;;  %vm1242_vm7 = vcmp.eq.f32.partialorder %v7911_v10, 0.0 }
 0x3ac   : > { %v1220_v57 = vsel %vm1219_vm0, %v1201_v41, %v1218_v30  ;;  %v1154_v39 = vpop.xlane.xlu1 %1153  ;;  %v7924_v30 = vrot.slane %v1006_v48, %v7564_v52  ;;  %v7926_v41 = vld [vmem:[#allocation13 + $0x88] sm:$0xff] }
 0x3ad   : > { %v1223_v13 = vsel %vm1221_vm1, %v1222_v46, %v1220_v57  ;;  %v7914_v55 = vadd.f32 1e-05, %v1189_v43  ;;  %v1190_v47 = vmul.f32 0.00390625, %v1154_v39  ;;  %v6354_v7 = vpop.eup %6353  ;;  %v7932_v43 = vrot.slane %v1007_v27, %v7561_v50  ;;  %v7955_v48 = vld [vmem:[#allocation13 + $0x128] sm:$0xff] }
 0x3ae   : > { %6359 = vrcp.f32 %v1223_v13  ;;  %v1225_v46 = vmul.f32 %v6354_v7, %v1202_v18  ;;  %v7935_v57 = vrot.slane %v1007_v27, %v7564_v52  ;;  %v1229_v39 = vand.u32 2147483648, %v1202_v18  ;;  %v7947_v27 = vld [vmem:[#allocation13 + $0xe8] sm:$0xff] }
 0x3af   : > { %6361 = vrsqrt.f32 %v7914_v55  ;;  %v7937_v13 = vadd.f32 1e-05, %v1190_v47  ;;  %v7971_v52 = vld [vmem:[#allocation13 + $0x1a8] sm:$0xff]  ;;  %vm1247_vm8 = vcmp.eq.f32.partialorder %v7914_v55, inf  ;;  %vm1249_vm9 = vcmp.eq.f32.partialorder %v7914_v55, 0.0 }
 0x3b0   : > { %v1227_v23 = vsel %vm1226_vm2, %v1202_v18, %v1225_v46  ;;  %v7953_v18 = vld [vmem:[#allocation13 + $0x108] sm:$0xff]  ;;  %v1243_v46 = vand.u32 2147483648, %v7911_v10 }
 0x3b1   : > { %v6356_v36 = vpop.eup %6355  ;;  %v1230_v6 = vsel %vm1228_vm3, %v1229_v39, %v1227_v23  ;;  %6363 = vrsqrt.f32 %v7937_v13  ;;  %v7961_v23 = vld [vmem:[#allocation13 + $0x168] sm:$0xff]  ;;  %vm1254_vm10 = vcmp.eq.f32.partialorder %v7937_v13, inf  ;;  %vm1256_vm11 = vcmp.eq.f32.partialorder %v7937_v13, 0.0 }
 0x3b2   : > { %v1232_v47 = vmul.f32 %v6356_v36, %v7908_v15  ;;  %v1157_v5 = vpop.xlane.xlu0 %1156  ;;  %6365 = vrcp.f32 %v1230_v6  ;;  %v1250_v6 = vand.u32 2147483648, %v7914_v55 }
 0x3b3   : > { %v1191_v7 = vmul.f32 0.00390625, %v1157_v5 }
 0x3b4   : > { %v1234_v36 = vsel %vm1233_vm4, %v7908_v15, %v1232_v47  ;;  %v1160_v39 = vpop.xlane.xlu1 %1159  ;;  %v7979_v15 = vld [vmem:[#allocation13 + $0x1e8] sm:$0xff] }
 0x3b5   : > { %v1237_v5 = vsel %vm1235_vm5, %v1236_v21, %v1234_v36  ;;  %v7973_v50 = vadd.f32 1e-05, %v1191_v7  ;;  %v1192_v49 = vmul.f32 0.00390625, %v1160_v39  ;;  %v6358_v31 = vpop.eup %6357 }
 0x3b6   : > { %6367 = vrcp.f32 %v1237_v5  ;;  %v1239_v7 = vmul.f32 %v6358_v31, %v7911_v10 }
 0x3b7   : > { %6369 = vrsqrt.f32 %v7973_v50  ;;  %v7995_v47 = vadd.f32 1e-05, %v1192_v49  ;;  %vm1261_vm12 = vcmp.eq.f32.partialorder %v7973_v50, inf  ;;  %vm1263_vm13 = vcmp.eq.f32.partialorder %v7973_v50, 0.0 }
 0x3b8   : > { %v6360_v5 = vpop.eup %6359  ;;  %v1241_v31 = vsel %vm1240_vm6, %v7911_v10, %v1239_v7 }
 0x3b9   : > { %v6362_v21 = vpop.eup %6361  ;;  %v1244_v39 = vsel %vm1242_vm7, %v1243_v46, %v1241_v31  ;;  %6371 = vrsqrt.f32 %v7995_v47  ;;  %v1331_v7 = vmul.f32 %v6360_v5, %v7742_v33  ;;  %v1257_v33 = vand.u32 2147483648, %v7937_v13 }
 0x3ba   : > { %v1246_v40 = vmul.f32 %v6362_v21, %v7914_v55  ;;  %v1163_v49 = vpop.xlane.xlu0 %1162  ;;  %6373 = vrcp.f32 %v1244_v39  ;;  %v1330_v21 = vmul.f32 %v6360_v5, %v7739_v32  ;;  %vm1268_vm14 = vcmp.eq.f32.partialorder %v7995_v47, inf }
 0x3bb   : > { %v1193_v26 = vmul.f32 0.00390625, %v1163_v49  ;;  %v6364_v10 = vpop.eup %6363  ;;  %vm1270_vm15 = vcmp.eq.f32.partialorder %v7995_v47, 0.0 }
 0x3bc   : > { %v1248_v24 = vsel %vm1247_vm8, %v7914_v55, %v1246_v40  ;;  %v1166_v46 = vpop.xlane.xlu1 %1165  ;;  %v6366_v31 = vpop.eup %6365  ;;  %v1253_v11 = vmul.f32 %v6364_v10, %v7937_v13 }
 0x3bd   : > { %v1251_v36 = vsel %vm1249_vm9, %v1250_v6, %v1248_v24  ;;  %v8014_v39 = vadd.f32 1e-05, %v1193_v26  ;;  %v1194_v22 = vmul.f32 0.00390625, %v1166_v46  ;;  %v1334_v49 = vmul.f32 %v6366_v31, %v7752_v56 }
 0x3be   : > { %6375 = vrcp.f32 %v1251_v36  ;;  %v1333_v55 = vmul.f32 %v6366_v31, %v7749_v45  ;;  %v1255_v40 = vsel %vm1254_vm10, %v7937_v13, %v1253_v11  ;;  %v1389_v24 = vmul.f32 %v7924_v30, %v1331_v7 }
 0x3bf   : > { %6377 = vrsqrt.f32 %v8014_v39  ;;  %v1258_v26 = vsel %vm1256_vm11, %v1257_v33, %v1255_v40  ;;  %v8025_v6 = vadd.f32 1e-05, %v1194_v22  ;;  %v1391_v36 = vmul.f32 %v7924_v30, %v1334_v49 }
 0x3c0   : > { %v6368_v32 = vpop.eup %6367  ;;  %v1388_v56 = vmul.f32 %v7921_v44, %v1330_v21  ;;  %6379 = vrcp.f32 %v1258_v26  ;;  %v1264_v45 = vand.u32 2147483648, %v7973_v50  ;;  %v1390_v11 = vmul.f32 %v7921_v44, %v1333_v55 }
 0x3c1   : > { %v6370_v5 = vpop.eup %6369  ;;  %v1271_v13 = vand.u32 2147483648, %v7995_v47  ;;  %6381 = vrsqrt.f32 %v8025_v6  ;;  %v1432_v46 = vadd.f32 %v7935_v57, %v1389_v24  ;;  %v1434_v21 = vadd.f32 %v7935_v57, %v1391_v36 }
 0x3c2   : > { %v1260_v7 = vmul.f32 %v6370_v5, %v7973_v50  ;;  %v1169_v22 = vpop.xlane.xlu0 %1168  ;;  %v1433_v31 = vadd.f32 %v7932_v43, %v1390_v11  ;;  %v1431_v40 = vadd.f32 %v7932_v43, %v1388_v56  ;;  %v1337_v26 = vmul.f32 %v6368_v32, %v7762_v4 }
 0x3c3   : > { %v1195_v10 = vmul.f32 0.00390625, %v1169_v22  ;;  %v6372_v33 = vpop.eup %6371  ;;  %v1336_v5 = vmul.f32 %v6368_v32, %v7759_v0  ;;  %v8050_v35 = vpack.c.bf16 %v1434_v21, %v1432_v46  ;;  %vm1275_vm0 = vcmp.eq.f32.partialorder %v8014_v39, inf }
 0x3c4   : > { %v1262_v49 = vsel %vm1261_vm12, %v7973_v50, %v1260_v7  ;;  %v1172_v55 = vpop.xlane.xlu1 %1171  ;;  %v6374_v1 = vpop.eup %6373  ;;  %v1267_v36 = vmul.f32 %v6372_v33, %v7995_v47  ;;  %v8052_v7 = vpack.c.bf16 %v1433_v31, %v1431_v40  ;;  %vm1277_vm1 = vcmp.eq.f32.partialorder %v8014_v39, 0.0 }
 0x3c5   : > { %v1265_v24 = vsel %vm1263_vm13, %v1264_v45, %v1262_v49  ;;  %v8048_v22 = vadd.f32 1e-05, %v1195_v10  ;;  %v1196_v11 = vmul.f32 0.00390625, %v1172_v55  ;;  %v1340_v56 = vmul.f32 %v6374_v1, %v7772_v20  ;;  %2321 = vmatprep.mubr.bf16.mxu0 %v8050_v35  ;;  %2547 = vmatprep.mubr.bf16.mxu1 %v8050_v35 }
 0x3c6   : > { %6383 = vrcp.f32 %v1265_v24  ;;  %v1269_v0 = vsel %vm1268_vm14, %v7995_v47, %v1267_v36  ;;  %v1393_v20 = vmul.f32 %v7924_v30, %v1337_v26  ;;  %v1278_v47 = vand.u32 2147483648, %v8014_v39  ;;  %2322 = vmatmul.mubr.bf16.vlgmr.msra.gmra.mrb[32].mxu0 %v8052_v7  ;;  %2548 = vmatmul.mubr.bf16.vlgmr.msra.gmra.mrb[0].mxu1 %v8052_v7 }
 0x3c7   : > { %6385 = vrsqrt.f32 %v8048_v22  ;;  %v1272_v4 = vsel %vm1270_vm15, %v1271_v13, %v1269_v0  ;;  %v8061_v32 = vadd.f32 1e-05, %v1196_v11  ;;  %v1395_v45 = vmul.f32 %v7924_v30, %v1340_v56 }
 0x3c8   : > { %v6376_v50 = vpop.eup %6375  ;;  %6387 = vrcp.f32 %v1272_v4  ;;  %v1339_v13 = vmul.f32 %v6374_v1, %v7769_v19  ;;  %vm1282_vm2 = vcmp.eq.f32.partialorder %v8025_v6, inf  ;;  %v10550_v21 = vcombine.low %v7900_v42, %v7902_v51 }
 0x3c9   : > { %v6378_v10 = vpop.eup %6377  ;;  %6389 = vrsqrt.f32 %v8061_v32  ;;  %v1392_v33 = vmul.f32 %v7921_v44, %v1336_v5  ;;  %v1285_v55 = vand.u32 2147483648, %v8025_v6  ;;  %v10551_v40 = vcombine.high %v7916_v17, %v7918_v29 }
 0x3ca   : > { %v1274_v46 = vmul.f32 %v6378_v10, %v8014_v39  ;;  %2403 = vmatpush1.bf16.msra.mxu0 %v10550_v21  ;;  %v6380_v49 = vpop.eup %6379  ;;  %v1438_v1 = vadd.f32 %v7935_v57, %v1395_v45  ;;  %v1394_v26 = vmul.f32 %v7921_v44, %v1339_v13  ;;  %v1436_v5 = vadd.f32 %v7935_v57, %v1393_v20 }
 0x3cb   : > { %v1175_v31 = vpop.xlane.xlu0 %1174  ;;  %2404 = vmatprep.subr.bf16.mxu0 %v10551_v40  ;;  %v6382_v24 = vpop.eup %6381  ;;  %v1343_v36 = vmul.f32 %v6376_v50, %v7782_v38  ;;  %v1346_v11 = vmul.f32 %v6380_v49, %v7788_v53  ;;  %v10552_v10 = vcombine.low %v7916_v17, %v7918_v29  ;;  %v1435_v20 = vadd.f32 %v7932_v43, %v1392_v33 }
 0x3cc   : > { %v1197_v19 = vmul.f32 0.00390625, %v1175_v31  ;;  %v1276_v42 = vsel %vm1275_vm0, %v8014_v39, %v1274_v46  ;;  %v1178_v51 = vpop.xlane.xlu1 %1177  ;;  %v1281_v0 = vmul.f32 %v6382_v24, %v8025_v6  ;;  %v8099_v13 = vpack.c.bf16 %v1438_v1, %v1436_v5 }
 0x3cd   : > { %v1279_v56 = vsel %vm1277_vm1, %v1278_v47, %v1276_v42  ;;  %v1198_v45 = vmul.f32 0.00390625, %v1178_v51  ;;  %v1437_v38 = vadd.f32 %v7932_v43, %v1394_v26  ;;  %vm1284_vm3 = vcmp.eq.f32.partialorder %v8025_v6, 0.0 }
 0x3ce   : > { %v8094_v4 = vadd.f32 1e-05, %v1197_v19  ;;  %6391 = vrcp.f32 %v1279_v56  ;;  %2405 = vmatpush1.bf16.msra.mxu0 %v10552_v10  ;;  %v1283_v53 = vsel %vm1282_vm2, %v8025_v6, %v1281_v0  ;;  %v10553_v39 = vcombine.high %v7926_v41, %v7928_v2  ;;  %2331 = vmatprep.mubr.bf16.mxu0 %v8099_v13  ;;  %v8143_v0 = vld [vmem:[#allocation13 + $0x208] sm:$0xff] }
 0x3cf   : > { %v1397_v17 = vmul.f32 %v7924_v30, %v1343_v36  ;;  %v1286_v47 = vsel %vm1284_vm3, %v1285_v55, %v1283_v53  ;;  %vm1289_vm4 = vcmp.eq.f32.partialorder %v8048_v22, inf  ;;  %v8113_v46 = vadd.f32 1e-05, %v1198_v45  ;;  %2557 = vmatprep.mubr.bf16.mxu1 %v8099_v13  ;;  %v8145_v45 = vld [vmem:[#allocation13 + $0x228] sm:$0xff] }
 0x3d0   : > { %6393 = vrsqrt.f32 %v8094_v4  ;;  %2406 = vmatprep.subr.bf16.mxu0 %v10553_v39  ;;  %v6384_v29 = vpop.eup %6383  ;;  %v8117_v21 = vpack.c.bf16 %v1437_v38, %v1435_v20  ;;  %vm1291_vm5 = vcmp.eq.f32.partialorder %v8048_v22, 0.0  ;;  %v1399_v31 = vmul.f32 %v7924_v30, %v1346_v11 }
 0x3d1   : > { %v6386_v6 = vpop.eup %6385  ;;  %6395 = vrcp.f32 %v1286_v47  ;;  %v1342_v33 = vmul.f32 %v6376_v50, %v7779_v37  ;;  %v1292_v40 = vand.u32 2147483648, %v8048_v22  ;;  %vm1296_vm6 = vcmp.eq.f32.partialorder %v8061_v32, inf }
 0x3d2   : > { %v1288_v55 = vmul.f32 %v6386_v6, %v8048_v22  ;;  %6397 = vrsqrt.f32 %v8113_v46  ;;  %2332 = vmatmul.mubr.bf16.gmra.mrb[36].mxu0 %v8117_v21  ;;  %2558 = vmatmul.mubr.bf16.gmra.mrb[4].mxu1 %v8117_v21  ;;  %v6388_v1 = vpop.eup %6387  ;;  %v10554_v26 = vcombine.low %v7926_v41, %v7928_v2  ;;  %v1440_v37 = vadd.f32 %v7935_v57, %v1397_v17 }
 0x3d3   : > { %v1181_v19 = vpop.xlane.xlu0 %1180  ;;  %v1442_v50 = vadd.f32 %v7935_v57, %v1399_v31  ;;  %v1345_v42 = vmul.f32 %v6380_v49, %v7785_v59  ;;  %v6390_v51 = vpop.eup %6389  ;;  %v10555_v36 = vcombine.high %v7945_v16, %v7947_v27  ;;  %v1396_v41 = vmul.f32 %v7921_v44, %v1342_v33 }
 0x3d4   : > { %2407 = vmatpush1.bf16.msra.mxu0 %v10554_v26  ;;  %v1199_v24 = vmul.f32 0.00390625, %v1181_v19  ;;  %v1290_v5 = vsel %vm1289_vm4, %v8048_v22, %v1288_v55  ;;  %v1184_v11 = vpop.xlane.xlu1 %1183  ;;  %v1349_v2 = vmul.f32 %v6384_v29, %v7804_v61  ;;  %v1352_v56 = vmul.f32 %v6388_v1, %v7810_v8 }
 0x3d5   : > { %2408 = vmatprep.subr.bf16.mxu0 %v10555_v36  ;;  %v1293_v59 = vsel %vm1291_vm5, %v1292_v40, %v1290_v5  ;;  %v1295_v49 = vmul.f32 %v6390_v51, %v8061_v32  ;;  %v8152_v20 = vpack.c.bf16 %v1442_v50, %v1440_v37  ;;  %v1299_v38 = vand.u32 2147483648, %v8061_v32 }
 0x3d6   : > { %v8150_v10 = vadd.f32 1e-05, %v1199_v24  ;;  %6399 = vrcp.f32 %v1293_v59  ;;  %v1200_v53 = vmul.f32 0.00390625, %v1184_v11  ;;  %v1398_v61 = vmul.f32 %v7921_v44, %v1345_v42 }
 0x3d7   : > { %v1297_v8 = vsel %vm1296_vm6, %v8061_v32, %v1295_v49  ;;  %vm1298_vm7 = vcmp.eq.f32.partialorder %v8061_v32, 0.0  ;;  %v10556_v22 = vcombine.low %v7945_v16, %v7947_v27  ;;  %2341 = vmatprep.mubr.bf16.mxu0 %v8152_v20  ;;  %v5585_v39 = vcombine.low %v8143_v0, %v8145_v45  ;;  %2567 = vmatprep.mubr.bf16.mxu1 %v8152_v20 }
 0x3d8   : > { %6401 = vrsqrt.f32 %v8150_v10  ;;  %v6392_v17 = vpop.eup %6391  ;;  %v1300_v47 = vsel %vm1298_vm7, %v1299_v38, %v1297_v8  ;;  %v8168_v6 = vadd.f32 1e-05, %v1200_v53  ;;  %v10557_v32 = vcombine.high %v7953_v18, %v7955_v48 }
 0x3d9   : > { %2409 = vmatpush1.bf16.msra.mxu0 %v10556_v22  ;;  %v1439_v16 = vadd.f32 %v7932_v43, %v1396_v41  ;;  %v1441_v27 = vadd.f32 %v7932_v43, %v1398_v61  ;;  %6403 = vrcp.f32 %v1300_v47  ;;  %v1401_v33 = vmul.f32 %v7924_v30, %v1349_v2 }
 0x3da   : > { %2410 = vmatprep.subr.bf16.mxu0 %v10557_v32  ;;  %v6394_v31 = vpop.eup %6393  ;;  %v1403_v55 = vmul.f32 %v7924_v30, %v1352_v56  ;;  %v1348_v40 = vmul.f32 %v6384_v29, %v7801_v60  ;;  %vm1303_vm8 = vcmp.eq.f32.partialorder %v8094_v4, inf  ;;  %vm1305_vm9 = vcmp.eq.f32.partialorder %v8094_v4, 0.0 }
 0x3db   : > { %v1302_v19 = vmul.f32 %v6394_v31, %v8094_v4  ;;  %6405 = vrsqrt.f32 %v8168_v6  ;;  %v6396_v26 = vpop.eup %6395  ;;  %v1306_v24 = vand.u32 2147483648, %v8094_v4  ;;  %v8183_v37 = vpack.c.bf16 %v1441_v27, %v1439_v16 }
 0x3dc   : > { %v10558_v50 = vcombine.low %v7953_v18, %v7955_v48  ;;  %v1444_v42 = vadd.f32 %v7935_v57, %v1401_v33  ;;  %v1446_v60 = vadd.f32 %v7935_v57, %v1403_v55  ;;  %v6398_v29 = vpop.eup %6397  ;;  %v10559_v5 = vcombine.high %v7959_v3, %v7961_v23 }
 0x3dd   : > { %v1304_v51 = vsel %vm1303_vm8, %v8094_v4, %v1302_v19  ;;  %v1351_v36 = vmul.f32 %v6388_v1, %v7807_v54  ;;  %v1400_v11 = vmul.f32 %v7921_v44, %v1348_v40  ;;  %v1355_v41 = vmul.f32 %v6392_v17, %v7824_v58  ;;  %2342 = vmatmul.mubr.bf16.gmra.mrb[40].mxu0 %v8183_v37 }
 0x3de   : > { %2411 = vmatpush1.bf16.msra.mxu0 %v10558_v50  ;;  %v1307_v2 = vsel %vm1305_vm9, %v1306_v24, %v1304_v51  ;;  %v1309_v48 = vmul.f32 %v6398_v29, %v8113_v46  ;;  %vm1310_vm10 = vcmp.eq.f32.partialorder %v8113_v46, inf  ;;  %2568 = vmatmul.mubr.bf16.gmra.mrb[8].mxu1 %v8183_v37  ;;  %v8201_v18 = vpack.c.bf16 %v1446_v60, %v1444_v42  ;;  %v1556_v42 = vld [vmem:[#allocation13 + $0x268] sm:$0xff] }
 0x3df   : > { %2412 = vmatprep.subr.bf16.mxu0 %v10559_v5  ;;  %6407 = vrcp.f32 %v1307_v2  ;;  %v1313_v4 = vand.u32 2147483648, %v8113_v46  ;;  %v1402_v54 = vmul.f32 %v7921_v44, %v1351_v36  ;;  %v1358_v1 = vmul.f32 %v6396_v26, %v7830_v28 }
 0x3e0   : > { %v1311_v58 = vsel %vm1310_vm10, %v8113_v46, %v1309_v48  ;;  %vm1312_vm11 = vcmp.eq.f32.partialorder %v8113_v46, 0.0  ;;  %v10560_v56 = vcombine.low %v7959_v3, %v7961_v23  ;;  %2351 = vmatprep.mubr.bf16.mxu0 %v8201_v18  ;;  %v1405_v59 = vmul.f32 %v7924_v30, %v1355_v41  ;;  %v6400_v38 = vpop.eup %6399  ;;  %2577 = vmatprep.mubr.bf16.mxu1 %v8201_v18 }
 0x3e1   : > { %v5586_v49 = vcombine.high %v8143_v0, %v8145_v45  ;;  %v1314_v53 = vsel %vm1312_vm11, %v1313_v4, %v1311_v58  ;;  %vm1317_vm12 = vcmp.eq.f32.partialorder %v8150_v10, inf  ;;  %v10561_v28 = vcombine.high %v7969_v62, %v7971_v52  ;;  %v10565_v58 = vld [vmem:[#allocation64_spill] sm:$0xff] }
 0x3e2   : > { %2413 = vmatpush1.bf16.msra.mxu0 %v10560_v56  ;;  %v1445_v3 = vadd.f32 %v7932_v43, %v1402_v54  ;;  %v1407_v23 = vmul.f32 %v7924_v30, %v1358_v1  ;;  %v6402_v46 = vpop.eup %6401  ;;  %6409 = vrcp.f32 %v1314_v53  ;;  %v1443_v61 = vadd.f32 %v7932_v43, %v1400_v11  ;;  %v1564_v1 = vld [vmem:[#allocation13 + $0x2a8] sm:$0xff] }
 0x3e3   : > { %2414 = vmatprep.subr.bf16.mxu0 %v10561_v28  ;;  %v1354_v8 = vmul.f32 %v6392_v17, %v7821_v25  ;;  %v1357_v22 = vmul.f32 %v6396_v26, %v7827_v34  ;;  %v1316_v47 = vmul.f32 %v6402_v46, %v8150_v10  ;;  %v1448_v32 = vadd.f32 %v7935_v57, %v1405_v59  ;;  %v6404_v31 = vpop.eup %6403 }
 0x3e4   : > { %v1450_v16 = vadd.f32 %v7935_v57, %v1407_v23  ;;  %v1361_v27 = vmul.f32 %v6400_v38, %v7844_v63  ;;  %vm1319_vm13 = vcmp.eq.f32.partialorder %v8150_v10, 0.0  ;;  %v1320_v33 = vand.u32 2147483648, %v8150_v10  ;;  %v10567_v23 = vld [vmem:[#allocation68_spill] sm:$0xff] }
 0x3e5   : > { %v8231_v55 = vpack.c.bf16 %v1445_v3, %v1443_v61  ;;  %v10562_v25 = vcombine.low %v7969_v62, %v7971_v52  ;;  %v1406_v34 = vmul.f32 %v7921_v44, %v1357_v22  ;;  %v6406_v17 = vpop.eup %6405  ;;  %v1318_v40 = vsel %vm1317_vm12, %v8150_v10, %v1316_v47  ;;  %v1552_v10 = vld [vmem:[#allocation13 + $0x248] sm:$0xff]  ;;  %v10568_v47 = vld [vmem:[#allocation67_spill] sm:$0xff] }
 0x3e6   : > { %v10563_v63 = vcombine.high %v7977_v9, %v7979_v15  ;;  %v8243_v19 = vpack.c.bf16 %v1450_v16, %v1448_v32  ;;  %v1364_v26 = vmul.f32 %v6404_v31, %v7850_v14  ;;  %v1409_v24 = vmul.f32 %v7924_v30, %v1361_v27  ;;  %v1572_v22 = vld [vmem:[#allocation13 + $0x2e8] sm:$0xff] }
 0x3e7   : > { %2415 = vmatpush1.bf16.msra.mxu0 %v10562_v25  ;;  %v1321_v50 = vsel %vm1319_vm13, %v1320_v33, %v1318_v40  ;;  %v1323_v52 = vmul.f32 %v6406_v17, %v8168_v6  ;;  %2578 = vmatmul.mubr.bf16.gmra.mrb[12].mxu1 %v8231_v55  ;;  %v1404_v62 = vmul.f32 %v7921_v44, %v1354_v8  ;;  %vm1324_vm14 = vcmp.eq.f32.partialorder %v8168_v6, inf  ;;  %v1568_v8 = vld [vmem:[#allocation13 + $0x2c8] sm:$0xff] }
 0x3e8   : > { %2416 = vmatprep.subr.bf16.mxu0 %v10563_v63  ;;  %2352 = vmatmul.mubr.bf16.gmra.mrb[44].mxu0 %v8231_v55  ;;  %6411 = vrcp.f32 %v1321_v50  ;;  %v1327_v60 = vand.u32 2147483648, %v8168_v6  ;;  %v1411_v14 = vmul.f32 %v7924_v30, %v1364_v26  ;;  %vm1326_vm15 = vcmp.eq.f32.partialorder %v8168_v6, 0.0  ;;  %v1580_v17 = vld [vmem:[#allocation13 + $0x328] sm:$0xff]  ;;  %v10570_v26 = vld [vmem:[#allocation70_spill] sm:$0xff] }
 0x3e9   : > { %2361 = vmatprep.mubr.bf16.mxu0 %v8243_v19  ;;  %2587 = vmatprep.mubr.bf16.mxu1 %v8243_v19  ;;  %v1325_v29 = vsel %vm1324_vm14, %v8168_v6, %v1323_v52  ;;  %v10564_v51 = vcombine.low %v7977_v9, %v7979_v15  ;;  %v1449_v5 = vadd.f32 %v7932_v43, %v1406_v34  ;;  %v6408_v11 = vpop.eup %6407  ;;  %v1560_v6 = vld [vmem:[#allocation13 + $0x288] sm:$0xff]  ;;  %v10566_v15 = vld [vmem:[#allocation66_spill] sm:$0xff] }
 0x3ea   : > { %v1363_v36 = vmul.f32 %v6404_v31, %v7847_v12  ;;  %v1328_v41 = vsel %vm1326_vm15, %v1327_v60, %v1325_v29  ;;  %v5594_v2 = vcombine.high %v1552_v10, %v1556_v42  ;;  %v1452_v48 = vadd.f32 %v7935_v57, %v1409_v24  ;;  %v1576_v34 = vld [vmem:[#allocation13 + $0x308] sm:$0xff] }
 0x3eb   : > { %2417 = vmatpush1.bf16.msra.mxu0 %v10564_v51  ;;  %v1454_v4 = vadd.f32 %v7935_v57, %v1411_v14  ;;  %6413 = vrcp.f32 %v1328_v41  ;;  %v1447_v54 = vadd.f32 %v7932_v43, %v1404_v62  ;;  %v1360_v9 = vmul.f32 %v6400_v38, %v10565_v58  ;;  %v10569_v40 = vld [vmem:[#allocation65_spill] sm:$0xff]  ;;  %v10571_v14 = vld [vmem:[#allocation72_spill] sm:$0xff] }
 0x3ec   : > { %2418 = vmatprep.subr.bf16.mxu0 %v5586_v49  ;;  %v1367_v56 = vmul.f32 %v6408_v11, %v10566_v15  ;;  %v6410_v12 = vpop.eup %6409  ;;  %v5593_v49 = vcombine.low %v1552_v10, %v1556_v42  ;;  %v1410_v28 = vmul.f32 %v7921_v44, %v1363_v36  ;;  %v5602_v3 = vcombine.high %v1560_v6, %v1564_v1  ;;  %v1584_v36 = vld [vmem:[#allocation13 + $0x348] sm:$0xff] }
 0x3ed   : > { %v8268_v59 = vpack.c.bf16 %v1454_v4, %v1452_v48  ;;  %v8270_v53 = vpack.c.bf16 %v1449_v5, %v1447_v54  ;;  %v1370_v46 = vmul.f32 %v6410_v12, %v10567_v23  ;;  %v1408_v61 = vmul.f32 %v7921_v44, %v1360_v9  ;;  %v10572_v4 = vld [vmem:[#allocation71_spill] sm:$0xff]  ;;  %v1592_v15 = vld [vmem:[#allocation13 + $0x388] sm:$0xff] }
 0x3ee   : > { %v1413_v38 = vmul.f32 %v7924_v30, %v1367_v56  ;;  %v5601_v45 = vcombine.low %v1560_v6, %v1564_v1  ;;  %v1369_v32 = vmul.f32 %v6410_v12, %v10568_v47  ;;  %v5610_v27 = vcombine.high %v1568_v8, %v1572_v22  ;;  %v1596_v56 = vld [vmem:[#allocation13 + $0x3a8] sm:$0xff] }
 0x3ef   : > { %2419 = vmatpush1.bf16.msra.mxu0 %v5585_v39  ;;  %2588 = vmatmul.mubr.bf16.gmra.mrb[16].mxu1 %v8270_v53  ;;  %v1415_v0 = vmul.f32 %v7924_v30, %v1370_v46  ;;  %v1453_v39 = vadd.f32 %v7932_v43, %v1410_v28  ;;  %v1451_v25 = vadd.f32 %v7932_v43, %v1408_v61  ;;  %v10573_v12 = vld [vmem:[#allocation69_spill] sm:$0xff] }
 0x3f0   : > { %2420 = vmatprep.subr.bf16.mxu0 %v5594_v2  ;;  %2362 = vmatmul.mubr.bf16.gmra.mrb[48].mxu0 %v8270_v53  ;;  %v1456_v31 = vadd.f32 %v7935_v57, %v1413_v38  ;;  %v1366_v63 = vmul.f32 %v6408_v11, %v10569_v40  ;;  %v5609_v10 = vcombine.low %v1568_v8, %v1572_v22  ;;  %v1588_v11 = vld [vmem:[#allocation13 + $0x368] sm:$0xff] }
 0x3f1   : > { %2371 = vmatprep.mubr.bf16.mxu0 %v8268_v59  ;;  %2597 = vmatprep.mubr.bf16.mxu1 %v8268_v59  ;;  %v1458_v33 = vadd.f32 %v7935_v57, %v1415_v0  ;;  %v8293_v62 = vpack.c.bf16 %v1453_v39, %v1451_v25  ;;  %v1414_v42 = vmul.f32 %v7921_v44, %v1369_v32  ;;  %v1600_v38 = vld [vmem:[#allocation13 + $0x3c8] sm:$0xff]  ;;  %v1482_v32 = vld [vmem:[#allocation13 + $0x18] sm:$0xff] }
 0x3f2   : > { %v6412_v16 = vpop.eup %6411  ;;  %v5618_v60 = vcombine.high %v1576_v34, %v1580_v17  ;;  %v1412_v5 = vmul.f32 %v7921_v44, %v1366_v63  ;;  %v5617_v2 = vcombine.low %v1576_v34, %v1580_v17  ;;  %v5626_v6 = vcombine.high %v1584_v36, %v1588_v11  ;;  %v1604_v61 = vld [vmem:[#allocation13 + $0x3e8] sm:$0xff]  ;;  %v6164_v25 = vld [vmem:[#allocation16 + $0x14] ss:$8 sps:$4 sm:$0xff]  }
 0x3f3   : > { %2421 = vmatpush1.bf16.msra.mxu0 %v5593_v49  ;;  %v1373_v24 = vmul.f32 %v6412_v16, %v10570_v26  ;;  %v8291_v50 = vpack.c.bf16 %v1458_v33, %v1456_v31  ;;  %v1457_v48 = vadd.f32 %v7932_v43, %v1414_v42  ;;  %v1372_v49 = vmul.f32 %v6412_v16, %v10573_v12  ;;  %v6159_v8 = vld [vmem:[#allocation16] ss:$8 sps:$4 sm:$0xff]   ;;  %v6161_v22 = vld [vmem:[#allocation16 + $0x4] ss:$8 sps:$4 sm:$0xff]   ;;  %v1486_v16 = vld [vmem:[#allocation13 + $0x38] sm:$0xff] }
 0x3f4   : > { %2422 = vmatprep.subr.bf16.mxu0 %v5602_v3  ;;  %v1455_v9 = vadd.f32 %v7932_v43, %v1412_v5  ;;  %v5625_v3 = vcombine.low %v1584_v36, %v1588_v11  ;;  %v5634_v46 = vcombine.high %v1592_v15, %v1596_v56  ;;  %v5633_v0 = vcombine.low %v1592_v15, %v1596_v56  ;;  %v6162_v33 = vld [vmem:[#allocation16 + $0x10] ss:$8 sps:$4 sm:$0xff]   ;;  %v6167_v34 = vld [vmem:[#allocation16 + $0x24] ss:$8 sps:$4 sm:$0xff]   ;;  %v6165_v40 = vld [vmem:[#allocation16 + $0x20] ss:$8 sps:$4 sm:$0xff]  }
 0x3f5   : > { %v6414_v52 = vpop.eup %6413  ;;  %v1417_v51 = vmul.f32 %v7924_v30, %v1373_v24  ;;  %v5642_v39 = vcombine.high %v1600_v38, %v1604_v61  ;;  %4737 = vmatprep.subr.bf16.mxu1 %v6161_v22  ;;  %v5526_v31 = vcombine.high %v1482_v32, %v1486_v16  ;;  %v1494_v17 = vld [vmem:[#allocation13 + $0x78] sm:$0xff]  ;;  %v5525_v26 = vcombine.low %v1482_v32, %v1486_v16  ;;  %v6171_v36 = vld [vmem:[#allocation16 + $0x40] ss:$8 sps:$4 sm:$0xff]  }
 0x3f6   : > { %v1376_v29 = vmul.f32 %v6414_v52, %v10571_v14  ;;  %v1375_v54 = vmul.f32 %v6414_v52, %v10572_v4  ;;  %4738 = vmatpush1.bf16.msra.mxu1 %v6159_v8  ;;  %v6170_v63 = vld [vmem:[#allocation16 + $0x34] ss:$8 sps:$4 sm:$0xff]   ;;  %v6168_v42 = vld [vmem:[#allocation16 + $0x30] ss:$8 sps:$4 sm:$0xff]   ;;  %v6177_v56 = vld [vmem:[#allocation16 + $0x60] ss:$8 sps:$4 sm:$0xff]  }
 0x3f7   : > { %2423 = vmatpush1.bf16.msra.mxu0 %v5601_v45  ;;  %2598 = vmatmul.mubr.bf16.gmra.mrb[20].mxu1 %v8293_v62  ;;  %v1460_v1 = vadd.f32 %v7935_v57, %v1417_v51  ;;  %v1498_v52 = vld [vmem:[#allocation13 + $0x98] sm:$0xff]  ;;  %v6183_v16 = vld [vmem:[#allocation16 + $0x80] ss:$8 sps:$4 sm:$0xff]  }
 0x3f8   : > { %2424 = vmatprep.subr.bf16.mxu0 %v5610_v27  ;;  %2372 = vmatmul.mubr.bf16.gmra.mrb[52].mxu0 %v8293_v62  ;;  %v1419_v41 = vmul.f32 %v7924_v30, %v1376_v29  ;;  %v8312_v30 = vpack.c.bf16 %v1457_v48, %v1455_v9  ;;  %v1418_v23 = vmul.f32 %v7921_v44, %v1375_v54  ;;  %v1506_v51 = vld [vmem:[#allocation13 + $0xd8] sm:$0xff] }
 0x3f9   : > { %2381 = vmatprep.mubr.bf16.mxu0 %v8291_v50  ;;  %2607 = vmatprep.mubr.bf16.mxu1 %v8291_v50  ;;  %v5641_v27 = vcombine.low %v1600_v38, %v1604_v61  ;;  %v1510_v5 = vld [vmem:[#allocation13 + $0xf8] sm:$0xff] }
 0x3fa   : > { %v1462_v58 = vadd.f32 %v7935_v57, %v1419_v41  ;;  %v1416_v57 = vmul.f32 %v7921_v44, %v1372_v49  ;;  %v1461_v45 = vadd.f32 %v7932_v43, %v1418_v23  ;;  %4739 = vmatprep.subr.bf16.mxu1 %v6164_v25  ;;  %v6176_v11 = vld [vmem:[#allocation16 + $0x54] ss:$8 sps:$4 sm:$0xff]   ;;  %v6174_v54 = vld [vmem:[#allocation16 + $0x50] ss:$8 sps:$4 sm:$0xff]  }
 0x3fb   : > { %2425 = vmatpush1.bf16.msra.mxu0 %v5609_v10  ;;  %4740 = vmatpush1.bf16.msra.mxu1 %v6162_v33  ;;  %v1502_v10 = vld [vmem:[#allocation13 + $0xb8] sm:$0xff] }
 0x3fc   : > { %2426 = vmatprep.subr.bf16.mxu0 %v5618_v60  ;;  %v8310_v28 = vpack.c.bf16 %v1462_v58, %v1460_v1  ;;  %v1459_v47 = vadd.f32 %v7932_v43, %v1416_v57  ;;  %v1490_v43 = vld [vmem:[#allocation13 + $0x58] sm:$0xff]  ;;  %4741 = vmatprep.subr.bf16.mxu1 %v6167_v34  ;;  %v6173_v60 = vld [vmem:[#allocation16 + $0x44] ss:$8 sps:$4 sm:$0xff]   ;;  %v5542_v29 = vcombine.high %v1498_v52, %v1502_v10 }
 0x3fd   : > { %v5534_v24 = vcombine.high %v1490_v43, %v1494_v17  ;;  %v5533_v14 = vcombine.low %v1490_v43, %v1494_v17  ;;  %v5541_v41 = vcombine.low %v1498_v52, %v1502_v10  ;;  %v1514_v48 = vld [vmem:[#allocation13 + $0x118] sm:$0xff]  ;;  %v5549_v1 = vcombine.low %v1506_v51, %v1510_v5  ;;  %v6189_v52 = vld [vmem:[#allocation16 + $0xa0] ss:$8 sps:$4 sm:$0xff]  }
 0x3fe   : > { %v8322_v44 = vpack.c.bf16 %v1461_v45, %v1459_v47  ;;  %v1518_v4 = vld [vmem:[#allocation13 + $0x138] sm:$0xff] }
 0x3ff   : > { %2427 = vmatpush1.bf16.msra.mxu0 %v5617_v2  ;;  %2608 = vmatmul.mubr.bf16.gmra.mrb[24].mxu1 %v8312_v30  ;;  %v5550_v2 = vcombine.high %v1506_v51, %v1510_v5  ;;  %v5558_v58 = vcombine.high %v1514_v48, %v1518_v4  ;;  %v1522_v9 = vld [vmem:[#allocation13 + $0x158] sm:$0xff]  ;;  %v5557_v49 = vcombine.low %v1514_v48, %v1518_v4  ;;  %v6195_v48 = vld [vmem:[#allocation16 + $0xc0] ss:$8 sps:$4 sm:$0xff]  }
 0x400   : > { %2428 = vmatprep.subr.bf16.mxu0 %v5626_v6  ;;  %2382 = vmatmul.mubr.bf16.gmra.mrb[56].mxu0 %v8312_v30  ;;  %v6179_v6 = vld [vmem:[#allocation16 + $0x64] ss:$8 sps:$4 sm:$0xff]   ;;  %v1526_v15 = vld [vmem:[#allocation13 + $0x178] sm:$0xff] }
 0x401   : > { %2391 = vmatprep.mubr.bf16.mxu0 %v8310_v28  ;;  %2617 = vmatprep.mubr.bf16.mxu1 %v8310_v28  ;;  %v6182_v12 = vld [vmem:[#allocation16 + $0x74] ss:$8 sps:$4 sm:$0xff]   ;;  %v6180_v57 = vld [vmem:[#allocation16 + $0x70] ss:$8 sps:$4 sm:$0xff]   ;;  %v5565_v38 = vcombine.low %v1522_v9, %v1526_v15 }
 0x402   : > { %4742 = vmatpush1.bf16.msra.mxu1 %v6165_v40  ;;  %v1530_v23 = vld [vmem:[#allocation13 + $0x198] sm:$0xff] }
 0x403   : > { %2429 = vmatpush1.bf16.msra.mxu0 %v5625_v3  ;;  %4743 = vmatprep.subr.bf16.mxu1 %v6170_v63  ;;  %v5566_v3 = vcombine.high %v1522_v9, %v1526_v15  ;;  %v1538_v8 = vld [vmem:[#allocation13 + $0x1d8] sm:$0xff]  ;;  %v6191_v63 = vld [vmem:[#allocation16 + $0xa4] ss:$8 sps:$4 sm:$0xff]  }
 0x404   : > { %2430 = vmatprep.subr.bf16.mxu0 %v5634_v46  ;;  %v1534_v46 = vld [vmem:[#allocation13 + $0x1b8] sm:$0xff] }
 0x405   : > { %v5574_v61 = vcombine.high %v1530_v23, %v1534_v46  ;;  %v1542_v22 = vld [vmem:[#allocation13 + $0x1f8] sm:$0xff] }
 0x406   : > { %4744 = vmatpush1.bf16.msra.mxu1 %v6168_v42  ;;  %v5582_v45 = vcombine.high %v1538_v8, %v1542_v22  ;;  %v1546_v47 = vld [vmem:[#allocation13 + $0x218] sm:$0xff] }
 0x407   : > { %2431 = vmatpush1.bf16.msra.mxu0 %v5633_v0  ;;  %2618 = vmatmul.mubr.bf16.gmra.mrb[28].mxu1 %v8322_v44  ;;  %v5573_v0 = vcombine.low %v1530_v23, %v1534_v46  ;;  %v1550_v32 = vld [vmem:[#allocation13 + $0x238] sm:$0xff]  ;;  %v6201_v23 = vld [vmem:[#allocation16 + $0xe0] ss:$8 sps:$4 sm:$0xff]  }
 0x408   : > { %2432 = vmatprep.subr.bf16.mxu0 %v5642_v39  ;;  %2392 = vmatmul.mubr.bf16.gmra.mrb[60].mxu0 %v8322_v44  ;;  %v6185_v39 = vld [vmem:[#allocation16 + $0x84] ss:$8 sps:$4 sm:$0xff]   ;;  %v6188_v33 = vld [vmem:[#allocation16 + $0x94] ss:$8 sps:$4 sm:$0xff]   ;;  %v6186_v43 = vld [vmem:[#allocation16 + $0x90] ss:$8 sps:$4 sm:$0xff]   ;;  %v5589_v17 = vcombine.low %v1546_v47, %v1550_v32 }
 0x409   : > { %2434 = vmatprep.mubr.bf16.mxu0 %v8050_v35  ;;  %4745 = vmatprep.subr.bf16.mxu1 %v6173_v60  ;;  %v1554_v25 = vld [vmem:[#allocation13 + $0x258] sm:$0xff] }
 0x40a   : > { %4746 = vmatpush1.bf16.msra.mxu1 %v6171_v36  ;;  %v1558_v34 = vld [vmem:[#allocation13 + $0x278] sm:$0xff] }
 0x40b   : > { %2433 = vmatpush1.bf16.msra.mxu0 %v5641_v27  ;;  %4747 = vmatprep.subr.bf16.mxu1 %v6176_v11  ;;  %v5581_v27 = vcombine.low %v1538_v8, %v1542_v22  ;;  %v5598_v40 = vcombine.high %v1554_v25, %v1558_v34  ;;  %v5597_v10 = vcombine.low %v1554_v25, %v1558_v34  ;;  %v6194_v60 = vld [vmem:[#allocation16 + $0xb4] ss:$8 sps:$4 sm:$0xff]   ;;  %v6192_v51 = vld [vmem:[#allocation16 + $0xb0] ss:$8 sps:$4 sm:$0xff]   ;;  %v6197_v11 = vld [vmem:[#allocation16 + $0xc4] ss:$8 sps:$4 sm:$0xff]  }
 0x40c   : > { %2628 = vmatprep.subr.bf16.mxu0 %v5526_v31  ;;  %v5590_v31 = vcombine.high %v1546_v47, %v1550_v32  ;;  %v6198_v9 = vld [vmem:[#allocation16 + $0xd0] ss:$8 sps:$4 sm:$0xff]   ;;  %v6209_v47 = vld [vmem:[#allocation16 + $0x104] ss:$8 sps:$4 sm:$0xff]  }
 0x40d   : > { %v1606_v8 = vld [vmem:[#allocation13 + $0x3f8] sm:$0xff] }
 0x40e   : > { %4748 = vmatpush1.bf16.msra.mxu1 %v6174_v54  ;;  %v6204_v22 = vld [vmem:[#allocation16 + $0xf0] ss:$8 sps:$4 sm:$0xff]  }
 0x40f   : > { %4749 = vmatprep.subr.bf16.mxu1 %v6179_v6  ;;  %v6200_v6 = vld [vmem:[#allocation16 + $0xd4] ss:$8 sps:$4 sm:$0xff]  }
 0x410   : > { %2435 = vmatmul.mubr.bf16.vlgmr.msra.gmra.mrb[64].mxu0 %v8052_v7 }
 0x411   : > { %2444 = vmatprep.mubr.bf16.mxu0 %v8099_v13  ;;  %2629 = vmatpush1.bf16.msra.mxu0 %v5525_v26  ;;  %v1562_v26 = vld [vmem:[#allocation13 + $0x298] sm:$0xff] }
 0x412   : > { %2630 = vmatprep.subr.bf16.mxu0 %v5534_v24  ;;  %4750 = vmatpush1.bf16.msra.mxu1 %v6177_v56  ;;  %v1566_v24 = vld [vmem:[#allocation13 + $0x2b8] sm:$0xff] }
 0x413   : > { %4751 = vmatprep.subr.bf16.mxu1 %v6182_v12  ;;  %v5606_v42 = vcombine.high %v1562_v26, %v1566_v24  ;;  %v5605_v5 = vcombine.low %v1562_v26, %v1566_v24  ;;  %v6203_v12 = vld [vmem:[#allocation16 + $0xe4] ss:$8 sps:$4 sm:$0xff]  }
 0x415   : > { %2631 = vmatpush1.bf16.msra.mxu0 %v5533_v14  ;;  %v1570_v14 = vld [vmem:[#allocation13 + $0x2d8] sm:$0xff] }
 0x416   : > { %2632 = vmatprep.subr.bf16.mxu0 %v5542_v29  ;;  %4752 = vmatpush1.bf16.msra.mxu1 %v6180_v57  ;;  %v1574_v29 = vld [vmem:[#allocation13 + $0x2f8] sm:$0xff] }
 0x417   : > { %4753 = vmatprep.subr.bf16.mxu1 %v6185_v39  ;;  %v5614_v36 = vcombine.high %v1570_v14, %v1574_v29  ;;  %v5613_v4 = vcombine.low %v1570_v14, %v1574_v29 }
 0x418   : > { %2445 = vmatmul.mubr.bf16.gmra.mrb[68].mxu0 %v8117_v21 }
 0x419   : > { %2454 = vmatprep.mubr.bf16.mxu0 %v8152_v20  ;;  %2633 = vmatpush1.bf16.msra.mxu0 %v5541_v41  ;;  %v1578_v41 = vld [vmem:[#allocation13 + $0x318] sm:$0xff] }
 0x41a   : > { %2634 = vmatprep.subr.bf16.mxu0 %v5550_v2  ;;  %4754 = vmatpush1.bf16.msra.mxu1 %v6183_v16  ;;  %v1582_v2 = vld [vmem:[#allocation13 + $0x338] sm:$0xff] }
 0x41b   : > { %4755 = vmatprep.subr.bf16.mxu1 %v6188_v33  ;;  %v5622_v54 = vcombine.high %v1578_v41, %v1582_v2  ;;  %v5621_v15 = vcombine.low %v1578_v41, %v1582_v2 }
 0x41d   : > { %2635 = vmatpush1.bf16.msra.mxu0 %v5549_v1  ;;  %v1586_v1 = vld [vmem:[#allocation13 + $0x358] sm:$0xff] }
 0x41e   : > { %2636 = vmatprep.subr.bf16.mxu0 %v5558_v58  ;;  %4756 = vmatpush1.bf16.msra.mxu1 %v6186_v43  ;;  %v1590_v58 = vld [vmem:[#allocation13 + $0x378] sm:$0xff] }
 0x41f   : > { %4757 = vmatprep.subr.bf16.mxu1 %v6191_v63  ;;  %v5630_v56 = vcombine.high %v1586_v1, %v1590_v58  ;;  %v5629_v46 = vcombine.low %v1586_v1, %v1590_v58 }
 0x420   : > { %2455 = vmatmul.mubr.bf16.gmra.mrb[72].mxu0 %v8183_v37 }
 0x421   : > { %2464 = vmatprep.mubr.bf16.mxu0 %v8201_v18  ;;  %2637 = vmatpush1.bf16.msra.mxu0 %v5557_v49  ;;  %v1594_v49 = vld [vmem:[#allocation13 + $0x398] sm:$0xff] }
 0x422   : > { %2638 = vmatprep.subr.bf16.mxu0 %v5566_v3  ;;  %4758 = vmatpush1.bf16.msra.mxu1 %v6189_v52  ;;  %v1598_v3 = vld [vmem:[#allocation13 + $0x3b8] sm:$0xff] }
 0x423   : > { %4759 = vmatprep.subr.bf16.mxu1 %v6194_v60  ;;  %v5638_v57 = vcombine.high %v1594_v49, %v1598_v3 }
 0x425   : > { %2639 = vmatpush1.bf16.msra.mxu0 %v5565_v38  ;;  %v6206_v38 = vld [vmem:[#allocation16 + $0xf4] ss:$8 sps:$4 sm:$0xff]  }
 0x426   : > { %2640 = vmatprep.subr.bf16.mxu0 %v5574_v61  ;;  %4760 = vmatpush1.bf16.msra.mxu1 %v6192_v51  ;;  %v1602_v61 = vld [vmem:[#allocation13 + $0x3d8] sm:$0xff] }
 0x427   : > { %4761 = vmatprep.subr.bf16.mxu1 %v6197_v11  ;;  %v5645_v39 = vcombine.low %v1602_v61, %v1606_v8 }
 0x428   : > { %2465 = vmatmul.mubr.bf16.gmra.mrb[76].mxu0 %v8231_v55 }
 0x429   : > { %2474 = vmatprep.mubr.bf16.mxu0 %v8243_v19  ;;  %2641 = vmatpush1.bf16.msra.mxu0 %v5573_v0  ;;  %v5637_v0 = vcombine.low %v1594_v49, %v1598_v3 }
 0x42a   : > { %2642 = vmatprep.subr.bf16.mxu0 %v5582_v45  ;;  %4762 = vmatpush1.bf16.msra.mxu1 %v6195_v48  ;;  %v5646_v45 = vcombine.high %v1602_v61, %v1606_v8 }
 0x42b   : > { %4763 = vmatprep.subr.bf16.mxu1 %v6200_v6 }
 0x42d   : > { %2643 = vmatpush1.bf16.msra.mxu0 %v5581_v27 }
 0x42e   : > { %2644 = vmatprep.subr.bf16.mxu0 %v5590_v31  ;;  %4764 = vmatpush1.bf16.msra.mxu1 %v6198_v9 }
 0x42f   : > { %4765 = vmatprep.subr.bf16.mxu1 %v6203_v12 }
 0x430   : > { %2475 = vmatmul.mubr.bf16.gmra.mrb[80].mxu0 %v8270_v53 }
 0x431   : > { %2484 = vmatprep.mubr.bf16.mxu0 %v8268_v59  ;;  %2645 = vmatpush1.bf16.msra.mxu0 %v5589_v17 }
 0x432   : > { %2646 = vmatprep.subr.bf16.mxu0 %v5598_v40  ;;  %4766 = vmatpush1.bf16.msra.mxu1 %v6201_v23 }
 0x433   : > { %4767 = vmatprep.subr.bf16.mxu1 %v6206_v38 }
 0x435   : > { %2647 = vmatpush1.bf16.msra.mxu0 %v5597_v10 }
 0x436   : > { %2648 = vmatprep.subr.bf16.mxu0 %v5606_v42  ;;  %4768 = vmatpush1.bf16.msra.mxu1 %v6204_v22 }
 0x437   : > { %4850 = vmatprep.subr.bf16.mxu1 %v6209_v47 }
 0x438   : > { %2485 = vmatmul.mubr.bf16.gmra.mrb[84].mxu0 %v8293_v62 }
 0x439   : > { %2494 = vmatprep.mubr.bf16.mxu0 %v8291_v50  ;;  %2649 = vmatpush1.bf16.msra.mxu0 %v5605_v5 }
 0x43a   : > { %2650 = vmatprep.subr.bf16.mxu0 %v5614_v36 }
 0x43d   : > { %2651 = vmatpush1.bf16.msra.mxu0 %v5613_v4 }
 0x43e   : > { %2652 = vmatprep.subr.bf16.mxu0 %v5622_v54 }
 0x440   : > { %2495 = vmatmul.mubr.bf16.gmra.mrb[88].mxu0 %v8312_v30 }
 0x441   : > { %2504 = vmatprep.mubr.bf16.mxu0 %v8310_v28  ;;  %2653 = vmatpush1.bf16.msra.mxu0 %v5621_v15 }
 0x442   : > { %2654 = vmatprep.subr.bf16.mxu0 %v5630_v56 }
 0x445   : > { %2655 = vmatpush1.bf16.msra.mxu0 %v5629_v46 }
 0x446   : > { %2656 = vmatprep.subr.bf16.mxu0 %v5638_v57 }
 0x448   : > { %2505 = vmatmul.mubr.bf16.gmra.mrb[92].mxu0 %v8322_v44 }
 0x449   : > { %2657 = vmatpush1.bf16.msra.mxu0 %v5637_v0  ;;  %2660 = vmatprep.mubr.bf16.mxu0 %v8050_v35  ;;  %v10574_v35 = vld [vmem:[#allocation29_spill] sm:$0xff] }
 0x44a   : > { %2658 = vmatprep.subr.bf16.mxu0 %v5646_v45  ;;  %v1619_v63 = vsub.s32 2, %v10574_v35  ;;  %v1623_v41 = vsub.s32 3, %v10574_v35 }
 0x44d   : > { %2659 = vmatpush1.bf16.msra.mxu0 %v5645_v39 }
 0x450   : > { %2661 = vmatmul.mubr.bf16.vlgmr.msra.gmra.mrb[96].mxu0 %v8052_v7  ;;  %v1627_v7 = vsub.s32 4, %v10574_v35 }
 0x451   : > { %2670 = vmatprep.mubr.bf16.mxu0 %v8099_v13  ;;  %v1607_v13 = vld [vmem:[#allocation14] sm:$0xff] }
 0x452   : > { %v8390_v11 = vrot.slane %v1607_v13, %v1619_v63  ;;  %v8407_v47 = vrot.slane %v1607_v13, %v1623_v41 }
 0x454   : > { %10579 = vst [vmem:[#allocation68_spill] sm:$0xff] %v8390_v11  ;;  %10582 = vst [vmem:[#allocation70_spill] sm:$0xff] %v8407_v47 }
 0x458   : > { %2671 = vmatmul.mubr.bf16.gmra.mrb[100].mxu0 %v8117_v21  ;;  %v1631_v21 = vsub.s32 5, %v10574_v35 }
 0x459   : > { %2680 = vmatprep.mubr.bf16.mxu0 %v8152_v20  ;;  %v10575_v20 = vld [vmem:[#allocation30_spill] sm:$0xff] }
 0x460   : > { %2681 = vmatmul.mubr.bf16.gmra.mrb[104].mxu0 %v8183_v37  ;;  %v8361_v37 = vrot.slane %v1607_v13, %v10575_v20 }
 0x461   : > { %2690 = vmatprep.mubr.bf16.mxu0 %v8201_v18  ;;  %v8363_v18 = vrot.slane %v1607_v13, %v1627_v7 }
 0x468   : > { %2691 = vmatmul.mubr.bf16.gmra.mrb[108].mxu0 %v8231_v55  ;;  %v10576_v55 = vld [vmem:[#allocation31_spill] sm:$0xff] }
 0x469   : > { %2700 = vmatprep.mubr.bf16.mxu0 %v8243_v19  ;;  %v8366_v19 = vrot.slane %v1607_v13, %v10576_v55 }
 0x470   : > { %2701 = vmatmul.mubr.bf16.gmra.mrb[112].mxu0 %v8270_v53 }
 0x471   : > { %2710 = vmatprep.mubr.bf16.mxu0 %v8268_v59 }
 0x478   : > { %2711 = vmatmul.mubr.bf16.gmra.mrb[116].mxu0 %v8293_v62 }
 0x479   : > { %2720 = vmatprep.mubr.bf16.mxu0 %v8291_v50  ;;  %v8368_v50 = vrot.slane %v1607_v13, %v1631_v21 }
 0x480   : > { %2721 = vmatmul.mubr.bf16.gmra.mrb[120].mxu0 %v8312_v30 }
 0x481   : > { %2730 = vmatprep.mubr.bf16.mxu0 %v8310_v28 }
 0x488   : > { %2731 = vmatmul.mubr.bf16.gmra.mrb[124].mxu0 %v8322_v44 }
 0x499   : > { %v2323_v59 = vpop.f32.mrb[32].mxu0  ;;  %v2549_v53 = vpop.f32.mrb[0].mxu1 }
 0x49a   : > { %v2324_v62 = vadd.f32 %v2323_v59, %v8361_v37  ;;  %v2550_v28 = vadd.f32 %v2549_v53, %v8363_v18  ;;  %v2325_v30 = vpop.f32.mrb[33].mxu0  ;;  %v2551_v44 = vpop.f32.mrb[1].mxu1 }
 0x49b   : > { %v8373_v32 = vadd.f32 %v2325_v30, %v8366_v19  ;;  %v2327_v16 = vpop.f32.mrb[34].mxu0  ;;  %v2553_v27 = vpop.f32.mrb[2].mxu1  ;;  %v8376_v25 = vadd.f32 %v2551_v44, %v8368_v50 }
 0x49c   : > { %v2869_v31 = vmul.f32 0.044715, %v2324_v62  ;;  %v2873_v33 = vmul.f32 0.044715, %v2550_v28  ;;  %v2328_v34 = vadd.f32 %v2327_v16, %v8361_v37  ;;  %v2554_v43 = vadd.f32 %v2553_v27, %v8363_v18  ;;  %v2329_v17 = vpop.f32.mrb[35].mxu0  ;;  %v2555_v40 = vpop.f32.mrb[3].mxu1 }
 0x49d   : > { %10577 = vst [vmem:[#allocation64_spill] sm:$0xff] %v8376_v25  ;;  %v2870_v52 = vmul.f32 0.044715, %v8373_v32  ;;  %v8383_v10 = vadd.f32 %v2329_v17, %v8366_v19  ;;  %v8386_v51 = vadd.f32 %v2555_v40, %v8368_v50  ;;  %v8388_v5 = vmul.f32 0.5, %v2324_v62 }
 0x49e   : > { %v2997_v26 = vmul.f32 %v2869_v31, %v2324_v62  ;;  %v3001_v24 = vmul.f32 %v2873_v33, %v2550_v28  ;;  %v2877_v42 = vmul.f32 0.044715, %v2328_v34  ;;  %v2881_v29 = vmul.f32 0.044715, %v2554_v43 }
 0x49f   : > { %10578 = vst [vmem:[#allocation66_spill] sm:$0xff] %v8386_v51  ;;  %v2998_v2 = vmul.f32 %v2870_v52, %v8373_v32  ;;  %v2874_v48 = vmul.f32 0.044715, %v8376_v25  ;;  %v2878_v54 = vmul.f32 0.044715, %v8383_v10  ;;  %v8402_v3 = vmul.f32 0.5, %v2550_v28 }
 0x4a0   : > { %v3125_v60 = vmul.f32 %v2997_v26, %v2324_v62  ;;  %v3129_v14 = vmul.f32 %v3001_v24, %v2550_v28  ;;  %v3005_v36 = vmul.f32 %v2877_v42, %v2328_v34  ;;  %v3009_v4 = vmul.f32 %v2881_v29, %v2554_v43 }
 0x4a1   : > { %10581 = vst [vmem:[#allocation65_spill] sm:$0xff] %v8402_v3  ;;  %v2882_v57 = vmul.f32 0.044715, %v8386_v51  ;;  %v3002_v7 = vmul.f32 %v2874_v48, %v8376_v25  ;;  %v3006_v59 = vmul.f32 %v2878_v54, %v8383_v10  ;;  %v8415_v30 = vmul.f32 0.5, %v2328_v34 }
 0x4a2   : > { %v3253_v58 = vadd.f32 %v3125_v60, %v2324_v62  ;;  %v3133_v9 = vmul.f32 %v3005_v36, %v2328_v34  ;;  %v3257_v23 = vadd.f32 %v3129_v14, %v2550_v28  ;;  %v3137_v46 = vmul.f32 %v3009_v4, %v2554_v43 }
 0x4a3   : > { %v3126_v28 = vmul.f32 %v2998_v2, %v8373_v32  ;;  %v8417_v44 = vmul.f32 0.5, %v2554_v43  ;;  %v3010_v27 = vmul.f32 %v2882_v57, %v8386_v51  ;;  %v8435_v26 = vmul.f32 %v3006_v59, %v8383_v10 }
 0x4a4   : > { %v3261_v8 = vadd.f32 %v3133_v9, %v2328_v34  ;;  %v3265_v21 = vadd.f32 %v3137_v46, %v2554_v43  ;;  %v3381_v62 = vmul.f32 0.7978846, %v3253_v58  ;;  %v3385_v16 = vmul.f32 0.7978846, %v3257_v23 }
 0x4a5   : > { %v2333_v6 = vpop.f32.mrb[36].mxu0  ;;  %v2559_v1 = vpop.f32.mrb[4].mxu1  ;;  %10583 = vst [vmem:[#allocation72_spill] sm:$0xff] %v8417_v44  ;;  %v8432_v34 = vmul.f32 %v3002_v7, %v8376_v25  ;;  %v8444_v14 = vmul.f32 %v3010_v27, %v8386_v51 }
 0x4a6   : > { %v8397_v15 = vadd.f32 %v2333_v6, %v8361_v37  ;;  %v8400_v56 = vadd.f32 %v2559_v1, %v8363_v18  ;;  %v2335_v12 = vpop.f32.mrb[37].mxu0  ;;  %v2561_v49 = vpop.f32.mrb[5].mxu1  ;;  %v3389_v33 = vmul.f32 0.7978846, %v3261_v8  ;;  %v3393_v43 = vmul.f32 0.7978846, %v3265_v21 }
 0x4a7   : > { %v2337_v38 = vpop.f32.mrb[38].mxu0  ;;  %v2563_v61 = vpop.f32.mrb[6].mxu1  ;;  %v8412_v53 = vadd.f32 %v2335_v12, %v8366_v19  ;;  %v8421_v13 = vadd.f32 %v2561_v49, %v8368_v50  ;;  %10586 = vst [vmem:[#allocation73_spill] sm:$0xff] %v8432_v34  ;;  %6415 = vtanh.f32 %v3381_v62  ;;  %10587 = vst [vmem:[#allocation74_spill] sm:$0xff] %v8444_v14  ;;  %v6258_v14 = vld [vmem:[#allocation16 + $0x300] ss:$8 sps:$4 sm:$0xff]  }
 0x4a8   : > { %10580 = vst [vmem:[#allocation67_spill] sm:$0xff] %v8400_v56  ;;  %v2885_v22 = vmul.f32 0.044715, %v8397_v15  ;;  %v2889_v0 = vmul.f32 0.044715, %v8400_v56  ;;  %v2339_v45 = vpop.f32.mrb[39].mxu0  ;;  %v8424_v31 = vadd.f32 %v2337_v38, %v8361_v37  ;;  %v8429_v63 = vadd.f32 %v2563_v61, %v8363_v18 }
 0x4a9   : > { %v2565_v39 = vpop.f32.mrb[7].mxu1  ;;  %10584 = vst [vmem:[#allocation71_spill] sm:$0xff] %v8421_v13  ;;  %v2886_v24 = vmul.f32 0.044715, %v8412_v53  ;;  %v2890_v52 = vmul.f32 0.044715, %v8421_v13  ;;  %v8441_v60 = vadd.f32 %v2339_v45, %v8366_v19  ;;  %6417 = vtanh.f32 %v3385_v16 }
 0x4aa   : > { %v3013_v17 = vmul.f32 %v2885_v22, %v8397_v15  ;;  %v3017_v40 = vmul.f32 %v2889_v0, %v8400_v56  ;;  %10585 = vst [vmem:[#allocation69_spill] sm:$0xff] %v8429_v63  ;;  %v2893_v42 = vmul.f32 0.044715, %v8424_v31  ;;  %v2897_v29 = vmul.f32 0.044715, %v8429_v63 }
 0x4ab   : > { %v8448_v36 = vadd.f32 %v2565_v39, %v8368_v50  ;;  %6419 = vtanh.f32 %v3389_v33  ;;  %v2894_v48 = vmul.f32 0.044715, %v8441_v60  ;;  %v3014_v6 = vmul.f32 %v2886_v24, %v8412_v53 }
 0x4ac   : > { %v8451_v41 = vmul.f32 %v3013_v17, %v8397_v15  ;;  %v8454_v2 = vmul.f32 %v3017_v40, %v8400_v56  ;;  %6421 = vtanh.f32 %v3393_v43  ;;  %v3018_v49 = vmul.f32 %v2890_v52, %v8421_v13 }
 0x4ad   : > { %10588 = vst [vmem:[#allocation75_spill] sm:$0xff] %v8448_v36  ;;  %v3021_v23 = vmul.f32 %v2893_v42, %v8424_v31  ;;  %v8470_v61 = vmul.f32 0.5, %v8373_v32  ;;  %v3025_v8 = vmul.f32 %v2897_v29, %v8429_v63  ;;  %v2898_v22 = vmul.f32 0.044715, %v8448_v36 }
 0x4ae   : > { %10589 = vst [vmem:[#allocation76_spill] sm:$0xff] %v8454_v2  ;;  %v3022_v21 = vmul.f32 %v2894_v48, %v8441_v60  ;;  %v8487_v27 = vmul.f32 %v3014_v6, %v8412_v53  ;;  %v8491_v17 = vmul.f32 0.5, %v8383_v10  ;;  %v8494_v40 = vadd.f32 %v3126_v28, %v8373_v32 }
 0x4af   : > { %v8505_v29 = vmul.f32 %v3018_v49, %v8421_v13  ;;  %v8508_v48 = vmul.f32 %v3021_v23, %v8424_v31  ;;  %v3026_v32 = vmul.f32 %v2898_v22, %v8448_v36 }
 0x4b0   : > { %v2343_v4 = vpop.f32.mrb[40].mxu0 }
 0x4b1   : > { %v2569_v54 = vpop.f32.mrb[8].mxu1  ;;  %v8459_v1 = vadd.f32 %v2343_v4, %v8361_v37  ;;  %v2345_v9 = vpop.f32.mrb[41].mxu0  ;;  %10594 = vst [vmem:[#allocation81_spill] sm:$0xff] %v8505_v29  ;;  %v8511_v4 = vmul.f32 %v3025_v8, %v8429_v63 }
 0x4b2   : > { %v8462_v58 = vadd.f32 %v2569_v54, %v8363_v18  ;;  %v2571_v12 = vpop.f32.mrb[9].mxu1  ;;  %v8467_v46 = vadd.f32 %v2345_v9, %v8366_v19  ;;  %v2347_v57 = vpop.f32.mrb[42].mxu0  ;;  %v8517_v54 = vmul.f32 %v3022_v21, %v8441_v60 }
 0x4b3   : > { %v2573_v38 = vpop.f32.mrb[10].mxu1  ;;  %v8475_v0 = vadd.f32 %v2571_v12, %v8368_v50  ;;  %v8478_v45 = vadd.f32 %v2347_v57, %v8361_v37  ;;  %v2349_v39 = vpop.f32.mrb[43].mxu0  ;;  %v2901_v59 = vmul.f32 0.044715, %v8459_v1  ;;  %10595 = vst [vmem:[#allocation82_spill] sm:$0xff] %v8511_v4 }
 0x4b4   : > { %10590 = vst [vmem:[#allocation77_spill] sm:$0xff] %v8462_v58  ;;  %v2575_v7 = vpop.f32.mrb[11].mxu1  ;;  %v2905_v62 = vmul.f32 0.044715, %v8462_v58  ;;  %v8484_v16 = vadd.f32 %v2573_v38, %v8363_v18  ;;  %v2902_v33 = vmul.f32 0.044715, %v8467_v46  ;;  %v8499_v52 = vadd.f32 %v2349_v39, %v8366_v19  ;;  %v8514_v28 = vpop.eup %6415 }
 0x4b5   : > { %10591 = vst [vmem:[#allocation78_spill] sm:$0xff] %v8475_v0  ;;  %v2906_v43 = vmul.f32 0.044715, %v8475_v0  ;;  %v2909_v24 = vmul.f32 0.044715, %v8478_v45  ;;  %v8502_v42 = vadd.f32 %v2575_v7, %v8368_v50  ;;  %v3029_v6 = vmul.f32 %v2901_v59, %v8459_v1  ;;  %v8522_v23 = vpop.eup %6417 }
 0x4b6   : > { %10592 = vst [vmem:[#allocation79_spill] sm:$0xff] %v8484_v16  ;;  %v3033_v9 = vmul.f32 %v2905_v62, %v8462_v58  ;;  %v2913_v12 = vmul.f32 0.044715, %v8484_v16  ;;  %10596 = vst [vmem:[#allocation83_spill] sm:$0xff] %v8522_v23  ;;  %v2910_v38 = vmul.f32 0.044715, %v8499_v52  ;;  %v8532_v59 = vpop.eup %6419  ;;  %v3030_v62 = vmul.f32 %v2902_v33, %v8467_v46 }
 0x4b7   : > { %10593 = vst [vmem:[#allocation80_spill] sm:$0xff] %v8502_v42  ;;  %v2914_v8 = vmul.f32 0.044715, %v8502_v42  ;;  %v3034_v55 = vmul.f32 %v2906_v43, %v8475_v0  ;;  %v3037_v20 = vmul.f32 %v2909_v24, %v8478_v45  ;;  %v8551_v24 = vmul.f32 %v3026_v32, %v8448_v36  ;;  %v6260_v36 = vld [vmem:[#allocation16 + $0x304] ss:$8 sps:$4 sm:$0xff]  }
 0x4b8   : > { %v8567_v32 = vmul.f32 %v3030_v62, %v8467_v46  ;;  %5076 = vmatprep.subr.bf16.mxu0 %v6260_v36 }
 0x4b9   : > { %10602 = vst [vmem:[#allocation89_spill] sm:$0xff] %v8551_v24  ;;  %v3042_v23 = vmul.f32 %v2914_v8, %v8502_v42  ;;  %5077 = vmatpush1.bf16.msra.mxu0 %v6258_v14 }
 0x4ba   : > { %v2579_v57 = vpop.f32.mrb[12].mxu1 }
 0x4bb   : > { %v2353_v49 = vpop.f32.mrb[44].mxu0  ;;  %v8530_v39 = vadd.f32 %v2579_v57, %v8363_v18  ;;  %v2581_v21 = vpop.f32.mrb[13].mxu1 }
 0x4bc   : > { %v8527_v22 = vadd.f32 %v2353_v49, %v8361_v37  ;;  %v2355_v7 = vpop.f32.mrb[45].mxu0  ;;  %v2583_v2 = vpop.f32.mrb[14].mxu1  ;;  %v8545_v29 = vadd.f32 %v2581_v21, %v8368_v50  ;;  %v8562_v21 = vmul.f32 %v3033_v9, %v8462_v58  ;;  %v8576_v9 = vmul.f32 %v3037_v20, %v8478_v45 }
 0x4bd   : > { %10598 = vst [vmem:[#allocation85_spill] sm:$0xff] %v8530_v39  ;;  %v8538_v4 = vadd.f32 %v2355_v7, %v8366_v19  ;;  %v2357_v63 = vpop.f32.mrb[46].mxu0  ;;  %v8540_v49 = vpop.eup %6421  ;;  %v2921_v56 = vmul.f32 0.044715, %v8530_v39  ;;  %v3041_v7 = vmul.f32 %v2913_v12, %v8484_v16  ;;  %v8556_v3 = vadd.f32 %v2583_v2, %v8363_v18 }
 0x4be   : > { %10597 = vst [vmem:[#allocation84_spill] sm:$0xff] %v8527_v22  ;;  %10599 = vst [vmem:[#allocation86_spill] sm:$0xff] %v8540_v49  ;;  %v2917_v57 = vmul.f32 0.044715, %v8527_v22  ;;  %v8548_v33 = vadd.f32 %v2357_v63, %v8361_v37  ;;  %v2359_v43 = vpop.f32.mrb[47].mxu0  ;;  %v2585_v13 = vpop.f32.mrb[15].mxu1  ;;  %v8559_v49 = vmul.f32 %v3029_v6, %v8459_v1  ;;  %v3038_v63 = vmul.f32 %v2910_v38, %v8499_v52 }
 0x4bf   : > { %10600 = vst [vmem:[#allocation87_spill] sm:$0xff] %v8545_v29  ;;  %v2918_v44 = vmul.f32 0.044715, %v8538_v4  ;;  %10603 = vst [vmem:[#allocation90_spill] sm:$0xff] %v8556_v3  ;;  %v3049_v24 = vmul.f32 %v2921_v56, %v8530_v39  ;;  %v2922_v2 = vmul.f32 0.044715, %v8545_v29  ;;  %v8573_v6 = vmul.f32 %v3034_v55, %v8475_v0 }
 0x4c0   : > { %10601 = vst [vmem:[#allocation88_spill] sm:$0xff] %v8548_v33  ;;  %10604 = vst [vmem:[#allocation91_spill] sm:$0xff] %v8562_v21  ;;  %v3045_v12 = vmul.f32 %v2917_v57, %v8527_v22  ;;  %v2925_v38 = vmul.f32 0.044715, %v8548_v33  ;;  %v8580_v8 = vadd.f32 %v2359_v43, %v8366_v19  ;;  %v8583_v62 = vmul.f32 %v3041_v7, %v8484_v16  ;;  %v6266_v16 = vld [vmem:[#allocation16 + $0x314] ss:$8 sps:$4 sm:$0xff]  }
 0x4c1   : > { %10605 = vst [vmem:[#allocation92_spill] sm:$0xff] %v8573_v6  ;;  %v3046_v57 = vmul.f32 %v2918_v44, %v8538_v4  ;;  %v2929_v56 = vmul.f32 0.044715, %v8556_v3  ;;  %v8588_v21 = vadd.f32 %v2585_v13, %v8368_v50  ;;  %v8591_v20 = vmul.f32 %v3038_v63, %v8499_v52  ;;  %v6264_v13 = vld [vmem:[#allocation16 + $0x310] ss:$8 sps:$4 sm:$0xff]   ;;  %5078 = vmatprep.subr.bf16.mxu0 %v6266_v16 }
 0x4c2   : > { %10606 = vst [vmem:[#allocation93_spill] sm:$0xff] %v8583_v62  ;;  %v2589_v58 = vpop.f32.mrb[16].mxu1  ;;  %v8594_v6 = vmul.f32 %v3042_v23, %v8502_v42  ;;  %v8603_v0 = vmul.f32 %v3045_v12, %v8527_v22  ;;  %v8606_v36 = vmul.f32 %v3049_v24, %v8530_v39  ;;  %v3050_v23 = vmul.f32 %v2922_v2, %v8545_v29 }
 0x4c3   : > { %10607 = vst [vmem:[#allocation94_spill] sm:$0xff] %v8588_v21  ;;  %v2363_v55 = vpop.f32.mrb[48].mxu0  ;;  %v8600_v7 = vadd.f32 %v2589_v58, %v8363_v18  ;;  %v2591_v62 = vpop.f32.mrb[17].mxu1  ;;  %v3053_v58 = vmul.f32 %v2925_v38, %v8548_v33  ;;  %v2926_v42 = vmul.f32 0.044715, %v8580_v8  ;;  %v3262_v12 = vadd.f32 %v8435_v26, %v8383_v10  ;;  %5079 = vmatpush1.bf16.msra.mxu0 %v6264_v13 }
 0x4c4   : > { %10608 = vst [vmem:[#allocation95_spill] sm:$0xff] %v8594_v6  ;;  %v8597_v43 = vadd.f32 %v2363_v55, %v8361_v37  ;;  %v2365_v44 = vpop.f32.mrb[49].mxu0  ;;  %10611 = vst [vmem:[#allocation98_spill] sm:$0xff] %v8603_v0  ;;  %v2593_v6 = vpop.f32.mrb[18].mxu1  ;;  %v8615_v14 = vadd.f32 %v2591_v62, %v8368_v50  ;;  %v8620_v2 = vmul.f32 %v3046_v57, %v8538_v4  ;;  %v3382_v38 = vmul.f32 0.7978846, %v8494_v40 }
 0x4c5   : > { %10610 = vst [vmem:[#allocation97_spill] sm:$0xff] %v8600_v7  ;;  %10612 = vst [vmem:[#allocation99_spill] sm:$0xff] %v8606_v36  ;;  %v8610_v63 = vadd.f32 %v2365_v44, %v8366_v19  ;;  %v2367_v55 = vpop.f32.mrb[50].mxu0  ;;  %v2595_v24 = vpop.f32.mrb[19].mxu1  ;;  %v2930_v44 = vmul.f32 0.044715, %v8588_v21  ;;  %v3057_v39 = vmul.f32 %v2929_v56, %v8556_v3  ;;  %v8633_v16 = vadd.f32 %v2593_v6, %v8363_v18 }
 0x4c6   : > { %10609 = vst [vmem:[#allocation96_spill] sm:$0xff] %v8597_v43  ;;  %10613 = vst [vmem:[#allocation100_spill] sm:$0xff] %v8615_v14  ;;  %v2369_v51 = vpop.f32.mrb[51].mxu0  ;;  %v2933_v36 = vmul.f32 0.044715, %v8597_v43  ;;  %6423 = vtanh.f32 %v3382_v38  ;;  %v8630_v26 = vadd.f32 %v2367_v55, %v8361_v37  ;;  %v8636_v57 = vmul.f32 %v3050_v23, %v8545_v29 }
 0x4c7   : > { %v2937_v62 = vmul.f32 0.044715, %v8600_v7  ;;  %v2934_v34 = vmul.f32 0.044715, %v8610_v63  ;;  %v3390_v25 = vmul.f32 0.7978846, %v3262_v12  ;;  %v8639_v40 = vmul.f32 %v3053_v58, %v8548_v33 }
 0x4c8   : > { %v2938_v10 = vmul.f32 0.044715, %v8615_v14  ;;  %10614 = vst [vmem:[#allocation101_spill] sm:$0xff] %v8630_v26  ;;  %10615 = vst [vmem:[#allocation102_spill] sm:$0xff] %v8633_v16  ;;  %v3054_v56 = vmul.f32 %v2926_v42, %v8580_v8  ;;  %v6270_v12 = vld [vmem:[#allocation16 + $0x320] ss:$8 sps:$4 sm:$0xff]   ;;  %v3058_v35 = vmul.f32 %v2930_v44, %v8588_v21  ;;  %v3061_v23 = vmul.f32 %v2933_v36, %v8597_v43 }
 0x4c9   : > { %10616 = vst [vmem:[#allocation103_spill] sm:$0xff] %v8636_v57  ;;  %10617 = vst [vmem:[#allocation104_spill] sm:$0xff] %v8639_v40  ;;  %6425 = vtanh.f32 %v3390_v25  ;;  %v6272_v13 = vld [vmem:[#allocation16 + $0x324] ss:$8 sps:$4 sm:$0xff]   ;;  %v2941_v38 = vmul.f32 0.044715, %v8630_v26  ;;  %v3065_v57 = vmul.f32 %v2937_v62, %v8600_v7  ;;  %v8650_v42 = vadd.f32 %v2369_v51, %v8366_v19 }
 0x4ca   : > { %v2945_v55 = vmul.f32 0.044715, %v8633_v16  ;;  %v3637_v6 = vadd.f32 1.0, %v8514_v28  ;;  %v3645_v58 = vadd.f32 1.0, %v8532_v59  ;;  %v2599_v25 = vpop.f32.mrb[20].mxu1  ;;  %5080 = vmatprep.subr.bf16.mxu0 %v6272_v13  ;;  %v3062_v44 = vmul.f32 %v2934_v34, %v8610_v63 }
 0x4cb   : > { %v2373_v47 = vpop.f32.mrb[52].mxu0  ;;  %10618 = vst [vmem:[#allocation105_spill] sm:$0xff] %v8650_v42  ;;  %v3066_v11 = vmul.f32 %v2938_v10, %v8615_v14  ;;  %v3069_v40 = vmul.f32 %v2941_v38, %v8630_v26  ;;  %v8656_v28 = vadd.f32 %v2595_v24, %v8368_v50  ;;  %v2601_v36 = vpop.f32.mrb[21].mxu1  ;;  %5081 = vmatpush1.bf16.msra.mxu0 %v6270_v12  ;;  %v6276_v62 = vld [vmem:[#allocation16 + $0x330] ss:$8 sps:$4 sm:$0xff]  }
 0x4cc   : > { %v2375_v29 = vpop.f32.mrb[53].mxu0  ;;  %v6278_v59 = vld [vmem:[#allocation16 + $0x334] ss:$8 sps:$4 sm:$0xff]   ;;  %v8659_v51 = vmul.f32 %v3637_v6, %v8388_v5  ;;  %v8662_v0 = vmul.f32 %v3645_v58, %v8415_v30  ;;  %v2942_v34 = vmul.f32 0.044715, %v8650_v42  ;;  %v8666_v10 = vadd.f32 %v2373_v47, %v8361_v37  ;;  %v2603_v13 = vpop.f32.mrb[22].mxu1 }
 0x4cd   : > { %10619 = vst [vmem:[#allocation106_spill] sm:$0xff] %v8656_v28  ;;  %v2377_v33 = vpop.f32.mrb[54].mxu0  ;;  %v8669_v24 = vmul.f32 %v3057_v39, %v8556_v3  ;;  %v3073_v12 = vmul.f32 %v2945_v55, %v8633_v16  ;;  %v8673_v22 = vadd.f32 %v2599_v25, %v8363_v18  ;;  %v8676_v5 = vadd.f32 %v2375_v29, %v8366_v19  ;;  %v2605_v30 = vpop.f32.mrb[23].mxu1 }
 0x4ce   : > { %v2379_v38 = vpop.f32.mrb[55].mxu0  ;;  %5082 = vmatprep.subr.bf16.mxu0 %v6278_v59  ;;  %v8679_v6 = vmul.f32 %v3054_v56, %v8580_v8  ;;  %v8682_v47 = vmul.f32 %v3058_v35, %v8588_v21  ;;  %v8685_v58 = vmul.f32 %v3061_v23, %v8597_v43  ;;  %v8690_v55 = vmul.f32 %v3065_v57, %v8600_v7 }
 0x4cf   : > { %10620 = vst [vmem:[#allocation107_spill] sm:$0xff] %v8669_v24  ;;  %10621 = vst [vmem:[#allocation108_spill] sm:$0xff] %v8673_v22  ;;  %v8693_v29 = vmul.f32 %v3062_v44, %v8610_v63  ;;  %v2946_v25 = vmul.f32 0.044715, %v8656_v28  ;;  %v8697_v56 = vadd.f32 %v2601_v36, %v8368_v50  ;;  %5083 = vmatpush1.bf16.msra.mxu0 %v6276_v62  ;;  %v2949_v57 = vmul.f32 0.044715, %v8666_v10 }
 0x4d0   : > { %10622 = vst [vmem:[#allocation109_spill] sm:$0xff] %v8682_v47  ;;  %10623 = vst [vmem:[#allocation110_spill] sm:$0xff] %v8685_v58  ;;  %v8700_v35 = vmul.f32 %v3066_v11, %v8615_v14  ;;  %v8703_v23 = vmul.f32 %v3069_v40, %v8630_v26  ;;  %v3070_v59 = vmul.f32 %v2942_v34, %v8650_v42  ;;  %v6424_v39 = vpop.eup %6423  ;;  %v2950_v36 = vmul.f32 0.044715, %v8676_v5 }
 0x4d1   : > { %10624 = vst [vmem:[#allocation111_spill] sm:$0xff] %v8690_v55  ;;  %10625 = vst [vmem:[#allocation112_spill] sm:$0xff] %v8693_v29  ;;  %v8708_v44 = vmul.f32 %v3073_v12, %v8633_v16  ;;  %v2953_v55 = vmul.f32 0.044715, %v8673_v22  ;;  %v3270_v62 = vadd.f32 %v8487_v27, %v8412_v53  ;;  %v3638_v40 = vadd.f32 1.0, %v6424_v39 }
 0x4d2   : > { %10626 = vst [vmem:[#allocation113_spill] sm:$0xff] %v8697_v56  ;;  %10627 = vst [vmem:[#allocation114_spill] sm:$0xff] %v8700_v35  ;;  %v2609_v7 = vpop.f32.mrb[24].mxu1  ;;  %v2954_v14 = vmul.f32 0.044715, %v8697_v56  ;;  %v3278_v34 = vadd.f32 %v8517_v54, %v8441_v60  ;;  %v8718_v24 = vadd.f32 %v2377_v33, %v8361_v37  ;;  %v3074_v3 = vmul.f32 %v2946_v25, %v8656_v28 }
 0x4d3   : > { %10628 = vst [vmem:[#allocation115_spill] sm:$0xff] %v8703_v23  ;;  %10629 = vst [vmem:[#allocation116_spill] sm:$0xff] %v8708_v44  ;;  %v2383_v11 = vpop.f32.mrb[56].mxu0  ;;  %v6426_v35 = vpop.eup %6425  ;;  %v8724_v27 = vmul.f32 0.5, %v8412_v53  ;;  %v3398_v47 = vmul.f32 0.7978846, %v3270_v62  ;;  %v8731_v23 = vmul.f32 %v3070_v59, %v8650_v42  ;;  %v3077_v54 = vmul.f32 %v2949_v57, %v8666_v10 }
 0x4d4   : > { %10630 = vst [vmem:[#allocation117_spill] sm:$0xff] %v8718_v24  ;;  %v2385_v12 = vpop.f32.mrb[57].mxu0  ;;  %v8720_v44 = vpop.f32.mrb[25].mxu1  ;;  %v3646_v16 = vadd.f32 1.0, %v6426_v35  ;;  %v3406_v33 = vmul.f32 0.7978846, %v3278_v34  ;;  %v8735_v26 = vadd.f32 %v2603_v13, %v8363_v18  ;;  %v3766_v62 = vmul.f32 %v3638_v40, %v8470_v61 }
 0x4d5   : > { %v8726_v21 = vpop.f32.mrb[58].mxu0  ;;  %v8728_v39 = vpop.f32.mrb[26].mxu1  ;;  %10631 = vst [vmem:[#allocation118_spill] sm:$0xff] %v8731_v23  ;;  %v6282_v53 = vld [vmem:[#allocation16 + $0x340] ss:$8 sps:$4 sm:$0xff]   ;;  %v3081_v43 = vmul.f32 %v2953_v55, %v8673_v22  ;;  %6427 = vtanh.f32 %v3398_v47  ;;  %v8745_v23 = vmul.f32 0.5, %v8441_v60  ;;  %v3269_v29 = vadd.f32 %v8451_v41, %v8397_v15 }
 0x4d6   : > { %10632 = vst [vmem:[#allocation119_spill] sm:$0xff] %v8735_v26  ;;  %v8737_v35 = vpop.f32.mrb[59].mxu0  ;;  %v8739_v25 = vpop.f32.mrb[27].mxu1  ;;  %v3774_v58 = vmul.f32 %v3646_v16, %v8491_v17  ;;  %v6284_v59 = vld [vmem:[#allocation16 + $0x344] ss:$8 sps:$4 sm:$0xff]   ;;  %6429 = vtanh.f32 %v3406_v33  ;;  %v3277_v61 = vadd.f32 %v8508_v48, %v8424_v31  ;;  %v8754_v17 = vadd.f32 %v2379_v38, %v8366_v19 }
 0x4d7   : > { %v2957_v13 = vmul.f32 0.044715, %v8718_v24  ;;  %v2961_v57 = vmul.f32 0.044715, %v8735_v26  ;;  %v6207_v42 = vld [vmem:[#allocation16 + $0x100] ss:$8 sps:$4 sm:$0xff]   ;;  %5084 = vmatprep.subr.bf16.mxu0 %v6284_v59  ;;  %v3078_v47 = vmul.f32 %v2950_v36, %v8676_v5  ;;  %v3082_v55 = vmul.f32 %v2954_v14, %v8697_v56 }
 0x4d8   : > { %v3894_v34 = vpack.c.bf16 %v3774_v58, %v3766_v62  ;;  %v6290_v16 = vld [vmem:[#allocation16 + $0x354] ss:$8 sps:$4 sm:$0xff]   ;;  %v8759_v40 = vadd.f32 %v2605_v30, %v8368_v50  ;;  %v8762_v58 = vadd.f32 %v2383_v11, %v8361_v37  ;;  %5085 = vmatpush1.bf16.msra.mxu0 %v6282_v53  ;;  %v6288_v41 = vld [vmem:[#allocation16 + $0x350] ss:$8 sps:$4 sm:$0xff]   ;;  %v3397_v48 = vmul.f32 0.7978846, %v3269_v29 }
 0x4d9   : > { %v6212_v60 = vld [vmem:[#allocation16 + $0x114] ss:$8 sps:$4 sm:$0xff]   ;;  %v3405_v33 = vmul.f32 0.7978846, %v3277_v61  ;;  %v2958_v38 = vmul.f32 0.044715, %v8754_v17  ;;  %v8766_v62 = vadd.f32 %v2609_v7, %v8363_v18  ;;  %5086 = vmatprep.subr.bf16.mxu0 %v6290_v16  ;;  %v10635_v14 = vpack.c.bf16 %v8662_v0, %v8659_v51 }
 0x4da   : > { %10633 = vst [vmem:[#allocation120_spill] sm:$0xff] %v8759_v40  ;;  %4769 = vmatprep.mubr.bf16.mxu1 %v3894_v34  ;;  %v8772_v30 = vmul.f32 %v3074_v3, %v8656_v28  ;;  %v3085_v36 = vmul.f32 %v2957_v13, %v8718_v24  ;;  %v2962_v11 = vmul.f32 0.044715, %v8759_v40  ;;  %v2965_v29 = vmul.f32 0.044715, %v8762_v58  ;;  %v8779_v59 = vpop.f32.mrb[28].mxu1 }
 0x4db   : > { %10634 = vst [vmem:[#allocation121_spill] sm:$0xff] %v8766_v62  ;;  %4770 = vmatmul.mubr.bf16.vlgmr.msra.gmra.mrb[32].mxu1 %v10635_v14  ;;  %v8777_v53 = vpop.f32.mrb[60].mxu0  ;;  %v6210_v7 = vld [vmem:[#allocation16 + $0x110] ss:$8 sps:$4 sm:$0xff]   ;;  %v8782_v34 = vmul.f32 %v3077_v54, %v8666_v10  ;;  %v3089_v0 = vmul.f32 %v2961_v57, %v8735_v26  ;;  %6431 = vtanh.f32 %v3397_v48  ;;  %v8786_v3 = vadd.f32 %v2385_v12, %v8366_v19  ;;  %v8790_v13 = vpop.f32.mrb[29].mxu1 }
 0x4dc   : > { %10636 = vst [vmem:[#allocation122_spill] sm:$0xff] %v8772_v30  ;;  %4851 = vmatpush1.bf16.msra.mxu1 %v6207_v42  ;;  %v8788_v51 = vpop.f32.mrb[61].mxu0  ;;  %v6215_v61 = vld [vmem:[#allocation16 + $0x124] ss:$8 sps:$4 sm:$0xff]   ;;  %v8793_v16 = vmul.f32 0.5, %v8397_v15  ;;  %v8796_v42 = vmul.f32 0.5, %v8424_v31  ;;  %6433 = vtanh.f32 %v3405_v33  ;;  %v3086_v54 = vmul.f32 %v2958_v38, %v8754_v17  ;;  %5087 = vmatpush1.bf16.msra.mxu0 %v6288_v41 }
 0x4dd   : > { %10637 = vst [vmem:[#allocation123_spill] sm:$0xff] %v8782_v34  ;;  %4852 = vmatprep.subr.bf16.mxu1 %v6212_v60  ;;  %v8799_v57 = vpop.f32.mrb[62].mxu0  ;;  %v8801_v48 = vpop.f32.mrb[30].mxu1  ;;  %v8804_v12 = vmul.f32 %v3081_v43, %v8673_v22  ;;  %v8807_v60 = vmul.f32 %v3078_v47, %v8676_v5  ;;  %v8810_v15 = vmul.f32 %v3082_v55, %v8697_v56  ;;  %v2969_v31 = vmul.f32 0.044715, %v8766_v62 }
 0x4de   : > { %v8813_v14 = vpop.f32.mrb[63].mxu0  ;;  %v8815_v33 = vpop.f32.mrb[31].mxu1  ;;  %v6294_v38 = vld [vmem:[#allocation16 + $0x360] ss:$8 sps:$4 sm:$0xff]   ;;  %v8818_v30 = vmul.f32 %v3085_v36, %v8718_v24  ;;  %v3090_v41 = vmul.f32 %v2962_v11, %v8759_v40  ;;  %v3093_v43 = vmul.f32 %v2965_v29, %v8762_v58  ;;  %v8824_v47 = vadd.f32 %v8720_v44, %v8368_v50  ;;  %v6296_v55 = vld [vmem:[#allocation16 + $0x364] ss:$8 sps:$4 sm:$0xff]  }
 0x4df   : > { %10638 = vst [vmem:[#allocation124_spill] sm:$0xff] %v8804_v12  ;;  %10639 = vst [vmem:[#allocation125_spill] sm:$0xff] %v8810_v15  ;;  %v6428_v12 = vpop.eup %6427  ;;  %v6213_v22 = vld [vmem:[#allocation16 + $0x120] ss:$8 sps:$4 sm:$0xff]   ;;  %v8827_v15 = vmul.f32 %v3089_v0, %v8735_v26  ;;  %v2966_v56 = vmul.f32 0.044715, %v8786_v3  ;;  %v3286_v36 = vadd.f32 %v8567_v32, %v8467_v46  ;;  %v3294_v11 = vadd.f32 %v8591_v20, %v8499_v52 }
 0x4e0   : > { %10640 = vst [vmem:[#allocation126_spill] sm:$0xff] %v8818_v30  ;;  %10641 = vst [vmem:[#allocation127_spill] sm:$0xff] %v8824_v47  ;;  %4853 = vmatpush1.bf16.msra.mxu1 %v6210_v7  ;;  %v6302_v29 = vld [vmem:[#allocation16 + $0x374] ss:$8 sps:$4 sm:$0xff]   ;;  %v6430_v28 = vpop.eup %6429  ;;  %v3654_v30 = vadd.f32 1.0, %v6428_v12  ;;  %v8835_v44 = vmul.f32 %v3086_v54, %v8754_v17  ;;  %v8839_v0 = vadd.f32 %v8726_v21, %v8361_v37  ;;  %5088 = vmatprep.subr.bf16.mxu0 %v6296_v55 }
 0x4e1   : > { %10642 = vst [vmem:[#allocation128_spill] sm:$0xff] %v8827_v15  ;;  %4854 = vmatprep.subr.bf16.mxu1 %v6215_v61  ;;  %v6218_v7 = vld [vmem:[#allocation16 + $0x134] ss:$8 sps:$4 sm:$0xff]   ;;  %v8843_v15 = vadd.f32 %v8728_v39, %v8363_v18  ;;  %v6300_v32 = vld [vmem:[#allocation16 + $0x370] ss:$8 sps:$4 sm:$0xff]   ;;  %v3662_v26 = vadd.f32 1.0, %v6430_v28  ;;  %v3097_v20 = vmul.f32 %v2969_v31, %v8766_v62  ;;  %5089 = vmatpush1.bf16.msra.mxu0 %v6294_v38 }
 0x4e2   : > { %v3414_v24 = vmul.f32 0.7978846, %v3286_v36  ;;  %v3422_v12 = vmul.f32 0.7978846, %v3294_v11  ;;  %v8849_v54 = vmul.f32 %v3090_v41, %v8759_v40  ;;  %v8852_v21 = vmul.f32 %v3093_v43, %v8762_v58  ;;  %5090 = vmatprep.subr.bf16.mxu0 %v6302_v29  ;;  %v6216_v38 = vld [vmem:[#allocation16 + $0x130] ss:$8 sps:$4 sm:$0xff]  }
 0x4e3   : > { %10643 = vst [vmem:[#allocation129_spill] sm:$0xff] %v8843_v15  ;;  %v8846_v61 = vpop.f32.mrb[64].mxu0  ;;  %v2970_v34 = vmul.f32 0.044715, %v8824_v47  ;;  %v8856_v39 = vmul.f32 0.5, %v8467_v46  ;;  %v3782_v28 = vmul.f32 %v3654_v30, %v8724_v27  ;;  %v3790_v31 = vmul.f32 %v3662_v26, %v8745_v23 }
 0x4e4   : > { %10644 = vst [vmem:[#allocation130_spill] sm:$0xff] %v8849_v54  ;;  %v8858_v55 = vpop.f32.mrb[65].mxu0  ;;  %4855 = vmatpush1.bf16.msra.mxu1 %v6213_v22  ;;  %6435 = vtanh.f32 %v3414_v24  ;;  %v6221_v41 = vld [vmem:[#allocation16 + $0x144] ss:$8 sps:$4 sm:$0xff]   ;;  %v3285_v43 = vadd.f32 %v8559_v49, %v8459_v1  ;;  %v2973_v46 = vmul.f32 0.044715, %v8839_v0  ;;  %v3293_v27 = vadd.f32 %v8576_v9, %v8478_v45 }
 0x4e5   : > { %v8864_v36 = vpop.f32.mrb[66].mxu0  ;;  %4856 = vmatprep.subr.bf16.mxu1 %v6218_v7  ;;  %6437 = vtanh.f32 %v3422_v12  ;;  %v2977_v11 = vmul.f32 0.044715, %v8843_v15  ;;  %v6432_v22 = vpop.eup %6431  ;;  %v3902_v26 = vpack.c.bf16 %v3790_v31, %v3782_v28  ;;  %v8874_v23 = vadd.f32 %v8737_v35, %v8366_v19  ;;  %5091 = vmatpush1.bf16.msra.mxu0 %v6300_v32  ;;  %v6219_v54 = vld [vmem:[#allocation16 + $0x140] ss:$8 sps:$4 sm:$0xff]  }
 0x4e6   : > { %v8870_v30 = vpop.f32.mrb[67].mxu0  ;;  %v3413_v24 = vmul.f32 0.7978846, %v3285_v43  ;;  %v8878_v49 = vadd.f32 %v8739_v25, %v8368_v50  ;;  %v6434_v29 = vpop.eup %6433  ;;  %v3653_v7 = vadd.f32 1.0, %v6432_v22  ;;  %v3094_v12 = vmul.f32 %v2966_v56, %v8786_v3  ;;  %v6224_v43 = vld [vmem:[#allocation16 + $0x154] ss:$8 sps:$4 sm:$0xff]  }
 0x4e7   : > { %v3098_v9 = vmul.f32 %v2970_v34, %v8824_v47  ;;  %v3421_v40 = vmul.f32 0.7978846, %v3293_v27  ;;  %4779 = vmatprep.mubr.bf16.mxu1 %v3902_v26  ;;  %v3661_v28 = vadd.f32 1.0, %v6434_v29  ;;  %v2974_v35 = vmul.f32 0.044715, %v8874_v23 }
 0x4e8   : > { %10645 = vst [vmem:[#allocation131_spill] sm:$0xff] %v8878_v49  ;;  %4857 = vmatpush1.bf16.msra.mxu1 %v6216_v38  ;;  %6439 = vtanh.f32 %v3413_v24  ;;  %v2978_v31 = vmul.f32 0.044715, %v8878_v49  ;;  %v2782_v25 = vmul.f32 0.5, %v8499_v52  ;;  %v3101_v32 = vmul.f32 %v2973_v46, %v8839_v0  ;;  %v6227_v46 = vld [vmem:[#allocation16 + $0x164] ss:$8 sps:$4 sm:$0xff]  }
 0x4e9   : > { %4858 = vmatprep.subr.bf16.mxu1 %v6221_v41  ;;  %6441 = vtanh.f32 %v3421_v40  ;;  %v8888_v56 = vadd.f32 %v8777_v53, %v8361_v37  ;;  %v3781_v34 = vmul.f32 %v3653_v7, %v8793_v16  ;;  %v3789_v38 = vmul.f32 %v3661_v28, %v8796_v42  ;;  %v6222_v42 = vld [vmem:[#allocation16 + $0x150] ss:$8 sps:$4 sm:$0xff]   ;;  %v6306_v7 = vld [vmem:[#allocation16 + $0x380] ss:$8 sps:$4 sm:$0xff]  }
 0x4ea   : > { %v3105_v27 = vmul.f32 %v2977_v11, %v8843_v15  ;;  %v8895_v22 = vadd.f32 %v8779_v59, %v8363_v18  ;;  %v8900_v41 = vmul.f32 %v3097_v20, %v8766_v62  ;;  %v8903_v40 = vmul.f32 %v3094_v12, %v8786_v3 }
 0x4eb   : > { %v8897_v52 = vpop.f32.mrb[68].mxu0  ;;  %v8906_v53 = vmul.f32 %v3098_v9, %v8824_v47  ;;  %v3102_v16 = vmul.f32 %v2974_v35, %v8874_v23  ;;  %v3901_v26 = vpack.c.bf16 %v3789_v38, %v3781_v34  ;;  %v8912_v59 = vmul.f32 0.5, %v8459_v1  ;;  %v6225_v34 = vld [vmem:[#allocation16 + $0x160] ss:$8 sps:$4 sm:$0xff]  }
 0x4ec   : > { %10646 = vst [vmem:[#allocation132_spill] sm:$0xff] %v8895_v22  ;;  %10647 = vst [vmem:[#allocation133_spill] sm:$0xff] %v8900_v41  ;;  %v8909_v11 = vpop.f32.mrb[69].mxu0  ;;  %v8915_v24 = vmul.f32 0.5, %v8478_v45  ;;  %4859 = vmatpush1.bf16.msra.mxu1 %v6219_v54  ;;  %v3106_v20 = vmul.f32 %v2978_v31, %v8878_v49  ;;  %v8921_v12 = vmul.f32 %v3101_v32, %v8839_v0  ;;  %v2981_v9 = vmul.f32 0.044715, %v8888_v56 }
 0x4ed   : > { %10648 = vst [vmem:[#allocation134_spill] sm:$0xff] %v8906_v53  ;;  %v8918_v29 = vpop.f32.mrb[70].mxu0  ;;  %4860 = vmatprep.subr.bf16.mxu1 %v6224_v43  ;;  %v8926_v28 = vadd.f32 %v8788_v51, %v8366_v19  ;;  %v8930_v1 = vadd.f32 %v8790_v13, %v8368_v50  ;;  %v6308_v54 = vld [vmem:[#allocation16 + $0x384] ss:$8 sps:$4 sm:$0xff]   ;;  %4780 = vmatmul.mubr.bf16.gmra.mrb[36].mxu1 %v3901_v26  ;;  %v2985_v32 = vmul.f32 0.044715, %v8895_v22 }
 0x4ee   : > { %v8932_v45 = vpop.f32.mrb[71].mxu0  ;;  %v6436_v35 = vpop.eup %6435  ;;  %v8935_v31 = vmul.f32 %v3105_v27, %v8843_v15  ;;  %v3302_v43 = vadd.f32 %v8620_v2, %v8538_v4  ;;  %v3310_v51 = vadd.f32 %v8679_v6, %v8580_v8  ;;  %v8943_v41 = vmul.f32 %v3102_v16, %v8874_v23  ;;  %5092 = vmatprep.subr.bf16.mxu0 %v6308_v54  ;;  %v6312_v26 = vld [vmem:[#allocation16 + $0x390] ss:$8 sps:$4 sm:$0xff]  }
 0x4ef   : > { %10649 = vst [vmem:[#allocation135_spill] sm:$0xff] %v8930_v1  ;;  %v6438_v38 = vpop.eup %6437  ;;  %v3670_v13 = vadd.f32 1.0, %v6436_v35  ;;  %v8946_v62 = vmul.f32 0.5, %v8538_v4  ;;  %v8950_v27 = vadd.f32 %v8799_v57, %v8361_v37  ;;  %v8953_v15 = vmul.f32 %v3106_v20, %v8878_v49  ;;  %5093 = vmatpush1.bf16.msra.mxu0 %v6306_v7  ;;  %v6230_v57 = vld [vmem:[#allocation16 + $0x174] ss:$8 sps:$4 sm:$0xff]   ;;  %v10655_v49 = vld [vmem:[#allocation98_spill] sm:$0xff] }
 0x4f0   : > { %10650 = vst [vmem:[#allocation136_spill] sm:$0xff] %v8935_v31  ;;  %v6314_v31 = vld [vmem:[#allocation16 + $0x394] ss:$8 sps:$4 sm:$0xff]   ;;  %v3678_v2 = vadd.f32 1.0, %v6438_v38  ;;  %4861 = vmatpush1.bf16.msra.mxu1 %v6222_v42  ;;  %v3430_v6 = vmul.f32 0.7978846, %v3302_v43  ;;  %v3109_v16 = vmul.f32 %v2981_v9, %v8888_v56  ;;  %v8960_v37 = vadd.f32 %v8801_v48, %v8363_v18 }
 0x4f1   : > { %10651 = vst [vmem:[#allocation137_spill] sm:$0xff] %v8950_v27  ;;  %10652 = vst [vmem:[#allocation138_spill] sm:$0xff] %v8953_v15  ;;  %v3438_v35 = vmul.f32 0.7978846, %v3310_v51  ;;  %v2982_v4 = vmul.f32 0.044715, %v8926_v28  ;;  %4862 = vmatprep.subr.bf16.mxu1 %v6227_v46  ;;  %5094 = vmatprep.subr.bf16.mxu0 %v6314_v31  ;;  %v3798_v20 = vmul.f32 %v3670_v13, %v8856_v39 }
 0x4f2   : > { %v2986_v53 = vmul.f32 0.044715, %v8930_v1  ;;  %10653 = vst [vmem:[#allocation139_spill] sm:$0xff] %v8960_v37  ;;  %v6440_v54 = vpop.eup %6439  ;;  %v3806_v42 = vmul.f32 %v3678_v2, %v2782_v25  ;;  %v3113_v43 = vmul.f32 %v2985_v32, %v8895_v22  ;;  %6443 = vtanh.f32 %v3430_v6  ;;  %v10654_v15 = vld [vmem:[#allocation84_spill] sm:$0xff] }
 0x4f3   : > { %v8964_v7 = vpop.f32.mrb[72].mxu0  ;;  %v6442_v9 = vpop.eup %6441  ;;  %v3669_v51 = vadd.f32 1.0, %v6440_v54  ;;  %6445 = vtanh.f32 %v3438_v35  ;;  %v2989_v46 = vmul.f32 0.044715, %v8950_v27  ;;  %v2993_v38 = vmul.f32 0.044715, %v8960_v37  ;;  %5095 = vmatpush1.bf16.msra.mxu0 %v6312_v26 }
 0x4f4   : > { %v8968_v18 = vpop.f32.mrb[73].mxu0  ;;  %v3910_v48 = vpack.c.bf16 %v3806_v42, %v3798_v20  ;;  %v3677_v31 = vadd.f32 1.0, %v6442_v9  ;;  %v3301_v39 = vadd.f32 %v10655_v49, %v10654_v15  ;;  %v10656_v25 = vld [vmem:[#allocation88_spill] sm:$0xff]  ;;  %4863 = vmatpush1.bf16.msra.mxu1 %v6225_v34  ;;  %v3110_v35 = vmul.f32 %v2982_v4, %v8926_v28  ;;  %v6233_v49 = vld [vmem:[#allocation16 + $0x184] ss:$8 sps:$4 sm:$0xff]  }
 0x4f5   : > { %v10657_v13 = vld [vmem:[#allocation104_spill] sm:$0xff]  ;;  %v8974_v6 = vpop.f32.mrb[74].mxu0  ;;  %v3114_v54 = vmul.f32 %v2986_v53, %v8930_v1  ;;  %v8979_v47 = vmul.f32 0.5, %v8580_v8  ;;  %v8983_v20 = vadd.f32 %v8813_v14, %v8366_v19  ;;  %4864 = vmatprep.subr.bf16.mxu1 %v6230_v57  ;;  %v3797_v34 = vmul.f32 %v3669_v51, %v8912_v59 }
 0x4f6   : > { %v3309_v32 = vadd.f32 %v10657_v13, %v10656_v25  ;;  %v6228_v2 = vld [vmem:[#allocation16 + $0x170] ss:$8 sps:$4 sm:$0xff]   ;;  %v8985_v42 = vpop.f32.mrb[75].mxu0  ;;  %4789 = vmatprep.mubr.bf16.mxu1 %v3910_v48  ;;  %v3805_v26 = vmul.f32 %v3677_v31, %v8915_v24  ;;  %v3429_v9 = vmul.f32 0.7978846, %v3301_v39  ;;  %v8990_v53 = vmul.f32 %v3109_v16, %v8888_v56 }
 0x4f7   : > { %10658 = vst [vmem:[#allocation84_spill] sm:$0xff] %v8985_v42  ;;  %v6318_v13 = vld [vmem:[#allocation16 + $0x3a0] ss:$8 sps:$4 sm:$0xff]   ;;  %v8993_v8 = vmul.f32 %v3113_v43, %v8895_v22  ;;  %v3117_v19 = vmul.f32 %v2989_v46, %v8950_v27  ;;  %v6320_v48 = vld [vmem:[#allocation16 + $0x3a4] ss:$8 sps:$4 sm:$0xff]   ;;  %v3121_v59 = vmul.f32 %v2993_v38, %v8960_v37  ;;  %v9003_v24 = vadd.f32 %v8815_v33, %v8368_v50 }
 0x4f8   : > { %v3437_v4 = vmul.f32 0.7978846, %v3309_v32  ;;  %10659 = vst [vmem:[#allocation98_spill] sm:$0xff] %v8990_v53  ;;  %v10661_v14 = vld [vmem:[#allocation68_spill] sm:$0xff]  ;;  %v3909_v42 = vpack.c.bf16 %v3805_v26, %v3797_v34  ;;  %6447 = vtanh.f32 %v3429_v9  ;;  %4865 = vmatpush1.bf16.msra.mxu1 %v6228_v2  ;;  %v9006_v43 = vmul.f32 0.5, %v10654_v15  ;;  %5096 = vmatprep.subr.bf16.mxu0 %v6320_v48  ;;  %v10666_v34 = vld [vmem:[#allocation105_spill] sm:$0xff] }
 0x4f9   : > { %10660 = vst [vmem:[#allocation88_spill] sm:$0xff] %v8993_v8  ;;  %v8998_v57 = vadd.f32 %v8846_v61, %v10661_v14  ;;  %10662 = vst [vmem:[#allocation104_spill] sm:$0xff] %v9003_v24  ;;  %v6231_v16 = vld [vmem:[#allocation16 + $0x180] ss:$8 sps:$4 sm:$0xff]   ;;  %v6236_v51 = vld [vmem:[#allocation16 + $0x194] ss:$8 sps:$4 sm:$0xff]   ;;  %4866 = vmatprep.subr.bf16.mxu1 %v6233_v49  ;;  %v9011_v38 = vmul.f32 %v3110_v35, %v8926_v28  ;;  %v9014_v50 = vmul.f32 %v3114_v54, %v8930_v1 }
 0x4fa   : > { %6449 = vtanh.f32 %v3437_v4  ;;  %v2990_v46 = vmul.f32 0.044715, %v8983_v20  ;;  %4790 = vmatmul.mubr.bf16.gmra.mrb[40].mxu1 %v3909_v42  ;;  %v9017_v33 = vmul.f32 0.5, %v10656_v25  ;;  %v10664_v15 = vld [vmem:[#allocation112_spill] sm:$0xff]  ;;  %5097 = vmatpush1.bf16.msra.mxu0 %v6318_v13  ;;  %v10665_v42 = vld [vmem:[#allocation70_spill] sm:$0xff]  ;;  %v9032_v25 = vadd.f32 %v8864_v36, %v10661_v14 }
 0x4fb   : > { %v2871_v61 = vmul.f32 0.044715, %v8998_v57  ;;  %10663 = vst [vmem:[#allocation68_spill] sm:$0xff] %v9014_v50  ;;  %v3318_v31 = vadd.f32 %v10664_v15, %v8610_v63  ;;  %v9021_v39 = vpop.f32.mrb[76].mxu0  ;;  %v6324_v32 = vld [vmem:[#allocation16 + $0x3b0] ss:$8 sps:$4 sm:$0xff]   ;;  %v9026_v35 = vadd.f32 %v8858_v55, %v10665_v42  ;;  %v9037_v15 = vmul.f32 %v3117_v19, %v8950_v27 }
 0x4fc   : > { %v6326_v2 = vld [vmem:[#allocation16 + $0x3b4] ss:$8 sps:$4 sm:$0xff]   ;;  %v10667_v54 = vld [vmem:[#allocation118_spill] sm:$0xff]  ;;  %v9034_v48 = vpop.f32.mrb[77].mxu0  ;;  %v6444_v13 = vpop.eup %6443  ;;  %v2994_v55 = vmul.f32 0.044715, %v9003_v24  ;;  %4867 = vmatpush1.bf16.msra.mxu1 %v6231_v16 }
 0x4fd   : > { %v2999_v49 = vmul.f32 %v2871_v61, %v8998_v57  ;;  %v3326_v26 = vadd.f32 %v10667_v54, %v10666_v34  ;;  %v6234_v9 = vld [vmem:[#allocation16 + $0x190] ss:$8 sps:$4 sm:$0xff]   ;;  %v6239_v4 = vld [vmem:[#allocation16 + $0x1a4] ss:$8 sps:$4 sm:$0xff]   ;;  %10668 = vst [vmem:[#allocation112_spill] sm:$0xff] %v9037_v15  ;;  %v9040_v61 = vmul.f32 %v3121_v59, %v8960_v37  ;;  %v9043_v54 = vpop.f32.mrb[78].mxu0  ;;  %5098 = vmatprep.subr.bf16.mxu0 %v6326_v2  ;;  %v6446_v36 = vpop.eup %6445 }
 0x4fe   : > { %v3446_v8 = vmul.f32 0.7978846, %v3318_v31  ;;  %v3686_v22 = vadd.f32 1.0, %v6444_v13  ;;  %v9047_v1 = vmul.f32 0.5, %v8610_v63  ;;  %4868 = vmatprep.subr.bf16.mxu1 %v6236_v51  ;;  %v9049_v19 = vpop.f32.mrb[79].mxu0  ;;  %v3694_v59 = vadd.f32 1.0, %v6446_v36  ;;  %5099 = vmatpush1.bf16.msra.mxu0 %v6324_v32 }
 0x4ff   : > { %10669 = vst [vmem:[#allocation70_spill] sm:$0xff] %v9040_v61  ;;  %v3127_v50 = vmul.f32 %v2999_v49, %v8998_v57  ;;  %v3454_v53 = vmul.f32 0.7978846, %v3326_v26  ;;  %10670 = vst [vmem:[#allocation105_spill] sm:$0xff] %v9049_v19  ;;  %v3118_v61 = vmul.f32 %v2990_v46, %v8983_v20  ;;  %v2879_v16 = vmul.f32 0.044715, %v9032_v25 }
 0x500   : > { %6451 = vtanh.f32 %v3446_v8  ;;  %v3814_v31 = vmul.f32 %v3686_v22, %v8946_v62  ;;  %v2872_v49 = vmul.f32 0.044715, %v9026_v35  ;;  %v3822_v63 = vmul.f32 %v3694_v59, %v8979_v47  ;;  %v10671_v26 = vld [vmem:[#allocation96_spill] sm:$0xff]  ;;  %v10672_v13 = vld [vmem:[#allocation110_spill] sm:$0xff]  ;;  %v10673_v37 = vld [vmem:[#allocation101_spill] sm:$0xff]  ;;  %4869 = vmatpush1.bf16.msra.mxu1 %v6234_v9 }
 0x501   : > { %v3255_v2 = vadd.f32 %v3127_v50, %v8998_v57  ;;  %6453 = vtanh.f32 %v3454_v53  ;;  %v3007_v51 = vmul.f32 %v2879_v16, %v9032_v25  ;;  %v3317_v36 = vadd.f32 %v10672_v13, %v10671_v26  ;;  %v10674_v46 = vld [vmem:[#allocation115_spill] sm:$0xff]  ;;  %v6237_v19 = vld [vmem:[#allocation16 + $0x1a0] ss:$8 sps:$4 sm:$0xff]   ;;  %v6332_v15 = vld [vmem:[#allocation16 + $0x3c4] ss:$8 sps:$4 sm:$0xff]   ;;  %4870 = vmatprep.subr.bf16.mxu1 %v6239_v4 }
 0x502   : > { %v3325_v8 = vadd.f32 %v10674_v46, %v10673_v37  ;;  %v6330_v32 = vld [vmem:[#allocation16 + $0x3c0] ss:$8 sps:$4 sm:$0xff]   ;;  %v3122_v62 = vmul.f32 %v2994_v55, %v9003_v24  ;;  %v9064_v22 = vmul.f32 0.5, %v8998_v57  ;;  %v9067_v53 = vmul.f32 0.5, %v10666_v34  ;;  %v6242_v50 = vld [vmem:[#allocation16 + $0x1b4] ss:$8 sps:$4 sm:$0xff]   ;;  %v6448_v59 = vpop.eup %6447  ;;  %5100 = vmatprep.subr.bf16.mxu0 %v6332_v15 }
 0x503   : > { %v9071_v47 = vadd.f32 %v8870_v30, %v10665_v42  ;;  %v3918_v16 = vpack.c.bf16 %v3822_v63, %v3814_v31  ;;  %v3445_v9 = vmul.f32 0.7978846, %v3317_v36  ;;  %v9075_v46 = vadd.f32 %v8897_v52, %v10661_v14  ;;  %v9077_v55 = vpop.f32.mrb[80].mxu0  ;;  %v6240_v27 = vld [vmem:[#allocation16 + $0x1b0] ss:$8 sps:$4 sm:$0xff]   ;;  %5101 = vmatpush1.bf16.msra.mxu0 %v6330_v32 }
 0x504   : > { %10675 = vst [vmem:[#allocation118_spill] sm:$0xff] %v9064_v22  ;;  %v3453_v13 = vmul.f32 0.7978846, %v3325_v8  ;;  %v6450_v57 = vpop.eup %6449  ;;  %v3685_v34 = vadd.f32 1.0, %v6448_v59  ;;  %v9080_v22 = vmul.f32 %v3118_v61, %v8983_v20  ;;  %v3000_v30 = vmul.f32 %v2872_v49, %v9026_v35  ;;  %v9084_v31 = vpop.f32.mrb[81].mxu0  ;;  %4871 = vmatpush1.bf16.msra.mxu1 %v6237_v19 }
 0x505   : > { %v3135_v4 = vmul.f32 %v3007_v51, %v9032_v25  ;;  %v6336_v63 = vld [vmem:[#allocation16 + $0x3d0] ss:$8 sps:$4 sm:$0xff]   ;;  %4799 = vmatprep.mubr.bf16.mxu1 %v3918_v16  ;;  %v3693_v52 = vadd.f32 1.0, %v6450_v57  ;;  %v3383_v36 = vmul.f32 0.7978846, %v3255_v2  ;;  %6455 = vtanh.f32 %v3445_v9  ;;  %v9090_v61 = vpop.f32.mrb[82].mxu0  ;;  %4872 = vmatprep.subr.bf16.mxu1 %v6242_v50 }
 0x506   : > { %v9088_v15 = vadd.f32 %v8909_v11, %v10665_v42  ;;  %v6338_v8 = vld [vmem:[#allocation16 + $0x3d4] ss:$8 sps:$4 sm:$0xff]   ;;  %v9093_v49 = vmul.f32 %v3122_v62, %v9003_v24  ;;  %v9096_v51 = vmul.f32 0.5, %v10671_v26  ;;  %6457 = vtanh.f32 %v3453_v13  ;;  %v6245_v2 = vld [vmem:[#allocation16 + $0x1c4] ss:$8 sps:$4 sm:$0xff]   ;;  %v9099_v59 = vpop.f32.mrb[83].mxu0 }
 0x507   : > { %v2880_v32 = vmul.f32 0.044715, %v9071_v47  ;;  %10677 = vst [vmem:[#allocation110_spill] sm:$0xff] %v9099_v59  ;;  %v3813_v11 = vmul.f32 %v3685_v34, %v9006_v43  ;;  %v3821_v19 = vmul.f32 %v3693_v52, %v9017_v33  ;;  %v9104_v16 = vmul.f32 0.5, %v9032_v25  ;;  %5102 = vmatprep.subr.bf16.mxu0 %v6338_v8  ;;  %v10681_v24 = vld [vmem:[#allocation126_spill] sm:$0xff] }
 0x508   : > { %10676 = vst [vmem:[#allocation96_spill] sm:$0xff] %v9093_v49  ;;  %v2887_v62 = vmul.f32 0.044715, %v9075_v46  ;;  %v9108_v26 = vmul.f32 %v3000_v30, %v9026_v35  ;;  %v3263_v9 = vadd.f32 %v3135_v4, %v9032_v25  ;;  %v9112_v50 = vmul.f32 0.5, %v10673_v37  ;;  %5103 = vmatpush1.bf16.msra.mxu0 %v6336_v63  ;;  %4873 = vmatpush1.bf16.msra.mxu1 %v6240_v27  ;;  %v6243_v30 = vld [vmem:[#allocation16 + $0x1c0] ss:$8 sps:$4 sm:$0xff]  }
 0x509   : > { %v3334_v13 = vadd.f32 %v8807_v60, %v8676_v5  ;;  %v3917_v33 = vpack.c.bf16 %v3821_v19, %v3813_v11  ;;  %6459 = vtanh.f32 %v3383_v36  ;;  %v2888_v57 = vmul.f32 0.044715, %v9088_v15  ;;  %4874 = vmatprep.subr.bf16.mxu1 %v6245_v2  ;;  %v6248_v60 = vld [vmem:[#allocation16 + $0x1d4] ss:$8 sps:$4 sm:$0xff]   ;;  %v6246_v19 = vld [vmem:[#allocation16 + $0x1d0] ss:$8 sps:$4 sm:$0xff]  }
 0x50a   : > { %v6452_v43 = vpop.eup %6451  ;;  %v3342_v34 = vadd.f32 %v8835_v44, %v8754_v17  ;;  %v3008_v25 = vmul.f32 %v2880_v32, %v9071_v47  ;;  %v9122_v4 = vadd.f32 %v8918_v29, %v10661_v14  ;;  %v3015_v36 = vmul.f32 %v2887_v62, %v9075_v46  ;;  %v10678_v44 = vld [vmem:[#allocation123_spill] sm:$0xff]  ;;  %v10680_v29 = vld [vmem:[#allocation117_spill] sm:$0xff] }
 0x50b   : > { %v6454_v52 = vpop.eup %6453  ;;  %v3702_v8 = vadd.f32 1.0, %v6452_v43  ;;  %v3462_v37 = vmul.f32 0.7978846, %v3334_v13  ;;  %4800 = vmatmul.mubr.bf16.gmra.mrb[44].mxu1 %v3917_v33  ;;  %v3333_v27 = vadd.f32 %v10678_v44, %v8666_v10  ;;  %v9127_v49 = vpop.f32.mrb[84].mxu0  ;;  %v6342_v43 = vld [vmem:[#allocation16 + $0x3e0] ss:$8 sps:$4 sm:$0xff]   ;;  %v3341_v2 = vadd.f32 %v10681_v24, %v10680_v29 }
 0x50c   : > { %v3710_v63 = vadd.f32 1.0, %v6454_v52  ;;  %v3470_v11 = vmul.f32 0.7978846, %v3342_v34  ;;  %10679 = vst [vmem:[#allocation101_spill] sm:$0xff] %v9127_v49  ;;  %v3391_v13 = vmul.f32 0.7978846, %v3263_v9  ;;  %4875 = vmatpush1.bf16.msra.mxu1 %v6243_v30  ;;  %v3016_v49 = vmul.f32 %v2888_v57, %v9088_v15 }
 0x50d   : > { %v3830_v32 = vmul.f32 %v3702_v8, %v9047_v1  ;;  %6461 = vtanh.f32 %v3462_v37  ;;  %v9132_v59 = vpop.f32.mrb[85].mxu0  ;;  %v6344_v33 = vld [vmem:[#allocation16 + $0x3e4] ss:$8 sps:$4 sm:$0xff]   ;;  %v2895_v34 = vmul.f32 0.044715, %v9122_v4  ;;  %v9140_v1 = vmul.f32 0.5, %v8676_v5  ;;  %4876 = vmatprep.subr.bf16.mxu1 %v6248_v60 }
 0x50e   : > { %v3838_v62 = vmul.f32 %v3710_v63, %v9067_v53  ;;  %6463 = vtanh.f32 %v3470_v11  ;;  %v3461_v52 = vmul.f32 0.7978846, %v3333_v27  ;;  %v9136_v44 = vpop.f32.mrb[86].mxu0  ;;  %v3469_v9 = vmul.f32 0.7978846, %v3341_v2  ;;  %5104 = vmatprep.subr.bf16.mxu0 %v6344_v33 }
 0x50f   : > { %v9144_v24 = vadd.f32 %v8932_v45, %v10665_v42  ;;  %v6251_v8 = vld [vmem:[#allocation16 + $0x1e4] ss:$8 sps:$4 sm:$0xff]   ;;  %v9146_v53 = vpop.f32.mrb[87].mxu0  ;;  %v6456_v37 = vpop.eup %6455  ;;  %v9149_v30 = vmul.f32 %v3008_v25, %v9071_v47  ;;  %v9153_v5 = vadd.f32 %v8964_v7, %v10661_v14  ;;  %5105 = vmatpush1.bf16.msra.mxu0 %v6342_v43  ;;  %v9156_v45 = vmul.f32 %v3015_v36, %v9075_v46  ;;  %v6249_v43 = vld [vmem:[#allocation16 + $0x1e0] ss:$8 sps:$4 sm:$0xff]  }
 0x510   : > { %v3926_v63 = vpack.c.bf16 %v3838_v62, %v3830_v32  ;;  %6465 = vtanh.f32 %v3461_v52  ;;  %v6458_v57 = vpop.eup %6457  ;;  %v3701_v11 = vadd.f32 1.0, %v6456_v37  ;;  %v9159_v60 = vmul.f32 0.5, %v8754_v17  ;;  %4877 = vmatpush1.bf16.msra.mxu1 %v6246_v19  ;;  %v6254_v2 = vld [vmem:[#allocation16 + $0x1f4] ss:$8 sps:$4 sm:$0xff]   ;;  %v6348_v62 = vld [vmem:[#allocation16 + $0x3f0] ss:$8 sps:$4 sm:$0xff]  }
 0x511   : > { %6467 = vtanh.f32 %v3469_v9  ;;  %v3709_v27 = vadd.f32 1.0, %v6458_v57  ;;  %v3023_v25 = vmul.f32 %v2895_v34, %v9122_v4  ;;  %v9163_v32 = vmul.f32 0.5, %v8666_v10  ;;  %4878 = vmatprep.subr.bf16.mxu1 %v6251_v8  ;;  %v6350_v10 = vld [vmem:[#allocation16 + $0x3f4] ss:$8 sps:$4 sm:$0xff]  }
 0x512   : > { %4809 = vmatprep.mubr.bf16.mxu1 %v3926_v63  ;;  %v9167_v7 = vadd.f32 %v8968_v18, %v10665_v42  ;;  %6469 = vtanh.f32 %v3391_v13  ;;  %v2896_v36 = vmul.f32 0.044715, %v9144_v24  ;;  %v3350_v17 = vadd.f32 %v8903_v40, %v8786_v3  ;;  %5106 = vmatprep.subr.bf16.mxu0 %v6350_v10 }
 0x513   : > { %v3358_v33 = vadd.f32 %v8943_v41, %v8874_v23  ;;  %v9174_v34 = vpop.eup %6459  ;;  %v3829_v18 = vmul.f32 %v3701_v11, %v9096_v51  ;;  %v3837_v19 = vmul.f32 %v3709_v27, %v9112_v50  ;;  %v2903_v52 = vmul.f32 0.044715, %v9153_v5  ;;  %v9183_v9 = vpop.f32.mrb[88].mxu0  ;;  %v6252_v11 = vld [vmem:[#allocation16 + $0x1f0] ss:$8 sps:$4 sm:$0xff]   ;;  %5107 = vmatpush1.bf16.msra.mxu0 %v6348_v62 }
 0x514   : > { %v9181_v13 = vadd.f32 %v8974_v6, %v10661_v14  ;;  %v9186_v40 = vmul.f32 %v3016_v49, %v9088_v15  ;;  %v2829_v41 = vmul.f32 0.5, %v10680_v29  ;;  %v3478_v8 = vmul.f32 0.7978846, %v3350_v17  ;;  %v9189_v63 = vpop.f32.mrb[89].mxu0  ;;  %4879 = vmatpush1.bf16.msra.mxu1 %v6249_v43 }
 0x515   : > { %v3486_v37 = vmul.f32 0.7978846, %v3358_v33  ;;  %v3925_v51 = vpack.c.bf16 %v3837_v19, %v3829_v18  ;;  %v9192_v50 = vmul.f32 %v3023_v25, %v9122_v4  ;;  %v2904_v57 = vmul.f32 0.044715, %v9167_v7  ;;  %v9198_v49 = vpop.f32.mrb[90].mxu0  ;;  %4880 = vmatprep.subr.bf16.mxu1 %v6254_v2 }
 0x516   : > { %v9196_v6 = vmul.f32 0.5, %v8786_v3  ;;  %10682 = vst [vmem:[#allocation115_spill] sm:$0xff] %v9198_v49  ;;  %v3024_v27 = vmul.f32 %v2896_v36, %v9144_v24  ;;  %6471 = vtanh.f32 %v3478_v8  ;;  %v3349_v17 = vadd.f32 %v8852_v21, %v8762_v58  ;;  %v6257_v33 = vld [vmem:[#allocation16 + $0x204] ss:$8 sps:$4 sm:$0xff]   ;;  %v9205_v10 = vpop.f32.mrb[91].mxu0  ;;  %v10684_v21 = vld [vmem:[#allocation84_spill] sm:$0xff] }
 0x517   : > { %v6462_v29 = vpop.eup %6461  ;;  %v3357_v25 = vadd.f32 %v8921_v12, %v8839_v0  ;;  %10683 = vst [vmem:[#allocation123_spill] sm:$0xff] %v9205_v10  ;;  %4810 = vmatmul.mubr.bf16.gmra.mrb[48].mxu1 %v3925_v51  ;;  %v3031_v18 = vmul.f32 %v2903_v52, %v9153_v5  ;;  %6473 = vtanh.f32 %v3486_v37  ;;  %v2911_v62 = vmul.f32 0.044715, %v9181_v13 }
 0x518   : > { %v6464_v3 = vpop.eup %6463  ;;  %v3718_v43 = vadd.f32 1.0, %v6462_v29  ;;  %v3477_v19 = vmul.f32 0.7978846, %v3349_v17  ;;  %v9211_v49 = vadd.f32 %v10684_v21, %v10665_v42  ;;  %v3032_v2 = vmul.f32 %v2904_v57, %v9167_v7  ;;  %4881 = vmatpush1.bf16.msra.mxu1 %v6252_v11 }
 0x519   : > { %v3726_v36 = vadd.f32 1.0, %v6464_v3  ;;  %v3485_v8 = vmul.f32 0.7978846, %v3357_v25  ;;  %v2846_v10 = vmul.f32 0.5, %v8874_v23  ;;  %v9217_v51 = vadd.f32 %v9021_v39, %v10661_v14  ;;  %4963 = vmatprep.subr.bf16.mxu1 %v6257_v33 }
 0x51a   : > { %v6466_v12 = vpop.eup %6465  ;;  %v9221_v52 = vadd.f32 %v9034_v48, %v10665_v42  ;;  %v3846_v29 = vmul.f32 %v3718_v43, %v9140_v1  ;;  %6475 = vtanh.f32 %v3477_v19  ;;  %v9226_v23 = vmul.f32 %v3024_v27, %v9144_v24 }
 0x51b   : > { %v6468_v37 = vpop.eup %6467  ;;  %v3854_v17 = vmul.f32 %v3726_v36, %v9159_v60  ;;  %v3717_v25 = vadd.f32 1.0, %v6466_v12  ;;  %v3039_v39 = vmul.f32 %v2911_v62, %v9181_v13  ;;  %6477 = vtanh.f32 %v3485_v8  ;;  %v9229_v3 = vpop.f32.mrb[92].mxu0 }
 0x51c   : > { %v3725_v57 = vadd.f32 1.0, %v6468_v37  ;;  %10685 = vst [vmem:[#allocation117_spill] sm:$0xff] %v9229_v3  ;;  %v9231_v48 = vpop.eup %6469  ;;  %v9234_v21 = vmul.f32 %v3031_v18, %v9153_v5  ;;  %v2837_v1 = vmul.f32 0.5, %v8762_v58  ;;  %v2912_v60 = vmul.f32 0.044715, %v9211_v49  ;;  %v9238_v33 = vpop.f32.mrb[93].mxu0 }
 0x51d   : > { %v3934_v11 = vpack.c.bf16 %v3854_v17, %v3846_v29  ;;  %10686 = vst [vmem:[#allocation126_spill] sm:$0xff] %v9238_v33  ;;  %v3845_v27 = vmul.f32 %v3717_v25, %v9163_v32  ;;  %v2919_v62 = vmul.f32 0.044715, %v9217_v51  ;;  %v2920_v36 = vmul.f32 0.044715, %v9221_v52  ;;  %v9243_v19 = vpop.f32.mrb[94].mxu0 }
 0x51e   : > { %v3853_v43 = vmul.f32 %v3725_v57, %v2829_v41  ;;  %10687 = vst [vmem:[#allocation84_spill] sm:$0xff] %v9243_v19  ;;  %v9246_v8 = vmul.f32 %v3032_v2, %v9167_v7  ;;  %v2845_v18 = vmul.f32 0.5, %v8839_v0  ;;  %v3366_v58 = vadd.f32 %v9011_v38, %v8926_v28  ;;  %v9253_v32 = vpop.f32.mrb[95].mxu0  ;;  %v10690_v2 = vld [vmem:[#allocation98_spill] sm:$0xff] }
 0x51f   : > { %4819 = vmatprep.mubr.bf16.mxu1 %v3934_v11  ;;  %v3374_v12 = vadd.f32 %v9080_v22, %v8983_v20  ;;  %10688 = vst [vmem:[#allocation140_spill] sm:$0xff] %v9253_v32  ;;  %v9256_v37 = vmul.f32 %v3039_v39, %v9181_v13  ;;  %v9260_v29 = vadd.f32 %v9043_v54, %v10661_v14  ;;  %v10691_v11 = vld [vmem:[#allocation137_spill] sm:$0xff]  ;;  %v10692_v22 = vld [vmem:[#allocation112_spill] sm:$0xff] }
 0x520   : > { %v3933_v41 = vpack.c.bf16 %v3853_v43, %v3845_v27  ;;  %v3365_v17 = vadd.f32 %v10690_v2, %v8888_v56  ;;  %v6472_v0 = vpop.eup %6471  ;;  %v3040_v25 = vmul.f32 %v2912_v60, %v9211_v49  ;;  %v3494_v38 = vmul.f32 0.7978846, %v3366_v58  ;;  %v10693_v2 = vld [vmem:[#allocation105_spill] sm:$0xff] }
 0x521   : > { %10689 = vst [vmem:[#allocation141_spill] sm:$0xff] %v9256_v37  ;;  %v3502_v57 = vmul.f32 0.7978846, %v3374_v12  ;;  %v3373_v19 = vadd.f32 %v10692_v22, %v10691_v11  ;;  %v6474_v32 = vpop.eup %6473  ;;  %v3734_v27 = vadd.f32 1.0, %v6472_v0  ;;  %v3047_v39 = vmul.f32 %v2919_v62, %v9217_v51 }
 0x522   : > { %4820 = vmatmul.mubr.bf16.gmra.mrb[52].mxu1 %v3933_v41  ;;  %v3048_v43 = vmul.f32 %v2920_v36, %v9221_v52  ;;  %v3493_v54 = vmul.f32 0.7978846, %v3365_v17  ;;  %v3742_v33 = vadd.f32 1.0, %v6474_v32  ;;  %6479 = vtanh.f32 %v3494_v38 }
 0x523   : > { %v3501_v3 = vmul.f32 0.7978846, %v3373_v19  ;;  %v9271_v37 = vadd.f32 %v10693_v2, %v10665_v42  ;;  %v9274_v60 = vmul.f32 0.5, %v8926_v28  ;;  %6481 = vtanh.f32 %v3502_v57  ;;  %v9281_v62 = vpop.f32.mrb[96].mxu0 }
 0x524   : > { %v2927_v58 = vmul.f32 0.044715, %v9260_v29  ;;  %v9279_v12 = vadd.f32 %v9077_v55, %v10661_v14  ;;  %v6476_v36 = vpop.eup %6475  ;;  %v3862_v32 = vmul.f32 %v3734_v27, %v9196_v6  ;;  %v3870_v19 = vmul.f32 %v3742_v33, %v2846_v10  ;;  %v9287_v17 = vpop.f32.mrb[97].mxu0 }
 0x525   : > { %v9285_v41 = vmul.f32 %v3040_v25, %v9211_v49  ;;  %6483 = vtanh.f32 %v3493_v54  ;;  %v6478_v28 = vpop.eup %6477  ;;  %v3733_v0 = vadd.f32 1.0, %v6476_v36  ;;  %v9290_v38 = vmul.f32 %v3047_v39, %v9217_v51  ;;  %v9293_v57 = vpop.f32.mrb[98].mxu0 }
 0x526   : > { %v2862_v55 = vmul.f32 0.5, %v8983_v20  ;;  %6485 = vtanh.f32 %v3501_v3  ;;  %v3942_v22 = vpack.c.bf16 %v3870_v19, %v3862_v32  ;;  %v3741_v2 = vadd.f32 1.0, %v6478_v28  ;;  %v9299_v33 = vpop.f32.mrb[99].mxu0 }
 0x527   : > { %v9296_v6 = vmul.f32 %v3048_v43, %v9221_v52  ;;  %v2928_v10 = vmul.f32 0.044715, %v9271_v37  ;;  %10694 = vst [vmem:[#allocation98_spill] sm:$0xff] %v9299_v33  ;;  %v3055_v25 = vmul.f32 %v2927_v58, %v9260_v29  ;;  %v2853_v27 = vmul.f32 0.5, %v8888_v56 }
 0x528   : > { %v2935_v39 = vmul.f32 0.044715, %v9279_v12  ;;  %v9306_v20 = vadd.f32 %v9084_v31, %v10665_v42  ;;  %4829 = vmatprep.mubr.bf16.mxu1 %v3942_v22  ;;  %v3861_v3 = vmul.f32 %v3733_v0, %v2837_v1  ;;  %v3869_v54 = vmul.f32 %v3741_v2, %v2845_v18 }
 0x529   : > { %v3256_v43 = vadd.f32 %v9108_v26, %v9026_v35  ;;  %v3264_v36 = vadd.f32 %v9149_v30, %v9071_v47  ;;  %v2861_v32 = vmul.f32 0.5, %v10691_v11  ;;  %v9315_v56 = vadd.f32 %v9090_v61, %v10661_v14  ;;  %v10695_v30 = vld [vmem:[#allocation118_spill] sm:$0xff] }
 0x52a   : > { %v3639_v58 = vadd.f32 1.0, %v9174_v34  ;;  %v3647_v31 = vadd.f32 1.0, %v9231_v48  ;;  %v3941_v19 = vpack.c.bf16 %v3869_v54, %v3861_v3  ;;  %v3056_v1 = vmul.f32 %v2928_v10, %v9271_v37  ;;  %v10697_v10 = vld [vmem:[#allocation110_spill] sm:$0xff] }
 0x52b   : > { %v3384_v18 = vmul.f32 0.7978846, %v3256_v43  ;;  %v3392_v28 = vmul.f32 0.7978846, %v3264_v36  ;;  %v3063_v26 = vmul.f32 %v2935_v39, %v9279_v12  ;;  %v2936_v0 = vmul.f32 0.044715, %v9306_v20 }
 0x52c   : > { %v9323_v22 = vmul.f32 %v3639_v58, %v10695_v30  ;;  %v9326_v11 = vmul.f32 %v3647_v31, %v9104_v16  ;;  %v9328_v61 = vpop.f32.mrb[100].mxu0  ;;  %v6480_v34 = vpop.eup %6479  ;;  %4830 = vmatmul.mubr.bf16.gmra.mrb[56].mxu1 %v3941_v19  ;;  %v9331_v48 = vmul.f32 %v3055_v25, %v9260_v29  ;;  %v2943_v2 = vmul.f32 0.044715, %v9315_v56  ;;  %v10699_v36 = vld [vmem:[#allocation101_spill] sm:$0xff] }
 0x52d   : > { %10696 = vst [vmem:[#allocation137_spill] sm:$0xff] %v9328_v61  ;;  %6487 = vtanh.f32 %v3384_v18  ;;  %v9336_v39 = vadd.f32 %v10697_v10, %v10665_v42  ;;  %v9338_v3 = vpop.f32.mrb[101].mxu0  ;;  %v6482_v54 = vpop.eup %6481  ;;  %v3750_v43 = vadd.f32 1.0, %v6480_v34  ;;  %v9344_v58 = vadd.f32 %v10699_v36, %v10661_v14 }
 0x52e   : > { %10698 = vst [vmem:[#allocation112_spill] sm:$0xff] %v9338_v3  ;;  %6489 = vtanh.f32 %v3392_v28  ;;  %v9346_v25 = vpop.f32.mrb[102].mxu0  ;;  %v3758_v19 = vadd.f32 1.0, %v6482_v54  ;;  %v9349_v18 = vmul.f32 %v3056_v1, %v9271_v37  ;;  %v2744_v30 = vmul.f32 0.5, %v9026_v35 }
 0x52f   : > { %10700 = vst [vmem:[#allocation105_spill] sm:$0xff] %v9346_v25  ;;  %v6484_v31 = vpop.eup %6483  ;;  %v9354_v34 = vadd.f32 %v9132_v59, %v10665_v42  ;;  %v9356_v28 = vpop.f32.mrb[103].mxu0  ;;  %v9359_v36 = vmul.f32 %v3063_v26, %v9279_v12  ;;  %v3064_v25 = vmul.f32 %v2936_v0, %v9306_v20  ;;  %v2752_v54 = vmul.f32 0.5, %v9071_v47 }
 0x530   : > { %10701 = vst [vmem:[#allocation118_spill] sm:$0xff] %v9356_v28  ;;  %v6486_v10 = vpop.eup %6485  ;;  %v3749_v16 = vadd.f32 1.0, %v6484_v31  ;;  %v3878_v1 = vmul.f32 %v3750_v43, %v9274_v60  ;;  %v3886_v3 = vmul.f32 %v3758_v19, %v2862_v55  ;;  %v2944_v35 = vmul.f32 0.044715, %v9336_v39 }
 0x531   : > { %10702 = vst [vmem:[#allocation110_spill] sm:$0xff] %v9359_v36  ;;  %v3757_v61 = vadd.f32 1.0, %v6486_v10  ;;  %v3071_v59 = vmul.f32 %v2943_v2, %v9315_v56  ;;  %v2951_v33 = vmul.f32 0.044715, %v9344_v58  ;;  %v3272_v31 = vadd.f32 %v9186_v40, %v9088_v15 }
 0x532   : > { %v3280_v26 = vadd.f32 %v9226_v23, %v9144_v24  ;;  %v3950_v28 = vpack.c.bf16 %v3886_v3, %v3878_v1  ;;  %v3877_v0 = vmul.f32 %v3749_v16, %v2853_v27  ;;  %v2952_v47 = vmul.f32 0.044715, %v9354_v34 }
 0x533   : > { %v3885_v36 = vmul.f32 %v3757_v61, %v2861_v32  ;;  %v9373_v60 = vmul.f32 %v3064_v25, %v9306_v20  ;;  %v3400_v55 = vmul.f32 0.7978846, %v3272_v31  ;;  %v9377_v2 = vadd.f32 %v9136_v44, %v10661_v14  ;;  %v9379_v19 = vpop.f32.mrb[104].mxu0 }
 0x534   : > { %v3408_v43 = vmul.f32 0.7978846, %v3280_v26  ;;  %4839 = vmatprep.mubr.bf16.mxu1 %v3950_v28  ;;  %v3072_v23 = vmul.f32 %v2944_v35, %v9336_v39  ;;  %v9383_v27 = vmul.f32 0.5, %v9088_v15  ;;  %v3271_v32 = vadd.f32 %v9156_v45, %v9075_v46  ;;  %v9387_v61 = vpop.f32.mrb[105].mxu0 }
 0x535   : > { %v3949_v40 = vpack.c.bf16 %v3885_v36, %v3877_v0  ;;  %6491 = vtanh.f32 %v3400_v55  ;;  %v3279_v3 = vadd.f32 %v9192_v50, %v9122_v4  ;;  %v9393_v44 = vadd.f32 %v9146_v53, %v10665_v42  ;;  %v9399_v25 = vpop.f32.mrb[106].mxu0 }
 0x536   : > { %v9397_v16 = vadd.f32 %v9183_v9, %v10661_v14  ;;  %10703 = vst [vmem:[#allocation101_spill] sm:$0xff] %v9399_v25  ;;  %v9402_v45 = vmul.f32 %v3071_v59, %v9315_v56  ;;  %v3079_v28 = vmul.f32 %v2951_v33, %v9344_v58  ;;  %6493 = vtanh.f32 %v3408_v43  ;;  %v9405_v50 = vpop.f32.mrb[107].mxu0 }
 0x537   : > { %v6488_v15 = vpop.eup %6487  ;;  %4840 = vmatmul.mubr.bf16.gmra.mrb[60].mxu1 %v3949_v40  ;;  %v3399_v10 = vmul.f32 0.7978846, %v3271_v32  ;;  %10704 = vst [vmem:[#allocation142_spill] sm:$0xff] %v9405_v50  ;;  %v3080_v1 = vmul.f32 %v2952_v47, %v9354_v34  ;;  %v2959_v9 = vmul.f32 0.044715, %v9377_v2  ;;  %v2768_v26 = vmul.f32 0.5, %v9144_v24 }
 0x538   : > { %v6490_v36 = vpop.eup %6489  ;;  %v3640_v53 = vadd.f32 1.0, %v6488_v15  ;;  %v3407_v35 = vmul.f32 0.7978846, %v3279_v3  ;;  %v9412_v59 = vadd.f32 %v9189_v63, %v10665_v42  ;;  %v9415_v33 = vmul.f32 %v3072_v23, %v9336_v39  ;;  %v6255_v32 = vld [vmem:[#allocation16 + $0x200] ss:$8 sps:$4 sm:$0xff]   ;;  %v10705_v15 = vld [vmem:[#allocation115_spill] sm:$0xff] }
 0x539   : > { %v3648_v31 = vadd.f32 1.0, %v6490_v36  ;;  %6495 = vtanh.f32 %v3399_v10  ;;  %v2960_v0 = vmul.f32 0.044715, %v9393_v44  ;;  %v2967_v55 = vmul.f32 0.044715, %v9397_v16 }
 0x53a   : > { %6497 = vtanh.f32 %v3407_v35  ;;  %v3768_v47 = vmul.f32 %v3640_v53, %v2744_v30  ;;  %v9420_v40 = vmul.f32 %v3079_v28, %v9344_v58  ;;  %v3288_v24 = vadd.f32 %v9246_v8, %v9167_v7 }
 0x53b   : > { %v3776_v43 = vmul.f32 %v3648_v31, %v2752_v54  ;;  %v9425_v63 = vmul.f32 %v3080_v1, %v9354_v34  ;;  %v3087_v23 = vmul.f32 %v2959_v9, %v9377_v2  ;;  %v3296_v3 = vadd.f32 %v9285_v41, %v9211_v49  ;;  %v9434_v30 = vpop.f32.mrb[108].mxu0  ;;  %v6263_v1 = vld [vmem:[#allocation16 + $0x214] ss:$8 sps:$4 sm:$0xff]  }
 0x53c   : > { %v9432_v10 = vadd.f32 %v10705_v15, %v10661_v14  ;;  %10706 = vst [vmem:[#allocation115_spill] sm:$0xff] %v9434_v30  ;;  %v2759_v28 = vmul.f32 0.5, %v9075_v46  ;;  %v2968_v8 = vmul.f32 0.044715, %v9412_v59  ;;  %v3416_v36 = vmul.f32 0.7978846, %v3288_v24 }
 0x53d   : > { %v3896_v54 = vpack.c.bf16 %v3776_v43, %v3768_v47  ;;  %v9438_v53 = vpop.f32.mrb[109].mxu0  ;;  %v2767_v9 = vmul.f32 0.5, %v9122_v4  ;;  %v3088_v35 = vmul.f32 %v2960_v0, %v9393_v44  ;;  %v3095_v41 = vmul.f32 %v2967_v55, %v9397_v16  ;;  %v10709_v43 = vld [vmem:[#allocation141_spill] sm:$0xff]  ;;  %v6261_v55 = vld [vmem:[#allocation16 + $0x210] ss:$8 sps:$4 sm:$0xff]  }
 0x53e   : > { %10707 = vst [vmem:[#allocation143_spill] sm:$0xff] %v9438_v53  ;;  %v3424_v31 = vmul.f32 0.7978846, %v3296_v3  ;;  %v9443_v15 = vpop.f32.mrb[110].mxu0  ;;  %6499 = vtanh.f32 %v3416_v36  ;;  %v2975_v47 = vmul.f32 0.044715, %v9432_v10  ;;  %v3287_v46 = vadd.f32 %v9234_v21, %v9153_v5 }
 0x53f   : > { %10708 = vst [vmem:[#allocation144_spill] sm:$0xff] %v9443_v15  ;;  %4882 = vmatprep.mubr.bf16.mxu1 %v3896_v54  ;;  %v3295_v24 = vadd.f32 %v10709_v43, %v9181_v13  ;;  %v9450_v53 = vpop.f32.mrb[111].mxu0  ;;  %v6492_v4 = vpop.eup %6491  ;;  %v10711_v0 = vpack.c.bf16 %v9326_v11, %v9323_v22  ;;  %v9456_v3 = vmul.f32 %v3087_v23, %v9377_v2  ;;  %v9459_v54 = vmul.f32 0.5, %v9167_v7  ;;  %v6269_v11 = vld [vmem:[#allocation16 + $0x224] ss:$8 sps:$4 sm:$0xff]   ;;  %v10712_v7 = vld [vmem:[#allocation123_spill] sm:$0xff] }
 0x540   : > { %10710 = vst [vmem:[#allocation141_spill] sm:$0xff] %v9450_v53  ;;  %v9462_v36 = vmul.f32 0.5, %v9211_v49  ;;  %6501 = vtanh.f32 %v3424_v31  ;;  %v6494_v21 = vpop.eup %6493  ;;  %v3656_v43 = vadd.f32 1.0, %v6492_v4  ;;  %v3096_v53 = vmul.f32 %v2968_v8, %v9412_v59  ;;  %v10713_v49 = vld [vmem:[#allocation117_spill] sm:$0xff] }
 0x541   : > { %4883 = vmatmul.mubr.bf16.vlgmr.msra.gmra.mrb[32].mxu1 %v10711_v0  ;;  %v3415_v15 = vmul.f32 0.7978846, %v3287_v46  ;;  %v3423_v30 = vmul.f32 0.7978846, %v3295_v24  ;;  %v3664_v22 = vadd.f32 1.0, %v6494_v21  ;;  %v9466_v23 = vmul.f32 %v3088_v35, %v9393_v44 }
 0x542   : > { %4964 = vmatpush1.bf16.msra.mxu1 %v6255_v32  ;;  %v9470_v0 = vadd.f32 %v10712_v7, %v10665_v42  ;;  %v9474_v31 = vadd.f32 %v10713_v49, %v10661_v14  ;;  %v9477_v4 = vmul.f32 %v3095_v41, %v9397_v16  ;;  %v3103_v8 = vmul.f32 %v2975_v47, %v9432_v10  ;;  %v6267_v7 = vld [vmem:[#allocation16 + $0x220] ss:$8 sps:$4 sm:$0xff]   ;;  %v6275_v41 = vld [vmem:[#allocation16 + $0x234] ss:$8 sps:$4 sm:$0xff]  }
 0x543   : > { %4965 = vmatprep.subr.bf16.mxu1 %v6263_v1  ;;  %v6496_v32 = vpop.eup %6495  ;;  %6503 = vtanh.f32 %v3415_v15  ;;  %v10715_v1 = vld [vmem:[#allocation126_spill] sm:$0xff]  ;;  %v3784_v24 = vmul.f32 %v3656_v43, %v9383_v27  ;;  %v3792_v21 = vmul.f32 %v3664_v22, %v2768_v26  ;;  %v9485_v49 = vpop.f32.mrb[112].mxu0  ;;  %v9491_v15 = vmul.f32 0.5, %v9153_v5 }
 0x544   : > { %10714 = vst [vmem:[#allocation123_spill] sm:$0xff] %v9477_v4  ;;  %v9482_v46 = vadd.f32 %v10715_v1, %v10665_v42  ;;  %v6498_v35 = vpop.eup %6497  ;;  %v3655_v50 = vadd.f32 1.0, %v6496_v32  ;;  %6505 = vtanh.f32 %v3423_v30  ;;  %v9488_v4 = vmul.f32 %v3096_v53, %v9412_v59  ;;  %v9495_v1 = vpop.f32.mrb[113].mxu0 }
 0x545   : > { %v3663_v25 = vadd.f32 1.0, %v6498_v35  ;;  %v3304_v47 = vadd.f32 %v9296_v6, %v9221_v52  ;;  %10716 = vst [vmem:[#allocation117_spill] sm:$0xff] %v9495_v1  ;;  %v3904_v27 = vpack.c.bf16 %v3792_v21, %v3784_v24  ;;  %v2976_v26 = vmul.f32 0.044715, %v9470_v0  ;;  %v9501_v43 = vpop.f32.mrb[114].mxu0 }
 0x546   : > { %4966 = vmatpush1.bf16.msra.mxu1 %v6261_v55  ;;  %v2983_v30 = vmul.f32 0.044715, %v9474_v31  ;;  %v3312_v55 = vadd.f32 %v9349_v18, %v9271_v37  ;;  %v3783_v53 = vmul.f32 %v3655_v50, %v2759_v28  ;;  %v2783_v5 = vmul.f32 0.5, %v9181_v13  ;;  %v9504_v35 = vpop.f32.mrb[115].mxu0  ;;  %v6273_v50 = vld [vmem:[#allocation16 + $0x230] ss:$8 sps:$4 sm:$0xff]  }
 0x547   : > { %4967 = vmatprep.subr.bf16.mxu1 %v6269_v11  ;;  %v3791_v22 = vmul.f32 %v3663_v25, %v2767_v9  ;;  %v3432_v32 = vmul.f32 0.7978846, %v3304_v47  ;;  %10717 = vst [vmem:[#allocation126_spill] sm:$0xff] %v9504_v35  ;;  %4892 = vmatprep.mubr.bf16.mxu1 %v3904_v27  ;;  %v9507_v6 = vmul.f32 %v3103_v8, %v9432_v10  ;;  %v2984_v11 = vmul.f32 0.044715, %v9482_v46 }
 0x548   : > { %v9511_v24 = vmul.f32 0.5, %v9221_v52  ;;  %v3440_v21 = vmul.f32 0.7978846, %v3312_v55  ;;  %v6500_v18 = vpop.eup %6499  ;;  %v3303_v13 = vadd.f32 %v9290_v38, %v9217_v51  ;;  %v3311_v25 = vadd.f32 %v9331_v48, %v9260_v29  ;;  %v6281_v8 = vld [vmem:[#allocation16 + $0x244] ss:$8 sps:$4 sm:$0xff]  }
 0x549   : > { %v3903_v1 = vpack.c.bf16 %v3791_v22, %v3783_v53  ;;  %6507 = vtanh.f32 %v3432_v32  ;;  %v3672_v9 = vadd.f32 1.0, %v6500_v18  ;;  %v3104_v47 = vmul.f32 %v2976_v26, %v9470_v0  ;;  %v10718_v53 = vld [vmem:[#allocation29_spill] sm:$0xff]  ;;  %v10719_v32 = vld [vmem:[#allocation84_spill] sm:$0xff] }
 0x54a   : > { %4968 = vmatpush1.bf16.msra.mxu1 %v6267_v7  ;;  %v6502_v28 = vpop.eup %6501  ;;  %v3111_v52 = vmul.f32 %v2983_v30, %v9474_v31  ;;  %6509 = vtanh.f32 %v3440_v21  ;;  %v3431_v7 = vmul.f32 0.7978846, %v3303_v13  ;;  %v3439_v55 = vmul.f32 0.7978846, %v3311_v25  ;;  %v6279_v25 = vld [vmem:[#allocation16 + $0x240] ss:$8 sps:$4 sm:$0xff]  }
 0x54b   : > { %4969 = vmatprep.subr.bf16.mxu1 %v6275_v41  ;;  %4893 = vmatmul.mubr.bf16.gmra.mrb[36].mxu1 %v3903_v1  ;;  %v3680_v27 = vadd.f32 1.0, %v6502_v28  ;;  %v1635_v22 = vsub.s32 6, %v10718_v53  ;;  %v3112_v38 = vmul.f32 %v2984_v11, %v9482_v46  ;;  %v9523_v48 = vadd.f32 %v10719_v32, %v10661_v14  ;;  %v10720_v41 = vld [vmem:[#allocation140_spill] sm:$0xff]  ;;  %v9530_v30 = vpop.f32.mrb[116].mxu0 }
 0x54c   : > { %v9527_v18 = vadd.f32 %v10720_v41, %v10665_v42  ;;  %v1639_v26 = vsub.s32 7, %v10718_v53  ;;  %10721 = vst [vmem:[#allocation29_spill] sm:$0xff] %v9530_v30  ;;  %v3800_v21 = vmul.f32 %v3672_v9, %v9459_v54  ;;  %6511 = vtanh.f32 %v3431_v7  ;;  %v6671_v11 = vld [vmem:[#allocation14] sm:$0xff]  ;;  %v9536_v14 = vpop.f32.mrb[117].mxu0 }
 0x54d   : > { %v6504_v1 = vpop.eup %6503  ;;  %v3808_v13 = vmul.f32 %v3680_v27, %v9462_v36  ;;  %v9534_v28 = vrot.slane %v6671_v11, %v1635_v22  ;;  %10722 = vst [vmem:[#allocation84_spill] sm:$0xff] %v9536_v14  ;;  %v9539_v53 = vmul.f32 %v3104_v47, %v9470_v0  ;;  %v6287_v41 = vld [vmem:[#allocation16 + $0x254] ss:$8 sps:$4 sm:$0xff]   ;;  %6513 = vtanh.f32 %v3439_v55  ;;  %v9542_v54 = vpop.f32.mrb[118].mxu0 }
 0x54e   : > { %4970 = vmatpush1.bf16.msra.mxu1 %v6273_v50  ;;  %v6506_v32 = vpop.eup %6505  ;;  %v3671_v42 = vadd.f32 1.0, %v6504_v1  ;;  %v2800_v50 = vmul.f32 0.5, %v9271_v37  ;;  %10723 = vst [vmem:[#allocation140_spill] sm:$0xff] %v9542_v54  ;;  %v9548_v7 = vrot.slane %v6671_v11, %v1639_v26  ;;  %v9550_v22 = vpop.f32.mrb[119].mxu0  ;;  %v9556_v47 = vmul.f32 %v3112_v38, %v9482_v46 }
 0x54f   : > { %4971 = vmatprep.subr.bf16.mxu1 %v6281_v8  ;;  %v3912_v36 = vpack.c.bf16 %v3808_v13, %v3800_v21  ;;  %v3679_v9 = vadd.f32 1.0, %v6506_v32  ;;  %v9546_v27 = vadd.f32 %v9281_v62, %v9534_v28  ;;  %10724 = vst [vmem:[#allocation145_spill] sm:$0xff] %v9550_v22  ;;  %v9553_v8 = vmul.f32 %v3111_v52, %v9474_v31  ;;  %v6285_v13 = vld [vmem:[#allocation16 + $0x250] ss:$8 sps:$4 sm:$0xff]  }
 0x550   : > { %v2991_v37 = vmul.f32 0.044715, %v9523_v48  ;;  %v3320_v55 = vadd.f32 %v9373_v60, %v9306_v20  ;;  %v3799_v1 = vmul.f32 %v3671_v42, %v9491_v15  ;;  %v2992_v26 = vmul.f32 0.044715, %v9527_v18 }
 0x551   : > { %4902 = vmatprep.mubr.bf16.mxu1 %v3912_v36  ;;  %v3807_v62 = vmul.f32 %v3679_v9, %v2783_v5  ;;  %v2875_v21 = vmul.f32 0.044715, %v9546_v27  ;;  %v9566_v52 = vadd.f32 %v9287_v17, %v9548_v7  ;;  %v3328_v38 = vadd.f32 %v9415_v33, %v9336_v39 }
 0x552   : > { %4972 = vmatpush1.bf16.msra.mxu1 %v6279_v25  ;;  %v3448_v11 = vmul.f32 0.7978846, %v3320_v55  ;;  %v9572_v60 = vadd.f32 %v9293_v57, %v9534_v28  ;;  %v6293_v25 = vld [vmem:[#allocation16 + $0x264] ss:$8 sps:$4 sm:$0xff]   ;;  %v2791_v32 = vmul.f32 0.5, %v9217_v51  ;;  %v2799_v42 = vmul.f32 0.5, %v9260_v29 }
 0x553   : > { %4973 = vmatprep.subr.bf16.mxu1 %v6287_v41  ;;  %v6508_v15 = vpop.eup %6507  ;;  %v3911_v5 = vpack.c.bf16 %v3807_v62, %v3799_v1  ;;  %v3003_v41 = vmul.f32 %v2875_v21, %v9546_v27  ;;  %v3119_v9 = vmul.f32 %v2991_v37, %v9523_v48  ;;  %v3456_v22 = vmul.f32 0.7978846, %v3328_v38  ;;  %v9578_v33 = vpop.f32.mrb[120].mxu0  ;;  %v6291_v29 = vld [vmem:[#allocation16 + $0x260] ss:$8 sps:$4 sm:$0xff]  }
 0x554   : > { %v6510_v36 = vpop.eup %6509  ;;  %v3688_v17 = vadd.f32 1.0, %v6508_v15  ;;  %6515 = vtanh.f32 %v3448_v11  ;;  %10725 = vst [vmem:[#allocation146_spill] sm:$0xff] %v9578_v33  ;;  %v3120_v55 = vmul.f32 %v2992_v26, %v9527_v18  ;;  %v2883_v51 = vmul.f32 0.044715, %v9572_v60  ;;  %v9583_v62 = vpop.f32.mrb[121].mxu0  ;;  %v10727_v37 = vld [vmem:[#allocation110_spill] sm:$0xff] }
 0x555   : > { %4903 = vmatmul.mubr.bf16.gmra.mrb[40].mxu1 %v3911_v5  ;;  %v3696_v57 = vadd.f32 1.0, %v6510_v36  ;;  %v3131_v1 = vmul.f32 %v3003_v41, %v9546_v27  ;;  %10726 = vst [vmem:[#allocation147_spill] sm:$0xff] %v9583_v62  ;;  %v2876_v21 = vmul.f32 0.044715, %v9566_v52  ;;  %6517 = vtanh.f32 %v3456_v22  ;;  %v9590_v15 = vpop.f32.mrb[122].mxu0 }
 0x556   : > { %4974 = vmatpush1.bf16.msra.mxu1 %v6285_v13  ;;  %v3319_v38 = vadd.f32 %v10727_v37, %v9279_v12  ;;  %v3327_v11 = vadd.f32 %v9402_v45, %v9315_v56  ;;  %10728 = vst [vmem:[#allocation110_spill] sm:$0xff] %v9590_v15  ;;  %v6512_v26 = vpop.eup %6511  ;;  %v3816_v5 = vmul.f32 %v3688_v17, %v9511_v24  ;;  %v6299_v36 = vld [vmem:[#allocation16 + $0x274] ss:$8 sps:$4 sm:$0xff]   ;;  %v9595_v33 = vpop.f32.mrb[123].mxu0  ;;  %v10729_v45 = vld [vmem:[#allocation98_spill] sm:$0xff]  ;;  %v2808_v24 = vmul.f32 0.5, %v9306_v20 }
 0x557   : > { %v3824_v41 = vmul.f32 %v3696_v57, %v2800_v50  ;;  %4975 = vmatprep.subr.bf16.mxu1 %v6293_v25  ;;  %v3259_v13 = vadd.f32 %v3131_v1, %v9546_v27  ;;  %v3011_v62 = vmul.f32 %v2883_v51, %v9572_v60  ;;  %v6514_v22 = vpop.eup %6513  ;;  %v3687_v54 = vadd.f32 1.0, %v6512_v26  ;;  %v6297_v57 = vld [vmem:[#allocation16 + $0x270] ss:$8 sps:$4 sm:$0xff]   ;;  %v10730_v1 = vld [vmem:[#allocation137_spill] sm:$0xff] }
 0x558   : > { %v3447_v37 = vmul.f32 0.7978846, %v3319_v38  ;;  %v3455_v14 = vmul.f32 0.7978846, %v3327_v11  ;;  %v9599_v30 = vadd.f32 %v10729_v45, %v9548_v7  ;;  %v3695_v35 = vadd.f32 1.0, %v6514_v22 }
 0x559   : > { %v3920_v15 = vpack.c.bf16 %v3824_v41, %v3816_v5  ;;  %v3139_v50 = vmul.f32 %v3011_v62, %v9572_v60  ;;  %v9604_v25 = vmul.f32 %v3119_v9, %v9523_v48  ;;  %v9607_v17 = vmul.f32 %v3120_v55, %v9527_v18  ;;  %v6305_v9 = vld [vmem:[#allocation16 + $0x284] ss:$8 sps:$4 sm:$0xff]  }
 0x55a   : > { %4976 = vmatpush1.bf16.msra.mxu1 %v6291_v29  ;;  %6519 = vtanh.f32 %v3447_v37  ;;  %v9611_v51 = vadd.f32 %v10730_v1, %v9534_v28  ;;  %v3815_v38 = vmul.f32 %v3687_v54, %v2791_v32  ;;  %v3823_v11 = vmul.f32 %v3695_v35, %v2799_v42  ;;  %v10731_v54 = vld [vmem:[#allocation112_spill] sm:$0xff] }
 0x55b   : > { %4912 = vmatprep.mubr.bf16.mxu1 %v3920_v15  ;;  %4977 = vmatprep.subr.bf16.mxu1 %v6299_v36  ;;  %v3004_v20 = vmul.f32 %v2876_v21, %v9566_v52  ;;  %v2816_v62 = vmul.f32 0.5, %v9336_v39  ;;  %v9616_v29 = vmul.f32 0.5, %v9546_v27  ;;  %v3387_v55 = vmul.f32 0.7978846, %v3259_v13  ;;  %v9619_v5 = vpop.f32.mrb[124].mxu0 }
 0x55c   : > { %6521 = vtanh.f32 %v3455_v14  ;;  %v2884_v26 = vmul.f32 0.044715, %v9599_v30  ;;  %v3919_v41 = vpack.c.bf16 %v3823_v11, %v3815_v38  ;;  %v3267_v15 = vadd.f32 %v3139_v50, %v9572_v60  ;;  %v9627_v39 = vpop.f32.mrb[125].mxu0  ;;  %v6303_v27 = vld [vmem:[#allocation16 + $0x280] ss:$8 sps:$4 sm:$0xff]  }
 0x55d   : > { %v2891_v35 = vmul.f32 0.044715, %v9611_v51  ;;  %v9625_v32 = vadd.f32 %v10731_v54, %v9548_v7  ;;  %10732 = vst [vmem:[#allocation98_spill] sm:$0xff] %v9627_v39  ;;  %v2807_v14 = vmul.f32 0.5, %v9279_v12  ;;  %v2815_v21 = vmul.f32 0.5, %v9315_v56  ;;  %v9635_v22 = vpop.f32.mrb[126].mxu0 }
 0x55e   : > { %v6516_v42 = vpop.eup %6515  ;;  %4978 = vmatpush1.bf16.msra.mxu1 %v6297_v57  ;;  %v3336_v36 = vadd.f32 %v9425_v63, %v9354_v34  ;;  %v3344_v13 = vadd.f32 %v9466_v23, %v9393_v44  ;;  %10733 = vst [vmem:[#allocation137_spill] sm:$0xff] %v9635_v22  ;;  %v9638_v37 = vmul.f32 %v3004_v20, %v9566_v52  ;;  %v9641_v50 = vmul.f32 0.5, %v9572_v60  ;;  %v6311_v12 = vld [vmem:[#allocation16 + $0x294] ss:$8 sps:$4 sm:$0xff]   ;;  %v10734_v56 = vld [vmem:[#allocation105_spill] sm:$0xff]  ;;  %v9647_v63 = vpop.f32.mrb[127].mxu0 }
 0x55f   : > { %4913 = vmatmul.mubr.bf16.gmra.mrb[44].mxu1 %v3919_v41  ;;  %v3704_v45 = vadd.f32 1.0, %v6516_v42  ;;  %4979 = vmatprep.subr.bf16.mxu1 %v6305_v9  ;;  %v9645_v57 = vadd.f32 %v10734_v56, %v9534_v28  ;;  %10735 = vst [vmem:[#allocation112_spill] sm:$0xff] %v9647_v63  ;;  %v6518_v1 = vpop.eup %6517  ;;  %6523 = vtanh.f32 %v3387_v55  ;;  %v3012_v23 = vmul.f32 %v2884_v26, %v9599_v30  ;;  %v6309_v42 = vld [vmem:[#allocation16 + $0x290] ss:$8 sps:$4 sm:$0xff]   ;;  %v6317_v26 = vld [vmem:[#allocation16 + $0x2a4] ss:$8 sps:$4 sm:$0xff]  }
 0x560   : > { %v3464_v38 = vmul.f32 0.7978846, %v3336_v36  ;;  %v3472_v11 = vmul.f32 0.7978846, %v3344_v13  ;;  %v3712_v20 = vadd.f32 1.0, %v6518_v1  ;;  %v3019_v9 = vmul.f32 %v2891_v35, %v9611_v51  ;;  %v10736_v35 = vld [vmem:[#allocation118_spill] sm:$0xff] }
 0x561   : > { %v3395_v41 = vmul.f32 0.7978846, %v3267_v15  ;;  %v2892_v60 = vmul.f32 0.044715, %v9625_v32  ;;  %v3832_v54 = vmul.f32 %v3704_v45, %v2808_v24  ;;  %v3335_v56 = vadd.f32 %v9420_v40, %v9344_v58 }
 0x562   : > { %4980 = vmatpush1.bf16.msra.mxu1 %v6303_v27  ;;  %6525 = vtanh.f32 %v3464_v38  ;;  %v3343_v55 = vadd.f32 %v9456_v3, %v9377_v2  ;;  %v3840_v63 = vmul.f32 %v3712_v20, %v2816_v62  ;;  %v2899_v15 = vmul.f32 0.044715, %v9645_v57 }
 0x563   : > { %4981 = vmatprep.subr.bf16.mxu1 %v6311_v12  ;;  %6527 = vtanh.f32 %v3472_v11  ;;  %v9659_v36 = vadd.f32 %v10736_v35, %v9548_v7  ;;  %v3463_v27 = vmul.f32 0.7978846, %v3335_v56  ;;  %v9663_v45 = vadd.f32 %v9379_v19, %v9534_v28  ;;  %v6315_v19 = vld [vmem:[#allocation16 + $0x2a0] ss:$8 sps:$4 sm:$0xff]  }
 0x564   : > { %v6520_v24 = vpop.eup %6519  ;;  %v3471_v13 = vmul.f32 0.7978846, %v3343_v55  ;;  %v9667_v40 = vadd.f32 %v9387_v61, %v9548_v7  ;;  %v3928_v3 = vpack.c.bf16 %v3840_v63, %v3832_v54  ;;  %6529 = vtanh.f32 %v3395_v41  ;;  %v6323_v63 = vld [vmem:[#allocation16 + $0x2b4] ss:$8 sps:$4 sm:$0xff]   ;;  %v10737_v55 = vld [vmem:[#allocation101_spill] sm:$0xff] }
 0x565   : > { %v3703_v62 = vadd.f32 1.0, %v6520_v24  ;;  %v2824_v12 = vmul.f32 0.5, %v9354_v34  ;;  %v9671_v38 = vmul.f32 %v3012_v23, %v9599_v30  ;;  %v3020_v11 = vmul.f32 %v2892_v60, %v9625_v32 }
 0x566   : > { %v6522_v1 = vpop.eup %6521  ;;  %4982 = vmatpush1.bf16.msra.mxu1 %v6309_v42  ;;  %v2832_v20 = vmul.f32 0.5, %v9393_v44  ;;  %6531 = vtanh.f32 %v3463_v27  ;;  %4922 = vmatprep.mubr.bf16.mxu1 %v3928_v3  ;;  %v9676_v61 = vmul.f32 %v3019_v9, %v9611_v51  ;;  %v2900_v34 = vmul.f32 0.044715, %v9659_v36  ;;  %v6329_v3 = vld [vmem:[#allocation16 + $0x2c4] ss:$8 sps:$4 sm:$0xff]  }
 0x567   : > { %v3711_v56 = vadd.f32 1.0, %v6522_v1  ;;  %4983 = vmatprep.subr.bf16.mxu1 %v6317_v26  ;;  %6533 = vtanh.f32 %v3471_v13  ;;  %v3027_v23 = vmul.f32 %v2899_v15, %v9645_v57  ;;  %v2907_v41 = vmul.f32 0.044715, %v9663_v45 }
 0x568   : > { %v2908_v60 = vmul.f32 0.044715, %v9667_v40  ;;  %v3352_v44 = vadd.f32 %v9488_v4, %v9412_v59  ;;  %v3831_v54 = vmul.f32 %v3703_v62, %v2807_v14  ;;  %v3360_v9 = vadd.f32 %v9539_v53, %v9470_v0  ;;  %v6321_v4 = vld [vmem:[#allocation16 + $0x2b0] ss:$8 sps:$4 sm:$0xff]  }
 0x569   : > { %v3839_v42 = vmul.f32 %v3711_v56, %v2815_v21  ;;  %v9688_v26 = vadd.f32 %v10737_v55, %v9534_v28  ;;  %v9690_v35 = vpop.eup %6523  ;;  %v9693_v15 = vmul.f32 %v3020_v11, %v9625_v32  ;;  %v2823_v24 = vmul.f32 0.5, %v9344_v58  ;;  %v10738_v58 = vld [vmem:[#allocation123_spill] sm:$0xff]  ;;  %v10739_v55 = vld [vmem:[#allocation142_spill] sm:$0xff] }
 0x56a   : > { %v2831_v27 = vmul.f32 0.5, %v9377_v2  ;;  %4984 = vmatpush1.bf16.msra.mxu1 %v6315_v19  ;;  %v3480_v14 = vmul.f32 0.7978846, %v3352_v44  ;;  %v3028_v13 = vmul.f32 %v2900_v34, %v9659_v36  ;;  %v3488_v53 = vmul.f32 0.7978846, %v3360_v9 }
 0x56b   : > { %v3927_v21 = vpack.c.bf16 %v3839_v42, %v3831_v54  ;;  %4985 = vmatprep.subr.bf16.mxu1 %v6323_v63  ;;  %v2915_v62 = vmul.f32 0.044715, %v9688_v26  ;;  %v9700_v56 = vmul.f32 %v3027_v23, %v9645_v57  ;;  %v3351_v11 = vadd.f32 %v10738_v58, %v9397_v16  ;;  %v6327_v54 = vld [vmem:[#allocation16 + $0x2c0] ss:$8 sps:$4 sm:$0xff]  }
 0x56c   : > { %v6526_v1 = vpop.eup %6525  ;;  %6535 = vtanh.f32 %v3480_v14  ;;  %v3359_v2 = vadd.f32 %v9507_v6, %v9432_v10  ;;  %v3035_v34 = vmul.f32 %v2907_v41, %v9663_v45  ;;  %v3036_v63 = vmul.f32 %v2908_v60, %v9667_v40 }
 0x56d   : > { %v6528_v19 = vpop.eup %6527  ;;  %4923 = vmatmul.mubr.bf16.gmra.mrb[48].mxu1 %v3927_v21  ;;  %v3720_v44 = vadd.f32 1.0, %v6526_v1  ;;  %6537 = vtanh.f32 %v3488_v53  ;;  %v3479_v23 = vmul.f32 0.7978846, %v3351_v11  ;;  %v9710_v14 = vadd.f32 %v10739_v55, %v9548_v7  ;;  %v6335_v53 = vld [vmem:[#allocation16 + $0x2d4] ss:$8 sps:$4 sm:$0xff]  }
 0x56e   : > { %v3728_v42 = vadd.f32 1.0, %v6528_v19  ;;  %4986 = vmatpush1.bf16.msra.mxu1 %v6321_v4  ;;  %v3487_v9 = vmul.f32 0.7978846, %v3359_v2  ;;  %v9712_v58 = vpop.eup %6529  ;;  %v9715_v6 = vmul.f32 %v3028_v13, %v9659_v36  ;;  %v2840_v21 = vmul.f32 0.5, %v9412_v59  ;;  %v10740_v2 = vld [vmem:[#allocation115_spill] sm:$0xff] }
 0x56f   : > { %v2848_v41 = vmul.f32 0.5, %v9470_v0  ;;  %4987 = vmatprep.subr.bf16.mxu1 %v6329_v3  ;;  %v3043_v60 = vmul.f32 %v2915_v62, %v9688_v26  ;;  %v3848_v1 = vmul.f32 %v3720_v44, %v2824_v12  ;;  %6539 = vtanh.f32 %v3479_v23  ;;  %v10741_v59 = vld [vmem:[#allocation143_spill] sm:$0xff] }
 0x570   : > { %v6532_v4 = vpop.eup %6531  ;;  %v3856_v11 = vmul.f32 %v3728_v42, %v2832_v20  ;;  %v9722_v19 = vadd.f32 %v10740_v2, %v9534_v28  ;;  %v9725_v13 = vmul.f32 %v3035_v34, %v9663_v45  ;;  %6541 = vtanh.f32 %v3487_v9  ;;  %v6333_v44 = vld [vmem:[#allocation16 + $0x2d0] ss:$8 sps:$4 sm:$0xff]  }
 0x571   : > { %v6534_v55 = vpop.eup %6533  ;;  %v3719_v22 = vadd.f32 1.0, %v6532_v4  ;;  %v9729_v0 = vadd.f32 %v10741_v59, %v9548_v7  ;;  %v9732_v12 = vmul.f32 %v3036_v63, %v9667_v40  ;;  %v2916_v20 = vmul.f32 0.044715, %v9710_v14  ;;  %v6341_v4 = vld [vmem:[#allocation16 + $0x2e4] ss:$8 sps:$4 sm:$0xff]  }
 0x572   : > { %v3936_v3 = vpack.c.bf16 %v3856_v11, %v3848_v1  ;;  %v3727_v62 = vadd.f32 1.0, %v6534_v55  ;;  %4988 = vmatpush1.bf16.msra.mxu1 %v6327_v54  ;;  %v9736_v42 = vmul.f32 %v3043_v60, %v9688_v26  ;;  %v2839_v34 = vmul.f32 0.5, %v9397_v16  ;;  %v10742_v16 = vld [vmem:[#allocation144_spill] sm:$0xff] }
 0x573   : > { %v2847_v23 = vmul.f32 0.5, %v9432_v10  ;;  %4989 = vmatprep.subr.bf16.mxu1 %v6335_v53  ;;  %v3368_v9 = vadd.f32 %v9556_v47, %v9482_v46  ;;  %v3847_v1 = vmul.f32 %v3719_v22, %v2823_v24  ;;  %v2923_v54 = vmul.f32 0.044715, %v9722_v19 }
 0x574   : > { %4932 = vmatprep.mubr.bf16.mxu1 %v3936_v3  ;;  %v3855_v63 = vmul.f32 %v3727_v62, %v2831_v27  ;;  %v3376_v11 = vadd.f32 %v9607_v17, %v9527_v18  ;;  %v2924_v60 = vmul.f32 0.044715, %v9729_v0  ;;  %v9748_v55 = vadd.f32 %v10742_v16, %v9534_v28  ;;  %v6339_v27 = vld [vmem:[#allocation16 + $0x2e0] ss:$8 sps:$4 sm:$0xff]   ;;  %v6347_v16 = vld [vmem:[#allocation16 + $0x2f4] ss:$8 sps:$4 sm:$0xff]  }
 0x575   : > { %v3496_v2 = vmul.f32 0.7978846, %v3368_v9  ;;  %v3367_v10 = vadd.f32 %v9553_v8, %v9474_v31  ;;  %v3044_v22 = vmul.f32 %v2916_v20, %v9710_v14  ;;  %v3375_v17 = vadd.f32 %v9604_v25, %v9523_v48 }
 0x576   : > { %v6536_v47 = vpop.eup %6535  ;;  %v3935_v53 = vpack.c.bf16 %v3855_v63, %v3847_v1  ;;  %4990 = vmatpush1.bf16.msra.mxu1 %v6333_v44  ;;  %v3504_v24 = vmul.f32 0.7978846, %v3376_v11  ;;  %v9756_v62 = vmul.f32 0.5, %v9482_v46  ;;  %v3051_v1 = vmul.f32 %v2923_v54, %v9722_v19 }
 0x577   : > { %v6538_v59 = vpop.eup %6537  ;;  %v3736_v3 = vadd.f32 1.0, %v6536_v47  ;;  %6543 = vtanh.f32 %v3496_v2  ;;  %4991 = vmatprep.subr.bf16.mxu1 %v6341_v4  ;;  %v3495_v9 = vmul.f32 0.7978846, %v3367_v10  ;;  %v3503_v20 = vmul.f32 0.7978846, %v3375_v17 }
 0x578   : > { %4933 = vmatmul.mubr.bf16.gmra.mrb[52].mxu1 %v3935_v53  ;;  %v3744_v8 = vadd.f32 1.0, %v6538_v59  ;;  %6545 = vtanh.f32 %v3504_v24  ;;  %v3052_v44 = vmul.f32 %v2924_v60, %v9729_v0  ;;  %v2864_v63 = vmul.f32 0.5, %v9527_v18  ;;  %v6345_v2 = vld [vmem:[#allocation16 + $0x2f0] ss:$8 sps:$4 sm:$0xff]   ;;  %v10743_v53 = vld [vmem:[#allocation141_spill] sm:$0xff] }
 0x579   : > { %v2931_v25 = vmul.f32 0.044715, %v9748_v55  ;;  %6547 = vtanh.f32 %v3495_v9  ;;  %v6540_v11 = vpop.eup %6539  ;;  %v3864_v46 = vmul.f32 %v3736_v3, %v2840_v21  ;;  %v9763_v4 = vmul.f32 %v3044_v22, %v9710_v14  ;;  %v10744_v60 = vld [vmem:[#allocation64_spill] sm:$0xff]  ;;  %v10745_v18 = vld [vmem:[#allocation73_spill] sm:$0xff]  ;;  %v10746_v59 = vld [vmem:[#allocation66_spill] sm:$0xff] }
 0x57a   : > { %v3872_v47 = vmul.f32 %v3744_v8, %v2848_v41  ;;  %6549 = vtanh.f32 %v3503_v20  ;;  %4992 = vmatpush1.bf16.msra.mxu1 %v6339_v27  ;;  %v6542_v10 = vpop.eup %6541  ;;  %v3735_v54 = vadd.f32 1.0, %v6540_v11  ;;  %v9767_v24 = vadd.f32 %v10743_v53, %v9548_v7  ;;  %v10747_v9 = vld [vmem:[#allocation74_spill] sm:$0xff] }
 0x57b   : > { %v3258_v17 = vadd.f32 %v10745_v18, %v10744_v60  ;;  %v3266_v39 = vadd.f32 %v10747_v9, %v10746_v59  ;;  %4993 = vmatprep.subr.bf16.mxu1 %v6347_v16  ;;  %v3743_v41 = vadd.f32 1.0, %v6542_v10  ;;  %v9774_v22 = vmul.f32 %v3051_v1, %v9722_v19 }
 0x57c   : > { %v3944_v21 = vpack.c.bf16 %v3872_v47, %v3864_v46  ;;  %v9778_v27 = vadd.f32 %v9485_v49, %v9534_v28  ;;  %v9781_v3 = vmul.f32 %v3052_v44, %v9729_v0  ;;  %v3059_v8 = vmul.f32 %v2931_v25, %v9748_v55  ;;  %v6672_v47 = vld [vmem:[#allocation16 + $0x304] ss:$8 sps:$4 sm:$0xff]  }
 0x57d   : > { %v3386_v20 = vmul.f32 0.7978846, %v3258_v17  ;;  %v3394_v11 = vmul.f32 0.7978846, %v3266_v39  ;;  %v3863_v53 = vmul.f32 %v3735_v54, %v2839_v34  ;;  %v3871_v18 = vmul.f32 %v3743_v41, %v2847_v23  ;;  %v10749_v17 = vld [vmem:[#allocation83_spill] sm:$0xff] }
 0x57e   : > { %4942 = vmatprep.mubr.bf16.mxu1 %v3944_v21  ;;  %v2855_v16 = vmul.f32 0.5, %v9474_v31  ;;  %4994 = vmatpush1.bf16.msra.mxu1 %v6345_v2  ;;  %v2939_v1 = vmul.f32 0.044715, %v9778_v27  ;;  %v2863_v46 = vmul.f32 0.5, %v9523_v48  ;;  %v2932_v49 = vmul.f32 0.044715, %v9767_v24 }
 0x57f   : > { %6551 = vtanh.f32 %v3386_v20  ;;  %5787 = vmatprep.subr.bf16.mxu1 %v6672_v47  ;;  %v3260_v44 = vadd.f32 %v9638_v37, %v9566_v52  ;;  %v3943_v25 = vpack.c.bf16 %v3871_v18, %v3863_v53  ;;  %v2746_v39 = vmul.f32 0.5, %v10744_v60  ;;  %v10750_v21 = vld [vmem:[#allocation86_spill] sm:$0xff] }
 0x580   : > { %6553 = vtanh.f32 %v3394_v11  ;;  %v3067_v34 = vmul.f32 %v2939_v1, %v9778_v27  ;;  %v9793_v23 = vmul.f32 %v3059_v8, %v9748_v55  ;;  %v3268_v48 = vadd.f32 %v9671_v38, %v9599_v30  ;;  %v10751_v1 = vld [vmem:[#allocation117_spill] sm:$0xff] }
 0x581   : > { %v6544_v31 = vpop.eup %6543  ;;  %v3388_v2 = vmul.f32 0.7978846, %v3260_v44  ;;  %v9799_v10 = vadd.f32 %v9501_v43, %v9534_v28  ;;  %4943 = vmatmul.mubr.bf16.gmra.mrb[56].mxu1 %v3943_v25  ;;  %v3641_v9 = vadd.f32 1.0, %v10749_v17  ;;  %v3649_v41 = vadd.f32 1.0, %v10750_v21  ;;  %v10753_v17 = vld [vmem:[#allocation72_spill] sm:$0xff] }
 0x582   : > { %10748 = vst [vmem:[#allocation105_spill] sm:$0xff] %v9793_v23  ;;  %v6546_v54 = vpop.eup %6545  ;;  %v3752_v37 = vadd.f32 1.0, %v6544_v31  ;;  %v3195_v60 = vmul.f32 %v3067_v34, %v9778_v27  ;;  %v3060_v11 = vmul.f32 %v2932_v49, %v9767_v24  ;;  %v3396_v53 = vmul.f32 0.7978846, %v3268_v48  ;;  %v10752_v48 = vld [vmem:[#allocation65_spill] sm:$0xff] }
 0x583   : > { %v6548_v20 = vpop.eup %6547  ;;  %v3760_v8 = vadd.f32 1.0, %v6546_v54  ;;  %6555 = vtanh.f32 %v3388_v2  ;;  %v9808_v47 = vadd.f32 %v10751_v1, %v9548_v7  ;;  %v2947_v44 = vmul.f32 0.044715, %v9799_v10 }
 0x584   : > { %v6550_v38 = vpop.eup %6549  ;;  %v3880_v18 = vmul.f32 %v3752_v37, %v9756_v62  ;;  %v3751_v43 = vadd.f32 1.0, %v6548_v20  ;;  %v3323_v31 = vadd.f32 %v3195_v60, %v9778_v27  ;;  %6557 = vtanh.f32 %v3396_v53  ;;  %v10754_v60 = vld [vmem:[#allocation126_spill] sm:$0xff] }
 0x585   : > { %v3888_v25 = vmul.f32 %v3760_v8, %v2864_v63  ;;  %v3759_v34 = vadd.f32 1.0, %v6550_v38  ;;  %v3075_v49 = vmul.f32 %v2947_v44, %v9799_v10  ;;  %v3769_v2 = vmul.f32 %v3641_v9, %v10752_v48  ;;  %v10758_v48 = vld [vmem:[#allocation89_spill] sm:$0xff] }
 0x586   : > { %v3879_v54 = vmul.f32 %v3751_v43, %v2855_v16  ;;  %v3777_v21 = vmul.f32 %v3649_v41, %v10753_v17  ;;  %v3643_v20 = vadd.f32 1.0, %v9690_v35  ;;  %v3651_v1 = vadd.f32 1.0, %v9712_v58 }
 0x587   : > { %v3952_v62 = vpack.c.bf16 %v3888_v25, %v3880_v18  ;;  %v3887_v37 = vmul.f32 %v3759_v34, %v2863_v46  ;;  %v2940_v23 = vmul.f32 0.044715, %v9808_v47  ;;  %v3203_v63 = vmul.f32 %v3075_v49, %v9799_v10  ;;  %v10757_v49 = vld [vmem:[#allocation75_spill] sm:$0xff] }
 0x588   : > { %v3897_v8 = vpack.c.bf16 %v3777_v21, %v3769_v2  ;;  %v9821_v16 = vadd.f32 %v10754_v60, %v9548_v7  ;;  %v2754_v41 = vmul.f32 0.5, %v10746_v59  ;;  %v9825_v46 = vmul.f32 %v3643_v20, %v9616_v29  ;;  %v10755_v59 = vld [vmem:[#allocation71_spill] sm:$0xff] }
 0x589   : > { %v6552_v53 = vpop.eup %6551  ;;  %4952 = vmatprep.mubr.bf16.mxu1 %v3952_v62  ;;  %v3951_v9 = vpack.c.bf16 %v3887_v37, %v3879_v54  ;;  %v9828_v35 = vmul.f32 %v3651_v1, %v9641_v50  ;;  %v9831_v38 = vmul.f32 %v3060_v11, %v9767_v24  ;;  %v3451_v43 = vmul.f32 0.7978846, %v3323_v31  ;;  %v10756_v54 = vld [vmem:[#allocation81_spill] sm:$0xff] }
 0x58a   : > { %v6554_v58 = vpop.eup %6553  ;;  %v3642_v18 = vadd.f32 1.0, %v6552_v53  ;;  %v3331_v44 = vadd.f32 %v3203_v63, %v9799_v10  ;;  %v3274_v29 = vadd.f32 %v10756_v54, %v10755_v59  ;;  %v3282_v50 = vadd.f32 %v10758_v48, %v10757_v49  ;;  %v10759_v53 = vld [vmem:[#allocation29_spill] sm:$0xff] }
 0x58b   : > { %4953 = vmatmul.mubr.bf16.gmra.mrb[60].mxu1 %v3951_v9  ;;  %v3650_v25 = vadd.f32 1.0, %v6554_v58  ;;  %v3899_v34 = vpack.c.bf16 %v9828_v35, %v9825_v46  ;;  %v9841_v2 = vmul.f32 0.5, %v9778_v27  ;;  %v3068_v11 = vmul.f32 %v2940_v23, %v9808_v47 }
 0x58c   : > { %v2748_v31 = vmul.f32 0.5, %v9566_v52  ;;  %v2948_v17 = vmul.f32 0.044715, %v9821_v16  ;;  %v3770_v62 = vmul.f32 %v3642_v18, %v2746_v39  ;;  %v3402_v20 = vmul.f32 0.7978846, %v3274_v29  ;;  %v10760_v52 = vld [vmem:[#allocation84_spill] sm:$0xff] }
 0x58d   : > { %v6556_v21 = vpop.eup %6555  ;;  %v3778_v37 = vmul.f32 %v3650_v25, %v2754_v41  ;;  %v3410_v1 = vmul.f32 0.7978846, %v3282_v50  ;;  %6559 = vtanh.f32 %v3451_v43  ;;  %v2756_v63 = vmul.f32 0.5, %v9599_v30 }
 0x58e   : > { %v3644_v60 = vadd.f32 1.0, %v6556_v21  ;;  %v9849_v9 = vadd.f32 %v10759_v53, %v9534_v28  ;;  %v6558_v27 = vpop.eup %6557  ;;  %v3459_v23 = vmul.f32 0.7978846, %v3331_v44  ;;  %6561 = vtanh.f32 %v3402_v20 }
 0x58f   : > { %v3898_v46 = vpack.c.bf16 %v3778_v37, %v3770_v62  ;;  %v9853_v35 = vadd.f32 %v10760_v52, %v9548_v7  ;;  %v9856_v39 = vmul.f32 %v3068_v11, %v9808_v47  ;;  %v3652_v41 = vadd.f32 1.0, %v6558_v27  ;;  %v10765_v37 = vld [vmem:[#allocation69_spill] sm:$0xff] }
 0x590   : > { %v9859_v58 = vmul.f32 0.5, %v9799_v10  ;;  %6563 = vtanh.f32 %v3410_v1  ;;  %v3076_v30 = vmul.f32 %v2948_v17, %v9821_v16  ;;  %v9863_v18 = vmul.f32 0.5, %v10755_v59  ;;  %v6673_v17 = vld [vmem:[#allocation16 + $0x300] ss:$8 sps:$4 sm:$0xff]  }
 0x591   : > { %4995 = vmatprep.mubr.bf16.mxu1 %v3898_v46  ;;  %v3276_v43 = vadd.f32 %v9693_v15, %v9625_v32  ;;  %v3284_v44 = vadd.f32 %v9715_v6, %v9659_v36  ;;  %v3772_v25 = vmul.f32 %v3644_v60, %v2748_v31  ;;  %v3780_v54 = vmul.f32 %v3652_v41, %v2756_v63  ;;  %v10761_v15 = vld [vmem:[#allocation140_spill] sm:$0xff]  ;;  %v10763_v6 = vld [vmem:[#allocation67_spill] sm:$0xff] }
 0x592   : > { %v2770_v29 = vmul.f32 0.5, %v10757_v49  ;;  %v2955_v10 = vmul.f32 0.044715, %v9849_v9  ;;  %6565 = vtanh.f32 %v3459_v23  ;;  %v2956_v48 = vmul.f32 0.044715, %v9853_v35  ;;  %v10764_v31 = vld [vmem:[#allocation76_spill] sm:$0xff] }
 0x593   : > { %4996 = vmatmul.mubr.bf16.vlgmr.msra.gmra.mrb[32].mxu1 %v3897_v8  ;;  %v3404_v50 = vmul.f32 0.7978846, %v3276_v43  ;;  %v3412_v11 = vmul.f32 0.7978846, %v3284_v44  ;;  %v3900_v59 = vpack.c.bf16 %v3780_v54, %v3772_v25  ;;  %v9874_v21 = vadd.f32 %v10761_v15, %v9534_v28  ;;  %v10766_v49 = vld [vmem:[#allocation82_spill] sm:$0xff]  ;;  %v10769_v54 = vld [vmem:[#allocation92_spill] sm:$0xff] }
 0x594   : > { %5803 = vmatpush1.bf16.msra.mxu1 %v6673_v17  ;;  %v3273_v62 = vadd.f32 %v10764_v31, %v10763_v6  ;;  %v3281_v20 = vadd.f32 %v10766_v49, %v10765_v37  ;;  %v9881_v1 = vmul.f32 %v3076_v30, %v9821_v16  ;;  %v6674_v8 = vld [vmem:[#allocation16 + $0x314] ss:$8 sps:$4 sm:$0xff]   ;;  %v9884_v63 = vmul.f32 0.5, %v9625_v32  ;;  %v10767_v32 = vld [vmem:[#allocation145_spill] sm:$0xff]  ;;  %v10772_v49 = vld [vmem:[#allocation146_spill] sm:$0xff] }
 0x595   : > { %10762 = vst [vmem:[#allocation118_spill] sm:$0xff] %v9874_v21  ;;  %5788 = vmatprep.subr.bf16.mxu1 %v6674_v8  ;;  %6567 = vtanh.f32 %v3404_v50  ;;  %v3275_v60 = vadd.f32 %v9676_v61, %v9611_v51  ;;  %5108 = vmatprep.mubr.bf16.mxu0 %v3900_v59  ;;  %v3083_v53 = vmul.f32 %v2955_v10, %v9849_v9  ;;  %v6675_v61 = vld [vmem:[#allocation16 + $0x310] ss:$8 sps:$4 sm:$0xff]   ;;  %v9899_v44 = vmul.f32 0.5, %v9659_v36 }
 0x596   : > { %6569 = vtanh.f32 %v3412_v11  ;;  %v3401_v27 = vmul.f32 0.7978846, %v3273_v62  ;;  %v3409_v46 = vmul.f32 0.7978846, %v3281_v20  ;;  %5109 = vmatmul.mubr.bf16.vlgmr.msra.gmra.mrb[128].mxu0 %v3899_v34  ;;  %v3084_v23 = vmul.f32 %v2956_v48, %v9853_v35  ;;  %v10768_v34 = vld [vmem:[#allocation78_spill] sm:$0xff]  ;;  %v10770_v59 = vld [vmem:[#allocation80_spill] sm:$0xff] }
 0x597   : > { %v3283_v52 = vadd.f32 %v9700_v56, %v9645_v57  ;;  %v3403_v41 = vmul.f32 0.7978846, %v3275_v60  ;;  %v9894_v30 = vadd.f32 %v10767_v32, %v9548_v7  ;;  %v9896_v43 = vpop.eup %6559  ;;  %v2963_v25 = vmul.f32 0.044715, %v9874_v21  ;;  %v6676_v56 = vld [vmem:[#allocation16 + $0x324] ss:$8 sps:$4 sm:$0xff]  }
 0x598   : > { %5804 = vmatpush1.bf16.msra.mxu1 %v6675_v61  ;;  %6571 = vtanh.f32 %v3401_v27  ;;  %v3290_v10 = vadd.f32 %v10769_v54, %v10768_v34  ;;  %v6562_v48 = vpop.eup %6561  ;;  %v10771_v17 = vld [vmem:[#allocation95_spill] sm:$0xff]  ;;  %v9909_v20 = vadd.f32 %v10772_v49, %v9534_v28  ;;  %v9912_v60 = vmul.f32 %v3083_v53, %v9849_v9  ;;  %v6677_v61 = vld [vmem:[#allocation16 + $0x320] ss:$8 sps:$4 sm:$0xff]  }
 0x599   : > { %5789 = vmatprep.subr.bf16.mxu1 %v6676_v56  ;;  %6573 = vtanh.f32 %v3409_v46  ;;  %v3411_v50 = vmul.f32 0.7978846, %v3283_v52  ;;  %v2964_v11 = vmul.f32 0.044715, %v9894_v30  ;;  %v3298_v15 = vadd.f32 %v10771_v17, %v10770_v59 }
 0x59a   : > { %v6564_v31 = vpop.eup %6563  ;;  %v3658_v62 = vadd.f32 1.0, %v6562_v48  ;;  %6575 = vtanh.f32 %v3403_v41  ;;  %v3418_v36 = vmul.f32 0.7978846, %v3290_v10  ;;  %10773 = vst [vmem:[#allocation101_spill] sm:$0xff] %v9912_v60  ;;  %v9915_v46 = vmul.f32 %v3084_v23, %v9853_v35  ;;  %v6678_v48 = vld [vmem:[#allocation16 + $0x334] ss:$8 sps:$4 sm:$0xff]  }
 0x59b   : > { %v3666_v8 = vadd.f32 1.0, %v6564_v31  ;;  %6577 = vtanh.f32 %v3411_v50  ;;  %v3426_v27 = vmul.f32 0.7978846, %v3298_v15  ;;  %v3091_v52 = vmul.f32 %v2963_v25, %v9874_v21 }
 0x59c   : > { %v2761_v32 = vmul.f32 0.5, %v10763_v6  ;;  %5805 = vmatpush1.bf16.msra.mxu1 %v6677_v61  ;;  %6579 = vtanh.f32 %v3418_v36  ;;  %v9919_v41 = vpop.eup %6565  ;;  %v3786_v54 = vmul.f32 %v3658_v62, %v9863_v18  ;;  %v3092_v53 = vmul.f32 %v2964_v11, %v9894_v30  ;;  %v10775_v62 = vld [vmem:[#allocation147_spill] sm:$0xff] }
 0x59d   : > { %v3794_v10 = vmul.f32 %v3666_v8, %v2770_v29  ;;  %6581 = vtanh.f32 %v3426_v27  ;;  %5790 = vmatprep.subr.bf16.mxu1 %v6678_v48  ;;  %v2769_v23 = vmul.f32 0.5, %v10765_v37  ;;  %v2763_v56 = vmul.f32 0.5, %v9611_v51  ;;  %v6679_v51 = vld [vmem:[#allocation16 + $0x330] ss:$8 sps:$4 sm:$0xff]  }
 0x59e   : > { %v2971_v25 = vmul.f32 0.044715, %v9909_v20  ;;  %v3292_v6 = vadd.f32 %v9732_v12, %v9667_v40  ;;  %v2771_v15 = vmul.f32 0.5, %v9645_v57  ;;  %v9930_v18 = vmul.f32 0.5, %v10768_v34 }
 0x59f   : > { %v6568_v50 = vpop.eup %6567  ;;  %v3906_v17 = vpack.c.bf16 %v3794_v10, %v3786_v54  ;;  %v3300_v29 = vadd.f32 %v9763_v4, %v9710_v14  ;;  %v9935_v37 = vmul.f32 %v3091_v52, %v9874_v21  ;;  %v9939_v12 = vadd.f32 %v10775_v62, %v9548_v7  ;;  %v6680_v4 = vld [vmem:[#allocation16 + $0x344] ss:$8 sps:$4 sm:$0xff]   ;;  %v10777_v10 = vld [vmem:[#allocation91_spill] sm:$0xff] }
 0x5a0   : > { %v6570_v11 = vpop.eup %6569  ;;  %v3660_v31 = vadd.f32 1.0, %v6568_v50  ;;  %5806 = vmatpush1.bf16.msra.mxu1 %v6679_v51  ;;  %v3420_v36 = vmul.f32 0.7978846, %v3292_v6  ;;  %v9942_v34 = vmul.f32 %v3092_v53, %v9894_v30  ;;  %v2786_v49 = vmul.f32 0.5, %v10770_v59  ;;  %v10776_v54 = vld [vmem:[#allocation77_spill] sm:$0xff]  ;;  %v10778_v51 = vld [vmem:[#allocation79_spill] sm:$0xff] }
 0x5a1   : > { %10774 = vst [vmem:[#allocation123_spill] sm:$0xff] %v9935_v37  ;;  %5005 = vmatprep.mubr.bf16.mxu1 %v3906_v17  ;;  %v3668_v57 = vadd.f32 1.0, %v6570_v11  ;;  %5791 = vmatprep.subr.bf16.mxu1 %v6680_v4  ;;  %v3428_v8 = vmul.f32 0.7978846, %v3300_v29  ;;  %v3099_v52 = vmul.f32 %v2971_v25, %v9909_v20  ;;  %v9947_v61 = vmul.f32 0.5, %v9667_v40  ;;  %v10779_v25 = vld [vmem:[#allocation93_spill] sm:$0xff] }
 0x5a2   : > { %v6572_v27 = vpop.eup %6571  ;;  %6583 = vtanh.f32 %v3420_v36  ;;  %v3289_v48 = vadd.f32 %v10777_v10, %v10776_v54  ;;  %v3788_v50 = vmul.f32 %v3660_v31, %v9884_v63  ;;  %v2972_v29 = vmul.f32 0.044715, %v9939_v12  ;;  %v6681_v4 = vld [vmem:[#allocation16 + $0x340] ss:$8 sps:$4 sm:$0xff]  }
 0x5a3   : > { %v6574_v6 = vpop.eup %6573  ;;  %v3796_v53 = vmul.f32 %v3668_v57, %v9899_v44  ;;  %v3657_v17 = vadd.f32 1.0, %v6572_v27  ;;  %6585 = vtanh.f32 %v3428_v8  ;;  %v3297_v62 = vadd.f32 %v10779_v25, %v10778_v51  ;;  %v10780_v63 = vld [vmem:[#allocation110_spill] sm:$0xff]  ;;  %v6682_v44 = vld [vmem:[#allocation16 + $0x354] ss:$8 sps:$4 sm:$0xff]  }
 0x5a4   : > { %v6576_v59 = vpop.eup %6575  ;;  %v3665_v11 = vadd.f32 1.0, %v6574_v6  ;;  %v3417_v40 = vmul.f32 0.7978846, %v3289_v48  ;;  %5807 = vmatpush1.bf16.msra.mxu1 %v6681_v4  ;;  %v9958_v31 = vadd.f32 %v10780_v63, %v9534_v28  ;;  %v2788_v4 = vmul.f32 0.5, %v9710_v14 }
 0x5a5   : > { %v6578_v36 = vpop.eup %6577  ;;  %v3908_v37 = vpack.c.bf16 %v3796_v53, %v3788_v50  ;;  %v3785_v10 = vmul.f32 %v3657_v17, %v2761_v32  ;;  %v3659_v21 = vadd.f32 1.0, %v6576_v59  ;;  %5792 = vmatprep.subr.bf16.mxu1 %v6682_v44  ;;  %v3425_v6 = vmul.f32 0.7978846, %v3297_v62  ;;  %v6683_v59 = vld [vmem:[#allocation16 + $0x350] ss:$8 sps:$4 sm:$0xff]  }
 0x5a6   : > { %v6580_v57 = vpop.eup %6579  ;;  %v3793_v8 = vmul.f32 %v3665_v11, %v2769_v23  ;;  %v3667_v27 = vadd.f32 1.0, %v6578_v36  ;;  %6587 = vtanh.f32 %v3417_v40  ;;  %v3291_v32 = vadd.f32 %v9725_v13, %v9663_v45  ;;  %v10782_v36 = vld [vmem:[#allocation103_spill] sm:$0xff] }
 0x5a7   : > { %v6582_v60 = vpop.eup %6581  ;;  %5118 = vmatprep.mubr.bf16.mxu0 %v3908_v37  ;;  %v3787_v48 = vmul.f32 %v3659_v21, %v2763_v56  ;;  %v3674_v25 = vadd.f32 1.0, %v6580_v57  ;;  %6589 = vtanh.f32 %v3425_v6  ;;  %v2979_v23 = vmul.f32 0.044715, %v9958_v31  ;;  %v6684_v37 = vld [vmem:[#allocation16 + $0x364] ss:$8 sps:$4 sm:$0xff]  }
 0x5a8   : > { %v3905_v50 = vpack.c.bf16 %v3793_v8, %v3785_v10  ;;  %v3795_v53 = vmul.f32 %v3667_v27, %v2771_v15  ;;  %v3682_v17 = vadd.f32 1.0, %v6582_v60  ;;  %5808 = vmatpush1.bf16.msra.mxu1 %v6683_v59  ;;  %v9965_v11 = vmul.f32 0.5, %v10776_v54  ;;  %v10781_v54 = vld [vmem:[#allocation87_spill] sm:$0xff]  ;;  %v10783_v57 = vld [vmem:[#allocation94_spill] sm:$0xff] }
 0x5a9   : > { %v3299_v21 = vadd.f32 %v9736_v42, %v9688_v26  ;;  %v3419_v56 = vmul.f32 0.7978846, %v3291_v32  ;;  %5793 = vmatprep.subr.bf16.mxu1 %v6684_v37  ;;  %v3802_v13 = vmul.f32 %v3674_v25, %v9930_v18  ;;  %v9972_v60 = vadd.f32 %v9595_v33, %v9548_v7  ;;  %v10784_v18 = vld [vmem:[#allocation109_spill] sm:$0xff]  ;;  %v10785_v59 = vld [vmem:[#allocation98_spill] sm:$0xff] }
 0x5aa   : > { %5006 = vmatmul.mubr.bf16.gmra.mrb[36].mxu1 %v3905_v50  ;;  %v3907_v14 = vpack.c.bf16 %v3795_v53, %v3787_v48  ;;  %v3810_v15 = vmul.f32 %v3682_v17, %v2786_v49  ;;  %v3100_v62 = vmul.f32 %v2972_v29, %v9939_v12  ;;  %v3306_v10 = vadd.f32 %v10782_v36, %v10781_v54  ;;  %v6685_v48 = vld [vmem:[#allocation16 + $0x360] ss:$8 sps:$4 sm:$0xff]   ;;  %v6686_v53 = vld [vmem:[#allocation16 + $0x374] ss:$8 sps:$4 sm:$0xff]  }
 0x5ab   : > { %v3427_v40 = vmul.f32 0.7978846, %v3299_v21  ;;  %6591 = vtanh.f32 %v3419_v56  ;;  %v9978_v44 = vmul.f32 %v3099_v52, %v9909_v20  ;;  %v3314_v49 = vadd.f32 %v10784_v18, %v10783_v57 }
 0x5ac   : > { %v6584_v42 = vpop.eup %6583  ;;  %5119 = vmatmul.mubr.bf16.gmra.mrb[132].mxu0 %v3907_v14  ;;  %v3914_v63 = vpack.c.bf16 %v3810_v15, %v3802_v13  ;;  %v9984_v33 = vadd.f32 %v9619_v5, %v9534_v28  ;;  %v3107_v27 = vmul.f32 %v2979_v23, %v9958_v31  ;;  %v3434_v6 = vmul.f32 0.7978846, %v3306_v10  ;;  %5809 = vmatpush1.bf16.msra.mxu1 %v6685_v48 }
 0x5ad   : > { %v6586_v8 = vpop.eup %6585  ;;  %v3676_v29 = vadd.f32 1.0, %v6584_v42  ;;  %6593 = vtanh.f32 %v3427_v40  ;;  %v2785_v52 = vmul.f32 0.5, %v10778_v51  ;;  %v2980_v32 = vmul.f32 0.044715, %v9972_v60  ;;  %5794 = vmatprep.subr.bf16.mxu1 %v6686_v53  ;;  %v6688_v42 = vld [vmem:[#allocation16 + $0x384] ss:$8 sps:$4 sm:$0xff]  }
 0x5ae   : > { %5015 = vmatprep.mubr.bf16.mxu1 %v3914_v63  ;;  %v3684_v25 = vadd.f32 1.0, %v6586_v8  ;;  %v3442_v50 = vmul.f32 0.7978846, %v3314_v49  ;;  %v9990_v5 = vmul.f32 %v3100_v62, %v9939_v12  ;;  %v2779_v17 = vmul.f32 0.5, %v9663_v45  ;;  %v6687_v62 = vld [vmem:[#allocation16 + $0x370] ss:$8 sps:$4 sm:$0xff]  }
 0x5af   : > { %6595 = vtanh.f32 %v3434_v6  ;;  %v9995_v23 = vadd.f32 %v10785_v59, %v9548_v7  ;;  %v3804_v56 = vmul.f32 %v3676_v29, %v9947_v61  ;;  %v2987_v51 = vmul.f32 0.044715, %v9984_v33 }
 0x5b0   : > { %v6588_v21 = vpop.eup %6587  ;;  %v3812_v37 = vmul.f32 %v3684_v25, %v2788_v4  ;;  %6597 = vtanh.f32 %v3442_v50  ;;  %v10000_v14 = vmul.f32 %v3107_v27, %v9958_v31  ;;  %v3308_v15 = vadd.f32 %v9781_v3, %v9729_v0  ;;  %5810 = vmatpush1.bf16.msra.mxu1 %v6687_v62  ;;  %v10787_v27 = vld [vmem:[#allocation99_spill] sm:$0xff] }
 0x5b1   : > { %v3673_v13 = vadd.f32 1.0, %v6588_v21  ;;  %v3316_v45 = vadd.f32 %v9831_v38, %v9767_v24  ;;  %v6590_v40 = vpop.eup %6589  ;;  %v2787_v61 = vmul.f32 0.5, %v9688_v26  ;;  %v3108_v4 = vmul.f32 %v2980_v32, %v9972_v60  ;;  %5795 = vmatprep.subr.bf16.mxu1 %v6688_v42  ;;  %v10786_v26 = vld [vmem:[#allocation85_spill] sm:$0xff]  ;;  %v10788_v32 = vld [vmem:[#allocation90_spill] sm:$0xff] }
 0x5b2   : > { %v3916_v36 = vpack.c.bf16 %v3812_v37, %v3804_v56  ;;  %v2794_v10 = vmul.f32 0.5, %v10781_v54  ;;  %v3681_v63 = vadd.f32 1.0, %v6590_v40  ;;  %v2802_v18 = vmul.f32 0.5, %v10783_v57  ;;  %v10789_v57 = vld [vmem:[#allocation107_spill] sm:$0xff]  ;;  %v10791_v42 = vld [vmem:[#allocation105_spill] sm:$0xff] }
 0x5b3   : > { %v10011_v3 = vmul.f32 0.5, %v9729_v0  ;;  %v3436_v49 = vmul.f32 0.7978846, %v3308_v15  ;;  %v3115_v38 = vmul.f32 %v2987_v51, %v9984_v33  ;;  %v2988_v8 = vmul.f32 0.044715, %v9995_v23  ;;  %v10790_v15 = vld [vmem:[#allocation137_spill] sm:$0xff] }
 0x5b4   : > { %5128 = vmatprep.mubr.bf16.mxu0 %v3916_v36  ;;  %v3444_v29 = vmul.f32 0.7978846, %v3316_v45  ;;  %v3305_v6 = vadd.f32 %v10787_v27, %v10786_v26  ;;  %v3801_v54 = vmul.f32 %v3673_v13, %v9965_v11  ;;  %v3809_v25 = vmul.f32 %v3681_v63, %v2785_v52  ;;  %v6689_v0 = vld [vmem:[#allocation16 + $0x380] ss:$8 sps:$4 sm:$0xff]   ;;  %v6690_v56 = vld [vmem:[#allocation16 + $0x394] ss:$8 sps:$4 sm:$0xff]  }
 0x5b5   : > { %v6592_v48 = vpop.eup %6591  ;;  %6599 = vtanh.f32 %v3436_v49  ;;  %v3313_v50 = vadd.f32 %v10789_v57, %v10788_v32  ;;  %5811 = vmatpush1.bf16.msra.mxu1 %v6689_v0  ;;  %v10021_v59 = vmul.f32 %v3108_v4, %v9972_v60  ;;  %v10025_v11 = vadd.f32 %v10790_v15, %v9534_v28  ;;  %v10793_v0 = vld [vmem:[#allocation114_spill] sm:$0xff] }
 0x5b6   : > { %v3675_v53 = vadd.f32 1.0, %v6592_v48  ;;  %6601 = vtanh.f32 %v3444_v29  ;;  %v3433_v21 = vmul.f32 0.7978846, %v3305_v6  ;;  %5796 = vmatprep.subr.bf16.mxu1 %v6690_v56  ;;  %v3913_v51 = vpack.c.bf16 %v3809_v25, %v3801_v54 }
 0x5b7   : > { %v6594_v37 = vpop.eup %6593  ;;  %v3441_v52 = vmul.f32 0.7978846, %v3313_v50  ;;  %v3307_v13 = vadd.f32 %v9774_v22, %v9722_v19  ;;  %v3116_v62 = vmul.f32 %v2988_v8, %v9995_v23  ;;  %v2804_v40 = vmul.f32 0.5, %v9767_v24  ;;  %v6691_v8 = vld [vmem:[#allocation16 + $0x390] ss:$8 sps:$4 sm:$0xff]  }
 0x5b8   : > { %v3683_v45 = vadd.f32 1.0, %v6594_v37  ;;  %6603 = vtanh.f32 %v3433_v21  ;;  %5016 = vmatmul.mubr.bf16.gmra.mrb[40].mxu1 %v3913_v51  ;;  %v10032_v4 = vmul.f32 %v3115_v38, %v9984_v33  ;;  %v3315_v28 = vadd.f32 %v10791_v42, %v9748_v55  ;;  %v6692_v38 = vld [vmem:[#allocation16 + $0x3a4] ss:$8 sps:$4 sm:$0xff]   ;;  %v10792_v50 = vld [vmem:[#allocation100_spill] sm:$0xff] }
 0x5b9   : > { %v6596_v36 = vpop.eup %6595  ;;  %6605 = vtanh.f32 %v3441_v52  ;;  %v3435_v63 = vmul.f32 0.7978846, %v3307_v13  ;;  %v3803_v29 = vmul.f32 %v3675_v53, %v2779_v17  ;;  %v2793_v6 = vmul.f32 0.5, %v10786_v26  ;;  %5812 = vmatpush1.bf16.msra.mxu1 %v6691_v8  ;;  %v10795_v53 = vld [vmem:[#allocation122_spill] sm:$0xff]  ;;  %v10796_v51 = vld [vmem:[#allocation112_spill] sm:$0xff] }
 0x5ba   : > { %v6598_v49 = vpop.eup %6597  ;;  %v3811_v27 = vmul.f32 %v3683_v45, %v2787_v61  ;;  %v3690_v22 = vadd.f32 1.0, %v6596_v36  ;;  %v2995_v48 = vmul.f32 0.044715, %v10025_v11  ;;  %v3443_v54 = vmul.f32 0.7978846, %v3315_v28  ;;  %5797 = vmatprep.subr.bf16.mxu1 %v6692_v38  ;;  %v10794_v61 = vld [vmem:[#allocation106_spill] sm:$0xff] }
 0x5bb   : > { %v3698_v24 = vadd.f32 1.0, %v6598_v49  ;;  %6607 = vtanh.f32 %v3435_v63  ;;  %v10039_v57 = vmul.f32 %v3116_v62, %v9995_v23  ;;  %v3322_v17 = vadd.f32 %v10793_v0, %v10792_v50  ;;  %v10797_v45 = vld [vmem:[#allocation97_spill] sm:$0xff]  ;;  %v10798_v62 = vld [vmem:[#allocation111_spill] sm:$0xff]  ;;  %v10800_v49 = vld [vmem:[#allocation116_spill] sm:$0xff] }
 0x5bc   : > { %v3915_v25 = vpack.c.bf16 %v3811_v27, %v3803_v29  ;;  %v3330_v21 = vadd.f32 %v10795_v53, %v10794_v61  ;;  %v3818_v26 = vmul.f32 %v3690_v22, %v2794_v10  ;;  %v2801_v37 = vmul.f32 0.5, %v10788_v32  ;;  %v6693_v42 = vld [vmem:[#allocation16 + $0x3a0] ss:$8 sps:$4 sm:$0xff]   ;;  %v6694_v27 = vld [vmem:[#allocation16 + $0x3b4] ss:$8 sps:$4 sm:$0xff]  }
 0x5bd   : > { %v3826_v56 = vmul.f32 %v3698_v24, %v2802_v18  ;;  %6609 = vtanh.f32 %v3443_v54  ;;  %v10048_v15 = vadd.f32 %v10796_v51, %v9548_v7  ;;  %v3450_v52 = vmul.f32 0.7978846, %v3322_v17  ;;  %5813 = vmatpush1.bf16.msra.mxu1 %v6693_v42  ;;  %v10799_v32 = vld [vmem:[#allocation102_spill] sm:$0xff] }
 0x5be   : > { %5129 = vmatmul.mubr.bf16.gmra.mrb[136].mxu0 %v3915_v25  ;;  %v3458_v13 = vmul.f32 0.7978846, %v3330_v21  ;;  %v3321_v36 = vadd.f32 %v10798_v62, %v10797_v45  ;;  %v10053_v10 = vmul.f32 %v2995_v48, %v10025_v11  ;;  %v2795_v18 = vmul.f32 0.5, %v9722_v19  ;;  %5798 = vmatprep.subr.bf16.mxu1 %v6694_v27  ;;  %v10801_v25 = vld [vmem:[#allocation113_spill] sm:$0xff]  ;;  %v10803_v21 = vld [vmem:[#allocation120_spill] sm:$0xff] }
 0x5bf   : > { %v6600_v28 = vpop.eup %6599  ;;  %v3922_v63 = vpack.c.bf16 %v3826_v56, %v3818_v26  ;;  %v3329_v29 = vadd.f32 %v10800_v49, %v10799_v32  ;;  %v2803_v8 = vmul.f32 0.5, %v9748_v55  ;;  %6611 = vtanh.f32 %v3450_v52  ;;  %v10802_v48 = vld [vmem:[#allocation125_spill] sm:$0xff]  ;;  %v10804_v26 = vld [vmem:[#allocation130_spill] sm:$0xff]  ;;  %v10806_v49 = vld [vmem:[#allocation124_spill] sm:$0xff] }
 0x5c0   : > { %v6602_v7 = vpop.eup %6601  ;;  %v3692_v22 = vadd.f32 1.0, %v6600_v28  ;;  %v3449_v24 = vmul.f32 0.7978846, %v3321_v36  ;;  %6613 = vtanh.f32 %v3458_v13  ;;  %v3338_v0 = vadd.f32 %v10802_v48, %v10801_v25  ;;  %v6695_v51 = vld [vmem:[#allocation16 + $0x3b0] ss:$8 sps:$4 sm:$0xff]  }
 0x5c1   : > { %5025 = vmatprep.mubr.bf16.mxu1 %v3922_v63  ;;  %v3700_v54 = vadd.f32 1.0, %v6602_v7  ;;  %v3457_v38 = vmul.f32 0.7978846, %v3329_v29  ;;  %v2996_v53 = vmul.f32 0.044715, %v10048_v15  ;;  %v3346_v56 = vadd.f32 %v10804_v26, %v10803_v21  ;;  %5814 = vmatpush1.bf16.msra.mxu1 %v6695_v51  ;;  %v10808_v48 = vld [vmem:[#allocation128_spill] sm:$0xff] }
 0x5c2   : > { %v6604_v17 = vpop.eup %6603  ;;  %v3820_v19 = vmul.f32 %v3692_v22, %v10011_v3  ;;  %6615 = vtanh.f32 %v3449_v24  ;;  %v3466_v13 = vmul.f32 0.7978846, %v3338_v0  ;;  %v6696_v36 = vld [vmem:[#allocation16 + $0x3c4] ss:$8 sps:$4 sm:$0xff]   ;;  %v2810_v28 = vmul.f32 0.5, %v10792_v50  ;;  %v10805_v3 = vld [vmem:[#allocation108_spill] sm:$0xff] }
 0x5c3   : > { %v6606_v55 = vpop.eup %6605  ;;  %v3828_v52 = vmul.f32 %v3700_v54, %v2804_v40  ;;  %v3689_v62 = vadd.f32 1.0, %v6604_v17  ;;  %6617 = vtanh.f32 %v3457_v38  ;;  %5799 = vmatprep.subr.bf16.mxu1 %v6696_v36  ;;  %v3474_v63 = vmul.f32 0.7978846, %v3346_v56  ;;  %v10807_v24 = vld [vmem:[#allocation119_spill] sm:$0xff]  ;;  %v6697_v0 = vld [vmem:[#allocation16 + $0x3c0] ss:$8 sps:$4 sm:$0xff]  }
 0x5c4   : > { %v3697_v42 = vadd.f32 1.0, %v6606_v55  ;;  %v3337_v29 = vadd.f32 %v10806_v49, %v10805_v3  ;;  %6619 = vtanh.f32 %v3466_v13  ;;  %v3345_v26 = vadd.f32 %v10808_v48, %v10807_v24  ;;  %v10814_v48 = vld [vmem:[#allocation133_spill] sm:$0xff] }
 0x5c5   : > { %v6608_v27 = vpop.eup %6607  ;;  %v3924_v7 = vpack.c.bf16 %v3828_v52, %v3820_v19  ;;  %v3817_v22 = vmul.f32 %v3689_v62, %v2793_v6  ;;  %6621 = vtanh.f32 %v3474_v63  ;;  %5815 = vmatpush1.bf16.msra.mxu1 %v6697_v0  ;;  %v10071_v50 = vmul.f32 %v2996_v53, %v10048_v15  ;;  %v10809_v19 = vld [vmem:[#allocation127_spill] sm:$0xff]  ;;  %v10810_v6 = vld [vmem:[#allocation134_spill] sm:$0xff]  ;;  %v10815_v0 = vld [vmem:[#allocation129_spill] sm:$0xff] }
 0x5c6   : > { %v3825_v40 = vmul.f32 %v3697_v42, %v2801_v37  ;;  %v3691_v54 = vadd.f32 1.0, %v6608_v27  ;;  %v3465_v38 = vmul.f32 0.7978846, %v3337_v29  ;;  %v2818_v56 = vmul.f32 0.5, %v10794_v61  ;;  %v6698_v52 = vld [vmem:[#allocation16 + $0x3d4] ss:$8 sps:$4 sm:$0xff]  }
 0x5c7   : > { %v6610_v17 = vpop.eup %6609  ;;  %5138 = vmatprep.mubr.bf16.mxu0 %v3924_v7  ;;  %v3473_v51 = vmul.f32 0.7978846, %v3345_v26  ;;  %v3354_v55 = vadd.f32 %v10810_v6, %v10809_v19  ;;  %5800 = vmatprep.subr.bf16.mxu1 %v6698_v52  ;;  %v2809_v13 = vmul.f32 0.5, %v10797_v45  ;;  %v2817_v36 = vmul.f32 0.5, %v10799_v32  ;;  %v10811_v42 = vld [vmem:[#allocation131_spill] sm:$0xff]  ;;  %v10812_v63 = vld [vmem:[#allocation138_spill] sm:$0xff] }
 0x5c8   : > { %v3921_v62 = vpack.c.bf16 %v3825_v40, %v3817_v22  ;;  %v3699_v37 = vadd.f32 1.0, %v6610_v17  ;;  %6623 = vtanh.f32 %v3465_v38  ;;  %v3362_v53 = vadd.f32 %v10812_v63, %v10811_v42  ;;  %v10813_v7 = vld [vmem:[#allocation121_spill] sm:$0xff]  ;;  %v10816_v22 = vld [vmem:[#allocation136_spill] sm:$0xff] }
 0x5c9   : > { %6625 = vtanh.f32 %v3473_v51  ;;  %v3482_v49 = vmul.f32 0.7978846, %v3354_v55  ;;  %v6612_v29 = vpop.eup %6611  ;;  %v3819_v61 = vmul.f32 %v3691_v54, %v2795_v18  ;;  %v3353_v26 = vadd.f32 %v10814_v48, %v10813_v7  ;;  %v6699_v51 = vld [vmem:[#allocation16 + $0x3d0] ss:$8 sps:$4 sm:$0xff]  }
 0x5ca   : > { %5026 = vmatmul.mubr.bf16.gmra.mrb[44].mxu1 %v3921_v62  ;;  %v3827_v27 = vmul.f32 %v3699_v37, %v2803_v8  ;;  %v3361_v40 = vadd.f32 %v10816_v22, %v10815_v0  ;;  %v6614_v17 = vpop.eup %6613  ;;  %v3706_v45 = vadd.f32 1.0, %v6612_v29  ;;  %v2826_v38 = vmul.f32 0.5, %v10801_v25  ;;  %v6700_v8 = vld [vmem:[#allocation16 + $0x3e4] ss:$8 sps:$4 sm:$0xff]  }
 0x5cb   : > { %v3490_v32 = vmul.f32 0.7978846, %v3362_v53  ;;  %6627 = vtanh.f32 %v3482_v49  ;;  %5816 = vmatpush1.bf16.msra.mxu1 %v6699_v51  ;;  %v3714_v52 = vadd.f32 1.0, %v6614_v17  ;;  %v3481_v62 = vmul.f32 0.7978846, %v3353_v26  ;;  %v10817_v53 = vld [vmem:[#allocation135_spill] sm:$0xff] }
 0x5cc   : > { %v6616_v6 = vpop.eup %6615  ;;  %v3923_v55 = vpack.c.bf16 %v3827_v27, %v3819_v61  ;;  %v3489_v18 = vmul.f32 0.7978846, %v3361_v40  ;;  %5801 = vmatprep.subr.bf16.mxu1 %v6700_v8  ;;  %v3834_v37 = vmul.f32 %v3706_v45, %v2810_v28  ;;  %v2834_v48 = vmul.f32 0.5, %v10803_v21  ;;  %v10818_v49 = vld [vmem:[#allocation68_spill] sm:$0xff] }
 0x5cd   : > { %v6618_v54 = vpop.eup %6617  ;;  %v3705_v63 = vadd.f32 1.0, %v6616_v6  ;;  %6629 = vtanh.f32 %v3490_v32  ;;  %v3842_v29 = vmul.f32 %v3714_v52, %v2818_v56  ;;  %v3370_v22 = vadd.f32 %v10818_v49, %v10817_v53  ;;  %v10819_v26 = vld [vmem:[#allocation104_spill] sm:$0xff] }
 0x5ce   : > { %5139 = vmatmul.mubr.bf16.gmra.mrb[140].mxu0 %v3923_v55  ;;  %v3713_v25 = vadd.f32 1.0, %v6618_v54  ;;  %6631 = vtanh.f32 %v3481_v62  ;;  %v6620_v51 = vpop.eup %6619  ;;  %v2825_v27 = vmul.f32 0.5, %v10805_v3  ;;  %v10820_v40 = vld [vmem:[#allocation96_spill] sm:$0xff]  ;;  %v2833_v62 = vmul.f32 0.5, %v10807_v24 }
 0x5cf   : > { %v3833_v61 = vmul.f32 %v3705_v63, %v2809_v13  ;;  %6633 = vtanh.f32 %v3489_v18  ;;  %v3378_v17 = vadd.f32 %v10820_v40, %v10819_v26  ;;  %v6701_v28 = vld [vmem:[#allocation16 + $0x3e0] ss:$8 sps:$4 sm:$0xff]   ;;  %v6622_v45 = vpop.eup %6621  ;;  %v3930_v21 = vpack.c.bf16 %v3842_v29, %v3834_v37  ;;  %v6702_v55 = vld [vmem:[#allocation16 + $0x3f4] ss:$8 sps:$4 sm:$0xff]  }
 0x5d0   : > { %5817 = vmatpush1.bf16.msra.mxu1 %v6701_v28  ;;  %v3841_v32 = vmul.f32 %v3713_v25, %v2817_v36  ;;  %v3722_v6 = vadd.f32 1.0, %v6620_v51  ;;  %v3498_v56 = vmul.f32 0.7978846, %v3370_v22  ;;  %v3730_v52 = vadd.f32 1.0, %v6622_v45  ;;  %v10821_v13 = vld [vmem:[#allocation132_spill] sm:$0xff]  ;;  %v10823_v40 = vld [vmem:[#allocation139_spill] sm:$0xff] }
 0x5d1   : > { %5802 = vmatprep.subr.bf16.mxu1 %v6702_v55  ;;  %v3506_v8 = vmul.f32 0.7978846, %v3378_v17  ;;  %v10822_v54 = vld [vmem:[#allocation88_spill] sm:$0xff]  ;;  %5035 = vmatprep.mubr.bf16.mxu1 %v3930_v21  ;;  %v10824_v28 = vld [vmem:[#allocation70_spill] sm:$0xff]  ;;  %v2842_v17 = vmul.f32 0.5, %v10809_v19  ;;  %v2850_v45 = vmul.f32 0.5, %v10811_v42  ;;  %v3332_v55 = vadd.f32 %v9881_v1, %v9821_v16 }
 0x5d2   : > { %v3369_v3 = vadd.f32 %v10822_v54, %v10821_v13  ;;  %v6624_v18 = vpop.eup %6623  ;;  %v3929_v63 = vpack.c.bf16 %v3841_v32, %v3833_v61  ;;  %v3850_v49 = vmul.f32 %v3722_v6, %v2826_v38  ;;  %6635 = vtanh.f32 %v3498_v56  ;;  %v6703_v51 = vld [vmem:[#allocation16 + $0x3f0] ss:$8 sps:$4 sm:$0xff]  }
 0x5d3   : > { %v3377_v37 = vadd.f32 %v10824_v28, %v10823_v40  ;;  %v6626_v36 = vpop.eup %6625  ;;  %v3858_v29 = vmul.f32 %v3730_v52, %v2834_v48  ;;  %v3721_v25 = vadd.f32 1.0, %v6624_v18  ;;  %6637 = vtanh.f32 %v3506_v8 }
 0x5d4   : > { %v3497_v22 = vmul.f32 0.7978846, %v3369_v3  ;;  %5818 = vmatpush1.bf16.msra.mxu1 %v6703_v51  ;;  %v3729_v24 = vadd.f32 1.0, %v6626_v36  ;;  %v3324_v6 = vadd.f32 %v9856_v39, %v9808_v47  ;;  %v2841_v19 = vmul.f32 0.5, %v10813_v7 }
 0x5d5   : > { %5036 = vmatmul.mubr.bf16.gmra.mrb[48].mxu1 %v3929_v63  ;;  %v3505_v21 = vmul.f32 0.7978846, %v3377_v37  ;;  %v6628_v61 = vpop.eup %6627  ;;  %v3938_v38 = vpack.c.bf16 %v3858_v29, %v3850_v49  ;;  %v3849_v32 = vmul.f32 %v3721_v25, %v2825_v27  ;;  %v3707_v42 = vadd.f32 1.0, %v9896_v43 }
 0x5d6   : > { %6639 = vtanh.f32 %v3497_v22  ;;  %v3857_v48 = vmul.f32 %v3729_v24, %v2833_v62  ;;  %v3738_v56 = vadd.f32 1.0, %v6628_v61  ;;  %v3452_v8 = vmul.f32 0.7978846, %v3324_v6  ;;  %v10827_v6 = vld [vmem:[#allocation123_spill] sm:$0xff] }
 0x5d7   : > { %6641 = vtanh.f32 %v3505_v21  ;;  %v6630_v52 = vpop.eup %6629  ;;  %5045 = vmatprep.mubr.bf16.mxu1 %v3938_v38  ;;  %v3715_v54 = vadd.f32 1.0, %v9919_v41  ;;  %v2849_v39 = vmul.f32 0.5, %v10815_v0  ;;  %v3460_v62 = vmul.f32 0.7978846, %v3332_v55  ;;  %v10825_v21 = vld [vmem:[#allocation101_spill] sm:$0xff] }
 0x5d8   : > { %v6632_v27 = vpop.eup %6631  ;;  %v3937_v3 = vpack.c.bf16 %v3857_v48, %v3849_v32  ;;  %v3746_v18 = vadd.f32 1.0, %v6630_v52  ;;  %6643 = vtanh.f32 %v3452_v8  ;;  %v10107_v1 = vmul.f32 %v3707_v42, %v9841_v2 }
 0x5d9   : > { %v6634_v63 = vpop.eup %6633  ;;  %v3737_v49 = vadd.f32 1.0, %v6632_v27  ;;  %v10110_v28 = vmul.f32 %v3715_v54, %v9859_v58  ;;  %v3866_v7 = vmul.f32 %v3738_v56, %v2842_v17  ;;  %6645 = vtanh.f32 %v3460_v62 }
 0x5da   : > { %v3874_v37 = vmul.f32 %v3746_v18, %v2850_v45  ;;  %v3745_v43 = vadd.f32 1.0, %v6634_v63  ;;  %v2858_v41 = vmul.f32 0.5, %v10817_v53  ;;  %v3340_v0 = vadd.f32 %v9915_v46, %v9853_v35 }
 0x5db   : > { %v3931_v36 = vpack.c.bf16 %v10110_v28, %v10107_v1  ;;  %v3348_v29 = vadd.f32 %v9942_v34, %v9894_v30  ;;  %v3865_v58 = vmul.f32 %v3737_v49, %v2841_v19  ;;  %v2866_v51 = vmul.f32 0.5, %v10819_v26  ;;  %v10826_v34 = vld [vmem:[#allocation118_spill] sm:$0xff] }
 0x5dc   : > { %v6636_v2 = vpop.eup %6635  ;;  %v3946_v25 = vpack.c.bf16 %v3874_v37, %v3866_v7  ;;  %v3873_v22 = vmul.f32 %v3745_v43, %v2849_v39  ;;  %v3468_v45 = vmul.f32 0.7978846, %v3340_v0  ;;  %v3339_v61 = vadd.f32 %v10825_v21, %v9849_v9 }
 0x5dd   : > { %5046 = vmatmul.mubr.bf16.gmra.mrb[52].mxu1 %v3937_v3  ;;  %v6638_v24 = vpop.eup %6637  ;;  %v3754_v17 = vadd.f32 1.0, %v6636_v2  ;;  %v3476_v53 = vmul.f32 0.7978846, %v3348_v29  ;;  %v2857_v32 = vmul.f32 0.5, %v10821_v13  ;;  %v3347_v48 = vadd.f32 %v10827_v6, %v10826_v34 }
 0x5de   : > { %5055 = vmatprep.mubr.bf16.mxu1 %v3946_v25  ;;  %v3945_v38 = vpack.c.bf16 %v3873_v22, %v3865_v58  ;;  %v3762_v46 = vadd.f32 1.0, %v6638_v24  ;;  %v2865_v52 = vmul.f32 0.5, %v10823_v40  ;;  %6647 = vtanh.f32 %v3468_v45 }
 0x5df   : > { %v3882_v55 = vmul.f32 %v3754_v17, %v2858_v41  ;;  %v3467_v26 = vmul.f32 0.7978846, %v3339_v61  ;;  %6649 = vtanh.f32 %v3476_v53  ;;  %v3475_v54 = vmul.f32 0.7978846, %v3347_v48 }
 0x5e0   : > { %v6640_v56 = vpop.eup %6639  ;;  %v3890_v8 = vmul.f32 %v3762_v46, %v2866_v51  ;;  %v3356_v3 = vadd.f32 %v9990_v5, %v9939_v12  ;;  %v3364_v13 = vadd.f32 %v10021_v59, %v9972_v60  ;;  %v3251_v18 = vmul.f32 %v10053_v10, %v10025_v11 }
 0x5e1   : > { %v6642_v19 = vpop.eup %6641  ;;  %v3753_v42 = vadd.f32 1.0, %v6640_v56  ;;  %6651 = vtanh.f32 %v3467_v26  ;;  %v3252_v40 = vmul.f32 %v10071_v50, %v10048_v15  ;;  %v2812_v5 = vmul.f32 0.5, %v9808_v47 }
 0x5e2   : > { %v3761_v27 = vadd.f32 1.0, %v6642_v19  ;;  %v3954_v39 = vpack.c.bf16 %v3890_v8, %v3882_v55  ;;  %6653 = vtanh.f32 %v3475_v54  ;;  %v6644_v62 = vpop.eup %6643  ;;  %v3484_v7 = vmul.f32 0.7978846, %v3356_v3 }
 0x5e3   : > { %v3881_v63 = vmul.f32 %v3753_v42, %v2857_v32  ;;  %v3492_v37 = vmul.f32 0.7978846, %v3364_v13  ;;  %v6646_v43 = vpop.eup %6645  ;;  %v3708_v41 = vadd.f32 1.0, %v6644_v62  ;;  %v3355_v59 = vadd.f32 %v9978_v44, %v9909_v20 }
 0x5e4   : > { %v3889_v49 = vmul.f32 %v3761_v27, %v2865_v52  ;;  %v3363_v10 = vadd.f32 %v10000_v14, %v9958_v31  ;;  %v2820_v0 = vmul.f32 0.5, %v9821_v16  ;;  %v3716_v29 = vadd.f32 1.0, %v6646_v43 }
 0x5e5   : > { %5056 = vmatmul.mubr.bf16.gmra.mrb[56].mxu1 %v3945_v38  ;;  %6655 = vtanh.f32 %v3484_v7  ;;  %v3483_v2 = vmul.f32 0.7978846, %v3355_v59  ;;  %v3836_v58 = vmul.f32 %v3708_v41, %v2812_v5  ;;  %v3372_v47 = vadd.f32 %v10039_v57, %v9995_v23 }
 0x5e6   : > { %5065 = vmatprep.mubr.bf16.mxu1 %v3954_v39  ;;  %v3953_v50 = vpack.c.bf16 %v3889_v49, %v3881_v63  ;;  %6657 = vtanh.f32 %v3492_v37  ;;  %v3491_v25 = vmul.f32 0.7978846, %v3363_v10  ;;  %v3844_v22 = vmul.f32 %v3716_v29, %v2820_v0 }
 0x5e7   : > { %v3380_v51 = vadd.f32 %v3252_v40, %v10048_v15  ;;  %6659 = vtanh.f32 %v3483_v2  ;;  %v3371_v44 = vadd.f32 %v10032_v4, %v9984_v33  ;;  %v3379_v14 = vadd.f32 %v3251_v18, %v10025_v11 }
 0x5e8   : > { %v6648_v24 = vpop.eup %6647  ;;  %v3932_v16 = vpack.c.bf16 %v3844_v22, %v3836_v58  ;;  %6661 = vtanh.f32 %v3491_v25  ;;  %v3500_v17 = vmul.f32 0.7978846, %v3372_v47  ;;  %v2828_v57 = vmul.f32 0.5, %v9853_v35 }
 0x5e9   : > { %v3508_v45 = vmul.f32 0.7978846, %v3380_v51  ;;  %v6650_v53 = vpop.eup %6649  ;;  %v3724_v21 = vadd.f32 1.0, %v6648_v24  ;;  %v3499_v61 = vmul.f32 0.7978846, %v3371_v44  ;;  %v2836_v32 = vmul.f32 0.5, %v9894_v30 }
 0x5ea   : > { %v3507_v38 = vmul.f32 0.7978846, %v3379_v14  ;;  %v3732_v6 = vadd.f32 1.0, %v6650_v53  ;;  %6663 = vtanh.f32 %v3500_v17  ;;  %v2827_v4 = vmul.f32 0.5, %v9849_v9 }
 0x5eb   : > { %v6652_v46 = vpop.eup %6651  ;;  %v2835_v56 = vmul.f32 0.5, %v10826_v34  ;;  %6665 = vtanh.f32 %v3508_v45  ;;  %v3852_v52 = vmul.f32 %v3724_v21, %v2828_v57  ;;  %v2844_v13 = vmul.f32 0.5, %v9939_v12 }
 0x5ec   : > { %v6654_v48 = vpop.eup %6653  ;;  %v3723_v55 = vadd.f32 1.0, %v6652_v46  ;;  %v3860_v26 = vmul.f32 %v3732_v6, %v2836_v32  ;;  %6667 = vtanh.f32 %v3499_v61  ;;  %v2852_v9 = vmul.f32 0.5, %v9972_v60 }
 0x5ed   : > { %5066 = vmatmul.mubr.bf16.gmra.mrb[60].mxu1 %v3953_v50  ;;  %v3731_v19 = vadd.f32 1.0, %v6654_v48  ;;  %6669 = vtanh.f32 %v3507_v38  ;;  %v2843_v49 = vmul.f32 0.5, %v9909_v20  ;;  %v2851_v7 = vmul.f32 0.5, %v9958_v31 }
 0x5ee   : > { %5148 = vmatprep.mubr.bf16.mxu1 %v3932_v16  ;;  %v3940_v35 = vpack.c.bf16 %v3860_v26, %v3852_v52  ;;  %v3851_v42 = vmul.f32 %v3723_v55, %v2827_v4  ;;  %v2860_v50 = vmul.f32 0.5, %v9995_v23  ;;  %v2868_v0 = vmul.f32 0.5, %v10048_v15  ;;  %v4085_v23 = vld [vmem:[#allocation17] sm:$0x3]  ;;  %v10828_v15 = vld [vmem:[#allocation30_spill] sm:$0xff]  ;;  %v10831_v26 = vld [vmem:[#allocation33_spill] sm:$0xff] }
 0x5ef   : > { %v6656_v8 = vpop.eup %6655  ;;  %v3859_v30 = vmul.f32 %v3731_v19, %v2835_v56  ;;  %v2859_v20 = vmul.f32 0.5, %v9984_v33  ;;  %v2867_v25 = vmul.f32 0.5, %v10025_v11  ;;  %v10162_v14 = vrot.slane %v4085_v23, %v10828_v15  ;;  %v10829_v33 = vld [vmem:[#allocation31_spill] sm:$0xff]  ;;  %v10830_v4 = vld [vmem:[#allocation32_spill] sm:$0xff] }
 0x5f0   : > { %v6658_v54 = vpop.eup %6657  ;;  %v3740_v27 = vadd.f32 1.0, %v6656_v8  ;;  %v10165_v24 = vrot.slane %v4085_v23, %v10829_v33  ;;  %v10838_v33 = vld [vmem:[#allocation40_spill] sm:$0xff] }
 0x5f1   : > { %v3939_v3 = vpack.c.bf16 %v3859_v30, %v3851_v42  ;;  %v3748_v34 = vadd.f32 1.0, %v6658_v54  ;;  %v6660_v18 = vpop.eup %6659  ;;  %v10833_v30 = vld [vmem:[#allocation35_spill] sm:$0xff] }
 0x5f2   : > { %v6662_v40 = vpop.eup %6661  ;;  %v3868_v39 = vmul.f32 %v3740_v27, %v2844_v13  ;;  %v3739_v63 = vadd.f32 1.0, %v6660_v18 }
 0x5f3   : > { %v3876_v62 = vmul.f32 %v3748_v34, %v2852_v9  ;;  %v3747_v37 = vadd.f32 1.0, %v6662_v40 }
 0x5f4   : > { %v6664_v43 = vpop.eup %6663  ;;  %v3867_v60 = vmul.f32 %v3739_v63, %v2843_v49 }
 0x5f5   : > { %5149 = vmatmul.mubr.bf16.vlgmr.msra.gmra.mrb[48].mxu1 %v3931_v36  ;;  %v3948_v12 = vpack.c.bf16 %v3876_v62, %v3868_v39  ;;  %v6666_v5 = vpop.eup %6665  ;;  %v3875_v41 = vmul.f32 %v3747_v37, %v2851_v7  ;;  %v3756_v59 = vadd.f32 1.0, %v6664_v43  ;;  %v10834_v43 = vld [vmem:[#allocation36_spill] sm:$0xff] }
 0x5f6   : > { %5158 = vmatprep.mubr.bf16.mxu1 %v3940_v35  ;;  %v6668_v10 = vpop.eup %6667  ;;  %v3764_v29 = vadd.f32 1.0, %v6666_v5  ;;  %v10832_v35 = vld [vmem:[#allocation34_spill] sm:$0xff] }
 0x5f7   : > { %v6670_v1 = vpop.eup %6669  ;;  %v3947_v28 = vpack.c.bf16 %v3875_v41, %v3867_v60  ;;  %v3755_v36 = vadd.f32 1.0, %v6668_v10  ;;  %v3884_v31 = vmul.f32 %v3756_v59, %v2860_v50  ;;  %v10835_v41 = vld [vmem:[#allocation37_spill] sm:$0xff]  ;;  %v10836_v50 = vld [vmem:[#allocation38_spill] sm:$0xff] }
 0x5f8   : > { %v3892_v2 = vmul.f32 %v3764_v29, %v2868_v0  ;;  %v3763_v58 = vadd.f32 1.0, %v6670_v1  ;;  %v10837_v29 = vld [vmem:[#allocation39_spill] sm:$0xff] }
 0x5f9   : > { %v3883_v47 = vmul.f32 %v3755_v36, %v2859_v20 }
 0x5fa   : > { %v3956_v22 = vpack.c.bf16 %v3892_v2, %v3884_v31  ;;  %v3891_v51 = vmul.f32 %v3763_v58, %v2867_v25 }
 0x5fc   : > { %v3955_v44 = vpack.c.bf16 %v3891_v51, %v3883_v47 }
 0x5fd   : > { %5159 = vmatmul.mubr.bf16.gmra.mrb[52].mxu1 %v3939_v3 }
 0x5fe   : > { %5168 = vmatprep.mubr.bf16.mxu1 %v3948_v12 }
 0x605   : > { %5169 = vmatmul.mubr.bf16.gmra.mrb[56].mxu1 %v3947_v28 }
 0x606   : > { %5178 = vmatprep.mubr.bf16.mxu1 %v3956_v22 }
 0x60d   : > { %5179 = vmatmul.mubr.bf16.gmra.mrb[60].mxu1 %v3955_v44 }
 0x666   : > { %v4997_v16 = vpop.f32.mrb[32].mxu1 }
 0x667   : > { %v5819_v11 = vadd.f32 %v4997_v16, %v10162_v14  ;;  %v4999_v17 = vpop.f32.mrb[33].mxu1 }
 0x668   : > { %v5821_v45 = vadd.f32 %v4999_v17, %v10165_v24  ;;  %v5001_v53 = vpop.f32.mrb[34].mxu1 }
 0x669   : > { %v5823_v21 = vadd.f32 %v5001_v53, %v10162_v14  ;;  %v5003_v61 = vpop.f32.mrb[35].mxu1  ;;  %v5110_v38 = vpop.f32.mrb[128].mxu0 }
 0x66a   : > { %v5825_v46 = vadd.f32 %v5003_v61, %v10165_v24  ;;  %v5820_v57 = vadd.f32 %v5819_v11, %v5110_v38  ;;  %v5112_v32 = vpop.f32.mrb[129].mxu0  ;;  %v10840_v61 = vld [vmem:[#allocation42_spill] sm:$0xff] }
 0x66b   : > { %v5822_v6 = vadd.f32 %v5821_v45, %v5112_v32  ;;  %v5114_v48 = vpop.f32.mrb[130].mxu0  ;;  %v10839_v45 = vld [vmem:[#allocation41_spill] sm:$0xff] }
 0x66c   : > { %v5189_v56 = vadd.f32 %v5820_v57, %v10830_v4  ;;  %v5824_v55 = vadd.f32 %v5823_v21, %v5114_v48  ;;  %v5116_v52 = vpop.f32.mrb[131].mxu0 }
 0x66d   : > { %v5190_v19 = vadd.f32 %v5822_v6, %v10831_v26  ;;  %v5826_v8 = vadd.f32 %v5825_v46, %v5116_v52  ;;  %v10841_v46 = vld [vmem:[#allocation43_spill] sm:$0xff] }
 0x66e   : > { %5221 = vst [vmem:[%s10175_s12] sm:$0xff] %v5189_v56  ;;  %v5191_v42 = vadd.f32 %v5824_v55, %v10832_v35 }
 0x66f   : > { %5222 = vst [vmem:[%s10175_s12 + $0x8] sm:$0xff] %v5190_v19  ;;  %v5192_v54 = vadd.f32 %v5826_v8, %v10833_v30 }
 0x670   : > { %5223 = vst [vmem:[%s10175_s12 + $0x10] sm:$0xff] %v5191_v42 }
 0x671   : > { %5224 = vst [vmem:[%s10175_s12 + $0x18] sm:$0xff] %v5192_v54  ;;  %v10842_v54 = vld [vmem:[#allocation44_spill] sm:$0xff] }
 0x67d   : > { %v5007_v27 = vpop.f32.mrb[36].mxu1 }
 0x67e   : > { %v5827_v3 = vadd.f32 %v5007_v27, %v10162_v14  ;;  %v5009_v13 = vpop.f32.mrb[37].mxu1 }
 0x67f   : > { %v5120_v9 = vpop.f32.mrb[132].mxu0  ;;  %v5829_v34 = vadd.f32 %v5009_v13, %v10165_v24  ;;  %v5011_v18 = vpop.f32.mrb[38].mxu1 }
 0x680   : > { %v5828_v40 = vadd.f32 %v5827_v3, %v5120_v9  ;;  %v5122_v39 = vpop.f32.mrb[133].mxu0  ;;  %v5831_v62 = vadd.f32 %v5011_v18, %v10162_v14  ;;  %v5013_v63 = vpop.f32.mrb[39].mxu1  ;;  %v10843_v9 = vld [vmem:[#allocation45_spill] sm:$0xff] }
 0x681   : > { %v5830_v49 = vadd.f32 %v5829_v34, %v5122_v39  ;;  %v5124_v7 = vpop.f32.mrb[134].mxu0  ;;  %v5833_v37 = vadd.f32 %v5013_v63, %v10165_v24 }
 0x682   : > { %v5193_v12 = vadd.f32 %v5828_v40, %v10834_v43  ;;  %v5832_v5 = vadd.f32 %v5831_v62, %v5124_v7  ;;  %v5126_v60 = vpop.f32.mrb[135].mxu0  ;;  %v10844_v40 = vld [vmem:[#allocation46_spill] sm:$0xff]  ;;  %v10845_v62 = vld [vmem:[#allocation47_spill] sm:$0xff] }
 0x683   : > { %v5194_v59 = vadd.f32 %v5830_v49, %v10835_v41  ;;  %v5834_v10 = vadd.f32 %v5833_v37, %v5126_v60 }
 0x684   : > { %5225 = vst [vmem:[%s10175_s12 + $0x20] sm:$0xff] %v5193_v12  ;;  %v5195_v0 = vadd.f32 %v5832_v5, %v10836_v50  ;;  %v10846_v5 = vld [vmem:[#allocation48_spill] sm:$0xff] }
 0x685   : > { %5226 = vst [vmem:[%s10175_s12 + $0x28] sm:$0xff] %v5194_v59  ;;  %v5196_v1 = vadd.f32 %v5834_v10, %v10837_v29  ;;  %v10847_v10 = vld [vmem:[#allocation49_spill] sm:$0xff]  ;;  %v10848_v29 = vld [vmem:[#allocation50_spill] sm:$0xff] }
 0x686   : > { %5227 = vst [vmem:[%s10175_s12 + $0x30] sm:$0xff] %v5195_v0 }
 0x687   : > { %5228 = vst [vmem:[%s10175_s12 + $0x38] sm:$0xff] %v5196_v1 }
 0x68b   : > { %v5017_v28 = vpop.f32.mrb[40].mxu1 }
 0x68c   : > { %v5019_v20 = vpop.f32.mrb[41].mxu1  ;;  %v5835_v36 = vadd.f32 %v5017_v28, %v10162_v14  ;;  %v10849_v28 = vld [vmem:[#allocation51_spill] sm:$0xff] }
 0x68d   : > { %v5021_v31 = vpop.f32.mrb[42].mxu1  ;;  %v5837_v2 = vadd.f32 %v5019_v20, %v10165_v24 }
 0x68e   : > { %v5023_v25 = vpop.f32.mrb[43].mxu1  ;;  %v5839_v58 = vadd.f32 %v5021_v31, %v10162_v14 }
 0x68f   : > { %v5841_v47 = vadd.f32 %v5023_v25, %v10165_v24 }
 0x691   : > { %v5130_v22 = vpop.f32.mrb[136].mxu0 }
 0x692   : > { %v5836_v51 = vadd.f32 %v5835_v36, %v5130_v22  ;;  %v5132_v44 = vpop.f32.mrb[137].mxu0  ;;  %v10850_v22 = vld [vmem:[#allocation52_spill] sm:$0xff] }
 0x693   : > { %v5838_v23 = vadd.f32 %v5837_v2, %v5132_v44  ;;  %v5134_v15 = vpop.f32.mrb[138].mxu0 }
 0x694   : > { %v5197_v16 = vadd.f32 %v5836_v51, %v10838_v33  ;;  %v5840_v11 = vadd.f32 %v5839_v58, %v5134_v15  ;;  %v5136_v17 = vpop.f32.mrb[139].mxu0 }
 0x695   : > { %v5198_v53 = vadd.f32 %v5838_v23, %v10839_v45  ;;  %v5842_v21 = vadd.f32 %v5841_v47, %v5136_v17  ;;  %v10851_v23 = vld [vmem:[#allocation53_spill] sm:$0xff]  ;;  %v10853_v17 = vld [vmem:[#allocation55_spill] sm:$0xff] }
 0x696   : > { %5229 = vst [vmem:[%s10175_s12 + $0x40] sm:$0xff] %v5197_v16  ;;  %v5199_v38 = vadd.f32 %v5840_v11, %v10840_v61  ;;  %v10852_v16 = vld [vmem:[#allocation54_spill] sm:$0xff] }
 0x697   : > { %5230 = vst [vmem:[%s10175_s12 + $0x48] sm:$0xff] %v5198_v53  ;;  %v5200_v57 = vadd.f32 %v5842_v21, %v10841_v46 }
 0x698   : > { %5231 = vst [vmem:[%s10175_s12 + $0x50] sm:$0xff] %v5199_v38 }
 0x699   : > { %5232 = vst [vmem:[%s10175_s12 + $0x58] sm:$0xff] %v5200_v57  ;;  %v10854_v57 = vld [vmem:[#allocation56_spill] sm:$0xff] }
 0x69d   : > { %v5027_v32 = vpop.f32.mrb[44].mxu1 }
 0x69e   : > { %v5843_v6 = vadd.f32 %v5027_v32, %v10162_v14  ;;  %v5029_v48 = vpop.f32.mrb[45].mxu1 }
 0x69f   : > { %v5845_v4 = vadd.f32 %v5029_v48, %v10165_v24  ;;  %v5031_v56 = vpop.f32.mrb[46].mxu1 }
 0x6a0   : > { %v5847_v55 = vadd.f32 %v5031_v56, %v10162_v14  ;;  %v5033_v52 = vpop.f32.mrb[47].mxu1 }
 0x6a1   : > { %v5140_v26 = vpop.f32.mrb[140].mxu0  ;;  %v5849_v19 = vadd.f32 %v5033_v52, %v10165_v24  ;;  %v10856_v52 = vld [vmem:[#allocation58_spill] sm:$0xff] }
 0x6a2   : > { %v5844_v8 = vadd.f32 %v5843_v6, %v5140_v26  ;;  %v5142_v35 = vpop.f32.mrb[141].mxu0 }
 0x6a3   : > { %v5846_v42 = vadd.f32 %v5845_v4, %v5142_v35  ;;  %v5144_v30 = vpop.f32.mrb[142].mxu0  ;;  %v10855_v4 = vld [vmem:[#allocation57_spill] sm:$0xff] }
 0x6a4   : > { %v5201_v27 = vadd.f32 %v5844_v8, %v10842_v54  ;;  %v5848_v3 = vadd.f32 %v5847_v55, %v5144_v30  ;;  %v5146_v13 = vpop.f32.mrb[143].mxu0 }
 0x6a5   : > { %v5202_v34 = vadd.f32 %v5846_v42, %v10843_v9  ;;  %v5850_v18 = vadd.f32 %v5849_v19, %v5146_v13  ;;  %v10857_v19 = vld [vmem:[#allocation59_spill] sm:$0xff] }
 0x6a6   : > { %5233 = vst [vmem:[%s10175_s12 + $0x60] sm:$0xff] %v5201_v27  ;;  %v5203_v39 = vadd.f32 %v5848_v3, %v10844_v40  ;;  %v10858_v3 = vld [vmem:[#allocation60_spill] sm:$0xff] }
 0x6a7   : > { %5234 = vst [vmem:[%s10175_s12 + $0x68] sm:$0xff] %v5202_v34  ;;  %v5204_v63 = vadd.f32 %v5850_v18, %v10845_v62  ;;  %v10859_v18 = vld [vmem:[#allocation61_spill] sm:$0xff]  ;;  %v10860_v62 = vld [vmem:[#allocation62_spill] sm:$0xff] }
 0x6a8   : > { %5235 = vst [vmem:[%s10175_s12 + $0x70] sm:$0xff] %v5203_v39 }
 0x6a9   : > { %5236 = vst [vmem:[%s10175_s12 + $0x78] sm:$0xff] %v5204_v63 }
 0x6c8   : > { %v5150_v49 = vpop.f32.mrb[48].mxu1 }
 0x6c9   : > { %v5851_v7 = vadd.f32 %v5150_v49, %v10162_v14  ;;  %v5152_v37 = vpop.f32.mrb[49].mxu1 }
 0x6ca   : > { %v5852_v43 = vadd.f32 %v5152_v37, %v10165_v24  ;;  %v5154_v12 = vpop.f32.mrb[50].mxu1 }
 0x6cb   : > { %v5205_v60 = vadd.f32 %v5851_v7, %v10846_v5  ;;  %v5853_v41 = vadd.f32 %v5154_v12, %v10162_v14  ;;  %v5156_v59 = vpop.f32.mrb[51].mxu1 }
 0x6cc   : > { %v5206_v50 = vadd.f32 %v5852_v43, %v10847_v10  ;;  %v5854_v0 = vadd.f32 %v5156_v59, %v10165_v24 }
 0x6cd   : > { %5237 = vst [vmem:[%s10175_s12 + $0x80] sm:$0xff] %v5205_v60  ;;  %v5207_v1 = vadd.f32 %v5853_v41, %v10848_v29 }
 0x6ce   : > { %5238 = vst [vmem:[%s10175_s12 + $0x88] sm:$0xff] %v5206_v50  ;;  %v5208_v20 = vadd.f32 %v5854_v0, %v10849_v28 }
 0x6cf   : > { %5239 = vst [vmem:[%s10175_s12 + $0x90] sm:$0xff] %v5207_v1 }
 0x6d0   : > { %5240 = vst [vmem:[%s10175_s12 + $0x98] sm:$0xff] %v5208_v20  ;;  %v5160_v36 = vpop.f32.mrb[52].mxu1 }
 0x6d1   : > { %v5855_v31 = vadd.f32 %v5160_v36, %v10162_v14  ;;  %v5162_v2 = vpop.f32.mrb[53].mxu1 }
 0x6d2   : > { %v5856_v25 = vadd.f32 %v5162_v2, %v10165_v24  ;;  %v5164_v58 = vpop.f32.mrb[54].mxu1 }
 0x6d3   : > { %v5209_v47 = vadd.f32 %v5855_v31, %v10850_v22  ;;  %v5857_v51 = vadd.f32 %v5164_v58, %v10162_v14  ;;  %v5166_v44 = vpop.f32.mrb[55].mxu1 }
 0x6d4   : > { %v5210_v15 = vadd.f32 %v5856_v25, %v10851_v23  ;;  %v5858_v33 = vadd.f32 %v5166_v44, %v10165_v24 }
 0x6d5   : > { %5241 = vst [vmem:[%s10175_s12 + $0xa0] sm:$0xff] %v5209_v47  ;;  %v5211_v11 = vadd.f32 %v5857_v51, %v10852_v16 }
 0x6d6   : > { %5242 = vst [vmem:[%s10175_s12 + $0xa8] sm:$0xff] %v5210_v15  ;;  %v5212_v45 = vadd.f32 %v5858_v33, %v10853_v17 }
 0x6d7   : > { %5243 = vst [vmem:[%s10175_s12 + $0xb0] sm:$0xff] %v5211_v11 }
 0x6d8   : > { %5244 = vst [vmem:[%s10175_s12 + $0xb8] sm:$0xff] %v5212_v45  ;;  %v5170_v53 = vpop.f32.mrb[56].mxu1 }
 0x6d9   : > { %v5859_v21 = vadd.f32 %v5170_v53, %v10162_v14  ;;  %v5172_v61 = vpop.f32.mrb[57].mxu1 }
 0x6da   : > { %v5860_v38 = vadd.f32 %v5172_v61, %v10165_v24  ;;  %v5174_v46 = vpop.f32.mrb[58].mxu1 }
 0x6db   : > { %v5213_v32 = vadd.f32 %v5859_v21, %v10854_v57  ;;  %v5861_v6 = vadd.f32 %v5174_v46, %v10162_v14  ;;  %v5176_v48 = vpop.f32.mrb[59].mxu1 }
 0x6dc   : > { %v5214_v56 = vadd.f32 %v5860_v38, %v10855_v4  ;;  %v5862_v55 = vadd.f32 %v5176_v48, %v10165_v24 }
 0x6dd   : > { %5245 = vst [vmem:[%s10175_s12 + $0xc0] sm:$0xff] %v5213_v32  ;;  %v5215_v26 = vadd.f32 %v5861_v6, %v10856_v52 }
 0x6de   : > { %5246 = vst [vmem:[%s10175_s12 + $0xc8] sm:$0xff] %v5214_v56  ;;  %v5216_v8 = vadd.f32 %v5862_v55, %v10857_v19 }
 0x6df   : > { %5247 = vst [vmem:[%s10175_s12 + $0xd0] sm:$0xff] %v5215_v26 }
 0x6e0   : > { %5248 = vst [vmem:[%s10175_s12 + $0xd8] sm:$0xff] %v5216_v8  ;;  %v5180_v35 = vpop.f32.mrb[60].mxu1 }
 0x6e1   : > { %v5863_v42 = vadd.f32 %v5180_v35, %v10162_v14  ;;  %v5182_v30 = vpop.f32.mrb[61].mxu1 }
 0x6e2   : > { %v5864_v54 = vadd.f32 %v5182_v30, %v10165_v24  ;;  %v5184_v27 = vpop.f32.mrb[62].mxu1 }
 0x6e3   : > { %v5217_v13 = vadd.f32 %v5863_v42, %v10858_v3  ;;  %v5865_v9 = vadd.f32 %v5184_v27, %v10162_v14  ;;  %v5186_v34 = vpop.f32.mrb[63].mxu1  ;;  %v10862_v14 = vld [vmem:[#allocation63_spill] sm:$0xff] }
 0x6e4   : > { %v5218_v40 = vadd.f32 %v5864_v54, %v10859_v18  ;;  %v5866_v39 = vadd.f32 %v5186_v34, %v10165_v24 }
 0x6e5   : > { %5249 = vst [vmem:[%s10175_s12 + $0xe0] sm:$0xff] %v5217_v13  ;;  %v5219_v63 = vadd.f32 %v5865_v9, %v10860_v62 }
 0x6e6   : > { %5250 = vst [vmem:[%s10175_s12 + $0xe8] sm:$0xff] %v5218_v40  ;;  %v5220_v49 = vadd.f32 %v5866_v39, %v10862_v14 }
 0x6e7   : > { %5251 = vst [vmem:[%s10175_s12 + $0xf0] sm:$0xff] %v5219_v63 }
 0x6e8   : > { %5252 = vst [vmem:[%s10175_s12 + $0xf8] sm:$0xff] %v5220_v49 }
 0x6e9   : > { %7001 = shalt.err (!%p6998_p13)
}
 0x6ea   : > { %s7002_s8 = scalar_lea.hbm %s10268_s18, 4096  ;;  %s7006_s2 = scalar_lea.hbm %s10861_s30, 8192 }
 0x6eb   : > { %p7003_p1 = scmp.ne.s32.totalorder %s10268_s18, %s7002_s8  ;;  %p7007_p2 = scmp.lt.u32.totalorder %s10268_s18, %s10861_s30 }
 0x6ec   : > { %p7008_p4 = scmp.lt.u32.totalorder %s7006_s2, %s7002_s8  ;;  %p7010_p5 = scmp.lt.u32.totalorder %s7002_s8, %s10268_s18 }
 0x6ed   : > { %p7004_p3 = pnand %p7003_p1, %p10863_p7 }
 0x6ee   : > { %p7009_p10 = por %p7008_p4, %p7007_p2 }
 0x6ef   : > { %p7005_p6 = pneg %p7004_p3 }
 0x6f0   : > { %p7011_p9 = por %p7010_p5, %p7009_p10 }
 0x6f2   : > { %p7012_p8 = pnand %p7011_p9, %p7005_p6 }
 0x6f4   : > { %7015 = shalt.err (!%p7012_p8)
}
 0x6f5   : > { %s7097_s26 = smov 256   ;;  %s7098_s27 = smov 16  }
 0x6f6   : > { %5983 = dma.vmem_to_hbm [thread:$0]  (%p10863_p7), %s10270_s4, 4096, %s10268_s18, %s5254_s19, %s7097_s26, %s7097_s26, %s7098_s27  }
 0x6f7 PF: > { %s5283_s12 = sand.u32 1, %s7066_s13   ;;  %p10864_p11 = scmp.ne.s32.totalorder %s10490_s25, 0 }
 0x6f8   : > { %p10865_p0 = scmp.ge.s32.totalorder %s7078_s16, 2  ;;  %s5284_s10 = scalar_lea.sflag [#allocation4], %s5283_s12 }
 0x6fa   : > { %p6018_p12 = pnand %p10865_p0, %p10864_p11 }
 0x6fc   : > { %7061 = dma.done.wait (!%p6018_p12), %s5284_s10, 4096  }
 0x6fd   : > { %7063 = vsyncadd (!%p6018_p12), %s5284_s10, 4294963200  ;;  %p30_p13 = scmp.ge.s32.totalorder %s7379_s11, 4   ;;  %s10866_s13 = smov %s7070_s14 }
 0x6fe   : > { %s10867_s14 = smov %s7074_s15  ;;  %s10868_s15 = smov %s7390_s17 }
 0x6ff   : > { %s10869_s16 = smov %s7379_s11  ;;  %32 = sbr.rel (!%p30_p13) target bundleno = 21 (0x15), region = 150 }
 0x706   :  { %5289 = vsyncpa [#allocation3], 1 }
 0x707   :  { %5291 = vsyncpa [#allocation3 + $0x1], 1 }
 0x708   :  { %5292 = vsyncpa [#allocation6], 1 }
 0x709   :  { %5294 = vsyncpa [#allocation6 + $0x1], 1 }
 0x70a   :  { %5295 = vsyncpa [#allocation9], 1 }
 0x70b   :  { %5296 = vsyncpa [#allocation12], 1 }
 0x70c   :  { %5297 = vsyncpa [#allocation15], 1 }
 0x70d   :  { %5298 = vsyncpa [#allocation18], 1 }
 0x70e   :  { %5299 = vsyncpa [#allocation4], 1 }
 0x70f   :  { %5301 = vsyncpa [#allocation4 + $0x1], 1 }

</bundles_post_ra>
